<compile_context>
chip_gen: v6e
topology: v6e:2x2x1
jax: 0.10.0
libtpu: 0.0.40
codegen_flags: <defaults>
</compile_context>

<pallas_src>
import jax
import jax.numpy as jnp
import numpy as np
from jax import lax
from jax.experimental import pallas as pl
from jax.experimental.pallas import tpu as pltpu


def _round_up(x, m):
    return ((x + m - 1) // m) * m


# ----------------------- fused conv-stack Pallas kernel ----------------------

def _make_conv_stack_kernel(num_layers, tb, h, w, c_ins, hidden):
    """Kernel running all stacked 3x3 convs + ReLU on a tile of `tb` ROIs.

    The activation lives in a single zero-haloed VMEM scratch buffer across
    layers; each 3x3 tap is one (tb*h*w, c_in) x (c_in, hidden) MXU matmul.
    """

    def kernel(*args):
        x_ref = args[0]
        w_refs = args[1:1 + num_layers]
        b_refs = args[1 + num_layers:1 + 2 * num_layers]
        o_ref = args[1 + 2 * num_layers]
        pad_ref = args[2 + 2 * num_layers]        # (tb, h+2, w+2, cmax) VMEM

        m = tb * h * w

        # Zero the halo buffer (borders stay zero for every layer), then place
        # the input tile in its interior.  A handful of VPU stores, hidden
        # under the input DMA.
        pad_ref[...] = jnp.zeros_like(pad_ref)
        pad_ref[:, 1:h + 1, 1:w + 1, :c_ins[0]] = x_ref[...]

        for l in range(num_layers):               # small, static, unrolled
            c_in = c_ins[l]
            # 3x3 conv = 9 shifted matmuls with M = tb*h*w (batched ROIs).
            # TODO(synk): for very large c_in, fold the 9 taps into K via
            # im2col concatenation for a single MXU-saturating matmul.
            acc = jnp.zeros((m, hidden), jnp.float32)
            for dh in range(3):
                for dw in range(3):
                    patch = pad_ref[:, dh:dh + h, dw:dw + w, :c_in]
                    patch2d = patch.reshape(m, c_in)
                    tap = w_refs[l][dh, dw, :, :]          # (c_in, hidden)
                    acc = acc + jnp.dot(patch2d, tap,
                                        preferred_element_type=jnp.float32)
            acc = jnp.maximum(acc + b_refs[l][...], 0.0)   # bias (1, hidden)
            act = acc.reshape(tb, h, w, hidden)
            if l + 1 < num_layers:
                # Next layer reads the same halo buffer; borders remain zero.
                pad_ref[:, 1:h + 1, 1:w + 1, :hidden] = act
            else:
                o_ref[...] = act.astype(o_ref.dtype)

    return kernel


def conv_stack(x_nhwc, conv_params, *, tb=8):
    """Fused [3x3 conv + ReLU] * L over NHWC ROI features, tb ROIs per step."""
    N, H, W, Cin = x_nhwc.shape
    L = len(conv_params)
    hidden = conv_params[0][0].shape[-1]
    c_ins = [Cin] + [hidden] * (L - 1)
    cmax = max(Cin, hidden)

    n_pad = _round_up(max(N, tb), tb)
    if n_pad != N:
        x_nhwc = jnp.pad(x_nhwc, ((0, n_pad - N), (0, 0), (0, 0), (0, 0)))

    in_specs = [pl.BlockSpec((tb, H, W, Cin), lambda n: (n, 0, 0, 0))]
    args = [x_nhwc]
    for l in range(L):
        in_specs.append(
            pl.BlockSpec((3, 3, c_ins[l], hidden), lambda n: (0, 0, 0, 0)))
        args.append(conv_params[l][0])
    for l in range(L):
        in_specs.append(pl.BlockSpec((1, hidden), lambda n: (0, 0)))
        args.append(conv_params[l][1].reshape(1, hidden))

    kernel = _make_conv_stack_kernel(L, tb, H, W, tuple(c_ins), hidden)
    return pl.pallas_call(
        kernel,
        out_shape=jax.ShapeDtypeStruct((n_pad, H, W, hidden), jnp.float32),
        grid=(n_pad // tb,),
        in_specs=in_specs,
        out_specs=pl.BlockSpec((tb, H, W, hidden), lambda n: (n, 0, 0, 0)),
        scratch_shapes=[pltpu.VMEM((tb, H + 2, W + 2, cmax), jnp.float32)],
        compiler_params=pltpu.CompilerParams(
            dimension_semantics=("parallel",),
            vmem_limit_bytes=32 * 1024 * 1024),
    )(*args)


# ------------------------------ tiled FC kernel ------------------------------

def fc_relu_kernel(x_ref, w_ref, b_ref, o_ref, acc_ref):
    k = pl.program_id(1)

    @pl.when(k == 0)
    def _():
        acc_ref[...] = jnp.zeros_like(acc_ref)

    acc_ref[...] += jnp.dot(x_ref[...], w_ref[...],
                            preferred_element_type=jnp.float32)

    @pl.when(k == pl.num_programs(1) - 1)
    def _():
        o_ref[...] = jnp.maximum(acc_ref[...] + b_ref[...],
                                 0.0).astype(o_ref.dtype)


def fc_relu(x_flat, w, b, *, tn=128, tk=512):
    """Linear + ReLU, tiled over (F, K) with a resident VMEM accumulator."""
    N, D = x_flat.shape
    F = w.shape[-1]

    n_pad = _round_up(N, 8)                 # f32 sublane multiple
    tk = min(tk, _round_up(D, 128))
    tn = min(tn, _round_up(F, 128))         # lane-dense output tiles
    d_pad = _round_up(D, tk)
    f_pad = _round_up(F, tn)

    x_p = jnp.pad(x_flat, ((0, n_pad - N), (0, d_pad - D)))
    w_p = jnp.pad(w, ((0, d_pad - D), (0, f_pad - F)))
    b_p = jnp.pad(b.reshape(1, F), ((0, 0), (0, f_pad - F)))

    out = pl.pallas_call(
        fc_relu_kernel,
        out_shape=jax.ShapeDtypeStruct((n_pad, f_pad), jnp.float32),
        grid=(f_pad // tn, d_pad // tk),          # reduction axis last
        in_specs=[
            pl.BlockSpec((n_pad, tk), lambda j, k: (0, k)),
            pl.BlockSpec((tk, tn), lambda j, k: (k, j)),
            pl.BlockSpec((1, tn), lambda j, k: (0, j)),
        ],
        out_specs=pl.BlockSpec((n_pad, tn), lambda j, k: (0, j)),
        scratch_shapes=[pltpu.VMEM((n_pad, tn), jnp.float32)],
        compiler_params=pltpu.CompilerParams(
            dimension_semantics=("parallel", "arbitrary"),
            vmem_limit_bytes=32 * 1024 * 1024),
    )(x_p, w_p, b_p)
    return out[:N, :F]


# ------------------------------- forward pass --------------------------------

@jax.jit
def roi_xconv1fc_head_forward(x_nchw, params):
    """roi_Xconv1fc_head forward on pre-pooled ROI features (NCHW input)."""
    n = x_nchw.shape[0]
    x = jnp.transpose(x_nchw, (0, 2, 3, 1))          # NCHW -> NHWC (once)
    x = conv_stack(x, params["convs"])               # (n_pad, H, W, hidden)
    # Flatten in NHWC order; fc_w_nhwc's rows were permuted once at
    # parameter-build time so no activation transpose is needed here.
    x_flat = x.reshape(x.shape[0], -1)
    y = fc_relu(x_flat, params["fc_w_nhwc"], params["fc_b"])
    return y[:n]


# --------------------------- deterministic params ----------------------------

def make_params(key, dim_in, hidden_dim, num_convs, roi_size, fc_dim):
    convs = []
    c_in = dim_in
    for _ in range(num_convs):
        key, kw = jax.random.split(key)
        std = np.sqrt(2.0 / (3 * 3 * hidden_dim))        # MSRAFill
        w = jax.random.normal(kw, (3, 3, c_in, hidden_dim), jnp.float32) * std
        b = jnp.zeros((hidden_dim,), jnp.float32)
        convs.append((w, b))
        c_in = hidden_dim
    d_in = c_in * roi_size * roi_size
    key, kf = jax.random.split(key)
    s = np.sqrt(3.0 / d_in)                              # XavierFill
    fc_w = jax.random.uniform(kf, (d_in, fc_dim), jnp.float32, -s, s)
    fc_b = jnp.zeros((fc_dim,), jnp.float32)
    # One-time host-side row permutation: PyTorch flattens NCHW (c, h, w);
    # the kernel flattens NHWC (h, w, c).  Re-ordering fc_w's rows lets the
    # kernel skip the activation transpose at zero runtime cost.
    fc_w_nhwc = (fc_w.reshape(c_in, roi_size, roi_size, fc_dim)
                 .transpose(1, 2, 0, 3)
                 .reshape(d_in, fc_dim))
    return {"convs": convs, "fc_w": fc_w, "fc_w_nhwc": fc_w_nhwc, "fc_b": fc_b}


# ------------------------------ reference check -------------------------------

def reference_forward(x_nchw, params):
    x = jnp.transpose(x_nchw, (0, 2, 3, 1))
    for (w, b) in params["convs"]:
        x = lax.conv_general_dilated(
            x, w, window_strides=(1, 1), padding=((1, 1), (1, 1)),
            dimension_numbers=("NHWC", "HWIO", "NHWC"))
        x = jnp.maximum(x + b[None, None, None, :], 0.0)
    n = x.shape[0]
    x_flat = jnp.transpose(x, (0, 3, 1, 2)).reshape(n, -1)   # PyTorch NCHW flatten
    y = x_flat @ params["fc_w"] + params["fc_b"][None, :]
    return jnp.maximum(y, 0.0)


if __name__ == "__main__":
    # cfg stand-ins (small): CONV_HEAD_DIM=32, NUM_STACKED_CONVS=2,
    # MLP_HEAD_DIM=128, ROI_XFORM_RESOLUTION=8; dim_in=4; num_rois=8.
    NUM_ROIS, DIM_IN, ROI = 8, 4, 8
    HIDDEN, NUM_CONVS, FC_DIM = 32, 2, 128

    key = jax.random.PRNGKey(0)
    key, kx = jax.random.split(key)
    # Pre-pooled ROI features (stand-in for roi_xform output), NCHW.
    x = jax.random.normal(kx, (NUM_ROIS, DIM_IN, ROI, ROI), jnp.float32)
    params = make_params(key, DIM_IN, HIDDEN, NUM_CONVS, ROI, FC_DIM)

    out = jax.block_until_ready(roi_xconv1fc_head_forward(x, params))
    ref = jax.block_until_ready(reference_forward(x, params))

    assert out.shape == (NUM_ROIS, FC_DIM)
    np.testing.assert_allclose(np.asarray(out), np.asarray(ref),
                               rtol=1e-4, atol=1e-4)
    print("KERNEL_OK")
</pallas_src>

<mosaic_0001>
module attributes {stable_mosaic.version = 11 : i64} {
  func.func @fc_relu_kernel(%arg0: i32, %arg1: i32, %arg2: memref<8x512xf32, #tpu.memory_space<vmem>>, %arg3: memref<512x128xf32, #tpu.memory_space<vmem>>, %arg4: memref<1x128xf32, #tpu.memory_space<vmem>>, %arg5: memref<8x128xf32, #tpu.memory_space<vmem>>, %arg6: memref<8x128xf32, #tpu.memory_space<vmem>>) attributes {dimension_semantics = [#tpu.dimension_semantics<parallel>, #tpu.dimension_semantics<arbitrary>], iteration_bounds = array<i64: 1, 4>, scalar_prefetch = 0 : i64, scratch_operands = 1 : i64, tpu.core_type = #tpu.core_type<tc>, window_params = [{transform_indices = @transform_0, window_bounds = array<i64: 8, 512>}, {transform_indices = @transform_1, window_bounds = array<i64: 512, 128>}, {transform_indices = @transform_2, window_bounds = array<i64: 1, 128>}, {transform_indices = @transform_3, window_bounds = array<i64: 8, 128>}]} {
    %c0_i32 = arith.constant 0 : i32
    %0 = arith.cmpi eq, %arg1, %c0_i32 : i32
    %1 = arith.extui %0 : i1 to i32
    %c0_i32_0 = arith.constant 0 : i32
    %2 = arith.cmpi ne, %1, %c0_i32_0 : i32
    scf.if %2 {
      %cst_9 = arith.constant 0.000000e+00 : f32
      %12 = vector.broadcast %cst_9 : f32 to vector<8x128xf32>
      %c0_10 = arith.constant 0 : index
      %c0_11 = arith.constant 0 : index
      %13 = vector.load %arg6[%c0_10, %c0_11] : memref<8x128xf32, #tpu.memory_space<vmem>>, vector<8x128xf32>
      tpu.vector_store %arg6[%c0_10, %c0_11], %12 {strides = array<i32>} : memref<8x128xf32, #tpu.memory_space<vmem>>, vector<8x128xf32>,
    } else {
    }
    %c0 = arith.constant 0 : index
    %c0_1 = arith.constant 0 : index
    %3 = vector.load %arg6[%c0, %c0_1] : memref<8x128xf32, #tpu.memory_space<vmem>>, vector<8x128xf32>
    %c0_2 = arith.constant 0 : index
    %c0_3 = arith.constant 0 : index
    %4 = vector.load %arg2[%c0_2, %c0_3] : memref<8x512xf32, #tpu.memory_space<vmem>>, vector<8x512xf32>
    %c0_4 = arith.constant 0 : index
    %c0_5 = arith.constant 0 : index
    %5 = vector.load %arg3[%c0_4, %c0_5] : memref<512x128xf32, #tpu.memory_space<vmem>>, vector<512x128xf32>
    %cst = arith.constant dense<0.000000e+00> : vector<8x128xf32>
    %6 = tpu.matmul %4, %5, %cst {dimension_numbers = #tpu.dot_dimension_numbers<[1], [0], [0], [1], [0, 0, 1, 1], [], []>} : vector<8x512xf32>, vector<512x128xf32>, vector<8x128xf32> -> vector<8x128xf32>
    %7 = arith.addf %3, %6 : vector<8x128xf32>
    %c0_6 = arith.constant 0 : index
    %c0_7 = arith.constant 0 : index
    %8 = vector.load %arg6[%c0_6, %c0_7] : memref<8x128xf32, #tpu.memory_space<vmem>>, vector<8x128xf32>
    tpu.vector_store %arg6[%c0_6, %c0_7], %7 {strides = array<i32>} : memref<8x128xf32, #tpu.memory_space<vmem>>, vector<8x128xf32>,
    %c3_i32 = arith.constant 3 : i32
    %9 = arith.cmpi eq, %arg1, %c3_i32 : i32
    %10 = arith.extui %9 : i1 to i32
    %c0_i32_8 = arith.constant 0 : i32
    %11 = arith.cmpi ne, %10, %c0_i32_8 : i32
    scf.if %11 {
      %c0_9 = arith.constant 0 : index
      %c0_10 = arith.constant 0 : index
      %12 = vector.load %arg6[%c0_9, %c0_10] : memref<8x128xf32, #tpu.memory_space<vmem>>, vector<8x128xf32>
      %c0_11 = arith.constant 0 : index
      %c0_12 = arith.constant 0 : index
      %13 = vector.load %arg4[%c0_11, %c0_12] : memref<1x128xf32, #tpu.memory_space<vmem>>, vector<1x128xf32>
      %14 = vector.broadcast %13 : vector<1x128xf32> to vector<8x128xf32>
      %15 = arith.addf %12, %14 : vector<8x128xf32>
      %cst_13 = arith.constant 0.000000e+00 : f32
      %16 = vector.broadcast %cst_13 : f32 to vector<8x128xf32>
      %17 = arith.maximumf %15, %16 : vector<8x128xf32>
      %c0_14 = arith.constant 0 : index
      %c0_15 = arith.constant 0 : index
      %18 = vector.load %arg5[%c0_14, %c0_15] : memref<8x128xf32, #tpu.memory_space<vmem>>, vector<8x128xf32>
      tpu.vector_store %arg5[%c0_14, %c0_15], %17 {strides = array<i32>} : memref<8x128xf32, #tpu.memory_space<vmem>>, vector<8x128xf32>,
    } else {
    }
    return
  }
  func.func @transform_0(%arg0: i32, %arg1: i32) -> (i32, i32) {
    %c0_i32 = arith.constant 0 : i32
    %c0_i32_0 = arith.constant 0 : i32
    return %c0_i32, %arg1 : i32, i32
  }
  func.func @transform_1(%arg0: i32, %arg1: i32) -> (i32, i32) {
    %c0_i32 = arith.constant 0 : i32
    return %arg1, %arg0 : i32, i32
  }
  func.func @transform_2(%arg0: i32, %arg1: i32) -> (i32, i32) {
    %c0_i32 = arith.constant 0 : i32
    %c0_i32_0 = arith.constant 0 : i32
    return %c0_i32, %arg0 : i32, i32
  }
  func.func @transform_3(%arg0: i32, %arg1: i32) -> (i32, i32) {
    %c0_i32 = arith.constant 0 : i32
    %c0_i32_0 = arith.constant 0 : i32
    return %c0_i32, %arg0 : i32, i32
  }
}

module attributes {stable_mosaic.version = 11 : i64} {
  func.func @kernel(%arg0: i32, %arg1: memref<8x8x8x4xf32, #tpu.memory_space<vmem>>, %arg2: memref<3x3x4x32xf32, #tpu.memory_space<vmem>>, %arg3: memref<3x3x32x32xf32, #tpu.memory_space<vmem>>, %arg4: memref<1x32xf32, #tpu.memory_space<vmem>>, %arg5: memref<1x32xf32, #tpu.memory_space<vmem>>, %arg6: memref<8x8x8x32xf32, #tpu.memory_space<vmem>>, %arg7: memref<8x10x10x32xf32, #tpu.memory_space<vmem>>) attributes {dimension_semantics = [#tpu.dimension_semantics<parallel>], iteration_bounds = array<i64: 1>, scalar_prefetch = 0 : i64, scratch_operands = 1 : i64, tpu.core_type = #tpu.core_type<tc>, window_params = [{transform_indices = @transform_0, window_bounds = array<i64: 8, 8, 8, 4>}, {pipeline_mode = #tpu.pipeline_mode<synchronous>, transform_indices = @transform_1, window_bounds = array<i64: 3, 3, 4, 32>}, {pipeline_mode = #tpu.pipeline_mode<synchronous>, transform_indices = @transform_2, window_bounds = array<i64: 3, 3, 32, 32>}, {pipeline_mode = #tpu.pipeline_mode<synchronous>, transform_indices = @transform_3, window_bounds = array<i64: 1, 32>}, {pipeline_mode = #tpu.pipeline_mode<synchronous>, transform_indices = @transform_4, window_bounds = array<i64: 1, 32>}, {transform_indices = @transform_5, window_bounds = array<i64: 8, 8, 8, 32>}]} {
    %cst = arith.constant 0.000000e+00 : f32
    %0 = vector.broadcast %cst : f32 to vector<8x10x10x32xf32>
    %c0 = arith.constant 0 : index
    %c0_0 = arith.constant 0 : index
    %c0_1 = arith.constant 0 : index
    %c0_2 = arith.constant 0 : index
    %1 = vector.load %arg7[%c0, %c0_0, %c0_1, %c0_2] : memref<8x10x10x32xf32, #tpu.memory_space<vmem>>, vector<8x10x10x32xf32>
    tpu.vector_store %arg7[%c0, %c0_0, %c0_1, %c0_2], %0 {strides = array<i32>} : memref<8x10x10x32xf32, #tpu.memory_space<vmem>>, vector<8x10x10x32xf32>,
    %c0_3 = arith.constant 0 : index
    %c0_4 = arith.constant 0 : index
    %c0_5 = arith.constant 0 : index
    %c0_6 = arith.constant 0 : index
    %2 = vector.load %arg1[%c0_3, %c0_4, %c0_5, %c0_6] : memref<8x8x8x4xf32, #tpu.memory_space<vmem>>, vector<8x8x8x4xf32>
    %c0_7 = arith.constant 0 : index
    %c1 = arith.constant 1 : index
    %c1_8 = arith.constant 1 : index
    %c0_9 = arith.constant 0 : index
    %3 = vector.load %arg7[%c0_7, %c1, %c1_8, %c0_9] : memref<8x10x10x32xf32, #tpu.memory_space<vmem>>, vector<8x8x8x4xf32>
    tpu.vector_store %arg7[%c0_7, %c1, %c1_8, %c0_9], %2 {strides = array<i32>} : memref<8x10x10x32xf32, #tpu.memory_space<vmem>>, vector<8x8x8x4xf32>,
    %cst_10 = arith.constant 0.000000e+00 : f32
    %4 = vector.broadcast %cst_10 : f32 to vector<512x32xf32>
    %c0_11 = arith.constant 0 : index
    %c0_12 = arith.constant 0 : index
    %c0_13 = arith.constant 0 : index
    %c0_14 = arith.constant 0 : index
    %5 = vector.load %arg7[%c0_11, %c0_12, %c0_13, %c0_14] : memref<8x10x10x32xf32, #tpu.memory_space<vmem>>, vector<8x8x8x4xf32>
    %6 = vector.shape_cast %5 : vector<8x8x8x4xf32> to vector<512x4xf32>
    %c0_15 = arith.constant 0 : index
    %c0_16 = arith.constant 0 : index
    %c0_17 = arith.constant 0 : index
    %c0_18 = arith.constant 0 : index
    %7 = vector.load %arg2[%c0_15, %c0_16, %c0_17, %c0_18] : memref<3x3x4x32xf32, #tpu.memory_space<vmem>>, vector<1x1x4x32xf32>
    %8 = vector.shape_cast %7 : vector<1x1x4x32xf32> to vector<4x32xf32>
    %cst_19 = arith.constant dense<0.000000e+00> : vector<512x32xf32>
    %9 = tpu.matmul %6, %8, %cst_19 {dimension_numbers = #tpu.dot_dimension_numbers<[1], [0], [0], [1], [0, 0, 1, 1], [], []>} : vector<512x4xf32>, vector<4x32xf32>, vector<512x32xf32> -> vector<512x32xf32>
    %10 = arith.addf %4, %9 : vector<512x32xf32>
    %c0_20 = arith.constant 0 : index
    %c0_21 = arith.constant 0 : index
    %c1_22 = arith.constant 1 : index
    %c0_23 = arith.constant 0 : index
    %11 = vector.load %arg7[%c0_20, %c0_21, %c1_22, %c0_23] : memref<8x10x10x32xf32, #tpu.memory_space<vmem>>, vector<8x8x8x4xf32>
    %12 = vector.shape_cast %11 : vector<8x8x8x4xf32> to vector<512x4xf32>
    %c0_24 = arith.constant 0 : index
    %c1_25 = arith.constant 1 : index
    %c0_26 = arith.constant 0 : index
    %c0_27 = arith.constant 0 : index
    %13 = vector.load %arg2[%c0_24, %c1_25, %c0_26, %c0_27] : memref<3x3x4x32xf32, #tpu.memory_space<vmem>>, vector<1x1x4x32xf32>
    %14 = vector.shape_cast %13 : vector<1x1x4x32xf32> to vector<4x32xf32>
    %cst_28 = arith.constant dense<0.000000e+00> : vector<512x32xf32>
    %15 = tpu.matmul %12, %14, %cst_28 {dimension_numbers = #tpu.dot_dimension_numbers<[1], [0], [0], [1], [0, 0, 1, 1], [], []>} : vector<512x4xf32>, vector<4x32xf32>, vector<512x32xf32> -> vector<512x32xf32>
    %16 = arith.addf %10, %15 : vector<512x32xf32>
    %c0_29 = arith.constant 0 : index
    %c0_30 = arith.constant 0 : index
    %c2 = arith.constant 2 : index
    %c0_31 = arith.constant 0 : index
    %17 = vector.load %arg7[%c0_29, %c0_30, %c2, %c0_31] : memref<8x10x10x32xf32, #tpu.memory_space<vmem>>, vector<8x8x8x4xf32>
    %18 = vector.shape_cast %17 : vector<8x8x8x4xf32> to vector<512x4xf32>
    %c0_32 = arith.constant 0 : index
    %c2_33 = arith.constant 2 : index
    %c0_34 = arith.constant 0 : index
    %c0_35 = arith.constant 0 : index
    %19 = vector.load %arg2[%c0_32, %c2_33, %c0_34, %c0_35] : memref<3x3x4x32xf32, #tpu.memory_space<vmem>>, vector<1x1x4x32xf32>
    %20 = vector.shape_cast %19 : vector<1x1x4x32xf32> to vector<4x32xf32>
    %cst_36 = arith.constant dense<0.000000e+00> : vector<512x32xf32>
    %21 = tpu.matmul %18, %20, %cst_36 {dimension_numbers = #tpu.dot_dimension_numbers<[1], [0], [0], [1], [0, 0, 1, 1], [], []>} : vector<512x4xf32>, vector<4x32xf32>, vector<512x32xf32> -> vector<512x32xf32>
    %22 = arith.addf %16, %21 : vector<512x32xf32>
    %c0_37 = arith.constant 0 : index
    %c1_38 = arith.constant 1 : index
    %c0_39 = arith.constant 0 : index
    %c0_40 = arith.constant 0 : index
    %23 = vector.load %arg7[%c0_37, %c1_38, %c0_39, %c0_40] : memref<8x10x10x32xf32, #tpu.memory_space<vmem>>, vector<8x8x8x4xf32>
    %24 = vector.shape_cast %23 : vector<8x8x8x4xf32> to vector<512x4xf32>
    %c1_41 = arith.constant 1 : index
    %c0_42 = arith.constant 0 : index
    %c0_43 = arith.constant 0 : index
    %c0_44 = arith.constant 0 : index
    %25 = vector.load %arg2[%c1_41, %c0_42, %c0_43, %c0_44] : memref<3x3x4x32xf32, #tpu.memory_space<vmem>>, vector<1x1x4x32xf32>
    %26 = vector.shape_cast %25 : vector<1x1x4x32xf32> to vector<4x32xf32>
    %cst_45 = arith.constant dense<0.000000e+00> : vector<512x32xf32>
    %27 = tpu.matmul %24, %26, %cst_45 {dimension_numbers = #tpu.dot_dimension_numbers<[1], [0], [0], [1], [0, 0, 1, 1], [], []>} : vector<512x4xf32>, vector<4x32xf32>, vector<512x32xf32> -> vector<512x32xf32>
    %28 = arith.addf %22, %27 : vector<512x32xf32>
    %c0_46 = arith.constant 0 : index
    %c1_47 = arith.constant 1 : index
    %c1_48 = arith.constant 1 : index
    %c0_49 = arith.constant 0 : index
    %29 = vector.load %arg7[%c0_46, %c1_47, %c1_48, %c0_49] : memref<8x10x10x32xf32, #tpu.memory_space<vmem>>, vector<8x8x8x4xf32>
    %30 = vector.shape_cast %29 : vector<8x8x8x4xf32> to vector<512x4xf32>
    %c1_50 = arith.constant 1 : index
    %c1_51 = arith.constant 1 : index
    %c0_52 = arith.constant 0 : index
    %c0_53 = arith.constant 0 : index
    %31 = vector.load %arg2[%c1_50, %c1_51, %c0_52, %c0_53] : memref<3x3x4x32xf32, #tpu.memory_space<vmem>>, vector<1x1x4x32xf32>
    %32 = vector.shape_cast %31 : vector<1x1x4x32xf32> to vector<4x32xf32>
    %cst_54 = arith.constant dense<0.000000e+00> : vector<512x32xf32>
    %33 = tpu.matmul %30, %32, %cst_54 {dimension_numbers = #tpu.dot_dimension_numbers<[1], [0], [0], [1], [0, 0, 1, 1], [], []>} : vector<512x4xf32>, vector<4x32xf32>, vector<512x32xf32> -> vector<512x32xf32>
    %34 = arith.addf %28, %33 : vector<512x32xf32>
    %c0_55 = arith.constant 0 : index
    %c1_56 = arith.constant 1 : index
    %c2_57 = arith.constant 2 : index
    %c0_58 = arith.constant 0 : index
    %35 = vector.load %arg7[%c0_55, %c1_56, %c2_57, %c0_58] : memref<8x10x10x32xf32, #tpu.memory_space<vmem>>, vector<8x8x8x4xf32>
    %36 = vector.shape_cast %35 : vector<8x8x8x4xf32> to vector<512x4xf32>
    %c1_59 = arith.constant 1 : index
    %c2_60 = arith.constant 2 : index
    %c0_61 = arith.constant 0 : index
    %c0_62 = arith.constant 0 : index
    %37 = vector.load %arg2[%c1_59, %c2_60, %c0_61, %c0_62] : memref<3x3x4x32xf32, #tpu.memory_space<vmem>>, vector<1x1x4x32xf32>
    %38 = vector.shape_cast %37 : vector<1x1x4x32xf32> to vector<4x32xf32>
    %cst_63 = arith.constant dense<0.000000e+00> : vector<512x32xf32>
    %39 = tpu.matmul %36, %38, %cst_63 {dimension_numbers = #tpu.dot_dimension_numbers<[1], [0], [0], [1], [0, 0, 1, 1], [], []>} : vector<512x4xf32>, vector<4x32xf32>, vector<512x32xf32> -> vector<512x32xf32>
    %40 = arith.addf %34, %39 : vector<512x32xf32>
    %c0_64 = arith.constant 0 : index
    %c2_65 = arith.constant 2 : index
    %c0_66 = arith.constant 0 : index
    %c0_67 = arith.constant 0 : index
    %41 = vector.load %arg7[%c0_64, %c2_65, %c0_66, %c0_67] : memref<8x10x10x32xf32, #tpu.memory_space<vmem>>, vector<8x8x8x4xf32>
    %42 = vector.shape_cast %41 : vector<8x8x8x4xf32> to vector<512x4xf32>
    %c2_68 = arith.constant 2 : index
    %c0_69 = arith.constant 0 : index
    %c0_70 = arith.constant 0 : index
    %c0_71 = arith.constant 0 : index
    %43 = vector.load %arg2[%c2_68, %c0_69, %c0_70, %c0_71] : memref<3x3x4x32xf32, #tpu.memory_space<vmem>>, vector<1x1x4x32xf32>
    %44 = vector.shape_cast %43 : vector<1x1x4x32xf32> to vector<4x32xf32>
    %cst_72 = arith.constant dense<0.000000e+00> : vector<512x32xf32>
    %45 = tpu.matmul %42, %44, %cst_72 {dimension_numbers = #tpu.dot_dimension_numbers<[1], [0], [0], [1], [0, 0, 1, 1], [], []>} : vector<512x4xf32>, vector<4x32xf32>, vector<512x32xf32> -> vector<512x32xf32>
    %46 = arith.addf %40, %45 : vector<512x32xf32>
    %c0_73 = arith.constant 0 : index
    %c2_74 = arith.constant 2 : index
    %c1_75 = arith.constant 1 : index
    %c0_76 = arith.constant 0 : index
    %47 = vector.load %arg7[%c0_73, %c2_74, %c1_75, %c0_76] : memref<8x10x10x32xf32, #tpu.memory_space<vmem>>, vector<8x8x8x4xf32>
    %48 = vector.shape_cast %47 : vector<8x8x8x4xf32> to vector<512x4xf32>
    %c2_77 = arith.constant 2 : index
    %c1_78 = arith.constant 1 : index
    %c0_79 = arith.constant 0 : index
    %c0_80 = arith.constant 0 : index
    %49 = vector.load %arg2[%c2_77, %c1_78, %c0_79, %c0_80] : memref<3x3x4x32xf32, #tpu.memory_space<vmem>>, vector<1x1x4x32xf32>
    %50 = vector.shape_cast %49 : vector<1x1x4x32xf32> to vector<4x32xf32>
    %cst_81 = arith.constant dense<0.000000e+00> : vector<512x32xf32>
    %51 = tpu.matmul %48, %50, %cst_81 {dimension_numbers = #tpu.dot_dimension_numbers<[1], [0], [0], [1], [0, 0, 1, 1], [], []>} : vector<512x4xf32>, vector<4x32xf32>, vector<512x32xf32> -> vector<512x32xf32>
    %52 = arith.addf %46, %51 : vector<512x32xf32>
    %c0_82 = arith.constant 0 : index
    %c2_83 = arith.constant 2 : index
    %c2_84 = arith.constant 2 : index
    %c0_85 = arith.constant 0 : index
    %53 = vector.load %arg7[%c0_82, %c2_83, %c2_84, %c0_85] : memref<8x10x10x32xf32, #tpu.memory_space<vmem>>, vector<8x8x8x4xf32>
    %54 = vector.shape_cast %53 : vector<8x8x8x4xf32> to vector<512x4xf32>
    %c2_86 = arith.constant 2 : index
    %c2_87 = arith.constant 2 : index
    %c0_88 = arith.constant 0 : index
    %c0_89 = arith.constant 0 : index
    %55 = vector.load %arg2[%c2_86, %c2_87, %c0_88, %c0_89] : memref<3x3x4x32xf32, #tpu.memory_space<vmem>>, vector<1x1x4x32xf32>
    %56 = vector.shape_cast %55 : vector<1x1x4x32xf32> to vector<4x32xf32>
    %cst_90 = arith.constant dense<0.000000e+00> : vector<512x32xf32>
    %57 = tpu.matmul %54, %56, %cst_90 {dimension_numbers = #tpu.dot_dimension_numbers<[1], [0], [0], [1], [0, 0, 1, 1], [], []>} : vector<512x4xf32>, vector<4x32xf32>, vector<512x32xf32> -> vector<512x32xf32>
    %58 = arith.addf %52, %57 : vector<512x32xf32>
    %c0_91 = arith.constant 0 : index
    %c0_92 = arith.constant 0 : index
    %59 = vector.load %arg4[%c0_91, %c0_92] : memref<1x32xf32, #tpu.memory_space<vmem>>, vector<1x32xf32>
    %60 = vector.broadcast %59 : vector<1x32xf32> to vector<512x32xf32>
    %61 = arith.addf %58, %60 : vector<512x32xf32>
    %cst_93 = arith.constant 0.000000e+00 : f32
    %62 = vector.broadcast %cst_93 : f32 to vector<512x32xf32>
    %63 = arith.maximumf %61, %62 : vector<512x32xf32>
    %64 = vector.shape_cast %63 : vector<512x32xf32> to vector<8x8x8x32xf32>
    %c0_94 = arith.constant 0 : index
    %c1_95 = arith.constant 1 : index
    %c1_96 = arith.constant 1 : index
    %c0_97 = arith.constant 0 : index
    %65 = vector.load %arg7[%c0_94, %c1_95, %c1_96, %c0_97] : memref<8x10x10x32xf32, #tpu.memory_space<vmem>>, vector<8x8x8x32xf32>
    tpu.vector_store %arg7[%c0_94, %c1_95, %c1_96, %c0_97], %64 {strides = array<i32>} : memref<8x10x10x32xf32, #tpu.memory_space<vmem>>, vector<8x8x8x32xf32>,
    %cst_98 = arith.constant 0.000000e+00 : f32
    %66 = vector.broadcast %cst_98 : f32 to vector<512x32xf32>
    %c0_99 = arith.constant 0 : index
    %c0_100 = arith.constant 0 : index
    %c0_101 = arith.constant 0 : index
    %c0_102 = arith.constant 0 : index
    %67 = vector.load %arg7[%c0_99, %c0_100, %c0_101, %c0_102] : memref<8x10x10x32xf32, #tpu.memory_space<vmem>>, vector<8x8x8x32xf32>
    %68 = vector.shape_cast %67 : vector<8x8x8x32xf32> to vector<512x32xf32>
    %c0_103 = arith.constant 0 : index
    %c0_104 = arith.constant 0 : index
    %c0_105 = arith.constant 0 : index
    %c0_106 = arith.constant 0 : index
    %69 = vector.load %arg3[%c0_103, %c0_104, %c0_105, %c0_106] : memref<3x3x32x32xf32, #tpu.memory_space<vmem>>, vector<1x1x32x32xf32>
    %70 = vector.shape_cast %69 : vector<1x1x32x32xf32> to vector<32x32xf32>
    %cst_107 = arith.constant dense<0.000000e+00> : vector<512x32xf32>
    %71 = tpu.matmul %68, %70, %cst_107 {dimension_numbers = #tpu.dot_dimension_numbers<[1], [0], [0], [1], [0, 0, 1, 1], [], []>} : vector<512x32xf32>, vector<32x32xf32>, vector<512x32xf32> -> vector<512x32xf32>
    %72 = arith.addf %66, %71 : vector<512x32xf32>
    %c0_108 = arith.constant 0 : index
    %c0_109 = arith.constant 0 : index
    %c1_110 = arith.constant 1 : index
    %c0_111 = arith.constant 0 : index
    %73 = vector.load %arg7[%c0_108, %c0_109, %c1_110, %c0_111] : memref<8x10x10x32xf32, #tpu.memory_space<vmem>>, vector<8x8x8x32xf32>
    %74 = vector.shape_cast %73 : vector<8x8x8x32xf32> to vector<512x32xf32>
    %c0_112 = arith.constant 0 : index
    %c1_113 = arith.constant 1 : index
    %c0_114 = arith.constant 0 : index
    %c0_115 = arith.constant 0 : index
    %75 = vector.load %arg3[%c0_112, %c1_113, %c0_114, %c0_115] : memref<3x3x32x32xf32, #tpu.memory_space<vmem>>, vector<1x1x32x32xf32>
    %76 = vector.shape_cast %75 : vector<1x1x32x32xf32> to vector<32x32xf32>
    %cst_116 = arith.constant dense<0.000000e+00> : vector<512x32xf32>
    %77 = tpu.matmul %74, %76, %cst_116 {dimension_numbers = #tpu.dot_dimension_numbers<[1], [0], [0], [1], [0, 0, 1, 1], [], []>} : vector<512x32xf32>, vector<32x32xf32>, vector<512x32xf32> -> vector<512x32xf32>
    %78 = arith.addf %72, %77 : vector<512x32xf32>
    %c0_117 = arith.constant 0 : index
    %c0_118 = arith.constant 0 : index
    %c2_119 = arith.constant 2 : index
    %c0_120 = arith.constant 0 : index
    %79 = vector.load %arg7[%c0_117, %c0_118, %c2_119, %c0_120] : memref<8x10x10x32xf32, #tpu.memory_space<vmem>>, vector<8x8x8x32xf32>
    %80 = vector.shape_cast %79 : vector<8x8x8x32xf32> to vector<512x32xf32>
    %c0_121 = arith.constant 0 : index
    %c2_122 = arith.constant 2 : index
    %c0_123 = arith.constant 0 : index
    %c0_124 = arith.constant 0 : index
    %81 = vector.load %arg3[%c0_121, %c2_122, %c0_123, %c0_124] : memref<3x3x32x32xf32, #tpu.memory_space<vmem>>, vector<1x1x32x32xf32>
    %82 = vector.shape_cast %81 : vector<1x1x32x32xf32> to vector<32x32xf32>
    %cst_125 = arith.constant dense<0.000000e+00> : vector<512x32xf32>
    %83 = tpu.matmul %80, %82, %cst_125 {dimension_numbers = #tpu.dot_dimension_numbers<[1], [0], [0], [1], [0, 0, 1, 1], [], []>} : vector<512x32xf32>, vector<32x32xf32>, vector<512x32xf32> -> vector<512x32xf32>
    %84 = arith.addf %78, %83 : vector<512x32xf32>
    %c0_126 = arith.constant 0 : index
    %c1_127 = arith.constant 1 : index
    %c0_128 = arith.constant 0 : index
    %c0_129 = arith.constant 0 : index
    %85 = vector.load %arg7[%c0_126, %c1_127, %c0_128, %c0_129] : memref<8x10x10x32xf32, #tpu.memory_space<vmem>>, vector<8x8x8x32xf32>
    %86 = vector.shape_cast %85 : vector<8x8x8x32xf32> to vector<512x32xf32>
    %c1_130 = arith.constant 1 : index
    %c0_131 = arith.constant 0 : index
    %c0_132 = arith.constant 0 : index
    %c0_133 = arith.constant 0 : index
    %87 = vector.load %arg3[%c1_130, %c0_131, %c0_132, %c0_133] : memref<3x3x32x32xf32, #tpu.memory_space<vmem>>, vector<1x1x32x32xf32>
    %88 = vector.shape_cast %87 : vector<1x1x32x32xf32> to vector<32x32xf32>
    %cst_134 = arith.constant dense<0.000000e+00> : vector<512x32xf32>
    %89 = tpu.matmul %86, %88, %cst_134 {dimension_numbers = #tpu.dot_dimension_numbers<[1], [0], [0], [1], [0, 0, 1, 1], [], []>} : vector<512x32xf32>, vector<32x32xf32>, vector<512x32xf32> -> vector<512x32xf32>
    %90 = arith.addf %84, %89 : vector<512x32xf32>
    %c0_135 = arith.constant 0 : index
    %c1_136 = arith.constant 1 : index
    %c1_137 = arith.constant 1 : index
    %c0_138 = arith.constant 0 : index
    %91 = vector.load %arg7[%c0_135, %c1_136, %c1_137, %c0_138] : memref<8x10x10x32xf32, #tpu.memory_space<vmem>>, vector<8x8x8x32xf32>
    %92 = vector.shape_cast %91 : vector<8x8x8x32xf32> to vector<512x32xf32>
    %c1_139 = arith.constant 1 : index
    %c1_140 = arith.constant 1 : index
    %c0_141 = arith.constant 0 : index
    %c0_142 = arith.constant 0 : index
    %93 = vector.load %arg3[%c1_139, %c1_140, %c0_141, %c0_142] : memref<3x3x32x32xf32, #tpu.memory_space<vmem>>, vector<1x1x32x32xf32>
    %94 = vector.shape_cast %93 : vector<1x1x32x32xf32> to vector<32x32xf32>
    %cst_143 = arith.constant dense<0.000000e+00> : vector<512x32xf32>
    %95 = tpu.matmul %92, %94, %cst_143 {dimension_numbers = #tpu.dot_dimension_numbers<[1], [0], [0], [1], [0, 0, 1, 1], [], []>} : vector<512x32xf32>, vector<32x32xf32>, vector<512x32xf32> -> vector<512x32xf32>
    %96 = arith.addf %90, %95 : vector<512x32xf32>
    %c0_144 = arith.constant 0 : index
    %c1_145 = arith.constant 1 : index
    %c2_146 = arith.constant 2 : index
    %c0_147 = arith.constant 0 : index
    %97 = vector.load %arg7[%c0_144, %c1_145, %c2_146, %c0_147] : memref<8x10x10x32xf32, #tpu.memory_space<vmem>>, vector<8x8x8x32xf32>
    %98 = vector.shape_cast %97 : vector<8x8x8x32xf32> to vector<512x32xf32>
    %c1_148 = arith.constant 1 : index
    %c2_149 = arith.constant 2 : index
    %c0_150 = arith.constant 0 : index
    %c0_151 = arith.constant 0 : index
    %99 = vector.load %arg3[%c1_148, %c2_149, %c0_150, %c0_151] : memref<3x3x32x32xf32, #tpu.memory_space<vmem>>, vector<1x1x32x32xf32>
    %100 = vector.shape_cast %99 : vector<1x1x32x32xf32> to vector<32x32xf32>
    %cst_152 = arith.constant dense<0.000000e+00> : vector<512x32xf32>
    %101 = tpu.matmul %98, %100, %cst_152 {dimension_numbers = #tpu.dot_dimension_numbers<[1], [0], [0], [1], [0, 0, 1, 1], [], []>} : vector<512x32xf32>, vector<32x32xf32>, vector<512x32xf32> -> vector<512x32xf32>
    %102 = arith.addf %96, %101 : vector<512x32xf32>
    %c0_153 = arith.constant 0 : index
    %c2_154 = arith.constant 2 : index
    %c0_155 = arith.constant 0 : index
    %c0_156 = arith.constant 0 : index
    %103 = vector.load %arg7[%c0_153, %c2_154, %c0_155, %c0_156] : memref<8x10x10x32xf32, #tpu.memory_space<vmem>>, vector<8x8x8x32xf32>
    %104 = vector.shape_cast %103 : vector<8x8x8x32xf32> to vector<512x32xf32>
    %c2_157 = arith.constant 2 : index
    %c0_158 = arith.constant 0 : index
    %c0_159 = arith.constant 0 : index
    %c0_160 = arith.constant 0 : index
    %105 = vector.load %arg3[%c2_157, %c0_158, %c0_159, %c0_160] : memref<3x3x32x32xf32, #tpu.memory_space<vmem>>, vector<1x1x32x32xf32>
    %106 = vector.shape_cast %105 : vector<1x1x32x32xf32> to vector<32x32xf32>
    %cst_161 = arith.constant dense<0.000000e+00> : vector<512x32xf32>
    %107 = tpu.matmul %104, %106, %cst_161 {dimension_numbers = #tpu.dot_dimension_numbers<[1], [0], [0], [1], [0, 0, 1, 1], [], []>} : vector<512x32xf32>, vector<32x32xf32>, vector<512x32xf32> -> vector<512x32xf32>
    %108 = arith.addf %102, %107 : vector<512x32xf32>
    %c0_162 = arith.constant 0 : index
    %c2_163 = arith.constant 2 : index
    %c1_164 = arith.constant 1 : index
    %c0_165 = arith.constant 0 : index
    %109 = vector.load %arg7[%c0_162, %c2_163, %c1_164, %c0_165] : memref<8x10x10x32xf32, #tpu.memory_space<vmem>>, vector<8x8x8x32xf32>
    %110 = vector.shape_cast %109 : vector<8x8x8x32xf32> to vector<512x32xf32>
    %c2_166 = arith.constant 2 : index
    %c1_167 = arith.constant 1 : index
    %c0_168 = arith.constant 0 : index
    %c0_169 = arith.constant 0 : index
    %111 = vector.load %arg3[%c2_166, %c1_167, %c0_168, %c0_169] : memref<3x3x32x32xf32, #tpu.memory_space<vmem>>, vector<1x1x32x32xf32>
    %112 = vector.shape_cast %111 : vector<1x1x32x32xf32> to vector<32x32xf32>
    %cst_170 = arith.constant dense<0.000000e+00> : vector<512x32xf32>
    %113 = tpu.matmul %110, %112, %cst_170 {dimension_numbers = #tpu.dot_dimension_numbers<[1], [0], [0], [1], [0, 0, 1, 1], [], []>} : vector<512x32xf32>, vector<32x32xf32>, vector<512x32xf32> -> vector<512x32xf32>
    %114 = arith.addf %108, %113 : vector<512x32xf32>
    %c0_171 = arith.constant 0 : index
    %c2_172 = arith.constant 2 : index
    %c2_173 = arith.constant 2 : index
    %c0_174 = arith.constant 0 : index
    %115 = vector.load %arg7[%c0_171, %c2_172, %c2_173, %c0_174] : memref<8x10x10x32xf32, #tpu.memory_space<vmem>>, vector<8x8x8x32xf32>
    %116 = vector.shape_cast %115 : vector<8x8x8x32xf32> to vector<512x32xf32>
    %c2_175 = arith.constant 2 : index
    %c2_176 = arith.constant 2 : index
    %c0_177 = arith.constant 0 : index
    %c0_178 = arith.constant 0 : index
    %117 = vector.load %arg3[%c2_175, %c2_176, %c0_177, %c0_178] : memref<3x3x32x32xf32, #tpu.memory_space<vmem>>, vector<1x1x32x32xf32>
    %118 = vector.shape_cast %117 : vector<1x1x32x32xf32> to vector<32x32xf32>
    %cst_179 = arith.constant dense<0.000000e+00> : vector<512x32xf32>
    %119 = tpu.matmul %116, %118, %cst_179 {dimension_numbers = #tpu.dot_dimension_numbers<[1], [0], [0], [1], [0, 0, 1, 1], [], []>} : vector<512x32xf32>, vector<32x32xf32>, vector<512x32xf32> -> vector<512x32xf32>
    %120 = arith.addf %114, %119 : vector<512x32xf32>
    %c0_180 = arith.constant 0 : index
    %c0_181 = arith.constant 0 : index
    %121 = vector.load %arg5[%c0_180, %c0_181] : memref<1x32xf32, #tpu.memory_space<vmem>>, vector<1x32xf32>
    %122 = vector.broadcast %121 : vector<1x32xf32> to vector<512x32xf32>
    %123 = arith.addf %120, %122 : vector<512x32xf32>
    %cst_182 = arith.constant 0.000000e+00 : f32
    %124 = vector.broadcast %cst_182 : f32 to vector<512x32xf32>
    %125 = arith.maximumf %123, %124 : vector<512x32xf32>
    %126 = vector.shape_cast %125 : vector<512x32xf32> to vector<8x8x8x32xf32>
    %c0_183 = arith.constant 0 : index
    %c0_184 = arith.constant 0 : index
    %c0_185 = arith.constant 0 : index
    %c0_186 = arith.constant 0 : index
    %127 = vector.load %arg6[%c0_183, %c0_184, %c0_185, %c0_186] : memref<8x8x8x32xf32, #tpu.memory_space<vmem>>, vector<8x8x8x32xf32>
    tpu.vector_store %arg6[%c0_183, %c0_184, %c0_185, %c0_186], %126 {strides = array<i32>} : memref<8x8x8x32xf32, #tpu.memory_space<vmem>>, vector<8x8x8x32xf32>,
    return
  }
  func.func @transform_0(%arg0: i32) -> (i32, i32, i32, i32) {
    %c0_i32 = arith.constant 0 : i32
    %c0_i32_0 = arith.constant 0 : i32
    %c0_i32_1 = arith.constant 0 : i32
    %c0_i32_2 = arith.constant 0 : i32
    return %arg0, %c0_i32, %c0_i32_0, %c0_i32_1 : i32, i32, i32, i32
  }
  func.func @transform_1(%arg0: i32) -> (i32, i32, i32, i32) {
    %c0_i32 = arith.constant 0 : i32
    %c0_i32_0 = arith.constant 0 : i32
    %c0_i32_1 = arith.constant 0 : i32
    %c0_i32_2 = arith.constant 0 : i32
    %c0_i32_3 = arith.constant 0 : i32
    return %c0_i32, %c0_i32_0, %c0_i32_1, %c0_i32_2 : i32, i32, i32, i32
  }
  func.func @transform_2(%arg0: i32) -> (i32, i32, i32, i32) {
    %c0_i32 = arith.constant 0 : i32
    %c0_i32_0 = arith.constant 0 : i32
    %c0_i32_1 = arith.constant 0 : i32
    %c0_i32_2 = arith.constant 0 : i32
    %c0_i32_3 = arith.constant 0 : i32
    return %c0_i32, %c0_i32_0, %c0_i32_1, %c0_i32_2 : i32, i32, i32, i32
  }
  func.func @transform_3(%arg0: i32) -> (i32, i32) {
    %c0_i32 = arith.constant 0 : i32
    %c0_i32_0 = arith.constant 0 : i32
    %c0_i32_1 = arith.constant 0 : i32
    return %c0_i32, %c0_i32_0 : i32, i32
  }
  func.func @transform_4(%arg0: i32) -> (i32, i32) {
    %c0_i32 = arith.constant 0 : i32
    %c0_i32_0 = arith.constant 0 : i32
    %c0_i32_1 = arith.constant 0 : i32
    return %c0_i32, %c0_i32_0 : i32, i32
  }
  func.func @transform_5(%arg0: i32) -> (i32, i32, i32, i32) {
    %c0_i32 = arith.constant 0 : i32
    %c0_i32_0 = arith.constant 0 : i32
    %c0_i32_1 = arith.constant 0 : i32
    %c0_i32_2 = arith.constant 0 : i32
    return %arg0, %c0_i32, %c0_i32_0, %c0_i32_1 : i32, i32, i32, i32
  }
}

</mosaic_0001>

<bundles_post_ra>
// kernel: roi_xconv1fc_head_forward.3
= control target key start
LH: loop header
LB: loop body
LE: loop exit
PB: predicated region body
PF: predicated region fallthrough
CT: control target
= control target key end

     0   :  { %8 = vsyncpa [#allocation4], 0  ;;  %s732_s12 = smov 0   ;;  %s734_s13 = smov 0   ;;  %s864_s0 = inlined_call_operand.vmem [shape: f32[8,2048], index: 0, kind: input, shape index: {}]   ;;  %s865_s1 = inlined_call_operand.vmem [shape: f32[2048,128], index: 1, kind: input, shape index: {}]   ;;  %s866_s2 = inlined_call_operand.vmem [shape: f32[1,128], index: 2, kind: input, shape index: {}]   ;;  %s867_s3 = inlined_call_operand.hbm [shape: f32[8,128], index: 3, kind: output, shape index: {}]  }
   0x1   :  { %s736_s14 = smov 0  }
   0x2 LB: > { %s540_s15 = sadd.s32 4294967295, %s708_s14   ;;  %s23_s16 = sadd.s32 1, %s704_s13  ;;  %s708_s14 = sphi %s736_s14, %s14_s14   ;;  %s704_s13 = sphi %s734_s13, %s870_s13   ;;  %s700_s12 = sphi %s732_s12, %s869_s12  }
   0x3   : > { %p24_p0 = scmp.ge.s32.totalorder %s23_s16, 4  ;;  %p544_p1 = scmp.ge.s32.totalorder %s708_s14, 1 }
   0x4   : > { %p175_p2 = scmp.lt.s32.totalorder %s708_s14, 5 }
   0x5   : > { %s872_s16 = smov (%p24_p0, %s23_s16), 0 }
   0x6   : > { %p176_p3 = pnand %p544_p1, %p175_p2 }
   0x7   : > { %s545_s17 = sshll.u32 (!%p176_p3), %s700_s12, 2  ;;  %s547_s18 = sshll.u32 (!%p176_p3), %s700_s12, 6 }
   0x8   : > { %179 = sbr.rel (%p176_p3) target bundleno = 288 (0x120), region = 32  ;;  %p206_p4 = scmp.lt.s32.totalorder (!%p176_p3), %s545_s17, 15 }
   0x9   : > { %p212_p5 = scmp.lt.s32.totalorder (!%p176_p3), %s547_s18, 255  ;;  %p549_p6 = scmp.ne.s32.totalorder (!%p176_p3), %s700_s12, 0 }
   0xd   : > { %s874_s17 = smov (!%p206_p4, %s545_s17), 15  ;;  %s876_s18 = smov (!%p212_p5, %s547_s18), 255 }
   0xe   : > { %s546_s19 = sshll.u32 %s874_s17, 3  ;;  %s548_s23 = sshll.u32 %s876_s18, 3 }
   0xf   : > { %s758_s22 = scalar_lea.vmem %s864_s0, %s546_s19  ;;  %s763_s26 = scalar_lea.vmem %s865_s1, %s548_s23 }
  0x10   : > { %226 = sbr.rel (%p549_p6) target bundleno = 23 (0x17), region = 36 }
  0x15   : > { %v710_v0 = vmov 0.0  }
  0x16   : > { %227 = vst [vmem:[#allocation2] sm:$0xff] %v710_v0 }
  0x17 PF: > { %v264_v1 = vld [vmem:[%s763_s26 + $0xf8] sm:$0xff]  ;;  %v263_v5 = vld [vmem:[%s763_s26 + $0xf0] sm:$0xff]  ;;  %v262_v9 = vld [vmem:[%s763_s26 + $0xe8] sm:$0xff]  ;;  %p550_p7 = scmp.ne.s32.totalorder %s700_s12, 3 }
  0x18   : > { %v296_v2 = vld [vmem:[%s763_s26 + $0x1f8] sm:$0xff]  ;;  %556 = vmatprep.subr.mxu0 %v264_v1  ;;  %v295_v6 = vld [vmem:[%s763_s26 + $0x1f0] sm:$0xff]  ;;  %v294_v10 = vld [vmem:[%s763_s26 + $0x1e8] sm:$0xff] }
  0x19   : > { %v248_v3 = vld [vmem:[%s763_s26 + $0x78] sm:$0xff]  ;;  %591 = vmatprep.subr.mxu1 %v296_v2  ;;  %v247_v7 = vld [vmem:[%s763_s26 + $0x70] sm:$0xff]  ;;  %v246_v11 = vld [vmem:[%s763_s26 + $0x68] sm:$0xff] }
  0x1a   : > { %v280_v4 = vld [vmem:[%s763_s26 + $0x178] sm:$0xff]  ;;  %557 = vmatpush3.msra.mxu0 %v248_v3  ;;  %v279_v8 = vld [vmem:[%s763_s26 + $0x170] sm:$0xff]  ;;  %v278_v12 = vld [vmem:[%s763_s26 + $0x168] sm:$0xff] }
  0x1b   : > { %592 = vmatpush3.msra.mxu1 %v280_v4  ;;  %558 = vmatprep.subr.mxu0 %v263_v5  ;;  %v261_v13 = vld [vmem:[%s763_s26 + $0xe0] sm:$0xff]  ;;  %v260_v17 = vld [vmem:[%s763_s26 + $0xd8] sm:$0xff]  ;;  %v259_v21 = vld [vmem:[%s763_s26 + $0xd0] sm:$0xff] }
  0x1c   : > { %593 = vmatprep.subr.mxu1 %v295_v6  ;;  %559 = vmatpush3.msra.mxu0 %v247_v7  ;;  %v293_v14 = vld [vmem:[%s763_s26 + $0x1e0] sm:$0xff]  ;;  %v292_v18 = vld [vmem:[%s763_s26 + $0x1d8] sm:$0xff]  ;;  %v291_v22 = vld [vmem:[%s763_s26 + $0x1d0] sm:$0xff] }
  0x1d   : > { %594 = vmatpush3.msra.mxu1 %v279_v8  ;;  %560 = vmatprep.subr.mxu0 %v262_v9  ;;  %v245_v15 = vld [vmem:[%s763_s26 + $0x60] sm:$0xff]  ;;  %v244_v19 = vld [vmem:[%s763_s26 + $0x58] sm:$0xff]  ;;  %v243_v23 = vld [vmem:[%s763_s26 + $0x50] sm:$0xff] }
  0x1e   : > { %595 = vmatprep.subr.mxu1 %v294_v10  ;;  %v277_v16 = vld [vmem:[%s763_s26 + $0x160] sm:$0xff]  ;;  %561 = vmatpush3.msra.mxu0 %v246_v11  ;;  %v276_v20 = vld [vmem:[%s763_s26 + $0x158] sm:$0xff]  ;;  %v275_v24 = vld [vmem:[%s763_s26 + $0x150] sm:$0xff] }
  0x1f   : > { %596 = vmatpush3.msra.mxu1 %v278_v12  ;;  %562 = vmatprep.subr.mxu0 %v261_v13  ;;  %v258_v25 = vld [vmem:[%s763_s26 + $0xc8] sm:$0xff]  ;;  %v257_v29 = vld [vmem:[%s763_s26 + $0xc0] sm:$0xff]  ;;  %v256_v33 = vld [vmem:[%s763_s26 + $0xb8] sm:$0xff] }
  0x20   : > { %597 = vmatprep.subr.mxu1 %v293_v14  ;;  %563 = vmatpush3.msra.mxu0 %v245_v15  ;;  %v290_v26 = vld [vmem:[%s763_s26 + $0x1c8] sm:$0xff]  ;;  %v289_v30 = vld [vmem:[%s763_s26 + $0x1c0] sm:$0xff]  ;;  %v288_v34 = vld [vmem:[%s763_s26 + $0x1b8] sm:$0xff] }
  0x21   : > { %598 = vmatpush3.msra.mxu1 %v277_v16  ;;  %564 = vmatprep.subr.mxu0 %v260_v17  ;;  %v242_v27 = vld [vmem:[%s763_s26 + $0x48] sm:$0xff]  ;;  %v241_v31 = vld [vmem:[%s763_s26 + $0x40] sm:$0xff]  ;;  %v240_v35 = vld [vmem:[%s763_s26 + $0x38] sm:$0xff] }
  0x22   : > { %599 = vmatprep.subr.mxu1 %v292_v18  ;;  %565 = vmatpush3.msra.mxu0 %v244_v19  ;;  %v274_v28 = vld [vmem:[%s763_s26 + $0x148] sm:$0xff]  ;;  %v273_v32 = vld [vmem:[%s763_s26 + $0x140] sm:$0xff]  ;;  %v272_v36 = vld [vmem:[%s763_s26 + $0x138] sm:$0xff] }
  0x23   : > { %600 = vmatpush3.msra.mxu1 %v276_v20  ;;  %566 = vmatprep.subr.mxu0 %v259_v21  ;;  %v255_v37 = vld [vmem:[%s763_s26 + $0xb0] sm:$0xff]  ;;  %v254_v41 = vld [vmem:[%s763_s26 + $0xa8] sm:$0xff]  ;;  %v253_v45 = vld [vmem:[%s763_s26 + $0xa0] sm:$0xff] }
  0x24   : > { %601 = vmatprep.subr.mxu1 %v291_v22  ;;  %567 = vmatpush3.msra.mxu0 %v243_v23  ;;  %v287_v38 = vld [vmem:[%s763_s26 + $0x1b0] sm:$0xff]  ;;  %v286_v42 = vld [vmem:[%s763_s26 + $0x1a8] sm:$0xff]  ;;  %v285_v46 = vld [vmem:[%s763_s26 + $0x1a0] sm:$0xff] }
  0x25   : > { %602 = vmatpush3.msra.mxu1 %v275_v24  ;;  %568 = vmatprep.subr.mxu0 %v258_v25  ;;  %v239_v39 = vld [vmem:[%s763_s26 + $0x30] sm:$0xff]  ;;  %v238_v43 = vld [vmem:[%s763_s26 + $0x28] sm:$0xff]  ;;  %v237_v47 = vld [vmem:[%s763_s26 + $0x20] sm:$0xff] }
  0x26   : > { %603 = vmatprep.subr.mxu1 %v290_v26  ;;  %569 = vmatpush3.msra.mxu0 %v242_v27  ;;  %v271_v40 = vld [vmem:[%s763_s26 + $0x130] sm:$0xff]  ;;  %v270_v44 = vld [vmem:[%s763_s26 + $0x128] sm:$0xff]  ;;  %v269_v48 = vld [vmem:[%s763_s26 + $0x120] sm:$0xff] }
  0x27   : > { %604 = vmatpush3.msra.mxu1 %v274_v28  ;;  %570 = vmatprep.subr.mxu0 %v257_v29  ;;  %v252_v49 = vld [vmem:[%s763_s26 + $0x98] sm:$0xff]  ;;  %v251_v53 = vld [vmem:[%s763_s26 + $0x90] sm:$0xff]  ;;  %v250_v57 = vld [vmem:[%s763_s26 + $0x88] sm:$0xff] }
  0x28   : > { %605 = vmatprep.subr.mxu1 %v289_v30  ;;  %571 = vmatpush3.msra.mxu0 %v241_v31  ;;  %v284_v50 = vld [vmem:[%s763_s26 + $0x198] sm:$0xff]  ;;  %v283_v54 = vld [vmem:[%s763_s26 + $0x190] sm:$0xff]  ;;  %v282_v58 = vld [vmem:[%s763_s26 + $0x188] sm:$0xff] }
  0x29   : > { %606 = vmatpush3.msra.mxu1 %v273_v32  ;;  %572 = vmatprep.subr.mxu0 %v256_v33  ;;  %v236_v51 = vld [vmem:[%s763_s26 + $0x18] sm:$0xff]  ;;  %v235_v55 = vld [vmem:[%s763_s26 + $0x10] sm:$0xff]  ;;  %v234_v59 = vld [vmem:[%s763_s26 + $0x8] sm:$0xff] }
  0x2a   : > { %607 = vmatprep.subr.mxu1 %v288_v34  ;;  %573 = vmatpush3.msra.mxu0 %v240_v35  ;;  %v268_v52 = vld [vmem:[%s763_s26 + $0x118] sm:$0xff]  ;;  %v267_v56 = vld [vmem:[%s763_s26 + $0x110] sm:$0xff]  ;;  %v266_v60 = vld [vmem:[%s763_s26 + $0x108] sm:$0xff] }
  0x2b   : > { %608 = vmatpush3.msra.mxu1 %v272_v36  ;;  %574 = vmatprep.subr.mxu0 %v255_v37  ;;  %v249_v61 = vld [vmem:[%s763_s26 + $0x80] sm:$0xff]  ;;  %v230_v0 = vld [vmem:[%s758_s22 + $0x8] sm:$0xff]  ;;  %v232_v2 = vld [vmem:[%s758_s22 + $0x18] sm:$0xff] }
  0x2c   : > { %609 = vmatprep.subr.mxu1 %v287_v38  ;;  %575 = vmatpush3.msra.mxu0 %v239_v39  ;;  %v281_v62 = vld [vmem:[%s763_s26 + $0x180] sm:$0xff]  ;;  %v231_v4 = vld [vmem:[%s758_s22 + $0x10] sm:$0xff] }
  0x2d   : > { %610 = vmatpush3.msra.mxu1 %v271_v40  ;;  %576 = vmatprep.subr.mxu0 %v254_v41  ;;  %v233_v63 = vld [vmem:[%s763_s26] sm:$0xff] }
  0x2e   : > { %611 = vmatprep.subr.mxu1 %v286_v42  ;;  %577 = vmatpush3.msra.mxu0 %v238_v43  ;;  %v265_v1 = vld [vmem:[%s763_s26 + $0x100] sm:$0xff] }
  0x2f   : > { %612 = vmatpush3.msra.mxu1 %v270_v44  ;;  %578 = vmatprep.subr.mxu0 %v253_v45  ;;  %v229_v3 = vld [vmem:[%s758_s22] sm:$0xff] }
  0x30   : > { %613 = vmatprep.subr.mxu1 %v285_v46  ;;  %579 = vmatpush3.msra.mxu0 %v237_v47  ;;  %v228_v11 = vld [vmem:[#allocation2] sm:$0xff] }
  0x31   : > { %614 = vmatpush3.msra.mxu1 %v269_v48  ;;  %580 = vmatprep.subr.mxu0 %v252_v49 }
  0x32   : > { %615 = vmatprep.subr.mxu1 %v284_v50  ;;  %581 = vmatpush3.msra.mxu0 %v236_v51 }
  0x33   : > { %616 = vmatpush3.msra.mxu1 %v268_v52  ;;  %582 = vmatprep.subr.mxu0 %v251_v53 }
  0x34   : > { %617 = vmatprep.subr.mxu1 %v283_v54  ;;  %583 = vmatpush3.msra.mxu0 %v235_v55 }
  0x35   : > { %618 = vmatpush3.msra.mxu1 %v267_v56  ;;  %584 = vmatprep.subr.mxu0 %v250_v57 }
  0x36   : > { %619 = vmatprep.subr.mxu1 %v282_v58  ;;  %585 = vmatpush3.msra.mxu0 %v234_v59 }
  0x37   : > { %620 = vmatpush3.msra.mxu1 %v266_v60  ;;  %586 = vmatprep.subr.mxu0 %v249_v61 }
  0x38   : > { %621 = vmatprep.subr.mxu1 %v281_v62  ;;  %587 = vmatpush3.msra.mxu0 %v233_v63 }
  0x39   : > { %361 = vmatprep.mubr.f32.mxu0 %v230_v0  ;;  %622 = vmatpush3.msra.mxu1 %v265_v1 }
  0x3a   : > { %431 = vmatprep.mubr.f32.mxu1 %v232_v2  ;;  %362 = vmatmul.mubr.f32.vlgmr.msra.gmra.mxu0 %v229_v3 }
  0x3b   : > { %432 = vmatmul.mubr.f32.vlgmr.msra.gmra.mxu1 %v231_v4 }
  0xfa   : > { %v588_v5 = vpop.f32.mrf.mxu0 }
  0xfb   : > { %v623_v6 = vpop.f32.mrf.mxu1 }
  0xfc   : > { %v589_v7 = vpop.f32.mrf.mxu0 }
  0xfd   : > { %v624_v8 = vpop.f32.mrf.mxu1  ;;  %v590_v9 = vadd.f32 %v589_v7, %v588_v5 }
  0xfe   : > { %v625_v10 = vadd.f32 %v624_v8, %v623_v6 }
 0x100   : > { %v434_v12 = vadd.f32 %v625_v10, %v590_v9  ;;  %442 = sbr.rel (%p550_p7) target bundleno = 273 (0x111), region = 40 }
 0x102   : > { %v437_v13 = vadd.f32 %v434_v12, %v228_v11 }
 0x104   : > { %438 = vst [vmem:[#allocation2] sm:$0xff] %v437_v13 }
 0x105   : > { %v551_v15 = vld [vmem:[%s866_s2] ss:$0 sm:$0xff] }
 0x10b   : > { %v443_v14 = vld [vmem:[#allocation2] sm:$0xff] }
 0x10c   : > { %v451_v16 = vadd.f32 %v551_v15, %v443_v14 }
 0x10e   : > { %v452_v17 = vmax.f32 %v451_v16, 0.0 }
 0x110   : > { %453 = vst [vmem:[#allocation3] sm:$0xff] %v452_v17 }
 0x111 PF: > { %p840_p8 = scmp.eq.s32.totalorder %s540_s15, 3  ;;  %s711_s30 = smov [#allocation3]  }
 0x112   : > { %s463_s4 = sshll.u32 %s711_s30, 4  ;;  %s464_s4 = int_to_ptr.vmem [resolvable:$true] %s463_s4 }
 0x113   : > { %s658_s5 = scalar_lea.vmem %s464_s4, 128  ;;  %p665_p12 = scmp.lt.s32.totalorder %s464_s4, %s464_s4 }
 0x114   : > { %p659_p9 = scmp.ne.s32.totalorder %s464_s4, %s658_s5  ;;  %p666_p13 = scmp.lt.s32.totalorder %s658_s5, %s658_s5 }
 0x116   : > { %p660_p10 = pnand %p659_p9, %p840_p8  ;;  %p667_p0 = por %p666_p13, %p665_p12 }
 0x118   : > { %p661_p11 = pneg %p660_p10 }
 0x11a   : > { %p668_p1 = pnand %p667_p0, %p661_p11 }
 0x11c   : > { %671 = shalt.err (!%p668_p1)
}
 0x11d   : > { %627 = dma.vmem_to_hbm [thread:$0]  (%p840_p8), %s464_s4, 128, %s867_s3, [#allocation4]  }
 0x11e   : > { %695 = dma.done.wait (%p840_p8), [#allocation4], 128  }
 0x11f   : > { %697 = vsyncadd (%p840_p8), [#allocation4], 4294967168 }
 0x120 PF: > { %s14_s14 = sadd.s32 1, %s708_s14   ;;  %s869_s12 = smov %s704_s13 }
 0x121   : > { %p11_p2 = scmp.ge.s32.totalorder %s14_s14, 6   ;;  %s870_s13 = smov %s872_s16 }
 0x123   :  { %13 = sbr.rel (!%p11_p2) target bundleno = 2 (0x2), region = 74 }
 0x128   :  { %476 = vsyncpa [#allocation4], 1 }
 0x129   :  { %478 = vsyncpa [#allocation4 + $0x1], 1 }

// kernel: roi_xconv1fc_head_forward.2
= control target key start
LH: loop header
LB: loop body
LE: loop exit
PB: predicated region body
PF: predicated region fallthrough
CT: control target
= control target key end

     0   :  { %10 = vsyncpa [#allocation4], 0  ;;  %s22767_s0 = inlined_call_operand.vmem [shape: f32[8,8,8,4], index: 0, kind: input, shape index: {}]   ;;  %s22768_s1 = inlined_call_operand.hbm [shape: f32[3,3,4,32], index: 1, kind: input, shape index: {}]   ;;  %s22769_s2 = inlined_call_operand.hbm [shape: f32[3,3,32,32], index: 2, kind: input, shape index: {}]   ;;  %s22770_s3 = inlined_call_operand.hbm [shape: f32[1,32], index: 3, kind: input, shape index: {}]   ;;  %s22771_s4 = inlined_call_operand.hbm [shape: f32[1,32], index: 4, kind: input, shape index: {}]   ;;  %s22772_s5 = inlined_call_operand.vmem [shape: f32[8,8,8,32], index: 5, kind: output, shape index: {}]  }
   0x1   :  { %11 = vsyncpa [#allocation6], 0 }
   0x2   :  { %12 = vsyncpa [#allocation9], 0  ;;  %s17581_s18 = smov [#allocation5]  }
   0x3   :  { %s32_s19 = sshll.u32 %s17581_s18, 4  ;;  %s33_s19 = int_to_ptr.vmem [resolvable:$true] %s32_s19 }
   0x4   :  { %s17503_s20 = scalar_lea.vmem %s33_s19, 4608  ;;  %p17508_p1 = scmp.lt.s32.totalorder %s33_s19, %s33_s19 }
   0x5   :  { %p17504_p0 = scmp.ne.s32.totalorder %s33_s19, %s17503_s20  ;;  %p17509_p2 = scmp.lt.s32.totalorder %s17503_s20, %s17503_s20 }
   0x7   :  { %p17510_p3 = por %p17509_p2, %p17508_p1 }
   0x9   :  { %p17511_p4 = pnand %p17510_p3, %p17504_p0 }
   0xb   :  { %17514 = shalt.err (!%p17511_p4)
}
   0xc   :  { %s17582_s21 = smov 128   ;;  %s17583_s22 = smov 8  }
   0xd   :  { %38 = dma.hbm_to_vmem [thread:$0]  %s22769_s2, 4608, %s33_s19, [#allocation6], %s17582_s21, %s17582_s21, %s17583_s22  }
   0xe   :  { %s17584_s25 = smov [#allocation3]  }
   0xf   :  { %s20_s26 = sshll.u32 %s17584_s25, 4  ;;  %s21_s26 = int_to_ptr.vmem [resolvable:$true] %s20_s26 }
  0x10   :  { %s17523_s27 = scalar_lea.vmem %s21_s26, 576  ;;  %p17528_p6 = scmp.lt.s32.totalorder %s21_s26, %s21_s26 }
  0x11   :  { %p17524_p5 = scmp.ne.s32.totalorder %s21_s26, %s17523_s27  ;;  %p17529_p7 = scmp.lt.s32.totalorder %s17523_s27, %s17523_s27 }
  0x13   :  { %p17530_p8 = por %p17529_p7, %p17528_p6 }
  0x15   :  { %p17531_p9 = pnand %p17530_p8, %p17524_p5 }
  0x17   :  { %17534 = shalt.err (!%p17531_p9)
}
  0x18   :  { %s17585_s28 = smov 64   ;;  %s17586_s29 = smov 4  }
  0x19   :  { %26 = dma.hbm_to_vmem [thread:$0]  %s22768_s1, 576, %s21_s26, [#allocation4], %s17585_s28, %s17585_s28, %s17586_s29  }
  0x1a   :  { %s17587_s7 = smov [#allocation7]   ;;  %s17588_s9 = smov [#allocation8]  }
  0x1b   :  { %s45_s8 = sshll.u32 %s17587_s7, 4  ;;  %s55_s2 = sshll.u32 %s17588_s9, 4  ;;  %s46_s8 = int_to_ptr.vmem [resolvable:$true] %s45_s8  ;;  %s56_s2 = int_to_ptr.vmem [resolvable:$true] %s55_s2 }
  0x1c   :  { %s17543_s10 = scalar_lea.vmem %s46_s8, 16  ;;  %s17547_s11 = scalar_lea.vmem %s46_s8, 32 }
  0x1d   :  { %p17544_p10 = scmp.ne.s32.totalorder %s46_s8, %s17543_s10  ;;  %p17548_p11 = scmp.lt.s32.totalorder %s46_s8, %s46_s8 }
  0x1e   :  { %p17549_p12 = scmp.lt.s32.totalorder %s17547_s11, %s17543_s10 }
  0x20   :  { %p17550_p13 = por %p17549_p12, %p17548_p11 }
  0x22   :  { %p17551_p0 = pnand %p17550_p13, %p17544_p10 }
  0x24   :  { %17554 = shalt.err (!%p17551_p0)
}
  0x25   :  { %48 = dma.hbm_to_vmem [thread:$0]  %s22770_s3, 16, %s46_s8, [#allocation6]  }
  0x26   :  { %s17563_s14 = scalar_lea.vmem %s56_s2, 16  ;;  %s17567_s1 = scalar_lea.vmem %s56_s2, 32 }
  0x27   :  { %p17564_p1 = scmp.ne.s32.totalorder %s56_s2, %s17563_s14  ;;  %p17568_p2 = scmp.lt.s32.totalorder %s56_s2, %s56_s2 }
  0x28   :  { %p17569_p3 = scmp.lt.s32.totalorder %s17567_s1, %s17563_s14 }
  0x2a   :  { %p17570_p4 = por %p17569_p3, %p17568_p2 }
  0x2c   :  { %p17571_p5 = pnand %p17570_p4, %p17564_p1 }
  0x2e   :  { %17574 = shalt.err (!%p17571_p5)
}
  0x2f   :  { %58 = dma.hbm_to_vmem [thread:$0]  %s22771_s4, 16, %s56_s2, [#allocation9]  }
  0x30   :  { %17575 = dma.done.wait [#allocation4], 576  }
  0x31   :  { %17576 = vsyncadd [#allocation4], 4294966720 }
  0x32   :  { %17577 = dma.done.wait [#allocation6], 4624  }
  0x33   :  { %17578 = vsyncadd [#allocation6], 4294962672 }
  0x34   :  { %17579 = dma.done.wait [#allocation9], 16  }
  0x35   :  { %17580 = vsyncadd [#allocation9], 4294967280  ;;  %vm71_vm0 = vcmask 261120   ;;  %vm73_vm1 = vcmask 254976   ;;  %v17589_v0 = vmov 0.0   ;;  %vm686_vm2 = vcmask 1043456  }
  0x36   :  { %72 = vst.msk [vmem:[#allocation2] sm:$0xff] %vm71_vm0, %v17589_v0  ;;  %75 = vst.msk [vmem:[#allocation2 + $0x10] sm:$0xff] %vm71_vm0, %v17589_v0  ;;  %vm298_vm3 = vcmask 31744   ;;  %v493_v1 = vld [vmem:[#allocation3 + $0x4] sm:$0xf]  ;;  %v234_v7 = vld [vmem:[%s22767_s0 + $0x8] sm:$0xff] }
  0x37   :  { %74 = vst.msk [vmem:[#allocation2 + $0x8] sm:$0x3] %vm73_vm1, %v17589_v0  ;;  %76 = vst.msk [vmem:[#allocation2 + $0x18] sm:$0x3] %vm73_vm1, %v17589_v0  ;;  %v427_v2 = vld [vmem:[#allocation3] sm:$0xf]  ;;  %15652 = vmatprep.subr.msk.mxu0 %vm686_vm2, %v493_v1 }
  0x38   :  { %77 = vst.msk [vmem:[#allocation2 + $0x20] sm:$0xff] %vm71_vm0, %v17589_v0  ;;  %79 = vst.msk [vmem:[#allocation2 + $0x30] sm:$0xff] %vm71_vm0, %v17589_v0  ;;  %v1720_v3 = vld [vmem:[#allocation3 + $0x8] sm:$0xf]  ;;  %15750 = vmatprep.subr.msk.mxu1 %vm686_vm2, %v427_v2  ;;  %v233_v6 = vld [vmem:[%s22767_s0] sm:$0xff]  ;;  %15653 = vmatpush3.msk.msra.mxu0 %vm686_vm2, %v493_v1 }
  0x39   :  { %78 = vst.msk [vmem:[#allocation2 + $0x28] sm:$0x3] %vm73_vm1, %v17589_v0  ;;  %80 = vst.msk [vmem:[#allocation2 + $0x38] sm:$0x3] %vm73_vm1, %v17589_v0  ;;  %v235_v8 = vld [vmem:[%s22767_s0 + $0x10] sm:$0xff]  ;;  %v236_v9 = vld [vmem:[%s22767_s0 + $0x18] sm:$0xff]  ;;  %15751 = vmatpush3.msk.msra.mxu1 %vm686_vm2, %v427_v2  ;;  %15848 = vmatprep.subr.msk.mxu0 %vm686_vm2, %v1720_v3 }
  0x3a   :  { %81 = vst.msk [vmem:[#allocation2 + $0x40] sm:$0xff] %vm71_vm0, %v17589_v0  ;;  %83 = vst.msk [vmem:[#allocation2 + $0x50] sm:$0xff] %vm71_vm0, %v17589_v0  ;;  %v237_v10 = vld [vmem:[%s22767_s0 + $0x20] sm:$0xff]  ;;  %v238_v11 = vld [vmem:[%s22767_s0 + $0x28] sm:$0xff] }
  0x3b   :  { %82 = vst.msk [vmem:[#allocation2 + $0x48] sm:$0x3] %vm73_vm1, %v17589_v0  ;;  %84 = vst.msk [vmem:[#allocation2 + $0x58] sm:$0x3] %vm73_vm1, %v17589_v0  ;;  %v239_v12 = vld [vmem:[%s22767_s0 + $0x30] sm:$0xff]  ;;  %v241_v13 = vld [vmem:[%s22767_s0 + $0x40] sm:$0xff] }
  0x3c   :  { %85 = vst.msk [vmem:[#allocation2 + $0x60] sm:$0xff] %vm71_vm0, %v17589_v0  ;;  %87 = vst.msk [vmem:[#allocation2 + $0x70] sm:$0xff] %vm71_vm0, %v17589_v0  ;;  %v242_v14 = vld [vmem:[%s22767_s0 + $0x48] sm:$0xff]  ;;  %v243_v15 = vld [vmem:[%s22767_s0 + $0x50] sm:$0xff] }
  0x3d   :  { %86 = vst.msk [vmem:[#allocation2 + $0x68] sm:$0x3] %vm73_vm1, %v17589_v0  ;;  %88 = vst.msk [vmem:[#allocation2 + $0x78] sm:$0x3] %vm73_vm1, %v17589_v0  ;;  %v363_v5 = vld [vmem:[#allocation2] sm:$0xff]  ;;  %v244_v16 = vld [vmem:[%s22767_s0 + $0x58] sm:$0xff] }
  0x3e   :  { %89 = vst.msk [vmem:[#allocation2 + $0x80] sm:$0xff] %vm71_vm0, %v17589_v0  ;;  %91 = vst.msk [vmem:[#allocation2 + $0x90] sm:$0xff] %vm71_vm0, %v17589_v0  ;;  %v428_v4 = vld [vmem:[#allocation2 + $0x1] sm:$0xff]  ;;  %15752 = vmatprep.mubr.msk.f32.mxu1 %vm298_vm3, %v363_v5  ;;  %v247_v19 = vld [vmem:[%s22767_s0 + $0x70] sm:$0xff] }
  0x3f   :  { %90 = vst.msk [vmem:[#allocation2 + $0x88] sm:$0x3] %vm73_vm1, %v17589_v0  ;;  %92 = vst.msk [vmem:[#allocation2 + $0x98] sm:$0x3] %vm73_vm1, %v17589_v0  ;;  %15654 = vmatprep.mubr.msk.f32.mxu0 %vm298_vm3, %v428_v4  ;;  %v245_v17 = vld [vmem:[%s22767_s0 + $0x60] sm:$0xff]  ;;  %v246_v18 = vld [vmem:[%s22767_s0 + $0x68] sm:$0xff] }
  0x40   :  { %93 = vst.msk [vmem:[#allocation2 + $0xa0] sm:$0xff] %vm71_vm0, %v17589_v0  ;;  %95 = vst.msk [vmem:[#allocation2 + $0xb0] sm:$0xff] %vm71_vm0, %v17589_v0  ;;  %v249_v20 = vld [vmem:[%s22767_s0 + $0x80] sm:$0xff]  ;;  %v250_v21 = vld [vmem:[%s22767_s0 + $0x88] sm:$0xff] }
  0x41   :  { %94 = vst.msk [vmem:[#allocation2 + $0xa8] sm:$0x3] %vm73_vm1, %v17589_v0  ;;  %96 = vst.msk [vmem:[#allocation2 + $0xb8] sm:$0x3] %vm73_vm1, %v17589_v0  ;;  %v251_v22 = vld [vmem:[%s22767_s0 + $0x90] sm:$0xff]  ;;  %v252_v23 = vld [vmem:[%s22767_s0 + $0x98] sm:$0xff] }
  0x42   :  { %97 = vst.msk [vmem:[#allocation2 + $0xc0] sm:$0xff] %vm71_vm0, %v17589_v0  ;;  %99 = vst.msk [vmem:[#allocation2 + $0xd0] sm:$0xff] %vm71_vm0, %v17589_v0  ;;  %v253_v26 = vld [vmem:[%s22767_s0 + $0xa0] sm:$0xff]  ;;  %v254_v44 = vld [vmem:[%s22767_s0 + $0xa8] sm:$0xff] }
  0x43   :  { %98 = vst.msk [vmem:[#allocation2 + $0xc8] sm:$0x3] %vm73_vm1, %v17589_v0  ;;  %100 = vst.msk [vmem:[#allocation2 + $0xd8] sm:$0x3] %vm73_vm1, %v17589_v0  ;;  %v255_v45 = vld [vmem:[%s22767_s0 + $0xb0] sm:$0xff]  ;;  %v257_v47 = vld [vmem:[%s22767_s0 + $0xc0] sm:$0xff] }
  0x44   :  { %101 = vst.msk [vmem:[#allocation2 + $0xe0] sm:$0xff] %vm71_vm0, %v17589_v0  ;;  %103 = vst.msk [vmem:[#allocation2 + $0xf0] sm:$0xff] %vm71_vm0, %v17589_v0  ;;  %v258_v48 = vld [vmem:[%s22767_s0 + $0xc8] sm:$0xff]  ;;  %v259_v49 = vld [vmem:[%s22767_s0 + $0xd0] sm:$0xff] }
  0x45   :  { %102 = vst.msk [vmem:[#allocation2 + $0xe8] sm:$0x3] %vm73_vm1, %v17589_v0  ;;  %104 = vst.msk [vmem:[#allocation2 + $0xf8] sm:$0x3] %vm73_vm1, %v17589_v0  ;;  %v260_v50 = vld [vmem:[%s22767_s0 + $0xd8] sm:$0xff]  ;;  %v261_v51 = vld [vmem:[%s22767_s0 + $0xe0] sm:$0xff] }
  0x46   :  { %105 = vst.msk [vmem:[#allocation2 + $0x100] sm:$0xff] %vm71_vm0, %v17589_v0  ;;  %107 = vst.msk [vmem:[#allocation2 + $0x110] sm:$0xff] %vm71_vm0, %v17589_v0  ;;  %v262_v54 = vld [vmem:[%s22767_s0 + $0xe8] sm:$0xff]  ;;  %v263_v55 = vld [vmem:[%s22767_s0 + $0xf0] sm:$0xff] }
  0x47   :  { %106 = vst.msk [vmem:[#allocation2 + $0x108] sm:$0x3] %vm73_vm1, %v17589_v0  ;;  %108 = vst.msk [vmem:[#allocation2 + $0x118] sm:$0x3] %vm73_vm1, %v17589_v0  ;;  %v371_v40 = vld [vmem:[#allocation2 + $0xa0] sm:$0xff]  ;;  %v266_v58 = vld [vmem:[%s22767_s0 + $0x108] sm:$0xff] }
  0x48   :  { %109 = vst.msk [vmem:[#allocation2 + $0x120] sm:$0xff] %vm71_vm0, %v17589_v0  ;;  %111 = vst.msk [vmem:[#allocation2 + $0x130] sm:$0xff] %vm71_vm0, %v17589_v0  ;;  %v436_v39 = vld [vmem:[#allocation2 + $0xa1] sm:$0xff]  ;;  %v267_v59 = vld [vmem:[%s22767_s0 + $0x110] sm:$0xff] }
  0x49   :  { %110 = vst.msk [vmem:[#allocation2 + $0x128] sm:$0x3] %vm73_vm1, %v17589_v0  ;;  %112 = vst.msk [vmem:[#allocation2 + $0x138] sm:$0x3] %vm73_vm1, %v17589_v0  ;;  %v265_v57 = vld [vmem:[%s22767_s0 + $0x100] sm:$0xff]  ;;  %v268_v60 = vld [vmem:[%s22767_s0 + $0x118] sm:$0xff] }
  0x4a   :  { %113 = vst.msk [vmem:[#allocation2 + $0x140] sm:$0xff] %vm71_vm0, %v17589_v0  ;;  %115 = vst.msk [vmem:[#allocation2 + $0x150] sm:$0xff] %vm71_vm0, %v17589_v0  ;;  %v269_v61 = vld [vmem:[%s22767_s0 + $0x120] sm:$0xff]  ;;  %v270_v63 = vld [vmem:[%s22767_s0 + $0x128] sm:$0xff] }
  0x4b   :  { %114 = vst.msk [vmem:[#allocation2 + $0x148] sm:$0x3] %vm73_vm1, %v17589_v0  ;;  %116 = vst.msk [vmem:[#allocation2 + $0x158] sm:$0x3] %vm73_vm1, %v17589_v0  ;;  %v273_v1 = vld [vmem:[%s22767_s0 + $0x140] sm:$0xff]  ;;  %v274_v2 = vld [vmem:[%s22767_s0 + $0x148] sm:$0xff] }
  0x4c   :  { %117 = vst.msk [vmem:[#allocation2 + $0x160] sm:$0xff] %vm71_vm0, %v17589_v0  ;;  %119 = vst.msk [vmem:[#allocation2 + $0x170] sm:$0xff] %vm71_vm0, %v17589_v0 }
  0x4d   :  { %118 = vst.msk [vmem:[#allocation2 + $0x168] sm:$0x3] %vm73_vm1, %v17589_v0  ;;  %120 = vst.msk [vmem:[#allocation2 + $0x178] sm:$0x3] %vm73_vm1, %v17589_v0 }
  0x4e   :  { %121 = vst.msk [vmem:[#allocation2 + $0x180] sm:$0xff] %vm71_vm0, %v17589_v0  ;;  %123 = vst.msk [vmem:[#allocation2 + $0x190] sm:$0xff] %vm71_vm0, %v17589_v0 }
  0x4f   :  { %122 = vst.msk [vmem:[#allocation2 + $0x188] sm:$0x3] %vm73_vm1, %v17589_v0  ;;  %124 = vst.msk [vmem:[#allocation2 + $0x198] sm:$0x3] %vm73_vm1, %v17589_v0 }
  0x50   :  { %125 = vst.msk [vmem:[#allocation2 + $0x1a0] sm:$0xff] %vm71_vm0, %v17589_v0  ;;  %127 = vst.msk [vmem:[#allocation2 + $0x1b0] sm:$0xff] %vm71_vm0, %v17589_v0 }
  0x51   :  { %126 = vst.msk [vmem:[#allocation2 + $0x1a8] sm:$0x3] %vm73_vm1, %v17589_v0  ;;  %128 = vst.msk [vmem:[#allocation2 + $0x1b8] sm:$0x3] %vm73_vm1, %v17589_v0 }
  0x52   :  { %129 = vst.msk [vmem:[#allocation2 + $0x1c0] sm:$0xff] %vm71_vm0, %v17589_v0  ;;  %131 = vst.msk [vmem:[#allocation2 + $0x1d0] sm:$0xff] %vm71_vm0, %v17589_v0 }
  0x53   :  { %130 = vst.msk [vmem:[#allocation2 + $0x1c8] sm:$0x3] %vm73_vm1, %v17589_v0  ;;  %132 = vst.msk [vmem:[#allocation2 + $0x1d8] sm:$0x3] %vm73_vm1, %v17589_v0 }
  0x54   :  { %133 = vst.msk [vmem:[#allocation2 + $0x1e0] sm:$0xff] %vm71_vm0, %v17589_v0  ;;  %135 = vst.msk [vmem:[#allocation2 + $0x1f0] sm:$0xff] %vm71_vm0, %v17589_v0 }
  0x55   :  { %134 = vst.msk [vmem:[#allocation2 + $0x1e8] sm:$0x3] %vm73_vm1, %v17589_v0  ;;  %136 = vst.msk [vmem:[#allocation2 + $0x1f8] sm:$0x3] %vm73_vm1, %v17589_v0 }
  0x56   :  { %137 = vst.msk [vmem:[#allocation2 + $0x200] sm:$0xff] %vm71_vm0, %v17589_v0  ;;  %139 = vst.msk [vmem:[#allocation2 + $0x210] sm:$0xff] %vm71_vm0, %v17589_v0 }
  0x57   :  { %138 = vst.msk [vmem:[#allocation2 + $0x208] sm:$0x3] %vm73_vm1, %v17589_v0  ;;  %140 = vst.msk [vmem:[#allocation2 + $0x218] sm:$0x3] %vm73_vm1, %v17589_v0 }
  0x58   :  { %141 = vst.msk [vmem:[#allocation2 + $0x220] sm:$0xff] %vm71_vm0, %v17589_v0  ;;  %143 = vst.msk [vmem:[#allocation2 + $0x230] sm:$0xff] %vm71_vm0, %v17589_v0 }
  0x59   :  { %142 = vst.msk [vmem:[#allocation2 + $0x228] sm:$0x3] %vm73_vm1, %v17589_v0  ;;  %144 = vst.msk [vmem:[#allocation2 + $0x238] sm:$0x3] %vm73_vm1, %v17589_v0 }
  0x5a   :  { %145 = vst.msk [vmem:[#allocation2 + $0x240] sm:$0xff] %vm71_vm0, %v17589_v0  ;;  %147 = vst.msk [vmem:[#allocation2 + $0x250] sm:$0xff] %vm71_vm0, %v17589_v0 }
  0x5b   :  { %146 = vst.msk [vmem:[#allocation2 + $0x248] sm:$0x3] %vm73_vm1, %v17589_v0  ;;  %148 = vst.msk [vmem:[#allocation2 + $0x258] sm:$0x3] %vm73_vm1, %v17589_v0 }
  0x5c   :  { %149 = vst.msk [vmem:[#allocation2 + $0x260] sm:$0xff] %vm71_vm0, %v17589_v0  ;;  %151 = vst.msk [vmem:[#allocation2 + $0x270] sm:$0xff] %vm71_vm0, %v17589_v0 }
  0x5d   :  { %150 = vst.msk [vmem:[#allocation2 + $0x268] sm:$0x3] %vm73_vm1, %v17589_v0  ;;  %152 = vst.msk [vmem:[#allocation2 + $0x278] sm:$0x3] %vm73_vm1, %v17589_v0 }
  0x5e   :  { %153 = vst.msk [vmem:[#allocation2 + $0x280] sm:$0xff] %vm71_vm0, %v17589_v0  ;;  %155 = vst.msk [vmem:[#allocation2 + $0x290] sm:$0xff] %vm71_vm0, %v17589_v0 }
  0x5f   :  { %154 = vst.msk [vmem:[#allocation2 + $0x288] sm:$0x3] %vm73_vm1, %v17589_v0  ;;  %156 = vst.msk [vmem:[#allocation2 + $0x298] sm:$0x3] %vm73_vm1, %v17589_v0 }
  0x60   :  { %157 = vst.msk [vmem:[#allocation2 + $0x2a0] sm:$0xff] %vm71_vm0, %v17589_v0  ;;  %159 = vst.msk [vmem:[#allocation2 + $0x2b0] sm:$0xff] %vm71_vm0, %v17589_v0 }
  0x61   :  { %158 = vst.msk [vmem:[#allocation2 + $0x2a8] sm:$0x3] %vm73_vm1, %v17589_v0  ;;  %160 = vst.msk [vmem:[#allocation2 + $0x2b8] sm:$0x3] %vm73_vm1, %v17589_v0 }
  0x62   :  { %161 = vst.msk [vmem:[#allocation2 + $0x2c0] sm:$0xff] %vm71_vm0, %v17589_v0  ;;  %163 = vst.msk [vmem:[#allocation2 + $0x2d0] sm:$0xff] %vm71_vm0, %v17589_v0 }
  0x63   :  { %162 = vst.msk [vmem:[#allocation2 + $0x2c8] sm:$0x3] %vm73_vm1, %v17589_v0  ;;  %164 = vst.msk [vmem:[#allocation2 + $0x2d8] sm:$0x3] %vm73_vm1, %v17589_v0 }
  0x64   :  { %165 = vst.msk [vmem:[#allocation2 + $0x2e0] sm:$0xff] %vm71_vm0, %v17589_v0  ;;  %167 = vst.msk [vmem:[#allocation2 + $0x2f0] sm:$0xff] %vm71_vm0, %v17589_v0 }
  0x65   :  { %166 = vst.msk [vmem:[#allocation2 + $0x2e8] sm:$0x3] %vm73_vm1, %v17589_v0  ;;  %168 = vst.msk [vmem:[#allocation2 + $0x2f8] sm:$0x3] %vm73_vm1, %v17589_v0 }
  0x66   :  { %169 = vst.msk [vmem:[#allocation2 + $0x300] sm:$0xff] %vm71_vm0, %v17589_v0  ;;  %171 = vst.msk [vmem:[#allocation2 + $0x310] sm:$0xff] %vm71_vm0, %v17589_v0 }
  0x67   :  { %170 = vst.msk [vmem:[#allocation2 + $0x308] sm:$0x3] %vm73_vm1, %v17589_v0  ;;  %172 = vst.msk [vmem:[#allocation2 + $0x318] sm:$0x3] %vm73_vm1, %v17589_v0 }
  0x68   :  { %173 = vst.msk [vmem:[#allocation2 + $0x320] sm:$0xff] %vm71_vm0, %v17589_v0  ;;  %175 = vst.msk [vmem:[#allocation2 + $0x330] sm:$0xff] %vm71_vm0, %v17589_v0 }
  0x69   :  { %174 = vst.msk [vmem:[#allocation2 + $0x328] sm:$0x3] %vm73_vm1, %v17589_v0  ;;  %176 = vst.msk [vmem:[#allocation2 + $0x338] sm:$0x3] %vm73_vm1, %v17589_v0 }
  0x6a   :  { %177 = vst.msk [vmem:[#allocation2 + $0x340] sm:$0xff] %vm71_vm0, %v17589_v0  ;;  %179 = vst.msk [vmem:[#allocation2 + $0x350] sm:$0xff] %vm71_vm0, %v17589_v0 }
  0x6b   :  { %178 = vst.msk [vmem:[#allocation2 + $0x348] sm:$0x3] %vm73_vm1, %v17589_v0  ;;  %180 = vst.msk [vmem:[#allocation2 + $0x358] sm:$0x3] %vm73_vm1, %v17589_v0 }
  0x6c   :  { %181 = vst.msk [vmem:[#allocation2 + $0x360] sm:$0xff] %vm71_vm0, %v17589_v0  ;;  %183 = vst.msk [vmem:[#allocation2 + $0x370] sm:$0xff] %vm71_vm0, %v17589_v0 }
  0x6d   :  { %182 = vst.msk [vmem:[#allocation2 + $0x368] sm:$0x3] %vm73_vm1, %v17589_v0  ;;  %184 = vst.msk [vmem:[#allocation2 + $0x378] sm:$0x3] %vm73_vm1, %v17589_v0 }
  0x6e   :  { %185 = vst.msk [vmem:[#allocation2 + $0x380] sm:$0xff] %vm71_vm0, %v17589_v0  ;;  %187 = vst.msk [vmem:[#allocation2 + $0x390] sm:$0xff] %vm71_vm0, %v17589_v0 }
  0x6f   :  { %186 = vst.msk [vmem:[#allocation2 + $0x388] sm:$0x3] %vm73_vm1, %v17589_v0  ;;  %188 = vst.msk [vmem:[#allocation2 + $0x398] sm:$0x3] %vm73_vm1, %v17589_v0 }
  0x70   :  { %189 = vst.msk [vmem:[#allocation2 + $0x3a0] sm:$0xff] %vm71_vm0, %v17589_v0  ;;  %191 = vst.msk [vmem:[#allocation2 + $0x3b0] sm:$0xff] %vm71_vm0, %v17589_v0 }
  0x71   :  { %190 = vst.msk [vmem:[#allocation2 + $0x3a8] sm:$0x3] %vm73_vm1, %v17589_v0  ;;  %192 = vst.msk [vmem:[#allocation2 + $0x3b8] sm:$0x3] %vm73_vm1, %v17589_v0 }
  0x72   :  { %193 = vst.msk [vmem:[#allocation2 + $0x3c0] sm:$0xff] %vm71_vm0, %v17589_v0  ;;  %195 = vst.msk [vmem:[#allocation2 + $0x3d0] sm:$0xff] %vm71_vm0, %v17589_v0 }
  0x73   :  { %194 = vst.msk [vmem:[#allocation2 + $0x3c8] sm:$0x3] %vm73_vm1, %v17589_v0  ;;  %196 = vst.msk [vmem:[#allocation2 + $0x3d8] sm:$0x3] %vm73_vm1, %v17589_v0 }
  0x74   :  { %197 = vst.msk [vmem:[#allocation2 + $0x3e0] sm:$0xff] %vm71_vm0, %v17589_v0  ;;  %199 = vst.msk [vmem:[#allocation2 + $0x3f0] sm:$0xff] %vm71_vm0, %v17589_v0 }
  0x75   :  { %198 = vst.msk [vmem:[#allocation2 + $0x3e8] sm:$0x3] %vm73_vm1, %v17589_v0  ;;  %200 = vst.msk [vmem:[#allocation2 + $0x3f8] sm:$0x3] %vm73_vm1, %v17589_v0 }
  0x76   :  { %201 = vst.msk [vmem:[#allocation2 + $0x400] sm:$0xff] %vm71_vm0, %v17589_v0  ;;  %203 = vst.msk [vmem:[#allocation2 + $0x410] sm:$0xff] %vm71_vm0, %v17589_v0 }
  0x77   :  { %202 = vst.msk [vmem:[#allocation2 + $0x408] sm:$0x3] %vm73_vm1, %v17589_v0  ;;  %204 = vst.msk [vmem:[#allocation2 + $0x418] sm:$0x3] %vm73_vm1, %v17589_v0 }
  0x78   :  { %205 = vst.msk [vmem:[#allocation2 + $0x420] sm:$0xff] %vm71_vm0, %v17589_v0  ;;  %207 = vst.msk [vmem:[#allocation2 + $0x430] sm:$0xff] %vm71_vm0, %v17589_v0 }
  0x79   :  { %206 = vst.msk [vmem:[#allocation2 + $0x428] sm:$0x3] %vm73_vm1, %v17589_v0  ;;  %208 = vst.msk [vmem:[#allocation2 + $0x438] sm:$0x3] %vm73_vm1, %v17589_v0 }
  0x7a   :  { %209 = vst.msk [vmem:[#allocation2 + $0x440] sm:$0xff] %vm71_vm0, %v17589_v0  ;;  %211 = vst.msk [vmem:[#allocation2 + $0x450] sm:$0xff] %vm71_vm0, %v17589_v0 }
  0x7b   :  { %210 = vst.msk [vmem:[#allocation2 + $0x448] sm:$0x3] %vm73_vm1, %v17589_v0  ;;  %212 = vst.msk [vmem:[#allocation2 + $0x458] sm:$0x3] %vm73_vm1, %v17589_v0 }
  0x7c   :  { %213 = vst.msk [vmem:[#allocation2 + $0x460] sm:$0xff] %vm71_vm0, %v17589_v0  ;;  %215 = vst.msk [vmem:[#allocation2 + $0x470] sm:$0xff] %vm71_vm0, %v17589_v0 }
  0x7d   :  { %214 = vst.msk [vmem:[#allocation2 + $0x468] sm:$0x3] %vm73_vm1, %v17589_v0  ;;  %216 = vst.msk [vmem:[#allocation2 + $0x478] sm:$0x3] %vm73_vm1, %v17589_v0 }
  0x7e   :  { %217 = vst.msk [vmem:[#allocation2 + $0x480] sm:$0xff] %vm71_vm0, %v17589_v0  ;;  %219 = vst.msk [vmem:[#allocation2 + $0x490] sm:$0xff] %vm71_vm0, %v17589_v0 }
  0x7f   :  { %218 = vst.msk [vmem:[#allocation2 + $0x488] sm:$0x3] %vm73_vm1, %v17589_v0  ;;  %220 = vst.msk [vmem:[#allocation2 + $0x498] sm:$0x3] %vm73_vm1, %v17589_v0 }
  0x80   :  { %221 = vst.msk [vmem:[#allocation2 + $0x4a0] sm:$0xff] %vm71_vm0, %v17589_v0  ;;  %223 = vst.msk [vmem:[#allocation2 + $0x4b0] sm:$0xff] %vm71_vm0, %v17589_v0 }
  0x81   :  { %222 = vst.msk [vmem:[#allocation2 + $0x4a8] sm:$0x3] %vm73_vm1, %v17589_v0  ;;  %224 = vst.msk [vmem:[#allocation2 + $0x4b8] sm:$0x3] %vm73_vm1, %v17589_v0 }
  0x82   :  { %225 = vst.msk [vmem:[#allocation2 + $0x4c0] sm:$0xff] %vm71_vm0, %v17589_v0  ;;  %227 = vst.msk [vmem:[#allocation2 + $0x4d0] sm:$0xff] %vm71_vm0, %v17589_v0 }
  0x83   :  { %226 = vst.msk [vmem:[#allocation2 + $0x4c8] sm:$0x3] %vm73_vm1, %v17589_v0  ;;  %228 = vst.msk [vmem:[#allocation2 + $0x4d8] sm:$0x3] %vm73_vm1, %v17589_v0 }
  0x84   :  { %229 = vst.msk [vmem:[#allocation2 + $0x4e0] sm:$0xff] %vm71_vm0, %v17589_v0  ;;  %231 = vst.msk [vmem:[#allocation2 + $0x4f0] sm:$0xff] %vm71_vm0, %v17589_v0 }
  0x85   :  { %230 = vst.msk [vmem:[#allocation2 + $0x4e8] sm:$0x3] %vm73_vm1, %v17589_v0  ;;  %232 = vst.msk [vmem:[#allocation2 + $0x4f8] sm:$0x3] %vm73_vm1, %v17589_v0  ;;  %v271_v0 = vld [vmem:[%s22767_s0 + $0x130] sm:$0xff] }
  0x86   :  { %299 = vst.msk [vmem:[#allocation2 + $0x11] sm:$0xff] %vm298_vm3, %v233_v6  ;;  %300 = vst.msk [vmem:[#allocation2 + $0x21] sm:$0xff] %vm298_vm3, %v234_v7 }
  0x87   :  { %301 = vst.msk [vmem:[#allocation2 + $0x31] sm:$0xff] %vm298_vm3, %v235_v8  ;;  %302 = vst.msk [vmem:[#allocation2 + $0x41] sm:$0xff] %vm298_vm3, %v236_v9  ;;  %v444_v9 = vld [vmem:[#allocation2 + $0x141] sm:$0xff] }
  0x88   :  { %303 = vst.msk [vmem:[#allocation2 + $0x51] sm:$0xff] %vm298_vm3, %v237_v10  ;;  %304 = vst.msk [vmem:[#allocation2 + $0x61] sm:$0xff] %vm298_vm3, %v238_v11  ;;  %v379_v10 = vld [vmem:[#allocation2 + $0x140] sm:$0xff] }
  0x89   :  { %305 = vst.msk [vmem:[#allocation2 + $0x71] sm:$0xff] %vm298_vm3, %v239_v12  ;;  %307 = vst.msk [vmem:[#allocation2 + $0xb1] sm:$0xff] %vm298_vm3, %v241_v13 }
  0x8a   :  { %308 = vst.msk [vmem:[#allocation2 + $0xc1] sm:$0xff] %vm298_vm3, %v242_v14  ;;  %309 = vst.msk [vmem:[#allocation2 + $0xd1] sm:$0xff] %vm298_vm3, %v243_v15 }
  0x8b   :  { %310 = vst.msk [vmem:[#allocation2 + $0xe1] sm:$0xff] %vm298_vm3, %v244_v16  ;;  %311 = vst.msk [vmem:[#allocation2 + $0xf1] sm:$0xff] %vm298_vm3, %v245_v17  ;;  %v275_v17 = vld [vmem:[%s22767_s0 + $0x150] sm:$0xff] }
  0x8c   :  { %312 = vst.msk [vmem:[#allocation2 + $0x101] sm:$0xff] %vm298_vm3, %v246_v18  ;;  %313 = vst.msk [vmem:[#allocation2 + $0x111] sm:$0xff] %vm298_vm3, %v247_v19  ;;  %v276_v18 = vld [vmem:[%s22767_s0 + $0x158] sm:$0xff]  ;;  %v277_v19 = vld [vmem:[%s22767_s0 + $0x160] sm:$0xff] }
  0x8d   :  { %315 = vst.msk [vmem:[#allocation2 + $0x151] sm:$0xff] %vm298_vm3, %v249_v20  ;;  %v429_v24 = vld [vmem:[#allocation2 + $0x11] sm:$0xff]  ;;  %316 = vst.msk [vmem:[#allocation2 + $0x161] sm:$0xff] %vm298_vm3, %v250_v21  ;;  %v430_v27 = vld [vmem:[#allocation2 + $0x21] sm:$0xff] }
  0x8e   :  { %v18028_v25 = vld [vmem:[#allocation2 + $0x10] sm:$0xff]  ;;  %317 = vst.msk [vmem:[#allocation2 + $0x171] sm:$0xff] %vm298_vm3, %v251_v22  ;;  %318 = vst.msk [vmem:[#allocation2 + $0x181] sm:$0xff] %vm298_vm3, %v252_v23  ;;  %15655 = vmatmul.mubr.msk.f32.vlgmr.msra.gmra.mxu0 %vm298_vm3, %v429_v24  ;;  %v18039_v28 = vld [vmem:[#allocation2 + $0x20] sm:$0xff] }
  0x8f   :  { %15753 = vmatmul.mubr.msk.f32.vlgmr.msra.gmra.mxu1 %vm298_vm3, %v18028_v25  ;;  %319 = vst.msk [vmem:[#allocation2 + $0x191] sm:$0xff] %vm298_vm3, %v253_v26  ;;  %15849 = vmatpush3.msk.msra.mxu0 %vm686_vm2, %v1720_v3  ;;  %v431_v29 = vld [vmem:[#allocation2 + $0x31] sm:$0xff]  ;;  %v432_v31 = vld [vmem:[#allocation2 + $0x41] sm:$0xff]  ;;  %320 = vst.msk [vmem:[#allocation2 + $0x1a1] sm:$0xff] %vm298_vm3, %v254_v44 }
  0x90   :  { %15657 = vmatprep.mubr.msk.f32.mxu0 %vm298_vm3, %v430_v27  ;;  %v18044_v30 = vld [vmem:[#allocation2 + $0x30] sm:$0xff]  ;;  %15755 = vmatprep.mubr.msk.f32.mxu1 %vm298_vm3, %v18039_v28  ;;  %v18048_v32 = vld [vmem:[#allocation2 + $0x40] sm:$0xff]  ;;  %321 = vst.msk [vmem:[#allocation2 + $0x1b1] sm:$0xff] %vm298_vm3, %v255_v45  ;;  %323 = vst.msk [vmem:[#allocation2 + $0x1f1] sm:$0xff] %vm298_vm3, %v257_v47 }
  0x91   :  { %v433_v33 = vld [vmem:[#allocation2 + $0x51] sm:$0xff]  ;;  %v434_v35 = vld [vmem:[#allocation2 + $0x61] sm:$0xff]  ;;  %324 = vst.msk [vmem:[#allocation2 + $0x201] sm:$0xff] %vm298_vm3, %v258_v48  ;;  %325 = vst.msk [vmem:[#allocation2 + $0x211] sm:$0xff] %vm298_vm3, %v259_v49 }
  0x92   :  { %15658 = vmatmul.mubr.msk.f32.gmra.mxu0 %vm298_vm3, %v431_v29  ;;  %v18056_v34 = vld [vmem:[#allocation2 + $0x50] sm:$0xff]  ;;  %v18058_v36 = vld [vmem:[#allocation2 + $0x60] sm:$0xff]  ;;  %326 = vst.msk [vmem:[#allocation2 + $0x221] sm:$0xff] %vm298_vm3, %v260_v50  ;;  %327 = vst.msk [vmem:[#allocation2 + $0x231] sm:$0xff] %vm298_vm3, %v261_v51 }
  0x93   :  { %15756 = vmatmul.mubr.msk.f32.gmra.mxu1 %vm298_vm3, %v18044_v30  ;;  %15660 = vmatprep.mubr.msk.f32.mxu0 %vm298_vm3, %v432_v31  ;;  %v435_v37 = vld [vmem:[#allocation2 + $0x71] sm:$0xff]  ;;  %v438_v43 = vld [vmem:[#allocation2 + $0xc1] sm:$0xff]  ;;  %328 = vst.msk [vmem:[#allocation2 + $0x241] sm:$0xff] %vm298_vm3, %v262_v54  ;;  %329 = vst.msk [vmem:[#allocation2 + $0x251] sm:$0xff] %vm298_vm3, %v263_v55 }
  0x94   :  { %15758 = vmatprep.mubr.msk.f32.mxu1 %vm298_vm3, %v18048_v32  ;;  %v18066_v38 = vld [vmem:[#allocation2 + $0x70] sm:$0xff]  ;;  %v18081_v46 = vld [vmem:[#allocation2 + $0xc0] sm:$0xff]  ;;  %331 = vst.msk [vmem:[#allocation2 + $0x291] sm:$0xff] %vm298_vm3, %v265_v57  ;;  %332 = vst.msk [vmem:[#allocation2 + $0x2a1] sm:$0xff] %vm298_vm3, %v266_v58 }
  0x95   :  { %v437_v41 = vld [vmem:[#allocation2 + $0xb1] sm:$0xff]  ;;  %v440_v56 = vld [vmem:[#allocation2 + $0xe1] sm:$0xff]  ;;  %333 = vst.msk [vmem:[#allocation2 + $0x2b1] sm:$0xff] %vm298_vm3, %v267_v59  ;;  %334 = vst.msk [vmem:[#allocation2 + $0x2c1] sm:$0xff] %vm298_vm3, %v268_v60 }
  0x96   :  { %15661 = vmatmul.mubr.msk.f32.gmra.mxu0 %vm298_vm3, %v433_v33  ;;  %v18068_v42 = vld [vmem:[#allocation2 + $0xb0] sm:$0xff]  ;;  %v18138_v62 = vld [vmem:[#allocation2 + $0xe0] sm:$0xff]  ;;  %335 = vst.msk [vmem:[#allocation2 + $0x2d1] sm:$0xff] %vm298_vm3, %v269_v61  ;;  %336 = vst.msk [vmem:[#allocation2 + $0x2e1] sm:$0xff] %vm298_vm3, %v270_v63 }
  0x97   :  { %15759 = vmatmul.mubr.msk.f32.gmra.mxu1 %vm298_vm3, %v18056_v34  ;;  %15663 = vmatprep.mubr.msk.f32.mxu0 %vm298_vm3, %v434_v35  ;;  %v439_v52 = vld [vmem:[#allocation2 + $0xd1] sm:$0xff]  ;;  %337 = vst.msk [vmem:[#allocation2 + $0x2f1] sm:$0xff] %vm298_vm3, %v271_v0  ;;  %339 = vst.msk [vmem:[#allocation2 + $0x331] sm:$0xff] %vm298_vm3, %v273_v1  ;;  %v442_v5 = vld [vmem:[#allocation2 + $0x101] sm:$0xff] }
  0x98   :  { %15761 = vmatprep.mubr.msk.f32.mxu1 %vm298_vm3, %v18058_v36  ;;  %v18102_v53 = vld [vmem:[#allocation2 + $0xd0] sm:$0xff]  ;;  %340 = vst.msk [vmem:[#allocation2 + $0x341] sm:$0xff] %vm298_vm3, %v274_v2  ;;  %v18167_v6 = vld [vmem:[#allocation2 + $0x100] sm:$0xff]  ;;  %341 = vst.msk [vmem:[#allocation2 + $0x351] sm:$0xff] %vm298_vm3, %v275_v17 }
  0x99   :  { %v441_v3 = vld [vmem:[#allocation2 + $0xf1] sm:$0xff]  ;;  %v446_v13 = vld [vmem:[#allocation2 + $0x161] sm:$0xff]  ;;  %342 = vst.msk [vmem:[#allocation2 + $0x361] sm:$0xff] %vm298_vm3, %v276_v18  ;;  %343 = vst.msk [vmem:[#allocation2 + $0x371] sm:$0xff] %vm298_vm3, %v277_v19 }
  0x9a   :  { %15664 = vmatmul.mubr.msk.f32.gmra.mxu0 %vm298_vm3, %v435_v37  ;;  %v18165_v4 = vld [vmem:[#allocation2 + $0xf0] sm:$0xff]  ;;  %v18184_v14 = vld [vmem:[#allocation2 + $0x160] sm:$0xff]  ;;  %v278_v21 = vld [vmem:[%s22767_s0 + $0x168] sm:$0xff] }
  0x9b   :  { %15762 = vmatmul.mubr.msk.f32.gmra.mxu1 %vm298_vm3, %v18066_v38  ;;  %15666 = vmatprep.mubr.msk.f32.mxu0 %vm298_vm3, %v436_v39  ;;  %v443_v7 = vld [vmem:[#allocation2 + $0x111] sm:$0xff]  ;;  %v448_v20 = vld [vmem:[#allocation2 + $0x181] sm:$0xff]  ;;  %344 = vst.msk [vmem:[#allocation2 + $0x381] sm:$0xff] %vm298_vm3, %v278_v21  ;;  %v2430_v51 = vld [vmem:[#allocation3 + $0xc] sm:$0xf] }
  0x9c   :  { %15764 = vmatprep.mubr.msk.f32.mxu1 %vm298_vm3, %v371_v40  ;;  %v18175_v8 = vld [vmem:[#allocation2 + $0x110] sm:$0xff]  ;;  %v18212_v23 = vld [vmem:[#allocation2 + $0x180] sm:$0xff]  ;;  %v282_v26 = vld [vmem:[%s22767_s0 + $0x188] sm:$0xff]  ;;  %15946 = vmatprep.subr.msk.mxu1 %vm686_vm2, %v2430_v51 }
  0x9d   :  { %v445_v11 = vld [vmem:[#allocation2 + $0x151] sm:$0xff]  ;;  %v281_v24 = vld [vmem:[%s22767_s0 + $0x180] sm:$0xff]  ;;  %348 = vst.msk [vmem:[#allocation2 + $0x3e1] sm:$0xff] %vm298_vm3, %v282_v26  ;;  %v286_v39 = vld [vmem:[%s22767_s0 + $0x1a8] sm:$0xff]  ;;  %15947 = vmatpush3.msk.msra.mxu1 %vm686_vm2, %v2430_v51 }
  0x9e   :  { %15667 = vmatmul.mubr.msk.f32.gmra.mxu0 %vm298_vm3, %v437_v41  ;;  %v18182_v12 = vld [vmem:[#allocation2 + $0x150] sm:$0xff]  ;;  %347 = vst.msk [vmem:[#allocation2 + $0x3d1] sm:$0xff] %vm298_vm3, %v281_v24  ;;  %v284_v33 = vld [vmem:[%s22767_s0 + $0x198] sm:$0xff]  ;;  %v285_v35 = vld [vmem:[%s22767_s0 + $0x1a0] sm:$0xff] }
  0x9f   :  { %15765 = vmatmul.mubr.msk.f32.gmra.mxu1 %vm298_vm3, %v18068_v42  ;;  %15669 = vmatprep.mubr.msk.f32.mxu0 %vm298_vm3, %v438_v43  ;;  %v447_v15 = vld [vmem:[#allocation2 + $0x171] sm:$0xff]  ;;  %v450_v37 = vld [vmem:[#allocation2 + $0x1a1] sm:$0xff]  ;;  %350 = vst.msk [vmem:[#allocation2 + $0x401] sm:$0xff] %vm298_vm3, %v284_v33  ;;  %351 = vst.msk [vmem:[#allocation2 + $0x411] sm:$0xff] %vm298_vm3, %v285_v35 }
  0xa0   :  { %15767 = vmatprep.mubr.msk.f32.mxu1 %vm298_vm3, %v18081_v46  ;;  %v18186_v16 = vld [vmem:[#allocation2 + $0x170] sm:$0xff]  ;;  %v18250_v41 = vld [vmem:[#allocation2 + $0x1a0] sm:$0xff]  ;;  %352 = vst.msk [vmem:[#allocation2 + $0x421] sm:$0xff] %vm298_vm3, %v286_v39  ;;  %v290_v44 = vld [vmem:[%s22767_s0 + $0x1c8] sm:$0xff] }
  0xa1   :  { %v279_v22 = vld [vmem:[%s22767_s0 + $0x170] sm:$0xff]  ;;  %v289_v43 = vld [vmem:[%s22767_s0 + $0x1c0] sm:$0xff]  ;;  %356 = vst.msk [vmem:[#allocation2 + $0x481] sm:$0xff] %vm298_vm3, %v290_v44  ;;  %v292_v47 = vld [vmem:[%s22767_s0 + $0x1d8] sm:$0xff] }
  0xa2   :  { %15670 = vmatmul.mubr.msk.f32.gmra.mxu0 %vm298_vm3, %v439_v52  ;;  %345 = vst.msk [vmem:[#allocation2 + $0x391] sm:$0xff] %vm298_vm3, %v279_v22  ;;  %v449_v27 = vld [vmem:[#allocation2 + $0x191] sm:$0xff]  ;;  %355 = vst.msk [vmem:[#allocation2 + $0x471] sm:$0xff] %vm298_vm3, %v289_v43  ;;  %v293_v48 = vld [vmem:[%s22767_s0 + $0x1e0] sm:$0xff] }
  0xa3   :  { %15768 = vmatmul.mubr.msk.f32.gmra.mxu1 %vm298_vm3, %v18102_v53  ;;  %15672 = vmatprep.mubr.msk.f32.mxu0 %vm298_vm3, %v440_v56  ;;  %v18222_v29 = vld [vmem:[#allocation2 + $0x190] sm:$0xff]  ;;  %358 = vst.msk [vmem:[#allocation2 + $0x4a1] sm:$0xff] %vm298_vm3, %v292_v47  ;;  %359 = vst.msk [vmem:[#allocation2 + $0x4b1] sm:$0xff] %vm298_vm3, %v293_v48  ;;  %v294_v49 = vld [vmem:[%s22767_s0 + $0x1e8] sm:$0xff] }
  0xa4   :  { %15770 = vmatprep.mubr.msk.f32.mxu1 %vm298_vm3, %v18138_v62  ;;  %v283_v31 = vld [vmem:[%s22767_s0 + $0x190] sm:$0xff]  ;;  %360 = vst.msk [vmem:[#allocation2 + $0x4c1] sm:$0xff] %vm298_vm3, %v294_v49  ;;  %v452_v55 = vld [vmem:[#allocation2 + $0x1e1] sm:$0xff]  ;;  %v248_v18 = vld [vmem:[%s22767_s0 + $0x78] sm:$0xff] }
  0xa5   :  { %349 = vst.msk [vmem:[#allocation2 + $0x3f1] sm:$0xff] %vm298_vm3, %v283_v31  ;;  %v287_v40 = vld [vmem:[%s22767_s0 + $0x1b0] sm:$0xff]  ;;  %v387_v56 = vld [vmem:[#allocation2 + $0x1e0] sm:$0xff]  ;;  %314 = vst.msk [vmem:[#allocation2 + $0x121] sm:$0xff] %vm298_vm3, %v248_v18 }
  0xa6   :  { %15673 = vmatmul.mubr.msk.f32.gmra.mxu0 %vm298_vm3, %v441_v3  ;;  %353 = vst.msk [vmem:[#allocation2 + $0x431] sm:$0xff] %vm298_vm3, %v287_v40  ;;  %v291_v45 = vld [vmem:[%s22767_s0 + $0x1d0] sm:$0xff]  ;;  %v454_v59 = vld [vmem:[#allocation2 + $0x201] sm:$0xff]  ;;  %v256_v21 = vld [vmem:[%s22767_s0 + $0xb8] sm:$0xff] }
  0xa7   :  { %15771 = vmatmul.mubr.msk.f32.gmra.mxu1 %vm298_vm3, %v18165_v4  ;;  %15675 = vmatprep.mubr.msk.f32.mxu0 %vm298_vm3, %v442_v5  ;;  %357 = vst.msk [vmem:[#allocation2 + $0x491] sm:$0xff] %vm298_vm3, %v291_v45  ;;  %v295_v50 = vld [vmem:[%s22767_s0 + $0x1f0] sm:$0xff]  ;;  %v18299_v60 = vld [vmem:[#allocation2 + $0x200] sm:$0xff]  ;;  %322 = vst.msk [vmem:[#allocation2 + $0x1c1] sm:$0xff] %vm298_vm3, %v256_v21 }
  0xa8   :  { %15773 = vmatprep.mubr.msk.f32.mxu1 %vm298_vm3, %v18167_v6  ;;  %361 = vst.msk [vmem:[#allocation2 + $0x4d1] sm:$0xff] %vm298_vm3, %v295_v50  ;;  %v451_v52 = vld [vmem:[#allocation2 + $0x1b1] sm:$0xff]  ;;  %v456_v0 = vld [vmem:[#allocation2 + $0x221] sm:$0xff] }
  0xa9   :  { %v18288_v54 = vld [vmem:[#allocation2 + $0x1b0] sm:$0xff]  ;;  %v18309_v1 = vld [vmem:[#allocation2 + $0x220] sm:$0xff]  ;;  %v264_v31 = vld [vmem:[%s22767_s0 + $0xf8] sm:$0xff] }
  0xaa   :  { %15676 = vmatmul.mubr.msk.f32.gmra.mxu0 %vm298_vm3, %v443_v7  ;;  %v453_v57 = vld [vmem:[#allocation2 + $0x1f1] sm:$0xff]  ;;  %v458_v7 = vld [vmem:[#allocation2 + $0x241] sm:$0xff]  ;;  %330 = vst.msk [vmem:[#allocation2 + $0x261] sm:$0xff] %vm298_vm3, %v264_v31 }
  0xab   :  { %15774 = vmatmul.mubr.msk.f32.gmra.mxu1 %vm298_vm3, %v18175_v8  ;;  %15678 = vmatprep.mubr.msk.f32.mxu0 %vm298_vm3, %v444_v9  ;;  %v18297_v58 = vld [vmem:[#allocation2 + $0x1f0] sm:$0xff]  ;;  %v18321_v9 = vld [vmem:[#allocation2 + $0x240] sm:$0xff]  ;;  %v272_v40 = vld [vmem:[%s22767_s0 + $0x138] sm:$0xff] }
  0xac   :  { %15776 = vmatprep.mubr.msk.f32.mxu1 %vm298_vm3, %v379_v10  ;;  %v455_v61 = vld [vmem:[#allocation2 + $0x211] sm:$0xff]  ;;  %v395_v17 = vld [vmem:[#allocation2 + $0x280] sm:$0xff]  ;;  %338 = vst.msk [vmem:[#allocation2 + $0x301] sm:$0xff] %vm298_vm3, %v272_v40 }
  0xad   :  { %v18307_v63 = vld [vmem:[#allocation2 + $0x210] sm:$0xff]  ;;  %v240_v10 = vld [vmem:[%s22767_s0 + $0x38] sm:$0xff]  ;;  %v462_v22 = vld [vmem:[#allocation2 + $0x2a1] sm:$0xff] }
  0xae   :  { %15679 = vmatmul.mubr.msk.f32.gmra.mxu0 %vm298_vm3, %v445_v11  ;;  %v457_v2 = vld [vmem:[#allocation2 + $0x231] sm:$0xff]  ;;  %306 = vst.msk [vmem:[#allocation2 + $0x81] sm:$0xff] %vm298_vm3, %v240_v10  ;;  %v18351_v24 = vld [vmem:[#allocation2 + $0x2a0] sm:$0xff] }
  0xaf   :  { %15777 = vmatmul.mubr.msk.f32.gmra.mxu1 %vm298_vm3, %v18182_v12  ;;  %15681 = vmatprep.mubr.msk.f32.mxu0 %vm298_vm3, %v446_v13  ;;  %v18317_v3 = vld [vmem:[#allocation2 + $0x230] sm:$0xff]  ;;  %v464_v33 = vld [vmem:[#allocation2 + $0x2c1] sm:$0xff] }
  0xb0   :  { %15779 = vmatprep.mubr.msk.f32.mxu1 %vm298_vm3, %v18184_v14  ;;  %v18319_v5 = vld [vmem:[#allocation3 + $0x10] sm:$0xf]  ;;  %v18365_v35 = vld [vmem:[#allocation2 + $0x2c0] sm:$0xff] }
  0xb1   :  { %16044 = vmatprep.subr.msk.mxu0 %vm686_vm2, %v18319_v5  ;;  %v459_v11 = vld [vmem:[#allocation2 + $0x251] sm:$0xff]  ;;  %v466_v43 = vld [vmem:[#allocation2 + $0x2e1] sm:$0xff] }
  0xb2   :  { %15682 = vmatmul.mubr.msk.f32.gmra.mxu0 %vm298_vm3, %v447_v15  ;;  %v18335_v13 = vld [vmem:[#allocation2 + $0x250] sm:$0xff]  ;;  %v460_v15 = vld [vmem:[#allocation2 + $0x281] sm:$0xff] }
  0xb3   :  { %15780 = vmatmul.mubr.msk.f32.gmra.mxu1 %vm298_vm3, %v18186_v16  ;;  %15684 = vmatprep.mubr.msk.f32.mxu0 %vm298_vm3, %v448_v20  ;;  %v461_v19 = vld [vmem:[#allocation2 + $0x291] sm:$0xff]  ;;  %v18379_v44 = vld [vmem:[#allocation2 + $0x2e0] sm:$0xff] }
  0xb4   :  { %15782 = vmatprep.mubr.msk.f32.mxu1 %vm298_vm3, %v18212_v23  ;;  %v18346_v20 = vld [vmem:[#allocation2 + $0x290] sm:$0xff]  ;;  %v468_v48 = vld [vmem:[#allocation2 + $0x321] sm:$0xff] }
  0xb5   :  { %v463_v26 = vld [vmem:[#allocation2 + $0x2b1] sm:$0xff]  ;;  %v403_v49 = vld [vmem:[#allocation2 + $0x320] sm:$0xff] }
  0xb6   :  { %15685 = vmatmul.mubr.msk.f32.gmra.mxu0 %vm298_vm3, %v449_v27  ;;  %v18360_v27 = vld [vmem:[#allocation2 + $0x2b0] sm:$0xff]  ;;  %v474_v10 = vld [vmem:[#allocation2 + $0x381] sm:$0xff] }
  0xb7   :  { %15783 = vmatmul.mubr.msk.f32.gmra.mxu1 %vm298_vm3, %v18222_v29  ;;  %15687 = vmatprep.mubr.msk.f32.mxu0 %vm298_vm3, %v450_v37  ;;  %v465_v37 = vld [vmem:[#allocation2 + $0x2d1] sm:$0xff]  ;;  %v476_v18 = vld [vmem:[#allocation2 + $0x3c1] sm:$0xff] }
  0xb8   :  { %15785 = vmatprep.mubr.msk.f32.mxu1 %vm298_vm3, %v18250_v41  ;;  %v18374_v39 = vld [vmem:[#allocation2 + $0x2d0] sm:$0xff]  ;;  %v18438_v31 = vld [vmem:[#allocation2 + $0x3e0] sm:$0xff] }
  0xb9   :  { %v467_v45 = vld [vmem:[#allocation2 + $0x2f1] sm:$0xff]  ;;  %v480_v40 = vld [vmem:[#allocation2 + $0x401] sm:$0xff] }
  0xba   :  { %15688 = vmatmul.mubr.msk.f32.gmra.mxu0 %vm298_vm3, %v451_v52  ;;  %v18388_v47 = vld [vmem:[#allocation2 + $0x2f0] sm:$0xff]  ;;  %v470_v52 = vld [vmem:[#allocation2 + $0x341] sm:$0xff] }
  0xbb   :  { %15786 = vmatmul.mubr.msk.f32.gmra.mxu1 %vm298_vm3, %v18288_v54  ;;  %15690 = vmatprep.mubr.msk.f32.mxu0 %vm298_vm3, %v452_v55  ;;  %v469_v50 = vld [vmem:[#allocation2 + $0x331] sm:$0xff]  ;;  %v18397_v55 = vld [vmem:[#allocation2 + $0x340] sm:$0xff] }
  0xbc   :  { %15788 = vmatprep.mubr.msk.f32.mxu1 %vm298_vm3, %v387_v56  ;;  %v18395_v51 = vld [vmem:[#allocation2 + $0x330] sm:$0xff] }
  0xbd   :  { %v471_v56 = vld [vmem:[#allocation2 + $0x351] sm:$0xff] }
  0xbe   :  { %15691 = vmatmul.mubr.msk.f32.gmra.mxu0 %vm298_vm3, %v453_v57  ;;  %v18405_v57 = vld [vmem:[#allocation2 + $0x350] sm:$0xff] }
  0xbf   :  { %15789 = vmatmul.mubr.msk.f32.gmra.mxu1 %vm298_vm3, %v18297_v58  ;;  %15693 = vmatprep.mubr.msk.f32.mxu0 %vm298_vm3, %v454_v59  ;;  %v472_v59 = vld [vmem:[#allocation2 + $0x361] sm:$0xff]  ;;  %v477_v21 = vld [vmem:[#allocation2 + $0x3d1] sm:$0xff] }
  0xc0   :  { %15791 = vmatprep.mubr.msk.f32.mxu1 %vm298_vm3, %v18299_v60 }
  0xc2   :  { %15694 = vmatmul.mubr.msk.f32.gmra.mxu0 %vm298_vm3, %v455_v61  ;;  %v18407_v61 = vld [vmem:[#allocation2 + $0x360] sm:$0xff] }
  0xc3   :  { %15792 = vmatmul.mubr.msk.f32.gmra.mxu1 %vm298_vm3, %v18307_v63  ;;  %15696 = vmatprep.mubr.msk.f32.mxu0 %vm298_vm3, %v456_v0  ;;  %v473_v0 = vld [vmem:[#allocation2 + $0x371] sm:$0xff] }
  0xc4   :  { %15794 = vmatprep.mubr.msk.f32.mxu1 %vm298_vm3, %v18309_v1 }
  0xc6   :  { %15697 = vmatmul.mubr.msk.f32.gmra.mxu0 %vm298_vm3, %v457_v2  ;;  %v18415_v2 = vld [vmem:[#allocation2 + $0x370] sm:$0xff] }
  0xc7   :  { %15795 = vmatmul.mubr.msk.f32.gmra.mxu1 %vm298_vm3, %v18317_v3  ;;  %15699 = vmatprep.mubr.msk.f32.mxu0 %vm298_vm3, %v458_v7  ;;  %v280_v7 = vld [vmem:[%s22767_s0 + $0x178] sm:$0xff] }
  0xc8   :  { %15797 = vmatprep.mubr.msk.f32.mxu1 %vm298_vm3, %v18321_v9  ;;  %346 = vst.msk [vmem:[#allocation2 + $0x3a1] sm:$0xff] %vm298_vm3, %v280_v7  ;;  %v419_v7 = vld [vmem:[#allocation2 + $0x460] sm:$0xff] }
  0xca   :  { %15700 = vmatmul.mubr.msk.f32.gmra.mxu0 %vm298_vm3, %v459_v11  ;;  %v18420_v11 = vld [vmem:[#allocation2 + $0x380] sm:$0xff] }
  0xcb   :  { %15798 = vmatmul.mubr.msk.f32.gmra.mxu1 %vm298_vm3, %v18335_v13  ;;  %15702 = vmatprep.mubr.msk.f32.mxu0 %vm298_vm3, %v460_v15  ;;  %v475_v15 = vld [vmem:[#allocation2 + $0x391] sm:$0xff] }
  0xcc   :  { %15800 = vmatprep.mubr.msk.f32.mxu1 %vm298_vm3, %v395_v17  ;;  %v18429_v17 = vld [vmem:[#allocation2 + $0x390] sm:$0xff] }
  0xce   :  { %15703 = vmatmul.mubr.msk.f32.gmra.mxu0 %vm298_vm3, %v461_v19  ;;  %v411_v19 = vld [vmem:[#allocation2 + $0x3c0] sm:$0xff] }
  0xcf   :  { %15801 = vmatmul.mubr.msk.f32.gmra.mxu1 %vm298_vm3, %v18346_v20  ;;  %15705 = vmatprep.mubr.msk.f32.mxu0 %vm298_vm3, %v462_v22  ;;  %v18436_v22 = vld [vmem:[#allocation2 + $0x3d0] sm:$0xff] }
  0xd0   :  { %15803 = vmatprep.mubr.msk.f32.mxu1 %vm298_vm3, %v18351_v24 }
  0xd2   :  { %15706 = vmatmul.mubr.msk.f32.gmra.mxu0 %vm298_vm3, %v463_v26  ;;  %v478_v26 = vld [vmem:[#allocation2 + $0x3e1] sm:$0xff] }
  0xd3   :  { %15804 = vmatmul.mubr.msk.f32.gmra.mxu1 %vm298_vm3, %v18360_v27  ;;  %15708 = vmatprep.mubr.msk.f32.mxu0 %vm298_vm3, %v464_v33  ;;  %v479_v33 = vld [vmem:[#allocation2 + $0x3f1] sm:$0xff] }
  0xd4   :  { %15806 = vmatprep.mubr.msk.f32.mxu1 %vm298_vm3, %v18365_v35 }
  0xd6   :  { %15709 = vmatmul.mubr.msk.f32.gmra.mxu0 %vm298_vm3, %v465_v37  ;;  %v18446_v37 = vld [vmem:[#allocation2 + $0x3f0] sm:$0xff] }
  0xd7   :  { %15807 = vmatmul.mubr.msk.f32.gmra.mxu1 %vm298_vm3, %v18374_v39  ;;  %15711 = vmatprep.mubr.msk.f32.mxu0 %vm298_vm3, %v466_v43  ;;  %v18448_v43 = vld [vmem:[#allocation2 + $0x400] sm:$0xff] }
  0xd8   :  { %15809 = vmatprep.mubr.msk.f32.mxu1 %vm298_vm3, %v18379_v44 }
  0xda   :  { %15712 = vmatmul.mubr.msk.f32.gmra.mxu0 %vm298_vm3, %v467_v45  ;;  %v481_v45 = vld [vmem:[#allocation2 + $0x411] sm:$0xff] }
  0xdb   :  { %15810 = vmatmul.mubr.msk.f32.gmra.mxu1 %vm298_vm3, %v18388_v47  ;;  %15714 = vmatprep.mubr.msk.f32.mxu0 %vm298_vm3, %v468_v48  ;;  %v18456_v48 = vld [vmem:[#allocation2 + $0x410] sm:$0xff] }
  0xdc   :  { %15812 = vmatprep.mubr.msk.f32.mxu1 %vm298_vm3, %v403_v49  ;;  %v288_v49 = vld [vmem:[%s22767_s0 + $0x1b8] sm:$0xff] }
  0xdd   :  { %354 = vst.msk [vmem:[#allocation2 + $0x441] sm:$0xff] %vm298_vm3, %v288_v49  ;;  %v18497_v49 = vld [vmem:[#allocation2 + $0x4b0] sm:$0xff] }
  0xde   :  { %15715 = vmatmul.mubr.msk.f32.gmra.mxu0 %vm298_vm3, %v469_v50  ;;  %v482_v50 = vld [vmem:[#allocation2 + $0x421] sm:$0xff] }
  0xdf   :  { %15813 = vmatmul.mubr.msk.f32.gmra.mxu1 %vm298_vm3, %v18395_v51  ;;  %15717 = vmatprep.mubr.msk.f32.mxu0 %vm298_vm3, %v470_v52  ;;  %v18461_v52 = vld [vmem:[#allocation2 + $0x420] sm:$0xff] }
  0xe0   :  { %15815 = vmatprep.mubr.msk.f32.mxu1 %vm298_vm3, %v18397_v55 }
  0xe2   :  { %15718 = vmatmul.mubr.msk.f32.gmra.mxu0 %vm298_vm3, %v471_v56  ;;  %v483_v56 = vld [vmem:[#allocation2 + $0x431] sm:$0xff] }
  0xe3   :  { %15816 = vmatmul.mubr.msk.f32.gmra.mxu1 %vm298_vm3, %v18405_v57  ;;  %15720 = vmatprep.mubr.msk.f32.mxu0 %vm298_vm3, %v472_v59  ;;  %v18470_v59 = vld [vmem:[#allocation2 + $0x430] sm:$0xff] }
  0xe4   :  { %15818 = vmatprep.mubr.msk.f32.mxu1 %vm298_vm3, %v18407_v61 }
  0xe6   :  { %15721 = vmatmul.mubr.msk.f32.gmra.mxu0 %vm298_vm3, %v473_v0  ;;  %v484_v0 = vld [vmem:[#allocation2 + $0x461] sm:$0xff] }
  0xe7   :  { %15819 = vmatmul.mubr.msk.f32.gmra.mxu1 %vm298_vm3, %v18415_v2  ;;  %15723 = vmatprep.mubr.msk.f32.mxu0 %vm298_vm3, %v474_v10  ;;  %v485_v10 = vld [vmem:[#allocation2 + $0x471] sm:$0xff] }
  0xe8   :  { %15821 = vmatprep.mubr.msk.f32.mxu1 %vm298_vm3, %v18420_v11 }
  0xea   :  { %15724 = vmatmul.mubr.msk.f32.gmra.mxu0 %vm298_vm3, %v475_v15  ;;  %v18477_v15 = vld [vmem:[#allocation2 + $0x470] sm:$0xff] }
  0xeb   :  { %15822 = vmatmul.mubr.msk.f32.gmra.mxu1 %vm298_vm3, %v18429_v17  ;;  %15726 = vmatprep.mubr.msk.f32.mxu0 %vm298_vm3, %v476_v18  ;;  %v486_v18 = vld [vmem:[#allocation2 + $0x481] sm:$0xff] }
  0xec   :  { %15824 = vmatprep.mubr.msk.f32.mxu1 %vm298_vm3, %v411_v19  ;;  %v18479_v19 = vld [vmem:[#allocation2 + $0x480] sm:$0xff] }
  0xee   :  { %15727 = vmatmul.mubr.msk.f32.gmra.mxu0 %vm298_vm3, %v477_v21  ;;  %v487_v21 = vld [vmem:[#allocation2 + $0x491] sm:$0xff] }
  0xef   :  { %15825 = vmatmul.mubr.msk.f32.gmra.mxu1 %vm298_vm3, %v18436_v22  ;;  %15729 = vmatprep.mubr.msk.f32.mxu0 %vm298_vm3, %v478_v26  ;;  %v18487_v26 = vld [vmem:[#allocation2 + $0x490] sm:$0xff] }
  0xf0   :  { %15827 = vmatprep.mubr.msk.f32.mxu1 %vm298_vm3, %v18438_v31 }
  0xf2   :  { %15730 = vmatmul.mubr.msk.f32.gmra.mxu0 %vm298_vm3, %v479_v33  ;;  %v488_v33 = vld [vmem:[#allocation2 + $0x4a1] sm:$0xff] }
  0xf3   :  { %15828 = vmatmul.mubr.msk.f32.gmra.mxu1 %vm298_vm3, %v18446_v37  ;;  %15732 = vmatprep.mubr.msk.f32.mxu0 %vm298_vm3, %v480_v40  ;;  %v18489_v40 = vld [vmem:[#allocation2 + $0x4a0] sm:$0xff] }
  0xf4   :  { %15830 = vmatprep.mubr.msk.f32.mxu1 %vm298_vm3, %v18448_v43 }
  0xf6   :  { %15733 = vmatmul.mubr.msk.f32.gmra.mxu0 %vm298_vm3, %v481_v45  ;;  %v489_v45 = vld [vmem:[#allocation2 + $0x4b1] sm:$0xff] }
  0xf7   :  { %15831 = vmatmul.mubr.msk.f32.gmra.mxu1 %vm298_vm3, %v18456_v48  ;;  %15735 = vmatprep.mubr.msk.f32.mxu0 %vm298_vm3, %v482_v50  ;;  %v296_v50 = vld [vmem:[%s22767_s0 + $0x1f8] sm:$0xff] }
  0xf8   :  { %15833 = vmatprep.mubr.msk.f32.mxu1 %vm298_vm3, %v18461_v52  ;;  %362 = vst.msk [vmem:[#allocation2 + $0x4e1] sm:$0xff] %vm298_vm3, %v296_v50  ;;  %v18528_v50 = vld [vmem:[#allocation3 + $0x18] sm:$0xf] }
  0xfa   :  { %15736 = vmatmul.mubr.msk.f32.gmra.mxu0 %vm298_vm3, %v483_v56  ;;  %v490_v56 = vld [vmem:[#allocation2 + $0x4c1] sm:$0xff] }
  0xfb   :  { %15834 = vmatmul.mubr.msk.f32.gmra.mxu1 %vm298_vm3, %v18470_v59  ;;  %15738 = vmatprep.mubr.msk.f32.mxu0 %vm298_vm3, %v484_v0  ;;  %v18502_v0 = vld [vmem:[#allocation2 + $0x4c0] sm:$0xff] }
  0xfc   :  { %15836 = vmatprep.mubr.msk.f32.mxu1 %vm298_vm3, %v419_v7  ;;  %v491_v7 = vld [vmem:[#allocation2 + $0x4d1] sm:$0xff] }
  0xfe   :  { %15739 = vmatmul.mubr.msk.f32.gmra.mxu0 %vm298_vm3, %v485_v10  ;;  %v18511_v10 = vld [vmem:[#allocation2 + $0x4d0] sm:$0xff] }
  0xff   :  { %15837 = vmatmul.mubr.msk.f32.gmra.mxu1 %vm298_vm3, %v18477_v15  ;;  %15741 = vmatprep.mubr.msk.f32.mxu0 %vm298_vm3, %v486_v18  ;;  %v1655_v18 = vld [vmem:[#allocation2 + $0x2] sm:$0xff] }
 0x100   :  { %15839 = vmatprep.mubr.msk.f32.mxu1 %vm298_vm3, %v18479_v19 }
 0x102   :  { %15742 = vmatmul.mubr.msk.f32.gmra.mxu0 %vm298_vm3, %v487_v21  ;;  %v18517_v21 = vld [vmem:[#allocation2 + $0x12] sm:$0xff] }
 0x103   :  { %15840 = vmatmul.mubr.msk.f32.gmra.mxu1 %vm298_vm3, %v18487_v26  ;;  %15744 = vmatprep.mubr.msk.f32.mxu0 %vm298_vm3, %v488_v33  ;;  %v3850_v33 = vld [vmem:[#allocation3 + $0x14] sm:$0xf] }
 0x104   :  { %15842 = vmatprep.mubr.msk.f32.mxu1 %vm298_vm3, %v18489_v40  ;;  %16142 = vmatprep.subr.msk.mxu1 %vm686_vm2, %v3850_v33 }
 0x106   :  { %15745 = vmatmul.mubr.msk.f32.gmra.mxu0 %vm298_vm3, %v489_v45  ;;  %v18521_v45 = vld [vmem:[#allocation2 + $0x22] sm:$0xff] }
 0x107   :  { %15843 = vmatmul.mubr.msk.f32.gmra.mxu1 %vm298_vm3, %v18497_v49  ;;  %15747 = vmatprep.mubr.msk.f32.mxu0 %vm298_vm3, %v490_v56  ;;  %v18538_v56 = vld [vmem:[#allocation2 + $0x42] sm:$0xff] }
 0x108   :  { %15845 = vmatprep.mubr.msk.f32.mxu1 %vm298_vm3, %v18502_v0 }
 0x10a   :  { %15748 = vmatmul.mubr.msk.f32.gmra.mxu0 %vm298_vm3, %v491_v7  ;;  %v1663_v7 = vld [vmem:[#allocation2 + $0xa2] sm:$0xff] }
 0x10b   :  { %15846 = vmatmul.mubr.msk.f32.gmra.mxu1 %vm298_vm3, %v18511_v10  ;;  %15850 = vmatprep.mubr.msk.f32.mxu0 %vm298_vm3, %v1655_v18  ;;  %v18585_v18 = vld [vmem:[#allocation2 + $0xe2] sm:$0xff] }
 0x10c   :  { %15948 = vmatprep.mubr.msk.f32.mxu1 %vm298_vm3, %v18028_v25  ;;  %v18534_v25 = vld [vmem:[#allocation2 + $0x32] sm:$0xff] }
 0x10e   :  { %15851 = vmatmul.mubr.msk.f32.vlgmr.msra.gmra.mxu0 %vm298_vm3, %v18517_v21 }
 0x10f   :  { %15949 = vmatmul.mubr.msk.f32.vlgmr.msra.gmra.mxu1 %vm298_vm3, %v18039_v28  ;;  %16045 = vmatpush3.msk.msra.mxu0 %vm686_vm2, %v18319_v5  ;;  %v18549_v28 = vld [vmem:[#allocation2 + $0x52] sm:$0xff]  ;;  %v2372_v5 = vld [vmem:[#allocation2 + $0x80] sm:$0xff] }
 0x110   :  { %15853 = vmatprep.mubr.msk.f32.mxu0 %vm298_vm3, %v18521_v45  ;;  %15951 = vmatprep.mubr.msk.f32.mxu1 %vm298_vm3, %v18044_v30  ;;  %v18553_v30 = vld [vmem:[#allocation2 + $0x62] sm:$0xff] }
 0x111   :  { %16143 = vmatpush3.msk.msra.mxu1 %vm686_vm2, %v3850_v33  ;;  %16240 = vmatprep.subr.msk.mxu0 %vm686_vm2, %v18528_v50  ;;  %v1671_v33 = vld [vmem:[#allocation2 + $0x142] sm:$0xff] }
 0x112   :  { %15854 = vmatmul.mubr.msk.f32.gmra.mxu0 %vm298_vm3, %v18534_v25 }
 0x113   :  { %15952 = vmatmul.mubr.msk.f32.gmra.mxu1 %vm298_vm3, %v18048_v32  ;;  %15856 = vmatprep.mubr.msk.f32.mxu0 %vm298_vm3, %v18538_v56  ;;  %v18561_v32 = vld [vmem:[#allocation2 + $0x72] sm:$0xff] }
 0x114   :  { %15954 = vmatprep.mubr.msk.f32.mxu1 %vm298_vm3, %v18056_v34  ;;  %v18569_v34 = vld [vmem:[#allocation2 + $0xb2] sm:$0xff] }
 0x116   :  { %15857 = vmatmul.mubr.msk.f32.gmra.mxu0 %vm298_vm3, %v18549_v28 }
 0x117   :  { %15955 = vmatmul.mubr.msk.f32.gmra.mxu1 %vm298_vm3, %v18058_v36  ;;  %15859 = vmatprep.mubr.msk.f32.mxu0 %vm298_vm3, %v18553_v30  ;;  %v18573_v36 = vld [vmem:[#allocation2 + $0xc2] sm:$0xff] }
 0x118   :  { %15957 = vmatprep.mubr.msk.f32.mxu1 %vm298_vm3, %v18066_v38  ;;  %v18581_v38 = vld [vmem:[#allocation2 + $0xd2] sm:$0xff] }
 0x11a   :  { %15860 = vmatmul.mubr.msk.f32.gmra.mxu0 %vm298_vm3, %v18561_v32 }
 0x11b   :  { %15958 = vmatmul.mubr.msk.f32.gmra.mxu1 %vm298_vm3, %v2372_v5  ;;  %15862 = vmatprep.mubr.msk.f32.mxu0 %vm298_vm3, %v1663_v7  ;;  %v18629_v5 = vld [vmem:[#allocation2 + $0x182] sm:$0xff] }
 0x11c   :  { %15960 = vmatprep.mubr.msk.f32.mxu1 %vm298_vm3, %v18068_v42  ;;  %v18593_v42 = vld [vmem:[#allocation2 + $0xf2] sm:$0xff]  ;;  %v1679_v7 = vld [vmem:[#allocation2 + $0x1e2] sm:$0xff] }
 0x11e   :  { %15863 = vmatmul.mubr.msk.f32.gmra.mxu0 %vm298_vm3, %v18569_v34 }
 0x11f   :  { %15961 = vmatmul.mubr.msk.f32.gmra.mxu1 %vm298_vm3, %v18081_v46  ;;  %15865 = vmatprep.mubr.msk.f32.mxu0 %vm298_vm3, %v18573_v36  ;;  %v18597_v46 = vld [vmem:[#allocation2 + $0x102] sm:$0xff] }
 0x120   :  { %15963 = vmatprep.mubr.msk.f32.mxu1 %vm298_vm3, %v18102_v53  ;;  %v18605_v53 = vld [vmem:[#allocation2 + $0x112] sm:$0xff] }
 0x122   :  { %15866 = vmatmul.mubr.msk.f32.gmra.mxu0 %vm298_vm3, %v18581_v38 }
 0x123   :  { %15964 = vmatmul.mubr.msk.f32.gmra.mxu1 %vm298_vm3, %v18138_v62  ;;  %15868 = vmatprep.mubr.msk.f32.mxu0 %vm298_vm3, %v18585_v18  ;;  %v2380_v62 = vld [vmem:[#allocation2 + $0x120] sm:$0xff] }
 0x124   :  { %15966 = vmatprep.mubr.msk.f32.mxu1 %vm298_vm3, %v18165_v4  ;;  %v18613_v4 = vld [vmem:[#allocation2 + $0x152] sm:$0xff] }
 0x126   :  { %15869 = vmatmul.mubr.msk.f32.gmra.mxu0 %vm298_vm3, %v18593_v42 }
 0x127   :  { %15967 = vmatmul.mubr.msk.f32.gmra.mxu1 %vm298_vm3, %v18167_v6  ;;  %15871 = vmatprep.mubr.msk.f32.mxu0 %vm298_vm3, %v18597_v46  ;;  %v18617_v6 = vld [vmem:[#allocation2 + $0x162] sm:$0xff] }
 0x128   :  { %15969 = vmatprep.mubr.msk.f32.mxu1 %vm298_vm3, %v18175_v8  ;;  %v18625_v8 = vld [vmem:[#allocation2 + $0x172] sm:$0xff] }
 0x12a   :  { %15872 = vmatmul.mubr.msk.f32.gmra.mxu0 %vm298_vm3, %v18605_v53 }
 0x12b   :  { %15970 = vmatmul.mubr.msk.f32.gmra.mxu1 %vm298_vm3, %v2380_v62  ;;  %15874 = vmatprep.mubr.msk.f32.mxu0 %vm298_vm3, %v1671_v33  ;;  %v18673_v62 = vld [vmem:[#allocation2 + $0x222] sm:$0xff] }
 0x12c   :  { %15972 = vmatprep.mubr.msk.f32.mxu1 %vm298_vm3, %v18182_v12  ;;  %v18637_v12 = vld [vmem:[#allocation2 + $0x192] sm:$0xff]  ;;  %v1687_v33 = vld [vmem:[#allocation2 + $0x282] sm:$0xff] }
 0x12e   :  { %15875 = vmatmul.mubr.msk.f32.gmra.mxu0 %vm298_vm3, %v18613_v4 }
 0x12f   :  { %15973 = vmatmul.mubr.msk.f32.gmra.mxu1 %vm298_vm3, %v18184_v14  ;;  %15877 = vmatprep.mubr.msk.f32.mxu0 %vm298_vm3, %v18617_v6  ;;  %v18641_v14 = vld [vmem:[#allocation2 + $0x1a2] sm:$0xff] }
 0x130   :  { %15975 = vmatprep.mubr.msk.f32.mxu1 %vm298_vm3, %v18186_v16  ;;  %v18649_v16 = vld [vmem:[#allocation2 + $0x1b2] sm:$0xff] }
 0x132   :  { %15878 = vmatmul.mubr.msk.f32.gmra.mxu0 %vm298_vm3, %v18625_v8 }
 0x133   :  { %15976 = vmatmul.mubr.msk.f32.gmra.mxu1 %vm298_vm3, %v18212_v23  ;;  %15880 = vmatprep.mubr.msk.f32.mxu0 %vm298_vm3, %v18629_v5  ;;  %v2388_v23 = vld [vmem:[#allocation2 + $0x1c0] sm:$0xff] }
 0x134   :  { %15978 = vmatprep.mubr.msk.f32.mxu1 %vm298_vm3, %v18222_v29  ;;  %v18657_v29 = vld [vmem:[#allocation2 + $0x1f2] sm:$0xff] }
 0x136   :  { %15881 = vmatmul.mubr.msk.f32.gmra.mxu0 %vm298_vm3, %v18637_v12 }
 0x137   :  { %15979 = vmatmul.mubr.msk.f32.gmra.mxu1 %vm298_vm3, %v18250_v41  ;;  %15883 = vmatprep.mubr.msk.f32.mxu0 %vm298_vm3, %v18641_v14  ;;  %v18661_v41 = vld [vmem:[#allocation2 + $0x202] sm:$0xff] }
 0x138   :  { %15981 = vmatprep.mubr.msk.f32.mxu1 %vm298_vm3, %v18288_v54  ;;  %v18669_v54 = vld [vmem:[#allocation2 + $0x212] sm:$0xff] }
 0x13a   :  { %15884 = vmatmul.mubr.msk.f32.gmra.mxu0 %vm298_vm3, %v18649_v16 }
 0x13b   :  { %15982 = vmatmul.mubr.msk.f32.gmra.mxu1 %vm298_vm3, %v2388_v23  ;;  %15886 = vmatprep.mubr.msk.f32.mxu0 %vm298_vm3, %v1679_v7 }
 0x13c   :  { %15984 = vmatprep.mubr.msk.f32.mxu1 %vm298_vm3, %v18297_v58  ;;  %v18681_v58 = vld [vmem:[#allocation2 + $0x232] sm:$0xff] }
 0x13d   :  { %22812 = vst [vmem:[#allocation13_spill] sm:$0xff] %v18681_v58 }
 0x13e   :  { %15887 = vmatmul.mubr.msk.f32.gmra.mxu0 %vm298_vm3, %v18657_v29 }
 0x13f   :  { %15985 = vmatmul.mubr.msk.f32.gmra.mxu1 %vm298_vm3, %v18299_v60  ;;  %15889 = vmatprep.mubr.msk.f32.mxu0 %vm298_vm3, %v18661_v41  ;;  %v18685_v60 = vld [vmem:[#allocation2 + $0x242] sm:$0xff] }
 0x140   :  { %15987 = vmatprep.mubr.msk.f32.mxu1 %vm298_vm3, %v18307_v63  ;;  %22813 = vst [vmem:[#allocation14_spill] sm:$0xff] %v18685_v60  ;;  %v18693_v63 = vld [vmem:[#allocation2 + $0x252] sm:$0xff] }
 0x141   :  { %22814 = vst [vmem:[#allocation15_spill] sm:$0xff] %v18693_v63 }
 0x142   :  { %15890 = vmatmul.mubr.msk.f32.gmra.mxu0 %vm298_vm3, %v18669_v54 }
 0x143   :  { %15988 = vmatmul.mubr.msk.f32.gmra.mxu1 %vm298_vm3, %v18309_v1  ;;  %15892 = vmatprep.mubr.msk.f32.mxu0 %vm298_vm3, %v18673_v62  ;;  %v2396_v1 = vld [vmem:[#allocation2 + $0x260] sm:$0xff] }
 0x144   :  { %15990 = vmatprep.mubr.msk.f32.mxu1 %vm298_vm3, %v18317_v3  ;;  %v18701_v3 = vld [vmem:[#allocation2 + $0x292] sm:$0xff] }
 0x145   :  { %22815 = vst [vmem:[#allocation16_spill] sm:$0xff] %v18701_v3 }
 0x146   :  { %15893 = vmatmul.mubr.msk.f32.gmra.mxu0 %vm298_vm3, %v18681_v58 }
 0x147   :  { %15991 = vmatmul.mubr.msk.f32.gmra.mxu1 %vm298_vm3, %v18321_v9  ;;  %15895 = vmatprep.mubr.msk.f32.mxu0 %vm298_vm3, %v18685_v60  ;;  %v18705_v9 = vld [vmem:[#allocation2 + $0x2a2] sm:$0xff] }
 0x148   :  { %15993 = vmatprep.mubr.msk.f32.mxu1 %vm298_vm3, %v18335_v13 }
 0x14a   :  { %15896 = vmatmul.mubr.msk.f32.gmra.mxu0 %vm298_vm3, %v18693_v63  ;;  %v18719_v63 = vld [vmem:[#allocation2 + $0x2c2] sm:$0xff] }
 0x14b   :  { %15994 = vmatmul.mubr.msk.f32.gmra.mxu1 %vm298_vm3, %v2396_v1  ;;  %15898 = vmatprep.mubr.msk.f32.mxu0 %vm298_vm3, %v1687_v33  ;;  %v18715_v1 = vld [vmem:[#allocation2 + $0x2b2] sm:$0xff] }
 0x14c   :  { %15996 = vmatprep.mubr.msk.f32.mxu1 %vm298_vm3, %v18346_v20  ;;  %22816 = vst [vmem:[#allocation17_spill] sm:$0xff] %v18715_v1 }
 0x14e   :  { %v15656_v23 = vpop.f32.mrf.mxu0  ;;  %15899 = vmatmul.mubr.msk.f32.gmra.mxu0 %vm298_vm3, %v18701_v3 }
 0x14f   :  { %v15754_v7 = vpop.f32.mrf.mxu1  ;;  %15997 = vmatmul.mubr.msk.f32.gmra.mxu1 %vm298_vm3, %v18351_v24  ;;  %15901 = vmatprep.mubr.msk.f32.mxu0 %vm298_vm3, %v18705_v9 }
 0x150   :  { %v18711_v13 = vadd.f32 %v15754_v7, %v15656_v23  ;;  %15999 = vmatprep.mubr.msk.f32.mxu1 %vm298_vm3, %v18360_v27  ;;  %v756_v20 = vpop.f32.mrf.mxu0  ;;  %v18731_v27 = vld [vmem:[#allocation2 + $0x2d2] sm:$0xff] }
 0x151   :  { %v1336_v33 = vpop.f32.mrf.mxu1  ;;  %22819 = vst [vmem:[#allocation20_spill] sm:$0xff] %v18731_v27 }
 0x152   :  { %v18721_v60 = vadd.f32 %v1336_v33, %v756_v20  ;;  %v15659_v3 = vpop.f32.mrf.mxu0  ;;  %15902 = vmatmul.mubr.msk.f32.gmra.mxu0 %vm298_vm3, %v18715_v1  ;;  %v18735_v20 = vld [vmem:[#allocation2 + $0x2e2] sm:$0xff] }
 0x153   :  { %v15757_v58 = vpop.f32.mrf.mxu1  ;;  %16000 = vmatmul.mubr.msk.f32.gmra.mxu1 %vm298_vm3, %v18365_v35  ;;  %15904 = vmatprep.mubr.msk.f32.mxu0 %vm298_vm3, %v18719_v63 }
 0x154   :  { %22817 = vst [vmem:[#allocation18_spill] sm:$0xff] %v18721_v60  ;;  %v18727_v24 = vadd.f32 %v15757_v58, %v15659_v3  ;;  %16002 = vmatprep.mubr.msk.f32.mxu1 %vm298_vm3, %v18374_v39  ;;  %v766_v23 = vpop.f32.mrf.mxu0  ;;  %v18747_v39 = vld [vmem:[#allocation2 + $0x2f2] sm:$0xff]  ;;  %v2404_v58 = vld [vmem:[#allocation2 + $0x300] sm:$0xff] }
 0x155   :  { %v1346_v7 = vpop.f32.mrf.mxu1 }
 0x156   :  { %22818 = vst [vmem:[#allocation19_spill] sm:$0xff] %v18727_v24  ;;  %v18737_v33 = vadd.f32 %v1346_v7, %v766_v23  ;;  %v15662_v60 = vpop.f32.mrf.mxu0  ;;  %15905 = vmatmul.mubr.msk.f32.gmra.mxu0 %vm298_vm3, %v18731_v27  ;;  %v1695_v7 = vld [vmem:[#allocation2 + $0x322] sm:$0xff] }
 0x157   :  { %v15760_v1 = vpop.f32.mrf.mxu1  ;;  %16003 = vmatmul.mubr.msk.f32.gmra.mxu1 %vm298_vm3, %v18379_v44  ;;  %15907 = vmatprep.mubr.msk.f32.mxu0 %vm298_vm3, %v18735_v20 }
 0x158   :  { %22820 = vst [vmem:[#allocation21_spill] sm:$0xff] %v18737_v33  ;;  %v18743_v35 = vadd.f32 %v15760_v1, %v15662_v60  ;;  %16005 = vmatprep.mubr.msk.f32.mxu1 %vm298_vm3, %v18388_v47  ;;  %v776_v3 = vpop.f32.mrf.mxu0  ;;  %v18759_v60 = vld [vmem:[#allocation2 + $0x332] sm:$0xff] }
 0x159   :  { %v1356_v23 = vpop.f32.mrf.mxu1 }
 0x15a   :  { %22821 = vst [vmem:[#allocation22_spill] sm:$0xff] %v18743_v35  ;;  %v18751_v33 = vadd.f32 %v1356_v23, %v776_v3  ;;  %v15665_v27 = vpop.f32.mrf.mxu0  ;;  %15908 = vmatmul.mubr.msk.f32.gmra.mxu0 %vm298_vm3, %v18747_v39  ;;  %v18763_v3 = vld [vmem:[#allocation2 + $0x342] sm:$0xff] }
 0x15b   :  { %v15763_v24 = vpop.f32.mrf.mxu1  ;;  %16006 = vmatmul.mubr.msk.f32.gmra.mxu1 %vm298_vm3, %v2404_v58  ;;  %15910 = vmatprep.mubr.msk.f32.mxu0 %vm298_vm3, %v1695_v7  ;;  %v18779_v7 = vld [vmem:[#allocation2 + $0x362] sm:$0xff] }
 0x15c   :  { %22822 = vst [vmem:[#allocation23_spill] sm:$0xff] %v18751_v33  ;;  %v18756_v44 = vadd.f32 %v15763_v24, %v15665_v27  ;;  %16008 = vmatprep.mubr.msk.f32.mxu1 %vm298_vm3, %v18395_v51  ;;  %v786_v47 = vpop.f32.mrf.mxu0  ;;  %v18775_v51 = vld [vmem:[#allocation2 + $0x352] sm:$0xff] }
 0x15d   :  { %v1366_v1 = vpop.f32.mrf.mxu1  ;;  %22824 = vst [vmem:[#allocation25_spill] sm:$0xff] %v18775_v51 }
 0x15e   :  { %v18765_v23 = vadd.f32 %v1366_v1, %v786_v47  ;;  %v15668_v33 = vpop.f32.mrf.mxu0  ;;  %15911 = vmatmul.mubr.msk.f32.gmra.mxu0 %vm298_vm3, %v18759_v60 }
 0x15f   :  { %v15766_v35 = vpop.f32.mrf.mxu1  ;;  %16009 = vmatmul.mubr.msk.f32.gmra.mxu1 %vm298_vm3, %v18397_v55  ;;  %15913 = vmatprep.mubr.msk.f32.mxu0 %vm298_vm3, %v18763_v3 }
 0x160   :  { %22823 = vst [vmem:[#allocation24_spill] sm:$0xff] %v18765_v23  ;;  %v18771_v24 = vadd.f32 %v15766_v35, %v15668_v33  ;;  %16011 = vmatprep.mubr.msk.f32.mxu1 %vm298_vm3, %v18405_v57  ;;  %v796_v27 = vpop.f32.mrf.mxu0  ;;  %v18791_v57 = vld [vmem:[#allocation2 + $0x372] sm:$0xff] }
 0x161   :  { %v1376_v58 = vpop.f32.mrf.mxu1  ;;  %22827 = vst [vmem:[#allocation28_spill] sm:$0xff] %v18791_v57 }
 0x162   :  { %v18781_v47 = vadd.f32 %v1376_v58, %v796_v27  ;;  %v15671_v1 = vpop.f32.mrf.mxu0  ;;  %15914 = vmatmul.mubr.msk.f32.gmra.mxu0 %vm298_vm3, %v18775_v51  ;;  %v18795_v27 = vld [vmem:[#allocation2 + $0x382] sm:$0xff] }
 0x163   :  { %v15769_v23 = vpop.f32.mrf.mxu1  ;;  %16012 = vmatmul.mubr.msk.f32.gmra.mxu1 %vm298_vm3, %v18407_v61  ;;  %15916 = vmatprep.mubr.msk.f32.mxu0 %vm298_vm3, %v18779_v7 }
 0x164   :  { %22825 = vst [vmem:[#allocation26_spill] sm:$0xff] %v18781_v47  ;;  %v18787_v55 = vadd.f32 %v15769_v23, %v15671_v1  ;;  %16014 = vmatprep.mubr.msk.f32.mxu1 %vm298_vm3, %v18415_v2  ;;  %v806_v33 = vpop.f32.mrf.mxu0  ;;  %v18807_v2 = vld [vmem:[#allocation2 + $0x392] sm:$0xff]  ;;  %v2412_v23 = vld [vmem:[#allocation2 + $0x3a0] sm:$0xff] }
 0x165   :  { %v1386_v35 = vpop.f32.mrf.mxu1 }
 0x166   :  { %22826 = vst [vmem:[#allocation27_spill] sm:$0xff] %v18787_v55  ;;  %v18797_v58 = vadd.f32 %v1386_v35, %v806_v33  ;;  %v15674_v47 = vpop.f32.mrf.mxu0  ;;  %15917 = vmatmul.mubr.msk.f32.gmra.mxu0 %vm298_vm3, %v18791_v57  ;;  %v1703_v35 = vld [vmem:[#allocation2 + $0x3c2] sm:$0xff] }
 0x167   :  { %v15772_v51 = vpop.f32.mrf.mxu1  ;;  %16015 = vmatmul.mubr.msk.f32.gmra.mxu1 %vm298_vm3, %v18420_v11  ;;  %15919 = vmatprep.mubr.msk.f32.mxu0 %vm298_vm3, %v18795_v27 }
 0x168   :  { %22828 = vst [vmem:[#allocation29_spill] sm:$0xff] %v18797_v58  ;;  %v18803_v61 = vadd.f32 %v15772_v51, %v15674_v47  ;;  %16017 = vmatprep.mubr.msk.f32.mxu1 %vm298_vm3, %v18429_v17  ;;  %v816_v1 = vpop.f32.mrf.mxu0  ;;  %v18819_v51 = vld [vmem:[#allocation2 + $0x3d2] sm:$0xff] }
 0x169   :  { %v1396_v33 = vpop.f32.mrf.mxu1 }
 0x16a   :  { %22829 = vst [vmem:[#allocation30_spill] sm:$0xff] %v18803_v61  ;;  %v18811_v58 = vadd.f32 %v1396_v33, %v816_v1  ;;  %v15677_v57 = vpop.f32.mrf.mxu0  ;;  %15920 = vmatmul.mubr.msk.f32.gmra.mxu0 %vm298_vm3, %v18807_v2  ;;  %v18823_v1 = vld [vmem:[#allocation2 + $0x3e2] sm:$0xff] }
 0x16b   :  { %v15775_v55 = vpop.f32.mrf.mxu1  ;;  %16018 = vmatmul.mubr.msk.f32.gmra.mxu1 %vm298_vm3, %v2412_v23  ;;  %15922 = vmatprep.mubr.msk.f32.mxu0 %vm298_vm3, %v1703_v35  ;;  %v18839_v35 = vld [vmem:[#allocation2 + $0x402] sm:$0xff] }
 0x16c   :  { %22830 = vst [vmem:[#allocation31_spill] sm:$0xff] %v18811_v58  ;;  %v18816_v11 = vadd.f32 %v15775_v55, %v15677_v57  ;;  %16020 = vmatprep.mubr.msk.f32.mxu1 %vm298_vm3, %v18436_v22  ;;  %v826_v17 = vpop.f32.mrf.mxu0  ;;  %v18835_v22 = vld [vmem:[#allocation2 + $0x3f2] sm:$0xff] }
 0x16d   :  { %v1406_v47 = vpop.f32.mrf.mxu1  ;;  %22832 = vst [vmem:[#allocation33_spill] sm:$0xff] %v18835_v22 }
 0x16e   :  { %v18825_v33 = vadd.f32 %v1406_v47, %v826_v17  ;;  %v15680_v58 = vpop.f32.mrf.mxu0  ;;  %15923 = vmatmul.mubr.msk.f32.gmra.mxu0 %vm298_vm3, %v18819_v51 }
 0x16f   :  { %v15778_v61 = vpop.f32.mrf.mxu1  ;;  %16021 = vmatmul.mubr.msk.f32.gmra.mxu1 %vm298_vm3, %v18438_v31  ;;  %15925 = vmatprep.mubr.msk.f32.mxu0 %vm298_vm3, %v18823_v1 }
 0x170   :  { %22831 = vst [vmem:[#allocation32_spill] sm:$0xff] %v18825_v33  ;;  %v18831_v55 = vadd.f32 %v15778_v61, %v15680_v58  ;;  %16023 = vmatprep.mubr.msk.f32.mxu1 %vm298_vm3, %v18446_v37  ;;  %v836_v57 = vpop.f32.mrf.mxu0  ;;  %v18851_v37 = vld [vmem:[#allocation2 + $0x412] sm:$0xff] }
 0x171   :  { %v1416_v23 = vpop.f32.mrf.mxu1  ;;  %22835 = vst [vmem:[#allocation36_spill] sm:$0xff] %v18851_v37 }
 0x172   :  { %v18841_v17 = vadd.f32 %v1416_v23, %v836_v57  ;;  %v15683_v47 = vpop.f32.mrf.mxu0  ;;  %15926 = vmatmul.mubr.msk.f32.gmra.mxu0 %vm298_vm3, %v18835_v22  ;;  %v18855_v57 = vld [vmem:[#allocation2 + $0x422] sm:$0xff] }
 0x173   :  { %v15781_v33 = vpop.f32.mrf.mxu1  ;;  %16024 = vmatmul.mubr.msk.f32.gmra.mxu1 %vm298_vm3, %v18448_v43  ;;  %15928 = vmatprep.mubr.msk.f32.mxu0 %vm298_vm3, %v18839_v35 }
 0x174   :  { %22833 = vst [vmem:[#allocation34_spill] sm:$0xff] %v18841_v17  ;;  %v18847_v31 = vadd.f32 %v15781_v33, %v15683_v47  ;;  %16026 = vmatprep.mubr.msk.f32.mxu1 %vm298_vm3, %v18456_v48  ;;  %v846_v58 = vpop.f32.mrf.mxu0  ;;  %v18867_v48 = vld [vmem:[#allocation2 + $0x432] sm:$0xff]  ;;  %v2420_v33 = vld [vmem:[#allocation2 + $0x440] sm:$0xff] }
 0x175   :  { %v1426_v61 = vpop.f32.mrf.mxu1 }
 0x176   :  { %22834 = vst [vmem:[#allocation35_spill] sm:$0xff] %v18847_v31  ;;  %v18857_v23 = vadd.f32 %v1426_v61, %v846_v58  ;;  %v15686_v17 = vpop.f32.mrf.mxu0  ;;  %15929 = vmatmul.mubr.msk.f32.gmra.mxu0 %vm298_vm3, %v18851_v37  ;;  %v1711_v61 = vld [vmem:[#allocation2 + $0x462] sm:$0xff] }
 0x177   :  { %v15784_v22 = vpop.f32.mrf.mxu1  ;;  %16027 = vmatmul.mubr.msk.f32.gmra.mxu1 %vm298_vm3, %v18461_v52  ;;  %15931 = vmatprep.mubr.msk.f32.mxu0 %vm298_vm3, %v18855_v57 }
 0x178   :  { %22836 = vst [vmem:[#allocation37_spill] sm:$0xff] %v18857_v23  ;;  %v18863_v43 = vadd.f32 %v15784_v22, %v15686_v17  ;;  %16029 = vmatprep.mubr.msk.f32.mxu1 %vm298_vm3, %v18470_v59  ;;  %v856_v47 = vpop.f32.mrf.mxu0  ;;  %v18879_v22 = vld [vmem:[#allocation2 + $0x472] sm:$0xff] }
 0x179   :  { %v1436_v58 = vpop.f32.mrf.mxu1 }
 0x17a   :  { %22837 = vst [vmem:[#allocation38_spill] sm:$0xff] %v18863_v43  ;;  %v18871_v23 = vadd.f32 %v1436_v58, %v856_v47  ;;  %v15689_v37 = vpop.f32.mrf.mxu0  ;;  %15932 = vmatmul.mubr.msk.f32.gmra.mxu0 %vm298_vm3, %v18867_v48  ;;  %v18883_v47 = vld [vmem:[#allocation2 + $0x482] sm:$0xff] }
 0x17b   :  { %v15787_v31 = vpop.f32.mrf.mxu1  ;;  %16030 = vmatmul.mubr.msk.f32.gmra.mxu1 %vm298_vm3, %v2420_v33  ;;  %15934 = vmatprep.mubr.msk.f32.mxu0 %vm298_vm3, %v1711_v61  ;;  %v18899_v61 = vld [vmem:[#allocation2 + $0x4a2] sm:$0xff] }
 0x17c   :  { %22838 = vst [vmem:[#allocation39_spill] sm:$0xff] %v18871_v23  ;;  %v18876_v52 = vadd.f32 %v15787_v31, %v15689_v37  ;;  %16032 = vmatprep.mubr.msk.f32.mxu1 %vm298_vm3, %v18477_v15  ;;  %v866_v59 = vpop.f32.mrf.mxu0  ;;  %v18895_v15 = vld [vmem:[#allocation2 + $0x492] sm:$0xff] }
 0x17d   :  { %v1446_v17 = vpop.f32.mrf.mxu1  ;;  %22840 = vst [vmem:[#allocation41_spill] sm:$0xff] %v18895_v15 }
 0x17e   :  { %v18885_v58 = vadd.f32 %v1446_v17, %v866_v59  ;;  %v15692_v23 = vpop.f32.mrf.mxu0  ;;  %15935 = vmatmul.mubr.msk.f32.gmra.mxu0 %vm298_vm3, %v18879_v22 }
 0x17f   :  { %v15790_v43 = vpop.f32.mrf.mxu1  ;;  %16033 = vmatmul.mubr.msk.f32.gmra.mxu1 %vm298_vm3, %v18479_v19  ;;  %15937 = vmatprep.mubr.msk.f32.mxu0 %vm298_vm3, %v18883_v47 }
 0x180   :  { %22839 = vst [vmem:[#allocation40_spill] sm:$0xff] %v18885_v58  ;;  %v18891_v31 = vadd.f32 %v15790_v43, %v15692_v23  ;;  %16035 = vmatprep.mubr.msk.f32.mxu1 %vm298_vm3, %v18487_v26  ;;  %v876_v37 = vpop.f32.mrf.mxu0  ;;  %v18911_v26 = vld [vmem:[#allocation2 + $0x4b2] sm:$0xff] }
 0x181   :  { %v1456_v33 = vpop.f32.mrf.mxu1  ;;  %22843 = vst [vmem:[#allocation44_spill] sm:$0xff] %v18911_v26 }
 0x182   :  { %v18901_v59 = vadd.f32 %v1456_v33, %v876_v37  ;;  %v15695_v17 = vpop.f32.mrf.mxu0  ;;  %15938 = vmatmul.mubr.msk.f32.gmra.mxu0 %vm298_vm3, %v18895_v15  ;;  %v18915_v37 = vld [vmem:[#allocation2 + $0x4c2] sm:$0xff] }
 0x183   :  { %v15793_v58 = vpop.f32.mrf.mxu1  ;;  %16036 = vmatmul.mubr.msk.f32.gmra.mxu1 %vm298_vm3, %v18489_v40  ;;  %15940 = vmatprep.mubr.msk.f32.mxu0 %vm298_vm3, %v18899_v61 }
 0x184   :  { %22841 = vst [vmem:[#allocation42_spill] sm:$0xff] %v18901_v59  ;;  %v18907_v19 = vadd.f32 %v15793_v58, %v15695_v17  ;;  %16038 = vmatprep.mubr.msk.f32.mxu1 %vm298_vm3, %v18497_v49  ;;  %v886_v23 = vpop.f32.mrf.mxu0  ;;  %v18927_v49 = vld [vmem:[#allocation2 + $0x4d2] sm:$0xff]  ;;  %v2428_v58 = vld [vmem:[#allocation2 + $0x4e0] sm:$0xff] }
 0x185   :  { %v1466_v43 = vpop.f32.mrf.mxu1  ;;  %22845 = vst [vmem:[#allocation46_spill] sm:$0xff] %v18927_v49 }
 0x186   :  { %22842 = vst [vmem:[#allocation43_spill] sm:$0xff] %v18907_v19  ;;  %v18917_v33 = vadd.f32 %v1466_v43, %v886_v23  ;;  %v15698_v59 = vpop.f32.mrf.mxu0  ;;  %15941 = vmatmul.mubr.msk.f32.gmra.mxu0 %vm298_vm3, %v18911_v26  ;;  %v3075_v43 = vld [vmem:[#allocation2 + $0x11] sm:$0xff] }
 0x187   :  { %v15796_v15 = vpop.f32.mrf.mxu1  ;;  %16039 = vmatmul.mubr.msk.f32.gmra.mxu1 %vm298_vm3, %v18502_v0  ;;  %15943 = vmatprep.mubr.msk.f32.mxu0 %vm298_vm3, %v18915_v37 }
 0x188   :  { %22844 = vst [vmem:[#allocation45_spill] sm:$0xff] %v18917_v33  ;;  %v18923_v40 = vadd.f32 %v15796_v15, %v15698_v59  ;;  %16041 = vmatprep.mubr.msk.f32.mxu1 %vm298_vm3, %v18511_v10  ;;  %v896_v17 = vpop.f32.mrf.mxu0  ;;  %v18939_v15 = vld [vmem:[#allocation2 + $0x21] sm:$0xff]  ;;  %v5271_v10 = vld [vmem:[#allocation3 + $0x1c] sm:$0xf] }
 0x189   :  { %v1476_v23 = vpop.f32.mrf.mxu1  ;;  %16338 = vmatprep.subr.msk.mxu1 %vm686_vm2, %v5271_v10 }
 0x18a   :  { %v18931_v33 = vadd.f32 %v1476_v23, %v896_v17  ;;  %v15701_v26 = vpop.f32.mrf.mxu0  ;;  %15944 = vmatmul.mubr.msk.f32.gmra.mxu0 %vm298_vm3, %v18927_v49  ;;  %v18943_v23 = vld [vmem:[#allocation2 + $0x31] sm:$0xff] }
 0x18b   :  { %v15799_v19 = vpop.f32.mrf.mxu1  ;;  %16042 = vmatmul.mubr.msk.f32.gmra.mxu1 %vm298_vm3, %v2428_v58  ;;  %16046 = vmatprep.mubr.msk.f32.mxu0 %vm298_vm3, %v3075_v43 }
 0x18c   :  { %22846 = vst [vmem:[#allocation47_spill] sm:$0xff] %v18931_v33  ;;  %v18936_v0 = vadd.f32 %v15799_v19, %v15701_v26  ;;  %16144 = vmatprep.mubr.msk.f32.mxu1 %vm298_vm3, %v18517_v21  ;;  %v906_v59 = vpop.f32.mrf.mxu0  ;;  %v18952_v19 = vld [vmem:[#allocation3 + $0x20] sm:$0xf] }
 0x18d   :  { %v1486_v17 = vpop.f32.mrf.mxu1  ;;  %22847 = vst [vmem:[#allocation48_spill] sm:$0xff] %v18952_v19  ;;  %v18960_v26 = vld [vmem:[#allocation2 + $0x41] sm:$0xff] }
 0x18e   :  { %v18946_v33 = vadd.f32 %v1486_v17, %v906_v59  ;;  %v15704_v49 = vpop.f32.mrf.mxu0  ;;  %16047 = vmatmul.mubr.msk.f32.vlgmr.msra.gmra.mxu0 %vm298_vm3, %v18939_v15  ;;  %22848 = vst [vmem:[#allocation49_spill] sm:$0xff] %v18960_v26  ;;  %v18964_v17 = vld [vmem:[#allocation2 + $0x51] sm:$0xff] }
 0x18f   :  { %v15802_v58 = vpop.f32.mrf.mxu1  ;;  %16145 = vmatmul.mubr.msk.f32.vlgmr.msra.gmra.mxu1 %vm298_vm3, %v18521_v45  ;;  %16241 = vmatpush3.msk.msra.mxu0 %vm686_vm2, %v18528_v50 }
 0x190   :  { %v18954_v21 = vadd.f32 %v15802_v58, %v15704_v49  ;;  %16049 = vmatprep.mubr.msk.f32.mxu0 %vm298_vm3, %v18943_v23  ;;  %v916_v43 = vpop.f32.mrf.mxu0  ;;  %16147 = vmatprep.mubr.msk.f32.mxu1 %vm298_vm3, %v18534_v25  ;;  %v18979_v25 = vld [vmem:[#allocation2 + $0x61] sm:$0xff] }
 0x191   :  { %v1496_v59 = vpop.f32.mrf.mxu1  ;;  %16339 = vmatpush3.msk.msra.mxu1 %vm686_vm2, %v5271_v10  ;;  %16436 = vmatprep.subr.msk.mxu0 %vm686_vm2, %v18952_v19  ;;  %22851 = vst [vmem:[#allocation52_spill] sm:$0xff] %v18979_v25 }
 0x192   :  { %v18967_v45 = vadd.f32 %v1496_v59, %v916_v43  ;;  %v15707_v50 = vpop.f32.mrf.mxu0  ;;  %16050 = vmatmul.mubr.msk.f32.gmra.mxu0 %vm298_vm3, %v18960_v26  ;;  %v18983_v59 = vld [vmem:[#allocation2 + $0x71] sm:$0xff] }
 0x193   :  { %v15805_v49 = vpop.f32.mrf.mxu1  ;;  %16148 = vmatmul.mubr.msk.f32.gmra.mxu1 %vm298_vm3, %v18538_v56  ;;  %16052 = vmatprep.mubr.msk.f32.mxu0 %vm298_vm3, %v18964_v17 }
 0x194   :  { %22849 = vst [vmem:[#allocation50_spill] sm:$0xff] %v18967_v45  ;;  %v18975_v58 = vadd.f32 %v15805_v49, %v15707_v50  ;;  %16150 = vmatprep.mubr.msk.f32.mxu1 %vm298_vm3, %v18549_v28  ;;  %v926_v10 = vpop.f32.mrf.mxu0  ;;  %v18995_v28 = vld [vmem:[#allocation2 + $0x81] sm:$0xff] }
 0x195   :  { %v1506_v43 = vpop.f32.mrf.mxu1  ;;  %v3792_v50 = vld [vmem:[#allocation2 + $0x82] sm:$0xff] }
 0x196   :  { %22850 = vst [vmem:[#allocation51_spill] sm:$0xff] %v18975_v58  ;;  %v18985_v45 = vadd.f32 %v1506_v43, %v926_v10  ;;  %v15710_v26 = vpop.f32.mrf.mxu0  ;;  %16053 = vmatmul.mubr.msk.f32.gmra.mxu0 %vm298_vm3, %v18979_v25  ;;  %v3083_v43 = vld [vmem:[#allocation2 + $0xb1] sm:$0xff] }
 0x197   :  { %v15808_v19 = vpop.f32.mrf.mxu1  ;;  %16151 = vmatmul.mubr.msk.f32.gmra.mxu1 %vm298_vm3, %v18553_v30  ;;  %16055 = vmatprep.mubr.msk.f32.mxu0 %vm298_vm3, %v18983_v59 }
 0x198   :  { %22852 = vst [vmem:[#allocation53_spill] sm:$0xff] %v18985_v45  ;;  %v18991_v56 = vadd.f32 %v15808_v19, %v15710_v26  ;;  %16153 = vmatprep.mubr.msk.f32.mxu1 %vm298_vm3, %v18561_v32  ;;  %v936_v49 = vpop.f32.mrf.mxu0  ;;  %v19007_v19 = vld [vmem:[#allocation2 + $0xc1] sm:$0xff] }
 0x199   :  { %v1516_v10 = vpop.f32.mrf.mxu1 }
 0x19a   :  { %22853 = vst [vmem:[#allocation54_spill] sm:$0xff] %v18991_v56  ;;  %v18999_v45 = vadd.f32 %v1516_v10, %v936_v49  ;;  %v15713_v25 = vpop.f32.mrf.mxu0  ;;  %16056 = vmatmul.mubr.msk.f32.gmra.mxu0 %vm298_vm3, %v18995_v28  ;;  %v19011_v49 = vld [vmem:[#allocation2 + $0xd1] sm:$0xff] }
 0x19b   :  { %v15811_v58 = vpop.f32.mrf.mxu1  ;;  %16154 = vmatmul.mubr.msk.f32.gmra.mxu1 %vm298_vm3, %v3792_v50  ;;  %16058 = vmatprep.mubr.msk.f32.mxu0 %vm298_vm3, %v3083_v43  ;;  %v19027_v43 = vld [vmem:[#allocation2 + $0xf1] sm:$0xff] }
 0x19c   :  { %22854 = vst [vmem:[#allocation55_spill] sm:$0xff] %v18999_v45  ;;  %v19004_v30 = vadd.f32 %v15811_v58, %v15713_v25  ;;  %16156 = vmatprep.mubr.msk.f32.mxu1 %vm298_vm3, %v18569_v34  ;;  %v946_v32 = vpop.f32.mrf.mxu0  ;;  %v19023_v34 = vld [vmem:[#allocation2 + $0xe1] sm:$0xff] }
 0x19d   :  { %v1526_v26 = vpop.f32.mrf.mxu1  ;;  %22856 = vst [vmem:[#allocation57_spill] sm:$0xff] %v19023_v34 }
 0x19e   :  { %v19013_v10 = vadd.f32 %v1526_v26, %v946_v32  ;;  %v15716_v45 = vpop.f32.mrf.mxu0  ;;  %16059 = vmatmul.mubr.msk.f32.gmra.mxu0 %vm298_vm3, %v19007_v19 }
 0x19f   :  { %v15814_v56 = vpop.f32.mrf.mxu1  ;;  %16157 = vmatmul.mubr.msk.f32.gmra.mxu1 %vm298_vm3, %v18573_v36  ;;  %16061 = vmatprep.mubr.msk.f32.mxu0 %vm298_vm3, %v19011_v49 }
 0x1a0   :  { %22855 = vst [vmem:[#allocation56_spill] sm:$0xff] %v19013_v10  ;;  %v19019_v58 = vadd.f32 %v15814_v56, %v15716_v45  ;;  %16159 = vmatprep.mubr.msk.f32.mxu1 %vm298_vm3, %v18581_v38  ;;  %v956_v25 = vpop.f32.mrf.mxu0  ;;  %v19039_v38 = vld [vmem:[#allocation2 + $0x101] sm:$0xff] }
 0x1a1   :  { %v1536_v50 = vpop.f32.mrf.mxu1  ;;  %22859 = vst [vmem:[#allocation60_spill] sm:$0xff] %v19039_v38 }
 0x1a2   :  { %v19029_v32 = vadd.f32 %v1536_v50, %v956_v25  ;;  %v15719_v26 = vpop.f32.mrf.mxu0  ;;  %16062 = vmatmul.mubr.msk.f32.gmra.mxu0 %vm298_vm3, %v19023_v34  ;;  %v19043_v25 = vld [vmem:[#allocation2 + $0x111] sm:$0xff] }
 0x1a3   :  { %v15817_v10 = vpop.f32.mrf.mxu1  ;;  %16160 = vmatmul.mubr.msk.f32.gmra.mxu1 %vm298_vm3, %v18585_v18  ;;  %16064 = vmatprep.mubr.msk.f32.mxu0 %vm298_vm3, %v19027_v43 }
 0x1a4   :  { %22857 = vst [vmem:[#allocation58_spill] sm:$0xff] %v19029_v32  ;;  %v19035_v36 = vadd.f32 %v15817_v10, %v15719_v26  ;;  %16162 = vmatprep.mubr.msk.f32.mxu1 %vm298_vm3, %v18593_v42  ;;  %v966_v45 = vpop.f32.mrf.mxu0  ;;  %v19055_v42 = vld [vmem:[#allocation2 + $0x121] sm:$0xff] }
 0x1a5   :  { %v1546_v56 = vpop.f32.mrf.mxu1  ;;  %v3800_v10 = vld [vmem:[#allocation2 + $0x122] sm:$0xff] }
 0x1a6   :  { %22858 = vst [vmem:[#allocation59_spill] sm:$0xff] %v19035_v36  ;;  %v19045_v50 = vadd.f32 %v1546_v56, %v966_v45  ;;  %v15722_v32 = vpop.f32.mrf.mxu0  ;;  %16065 = vmatmul.mubr.msk.f32.gmra.mxu0 %vm298_vm3, %v19039_v38  ;;  %v3091_v56 = vld [vmem:[#allocation2 + $0x151] sm:$0xff] }
 0x1a7   :  { %v15820_v34 = vpop.f32.mrf.mxu1  ;;  %16163 = vmatmul.mubr.msk.f32.gmra.mxu1 %vm298_vm3, %v18597_v46  ;;  %16067 = vmatprep.mubr.msk.f32.mxu0 %vm298_vm3, %v19043_v25 }
 0x1a8   :  { %22860 = vst [vmem:[#allocation61_spill] sm:$0xff] %v19045_v50  ;;  %v19051_v18 = vadd.f32 %v15820_v34, %v15722_v32  ;;  %16165 = vmatprep.mubr.msk.f32.mxu1 %vm298_vm3, %v18605_v53  ;;  %v976_v26 = vpop.f32.mrf.mxu0  ;;  %v19067_v34 = vld [vmem:[#allocation2 + $0x161] sm:$0xff] }
 0x1a9   :  { %v1556_v45 = vpop.f32.mrf.mxu1 }
 0x1aa   :  { %22861 = vst [vmem:[#allocation62_spill] sm:$0xff] %v19051_v18  ;;  %v19059_v50 = vadd.f32 %v1556_v45, %v976_v26  ;;  %v15725_v38 = vpop.f32.mrf.mxu0  ;;  %16068 = vmatmul.mubr.msk.f32.gmra.mxu0 %vm298_vm3, %v19055_v42  ;;  %v19071_v26 = vld [vmem:[#allocation2 + $0x171] sm:$0xff] }
 0x1ab   :  { %v15823_v36 = vpop.f32.mrf.mxu1  ;;  %16166 = vmatmul.mubr.msk.f32.gmra.mxu1 %vm298_vm3, %v3800_v10  ;;  %16070 = vmatprep.mubr.msk.f32.mxu0 %vm298_vm3, %v3091_v56  ;;  %v19087_v56 = vld [vmem:[#allocation2 + $0x191] sm:$0xff] }
 0x1ac   :  { %22862 = vst [vmem:[#allocation63_spill] sm:$0xff] %v19059_v50  ;;  %v19064_v46 = vadd.f32 %v15823_v36, %v15725_v38  ;;  %16168 = vmatprep.mubr.msk.f32.mxu1 %vm298_vm3, %v18613_v4  ;;  %v986_v53 = vpop.f32.mrf.mxu0  ;;  %v19083_v4 = vld [vmem:[#allocation2 + $0x181] sm:$0xff] }
 0x1ad   :  { %v1566_v32 = vpop.f32.mrf.mxu1  ;;  %22864 = vst [vmem:[#allocation65_spill] sm:$0xff] %v19083_v4 }
 0x1ae   :  { %v19073_v45 = vadd.f32 %v1566_v32, %v986_v53  ;;  %v15728_v50 = vpop.f32.mrf.mxu0  ;;  %16071 = vmatmul.mubr.msk.f32.gmra.mxu0 %vm298_vm3, %v19067_v34 }
 0x1af   :  { %v15826_v18 = vpop.f32.mrf.mxu1  ;;  %16169 = vmatmul.mubr.msk.f32.gmra.mxu1 %vm298_vm3, %v18617_v6  ;;  %16073 = vmatprep.mubr.msk.f32.mxu0 %vm298_vm3, %v19071_v26 }
 0x1b0   :  { %22863 = vst [vmem:[#allocation64_spill] sm:$0xff] %v19073_v45  ;;  %v19079_v36 = vadd.f32 %v15826_v18, %v15728_v50  ;;  %16171 = vmatprep.mubr.msk.f32.mxu1 %vm298_vm3, %v18625_v8  ;;  %v996_v38 = vpop.f32.mrf.mxu0  ;;  %v19099_v8 = vld [vmem:[#allocation2 + $0x1a1] sm:$0xff] }
 0x1b1   :  { %v1576_v10 = vpop.f32.mrf.mxu1  ;;  %22867 = vst [vmem:[#allocation68_spill] sm:$0xff] %v19099_v8 }
 0x1b2   :  { %v19089_v53 = vadd.f32 %v1576_v10, %v996_v38  ;;  %v15731_v32 = vpop.f32.mrf.mxu0  ;;  %16074 = vmatmul.mubr.msk.f32.gmra.mxu0 %vm298_vm3, %v19083_v4  ;;  %v19103_v38 = vld [vmem:[#allocation2 + $0x1b1] sm:$0xff] }
 0x1b3   :  { %v15829_v45 = vpop.f32.mrf.mxu1  ;;  %16172 = vmatmul.mubr.msk.f32.gmra.mxu1 %vm298_vm3, %v18629_v5  ;;  %16076 = vmatprep.mubr.msk.f32.mxu0 %vm298_vm3, %v19087_v56 }
 0x1b4   :  { %22865 = vst [vmem:[#allocation66_spill] sm:$0xff] %v19089_v53  ;;  %v19095_v6 = vadd.f32 %v15829_v45, %v15731_v32  ;;  %16174 = vmatprep.mubr.msk.f32.mxu1 %vm298_vm3, %v18637_v12  ;;  %v1006_v50 = vpop.f32.mrf.mxu0  ;;  %v19115_v12 = vld [vmem:[#allocation2 + $0x1c1] sm:$0xff] }
 0x1b5   :  { %v1586_v18 = vpop.f32.mrf.mxu1  ;;  %v3808_v45 = vld [vmem:[#allocation2 + $0x1c2] sm:$0xff] }
 0x1b6   :  { %22866 = vst [vmem:[#allocation67_spill] sm:$0xff] %v19095_v6  ;;  %v19105_v10 = vadd.f32 %v1586_v18, %v1006_v50  ;;  %v15734_v53 = vpop.f32.mrf.mxu0  ;;  %16077 = vmatmul.mubr.msk.f32.gmra.mxu0 %vm298_vm3, %v19099_v8  ;;  %v3099_v18 = vld [vmem:[#allocation2 + $0x1f1] sm:$0xff] }
 0x1b7   :  { %v15832_v4 = vpop.f32.mrf.mxu1  ;;  %16175 = vmatmul.mubr.msk.f32.gmra.mxu1 %vm298_vm3, %v18641_v14  ;;  %16079 = vmatprep.mubr.msk.f32.mxu0 %vm298_vm3, %v19103_v38 }
 0x1b8   :  { %22868 = vst [vmem:[#allocation69_spill] sm:$0xff] %v19105_v10  ;;  %v19111_v5 = vadd.f32 %v15832_v4, %v15734_v53  ;;  %16177 = vmatprep.mubr.msk.f32.mxu1 %vm298_vm3, %v18649_v16  ;;  %v1016_v32 = vpop.f32.mrf.mxu0  ;;  %v19127_v4 = vld [vmem:[#allocation2 + $0x201] sm:$0xff] }
 0x1b9   :  { %v1596_v50 = vpop.f32.mrf.mxu1  ;;  %22871 = vst [vmem:[#allocation72_spill] sm:$0xff] %v19127_v4 }
 0x1ba   :  { %22869 = vst [vmem:[#allocation70_spill] sm:$0xff] %v19111_v5  ;;  %v19119_v10 = vadd.f32 %v1596_v50, %v1016_v32  ;;  %v15737_v8 = vpop.f32.mrf.mxu0  ;;  %16080 = vmatmul.mubr.msk.f32.gmra.mxu0 %vm298_vm3, %v19115_v12  ;;  %v19131_v32 = vld [vmem:[#allocation2 + $0x211] sm:$0xff] }
 0x1bb   :  { %v15835_v6 = vpop.f32.mrf.mxu1  ;;  %16178 = vmatmul.mubr.msk.f32.gmra.mxu1 %vm298_vm3, %v3808_v45  ;;  %16082 = vmatprep.mubr.msk.f32.mxu0 %vm298_vm3, %v3099_v18  ;;  %22872 = vst [vmem:[#allocation73_spill] sm:$0xff] %v19131_v32  ;;  %v19145_v18 = vld [vmem:[#allocation2 + $0x231] sm:$0xff] }
 0x1bc   :  { %22870 = vst [vmem:[#allocation71_spill] sm:$0xff] %v19119_v10  ;;  %v19124_v14 = vadd.f32 %v15835_v6, %v15737_v8  ;;  %16180 = vmatprep.mubr.msk.f32.mxu1 %vm298_vm3, %v18657_v29  ;;  %v1026_v16 = vpop.f32.mrf.mxu0  ;;  %v3102_v29 = vld [vmem:[#allocation2 + $0x221] sm:$0xff]  ;;  %22875 = vst [vmem:[#allocation76_spill] sm:$0xff] %v19145_v18 }
 0x1bd   :  { %v1606_v53 = vpop.f32.mrf.mxu1 }
 0x1be   :  { %v19133_v50 = vadd.f32 %v1606_v53, %v1026_v16  ;;  %v15740_v10 = vpop.f32.mrf.mxu0  ;;  %16083 = vmatmul.mubr.msk.f32.gmra.mxu0 %vm298_vm3, %v19127_v4 }
 0x1bf   :  { %v15838_v5 = vpop.f32.mrf.mxu1  ;;  %16181 = vmatmul.mubr.msk.f32.gmra.mxu1 %vm298_vm3, %v18661_v41  ;;  %16085 = vmatprep.mubr.msk.f32.mxu0 %vm298_vm3, %v19131_v32 }
 0x1c0   :  { %22873 = vst [vmem:[#allocation74_spill] sm:$0xff] %v19133_v50  ;;  %v19139_v6 = vadd.f32 %v15838_v5, %v15740_v10  ;;  %16183 = vmatprep.mubr.msk.f32.mxu1 %vm298_vm3, %v18669_v54  ;;  %v1036_v8 = vpop.f32.mrf.mxu0  ;;  %v3104_v10 = vld [vmem:[#allocation2 + $0x241] sm:$0xff] }
 0x1c1   :  { %v1616_v45 = vpop.f32.mrf.mxu1  ;;  %v22878_v54 = vld [vmem:[#allocation13_spill] sm:$0xff] }
 0x1c2   :  { %22874 = vst [vmem:[#allocation75_spill] sm:$0xff] %v19139_v6  ;;  %v19147_v16 = vadd.f32 %v1616_v45, %v1036_v8  ;;  %v15743_v53 = vpop.f32.mrf.mxu0  ;;  %16086 = vmatmul.mubr.msk.f32.gmra.mxu0 %vm298_vm3, %v3102_v29  ;;  %v19158_v8 = vld [vmem:[#allocation2 + $0x251] sm:$0xff] }
 0x1c3   :  { %v15841_v50 = vpop.f32.mrf.mxu1  ;;  %16184 = vmatmul.mubr.msk.f32.gmra.mxu1 %vm298_vm3, %v18673_v62  ;;  %16088 = vmatprep.mubr.msk.f32.mxu0 %vm298_vm3, %v19145_v18  ;;  %22879 = vst [vmem:[#allocation13_spill] sm:$0xff] %v19158_v8  ;;  %v22881_v62 = vld [vmem:[#allocation14_spill] sm:$0xff] }
 0x1c4   :  { %22876 = vst [vmem:[#allocation77_spill] sm:$0xff] %v19147_v16  ;;  %v19152_v41 = vadd.f32 %v15841_v50, %v15743_v53  ;;  %16186 = vmatprep.mubr.msk.f32.mxu1 %vm298_vm3, %v22878_v54  ;;  %v1046_v5 = vpop.f32.mrf.mxu0  ;;  %v3106_v53 = vld [vmem:[#allocation2 + $0x261] sm:$0xff]  ;;  %v22883_v54 = vld [vmem:[#allocation15_spill] sm:$0xff] }
 0x1c5   :  { %v1626_v6 = vpop.f32.mrf.mxu1 }
 0x1c6   :  { %22877 = vst [vmem:[#allocation78_spill] sm:$0xff] %v19152_v41  ;;  %v19160_v45 = vadd.f32 %v1626_v6, %v1046_v5  ;;  %v15746_v16 = vpop.f32.mrf.mxu0  ;;  %16089 = vmatmul.mubr.msk.f32.gmra.mxu0 %vm298_vm3, %v3104_v10  ;;  %v3816_v41 = vld [vmem:[#allocation2 + $0x262] sm:$0xff]  ;;  %v3107_v5 = vld [vmem:[#allocation2 + $0x291] sm:$0xff] }
 0x1c7   :  { %v15844_v29 = vpop.f32.mrf.mxu1  ;;  %16187 = vmatmul.mubr.msk.f32.gmra.mxu1 %vm298_vm3, %v22881_v62  ;;  %16091 = vmatprep.mubr.msk.f32.mxu0 %vm298_vm3, %v19158_v8  ;;  %v22886_v62 = vld [vmem:[#allocation16_spill] sm:$0xff]  ;;  %v3109_v8 = vld [vmem:[#allocation2 + $0x2b1] sm:$0xff] }
 0x1c8   :  { %22880 = vst [vmem:[#allocation79_spill] sm:$0xff] %v19160_v45  ;;  %v19165_v50 = vadd.f32 %v15844_v29, %v15746_v16  ;;  %16189 = vmatprep.mubr.msk.f32.mxu1 %vm298_vm3, %v22883_v54  ;;  %v1056_v18 = vpop.f32.mrf.mxu0  ;;  %v3108_v29 = vld [vmem:[#allocation2 + $0x2a1] sm:$0xff] }
 0x1c9   :  { %v1636_v6 = vpop.f32.mrf.mxu1 }
 0x1ca   :  { %22882 = vst [vmem:[#allocation14_spill] sm:$0xff] %v19165_v50  ;;  %v19171_v45 = vadd.f32 %v1636_v6, %v1056_v18  ;;  %v15749_v32 = vpop.f32.mrf.mxu0  ;;  %16092 = vmatmul.mubr.msk.f32.gmra.mxu0 %vm298_vm3, %v3106_v53  ;;  %v22888_v53 = vld [vmem:[#allocation17_spill] sm:$0xff] }
 0x1cb   :  { %v15847_v10 = vpop.f32.mrf.mxu1  ;;  %16190 = vmatmul.mubr.msk.f32.gmra.mxu1 %vm298_vm3, %v3816_v41  ;;  %16094 = vmatprep.mubr.msk.f32.mxu0 %vm298_vm3, %v3107_v5  ;;  %v3110_v41 = vld [vmem:[#allocation2 + $0x2c1] sm:$0xff] }
 0x1cc   :  { %22884 = vst [vmem:[#allocation15_spill] sm:$0xff] %v19171_v45  ;;  %v19175_v16 = vadd.f32 %v15847_v10, %v15749_v32  ;;  %16192 = vmatprep.mubr.msk.f32.mxu1 %vm298_vm3, %v22886_v62  ;;  %v1066_v54 = vpop.f32.mrf.mxu0  ;;  %v3111_v62 = vld [vmem:[#allocation2 + $0x2d1] sm:$0xff] }
 0x1cd   :  { %v1646_v50 = vpop.f32.mrf.mxu1 }
 0x1ce   :  { %22885 = vst [vmem:[#allocation80_spill] sm:$0xff] %v19175_v16  ;;  %v19180_v4 = vadd.f32 %v1646_v50, %v1066_v54  ;;  %v15852_v18 = vpop.f32.mrf.mxu0  ;;  %16095 = vmatmul.mubr.msk.f32.gmra.mxu0 %vm298_vm3, %v3108_v29  ;;  %v22889_v50 = vld [vmem:[#allocation18_spill] sm:$0xff] }
 0x1cf   :  { %v15950_v6 = vpop.f32.mrf.mxu1  ;;  %16193 = vmatmul.mubr.msk.f32.gmra.mxu1 %vm298_vm3, %v18705_v9  ;;  %v2302_v32 = vadd.f32 %v15852_v18, %v18711_v13  ;;  %16097 = vmatprep.mubr.msk.f32.mxu0 %vm298_vm3, %v3109_v8  ;;  %v22891_v9 = vld [vmem:[#allocation19_spill] sm:$0xff]  ;;  %v3112_v18 = vld [vmem:[#allocation2 + $0x2e1] sm:$0xff] }
 0x1d0   :  { %22887 = vst [vmem:[#allocation16_spill] sm:$0xff] %v19180_v4  ;;  %16195 = vmatprep.mubr.msk.f32.mxu1 %vm298_vm3, %v22888_v53  ;;  %v1982_v5 = vpop.f32.mrf.mxu0  ;;  %v22892_v53 = vld [vmem:[#allocation20_spill] sm:$0xff] }
 0x1d1   :  { %v2692_v10 = vpop.f32.mrf.mxu1  ;;  %v2301_v54 = vadd.f32 %v1982_v5, %v22889_v50  ;;  %v19190_v4 = vadd.f32 %v15950_v6, %v2302_v32  ;;  %v3113_v32 = vld [vmem:[#allocation2 + $0x2f1] sm:$0xff]  ;;  %v22893_v50 = vld [vmem:[#allocation21_spill] sm:$0xff] }
 0x1d2   :  { %v15855_v29 = vpop.f32.mrf.mxu0  ;;  %16098 = vmatmul.mubr.msk.f32.gmra.mxu0 %vm298_vm3, %v3110_v41 }
 0x1d3   :  { %22890 = vst [vmem:[#allocation17_spill] sm:$0xff] %v19190_v4  ;;  %v15953_v16 = vpop.f32.mrf.mxu1  ;;  %16196 = vmatmul.mubr.msk.f32.gmra.mxu1 %vm298_vm3, %v18719_v63  ;;  %v2304_v13 = vadd.f32 %v15855_v29, %v22891_v9  ;;  %v19196_v8 = vadd.f32 %v2692_v10, %v2301_v54  ;;  %16100 = vmatprep.mubr.msk.f32.mxu0 %vm298_vm3, %v3111_v62  ;;  %v22895_v10 = vld [vmem:[#allocation22_spill] sm:$0xff]  ;;  %v3114_v29 = vld [vmem:[#allocation2 + $0x301] sm:$0xff] }
 0x1d4   :  { %16198 = vmatprep.mubr.msk.f32.mxu1 %vm298_vm3, %v22892_v53  ;;  %v1992_v5 = vpop.f32.mrf.mxu0  ;;  %v3824_v9 = vld [vmem:[#allocation2 + $0x302] sm:$0xff]  ;;  %v3115_v53 = vld [vmem:[#allocation2 + $0x331] sm:$0xff] }
 0x1d5   :  { %v2702_v6 = vpop.f32.mrf.mxu1  ;;  %v2303_v4 = vadd.f32 %v1992_v5, %v22893_v50  ;;  %v19202_v41 = vadd.f32 %v15953_v16, %v2304_v13  ;;  %v22896_v5 = vld [vmem:[#allocation23_spill] sm:$0xff] }
 0x1d6   :  { %v15858_v45 = vpop.f32.mrf.mxu0  ;;  %16101 = vmatmul.mubr.msk.f32.gmra.mxu0 %vm298_vm3, %v3112_v18 }
 0x1d7   :  { %22894 = vst [vmem:[#allocation18_spill] sm:$0xff] %v19202_v41  ;;  %v15956_v63 = vpop.f32.mrf.mxu1  ;;  %16199 = vmatmul.mubr.msk.f32.gmra.mxu1 %vm298_vm3, %v18735_v20  ;;  %v2306_v62 = vadd.f32 %v15858_v45, %v22895_v10  ;;  %v19208_v54 = vadd.f32 %v2702_v6, %v2303_v4  ;;  %16103 = vmatprep.mubr.msk.f32.mxu0 %vm298_vm3, %v3113_v32  ;;  %v22897_v10 = vld [vmem:[#allocation24_spill] sm:$0xff] }
 0x1d8   :  { %16201 = vmatprep.mubr.msk.f32.mxu1 %vm298_vm3, %v18747_v39  ;;  %v2002_v16 = vpop.f32.mrf.mxu0  ;;  %v3116_v39 = vld [vmem:[#allocation2 + $0x341] sm:$0xff] }
 0x1d9   :  { %v2712_v13 = vpop.f32.mrf.mxu1  ;;  %v2305_v18 = vadd.f32 %v2002_v16, %v22896_v5  ;;  %v19214_v50 = vadd.f32 %v15956_v63, %v2306_v62  ;;  %v3117_v63 = vld [vmem:[#allocation2 + $0x351] sm:$0xff] }
 0x1da   :  { %v15861_v41 = vpop.f32.mrf.mxu0  ;;  %16104 = vmatmul.mubr.msk.f32.gmra.mxu0 %vm298_vm3, %v3114_v29 }
 0x1db   :  { %v15959_v20 = vpop.f32.mrf.mxu1  ;;  %16202 = vmatmul.mubr.msk.f32.gmra.mxu1 %vm298_vm3, %v3824_v9  ;;  %v2308_v4 = vadd.f32 %v15861_v41, %v18756_v44  ;;  %v19219_v45 = vadd.f32 %v2712_v13, %v2305_v18  ;;  %16106 = vmatprep.mubr.msk.f32.mxu0 %vm298_vm3, %v3115_v53  ;;  %v22898_v13 = vld [vmem:[#allocation25_spill] sm:$0xff]  ;;  %v3119_v18 = vld [vmem:[#allocation2 + $0x371] sm:$0xff] }
 0x1dc   :  { %16204 = vmatprep.mubr.msk.f32.mxu1 %vm298_vm3, %v18759_v60  ;;  %v2012_v6 = vpop.f32.mrf.mxu0  ;;  %v3118_v60 = vld [vmem:[#allocation2 + $0x361] sm:$0xff] }
 0x1dd   :  { %v2722_v32 = vpop.f32.mrf.mxu1  ;;  %v2307_v62 = vadd.f32 %v2012_v6, %v22897_v10  ;;  %v19225_v16 = vadd.f32 %v15959_v20, %v2308_v4  ;;  %v22899_v20 = vld [vmem:[#allocation26_spill] sm:$0xff]  ;;  %v3120_v10 = vld [vmem:[#allocation2 + $0x381] sm:$0xff] }
 0x1de   :  { %v15864_v29 = vpop.f32.mrf.mxu0  ;;  %16107 = vmatmul.mubr.msk.f32.gmra.mxu0 %vm298_vm3, %v3116_v39 }
 0x1df   :  { %v15962_v9 = vpop.f32.mrf.mxu1  ;;  %16205 = vmatmul.mubr.msk.f32.gmra.mxu1 %vm298_vm3, %v18763_v3  ;;  %v2310_v44 = vadd.f32 %v15864_v29, %v18771_v24  ;;  %v19231_v41 = vadd.f32 %v2722_v32, %v2307_v62  ;;  %16109 = vmatprep.mubr.msk.f32.mxu0 %vm298_vm3, %v3117_v63  ;;  %v22900_v24 = vld [vmem:[#allocation27_spill] sm:$0xff]  ;;  %v22901_v62 = vld [vmem:[#allocation28_spill] sm:$0xff] }
 0x1e0   :  { %16207 = vmatprep.mubr.msk.f32.mxu1 %vm298_vm3, %v22898_v13  ;;  %v2022_v53 = vpop.f32.mrf.mxu0  ;;  %v22902_v13 = vld [vmem:[#allocation29_spill] sm:$0xff] }
 0x1e1   :  { %v2732_v5 = vpop.f32.mrf.mxu1  ;;  %v2309_v4 = vadd.f32 %v2022_v53, %v22899_v20  ;;  %v19237_v39 = vadd.f32 %v15962_v9, %v2310_v44  ;;  %v3121_v44 = vld [vmem:[#allocation2 + $0x391] sm:$0xff] }
 0x1e2   :  { %v15867_v6 = vpop.f32.mrf.mxu0  ;;  %16110 = vmatmul.mubr.msk.f32.gmra.mxu0 %vm298_vm3, %v3118_v60 }
 0x1e3   :  { %v15965_v3 = vpop.f32.mrf.mxu1  ;;  %16208 = vmatmul.mubr.msk.f32.gmra.mxu1 %vm298_vm3, %v18779_v7  ;;  %v2312_v32 = vadd.f32 %v15867_v6, %v22900_v24  ;;  %v19243_v63 = vadd.f32 %v2732_v5, %v2309_v4  ;;  %16112 = vmatprep.mubr.msk.f32.mxu0 %vm298_vm3, %v3119_v18  ;;  %v22904_v5 = vld [vmem:[#allocation30_spill] sm:$0xff]  ;;  %v3122_v6 = vld [vmem:[#allocation2 + $0x3a1] sm:$0xff] }
 0x1e4   :  { %16210 = vmatprep.mubr.msk.f32.mxu1 %vm298_vm3, %v22901_v62  ;;  %v2032_v29 = vpop.f32.mrf.mxu0  ;;  %v3832_v24 = vld [vmem:[#allocation2 + $0x3a2] sm:$0xff]  ;;  %v3123_v62 = vld [vmem:[#allocation2 + $0x3d1] sm:$0xff] }
 0x1e5   :  { %v2742_v9 = vpop.f32.mrf.mxu1  ;;  %v2311_v53 = vadd.f32 %v2032_v29, %v22902_v13  ;;  %v19249_v60 = vadd.f32 %v15965_v3, %v2312_v32  ;;  %v22905_v29 = vld [vmem:[#allocation31_spill] sm:$0xff] }
 0x1e6   :  { %v15870_v20 = vpop.f32.mrf.mxu0  ;;  %16113 = vmatmul.mubr.msk.f32.gmra.mxu0 %vm298_vm3, %v3120_v10 }
 0x1e7   :  { %22903 = vst [vmem:[#allocation19_spill] sm:$0xff] %v19249_v60  ;;  %v15968_v7 = vpop.f32.mrf.mxu1  ;;  %16211 = vmatmul.mubr.msk.f32.gmra.mxu1 %vm298_vm3, %v18795_v27  ;;  %v2314_v18 = vadd.f32 %v15870_v20, %v22904_v5  ;;  %v19255_v4 = vadd.f32 %v2742_v9, %v2311_v53  ;;  %16115 = vmatprep.mubr.msk.f32.mxu0 %vm298_vm3, %v3121_v44  ;;  %v22906_v5 = vld [vmem:[#allocation32_spill] sm:$0xff] }
 0x1e8   :  { %16213 = vmatprep.mubr.msk.f32.mxu1 %vm298_vm3, %v18807_v2  ;;  %v2042_v3 = vpop.f32.mrf.mxu0  ;;  %v3124_v2 = vld [vmem:[#allocation2 + $0x3e1] sm:$0xff] }
 0x1e9   :  { %v2752_v32 = vpop.f32.mrf.mxu1  ;;  %v2313_v10 = vadd.f32 %v2042_v3, %v22905_v29  ;;  %v19261_v13 = vadd.f32 %v15968_v7, %v2314_v18  ;;  %v3125_v7 = vld [vmem:[#allocation2 + $0x3f1] sm:$0xff] }
 0x1ea   :  { %v15873_v60 = vpop.f32.mrf.mxu0  ;;  %16116 = vmatmul.mubr.msk.f32.gmra.mxu0 %vm298_vm3, %v3122_v6 }
 0x1eb   :  { %v15971_v27 = vpop.f32.mrf.mxu1  ;;  %16214 = vmatmul.mubr.msk.f32.gmra.mxu1 %vm298_vm3, %v3832_v24  ;;  %v2316_v9 = vadd.f32 %v15873_v60, %v18816_v11  ;;  %v19266_v44 = vadd.f32 %v2752_v32, %v2313_v10  ;;  %16118 = vmatprep.mubr.msk.f32.mxu0 %vm298_vm3, %v3123_v62  ;;  %v22907_v32 = vld [vmem:[#allocation33_spill] sm:$0xff]  ;;  %v3127_v10 = vld [vmem:[#allocation2 + $0x411] sm:$0xff] }
 0x1ec   :  { %16216 = vmatprep.mubr.msk.f32.mxu1 %vm298_vm3, %v18819_v51  ;;  %v2052_v53 = vpop.f32.mrf.mxu0  ;;  %v3126_v51 = vld [vmem:[#allocation2 + $0x401] sm:$0xff] }
 0x1ed   :  { %v2762_v20 = vpop.f32.mrf.mxu1  ;;  %v2315_v18 = vadd.f32 %v2052_v53, %v22906_v5  ;;  %v19272_v3 = vadd.f32 %v15971_v27, %v2316_v9  ;;  %v22908_v27 = vld [vmem:[#allocation34_spill] sm:$0xff]  ;;  %v3128_v5 = vld [vmem:[#allocation2 + $0x421] sm:$0xff] }
 0x1ee   :  { %v15876_v6 = vpop.f32.mrf.mxu0  ;;  %16119 = vmatmul.mubr.msk.f32.gmra.mxu0 %vm298_vm3, %v3124_v2 }
 0x1ef   :  { %v15974_v24 = vpop.f32.mrf.mxu1  ;;  %16217 = vmatmul.mubr.msk.f32.gmra.mxu1 %vm298_vm3, %v18823_v1  ;;  %v2318_v11 = vadd.f32 %v15876_v6, %v18831_v55  ;;  %v19278_v60 = vadd.f32 %v2762_v20, %v2315_v18  ;;  %16121 = vmatprep.mubr.msk.f32.mxu0 %vm298_vm3, %v3125_v7  ;;  %v22909_v55 = vld [vmem:[#allocation35_spill] sm:$0xff]  ;;  %v22910_v18 = vld [vmem:[#allocation36_spill] sm:$0xff] }
 0x1f0   :  { %16219 = vmatprep.mubr.msk.f32.mxu1 %vm298_vm3, %v22907_v32  ;;  %v2062_v62 = vpop.f32.mrf.mxu0  ;;  %v22911_v32 = vld [vmem:[#allocation37_spill] sm:$0xff] }
 0x1f1   :  { %v2772_v29 = vpop.f32.mrf.mxu1  ;;  %v2317_v9 = vadd.f32 %v2062_v62, %v22908_v27  ;;  %v19284_v2 = vadd.f32 %v15974_v24, %v2318_v11  ;;  %v3129_v11 = vld [vmem:[#allocation2 + $0x431] sm:$0xff] }
 0x1f2   :  { %v15879_v53 = vpop.f32.mrf.mxu0  ;;  %16122 = vmatmul.mubr.msk.f32.gmra.mxu0 %vm298_vm3, %v3126_v51 }
 0x1f3   :  { %v15977_v1 = vpop.f32.mrf.mxu1  ;;  %16220 = vmatmul.mubr.msk.f32.gmra.mxu1 %vm298_vm3, %v18839_v35  ;;  %v2320_v20 = vadd.f32 %v15879_v53, %v22909_v55  ;;  %v19290_v7 = vadd.f32 %v2772_v29, %v2317_v9  ;;  %16124 = vmatprep.mubr.msk.f32.mxu0 %vm298_vm3, %v3127_v10  ;;  %v22913_v29 = vld [vmem:[#allocation38_spill] sm:$0xff]  ;;  %v3130_v53 = vld [vmem:[#allocation2 + $0x441] sm:$0xff] }
 0x1f4   :  { %16222 = vmatprep.mubr.msk.f32.mxu1 %vm298_vm3, %v22910_v18  ;;  %v2072_v6 = vpop.f32.mrf.mxu0  ;;  %v3840_v55 = vld [vmem:[#allocation2 + $0x442] sm:$0xff]  ;;  %v3131_v18 = vld [vmem:[#allocation2 + $0x471] sm:$0xff] }
 0x1f5   :  { %v2782_v24 = vpop.f32.mrf.mxu1  ;;  %v2319_v62 = vadd.f32 %v2072_v6, %v22911_v32  ;;  %v19296_v51 = vadd.f32 %v15977_v1, %v2320_v20  ;;  %v22914_v6 = vld [vmem:[#allocation39_spill] sm:$0xff] }
 0x1f6   :  { %v15882_v27 = vpop.f32.mrf.mxu0  ;;  %16125 = vmatmul.mubr.msk.f32.gmra.mxu0 %vm298_vm3, %v3128_v5 }
 0x1f7   :  { %22912 = vst [vmem:[#allocation20_spill] sm:$0xff] %v19296_v51  ;;  %v15980_v35 = vpop.f32.mrf.mxu1  ;;  %16223 = vmatmul.mubr.msk.f32.gmra.mxu1 %vm298_vm3, %v18855_v57  ;;  %v2322_v10 = vadd.f32 %v15882_v27, %v22913_v29  ;;  %v19302_v9 = vadd.f32 %v2782_v24, %v2319_v62  ;;  %16127 = vmatprep.mubr.msk.f32.mxu0 %vm298_vm3, %v3129_v11  ;;  %v22915_v29 = vld [vmem:[#allocation40_spill] sm:$0xff] }
 0x1f8   :  { %16225 = vmatprep.mubr.msk.f32.mxu1 %vm298_vm3, %v18867_v48  ;;  %v2082_v1 = vpop.f32.mrf.mxu0  ;;  %v3132_v48 = vld [vmem:[#allocation2 + $0x481] sm:$0xff] }
 0x1f9   :  { %v2792_v20 = vpop.f32.mrf.mxu1  ;;  %v2321_v5 = vadd.f32 %v2082_v1, %v22914_v6  ;;  %v19308_v32 = vadd.f32 %v15980_v35, %v2322_v10  ;;  %v3133_v35 = vld [vmem:[#allocation2 + $0x491] sm:$0xff] }
 0x1fa   :  { %v15885_v51 = vpop.f32.mrf.mxu0  ;;  %16128 = vmatmul.mubr.msk.f32.gmra.mxu0 %vm298_vm3, %v3130_v53 }
 0x1fb   :  { %v15983_v57 = vpop.f32.mrf.mxu1  ;;  %16226 = vmatmul.mubr.msk.f32.gmra.mxu1 %vm298_vm3, %v3840_v55  ;;  %v2324_v24 = vadd.f32 %v15885_v51, %v18876_v52  ;;  %v19313_v11 = vadd.f32 %v2792_v20, %v2321_v5  ;;  %16130 = vmatprep.mubr.msk.f32.mxu0 %vm298_vm3, %v3131_v18  ;;  %v22916_v20 = vld [vmem:[#allocation41_spill] sm:$0xff]  ;;  %v3135_v5 = vld [vmem:[#allocation2 + $0x4b1] sm:$0xff] }
 0x1fc   :  { %16228 = vmatprep.mubr.msk.f32.mxu1 %vm298_vm3, %v18879_v22  ;;  %v2092_v62 = vpop.f32.mrf.mxu0  ;;  %v3134_v22 = vld [vmem:[#allocation2 + $0x4a1] sm:$0xff] }
 0x1fd   :  { %v2802_v27 = vpop.f32.mrf.mxu1  ;;  %v2323_v10 = vadd.f32 %v2092_v62, %v22915_v29  ;;  %v19319_v1 = vadd.f32 %v15983_v57, %v2324_v24  ;;  %v22917_v57 = vld [vmem:[#allocation42_spill] sm:$0xff]  ;;  %v3136_v29 = vld [vmem:[#allocation2 + $0x4c1] sm:$0xff] }
 0x1fe   :  { %v15888_v53 = vpop.f32.mrf.mxu0  ;;  %16131 = vmatmul.mubr.msk.f32.gmra.mxu0 %vm298_vm3, %v3132_v48 }
 0x1ff   :  { %v15986_v55 = vpop.f32.mrf.mxu1  ;;  %16229 = vmatmul.mubr.msk.f32.gmra.mxu1 %vm298_vm3, %v18883_v47  ;;  %v2326_v52 = vadd.f32 %v15888_v53, %v18891_v31  ;;  %v19325_v51 = vadd.f32 %v2802_v27, %v2323_v10  ;;  %16133 = vmatprep.mubr.msk.f32.mxu0 %vm298_vm3, %v3133_v35  ;;  %v22918_v31 = vld [vmem:[#allocation43_spill] sm:$0xff]  ;;  %v22919_v10 = vld [vmem:[#allocation44_spill] sm:$0xff] }
 0x200   :  { %16231 = vmatprep.mubr.msk.f32.mxu1 %vm298_vm3, %v22916_v20  ;;  %v2102_v18 = vpop.f32.mrf.mxu0  ;;  %v22920_v20 = vld [vmem:[#allocation45_spill] sm:$0xff] }
 0x201   :  { %v2812_v6 = vpop.f32.mrf.mxu1  ;;  %v2325_v24 = vadd.f32 %v2102_v18, %v22917_v57  ;;  %v19331_v48 = vadd.f32 %v15986_v55, %v2326_v52  ;;  %v3137_v52 = vld [vmem:[#allocation2 + $0x4d1] sm:$0xff] }
 0x202   :  { %v15891_v62 = vpop.f32.mrf.mxu0  ;;  %16134 = vmatmul.mubr.msk.f32.gmra.mxu0 %vm298_vm3, %v3134_v22 }
 0x203   :  { %v15989_v47 = vpop.f32.mrf.mxu1  ;;  %16232 = vmatmul.mubr.msk.f32.gmra.mxu1 %vm298_vm3, %v18899_v61  ;;  %v2328_v27 = vadd.f32 %v15891_v62, %v22918_v31  ;;  %v19337_v35 = vadd.f32 %v2812_v6, %v2325_v24  ;;  %16136 = vmatprep.mubr.msk.f32.mxu0 %vm298_vm3, %v3135_v5  ;;  %v3138_v24 = vld [vmem:[#allocation2 + $0x4e1] sm:$0xff]  ;;  %v22922_v62 = vld [vmem:[#allocation46_spill] sm:$0xff] }
 0x204   :  { %16234 = vmatprep.mubr.msk.f32.mxu1 %vm298_vm3, %v22919_v10  ;;  %v2112_v53 = vpop.f32.mrf.mxu0  ;;  %v3848_v31 = vld [vmem:[#allocation2 + $0x4e2] sm:$0xff] }
 0x205   :  { %v2822_v55 = vpop.f32.mrf.mxu1  ;;  %v2327_v18 = vadd.f32 %v2112_v53, %v22920_v20  ;;  %v19343_v22 = vadd.f32 %v15989_v47, %v2328_v27  ;;  %v4496_v10 = vld [vmem:[#allocation2 + $0x20] sm:$0xff]  ;;  %v22923_v53 = vld [vmem:[#allocation47_spill] sm:$0xff] }
 0x206   :  { %v15894_v57 = vpop.f32.mrf.mxu0  ;;  %16137 = vmatmul.mubr.msk.f32.gmra.mxu0 %vm298_vm3, %v3136_v29 }
 0x207   :  { %22921 = vst [vmem:[#allocation21_spill] sm:$0xff] %v19343_v22  ;;  %v15992_v61 = vpop.f32.mrf.mxu1  ;;  %16235 = vmatmul.mubr.msk.f32.gmra.mxu1 %vm298_vm3, %v18915_v37  ;;  %v2330_v6 = vadd.f32 %v15894_v57, %v18923_v40  ;;  %v19349_v5 = vadd.f32 %v2822_v55, %v2327_v18  ;;  %16139 = vmatprep.mubr.msk.f32.mxu0 %vm298_vm3, %v3137_v52  ;;  %v4497_v52 = vld [vmem:[#allocation2 + $0x30] sm:$0xff] }
 0x208   :  { %16237 = vmatprep.mubr.msk.f32.mxu1 %vm298_vm3, %v22922_v62  ;;  %v2122_v47 = vpop.f32.mrf.mxu0 }
 0x209   :  { %v2832_v27 = vpop.f32.mrf.mxu1  ;;  %v2329_v29 = vadd.f32 %v2122_v47, %v22923_v53  ;;  %v19355_v20 = vadd.f32 %v15992_v61, %v2330_v6  ;;  %v4498_v61 = vld [vmem:[#allocation2 + $0x40] sm:$0xff] }
 0x20a   :  { %v15897_v22 = vpop.f32.mrf.mxu0  ;;  %16140 = vmatmul.mubr.msk.f32.gmra.mxu0 %vm298_vm3, %v3138_v24  ;;  %v22924_v47 = vld [vmem:[#allocation48_spill] sm:$0xff] }
 0x20b   :  { %v15995_v37 = vpop.f32.mrf.mxu1  ;;  %16238 = vmatmul.mubr.msk.f32.gmra.mxu1 %vm298_vm3, %v3848_v31  ;;  %v2332_v40 = vadd.f32 %v15897_v22, %v18936_v0  ;;  %v19360_v55 = vadd.f32 %v2832_v27, %v2329_v29  ;;  %16242 = vmatprep.mubr.msk.f32.mxu0 %vm298_vm3, %v4496_v10  ;;  %v22925_v10 = vld [vmem:[#allocation49_spill] sm:$0xff]  ;;  %v4500_v53 = vld [vmem:[#allocation2 + $0x60] sm:$0xff]  ;;  %v22926_v29 = vld [vmem:[#allocation50_spill] sm:$0xff] }
 0x20c   :  { %16340 = vmatprep.mubr.msk.f32.mxu1 %vm298_vm3, %v18939_v15  ;;  %v2132_v18 = vpop.f32.mrf.mxu0  ;;  %v4499_v15 = vld [vmem:[#allocation2 + $0x50] sm:$0xff] }
 0x20d   :  { %v2842_v57 = vpop.f32.mrf.mxu1  ;;  %v2331_v6 = vadd.f32 %v2132_v18, %v18946_v33  ;;  %v19366_v62 = vadd.f32 %v15995_v37, %v2332_v40 }
 0x20e   :  { %v15900_v24 = vpop.f32.mrf.mxu0  ;;  %16243 = vmatmul.mubr.msk.f32.vlgmr.msra.gmra.mxu0 %vm298_vm3, %v4497_v52  ;;  %v22927_v52 = vld [vmem:[#allocation51_spill] sm:$0xff] }
 0x20f   :  { %v15998_v31 = vpop.f32.mrf.mxu1  ;;  %16341 = vmatmul.mubr.msk.f32.vlgmr.msra.gmra.mxu1 %vm298_vm3, %v18943_v23  ;;  %v2334_v0 = vadd.f32 %v15900_v24, %v18954_v21  ;;  %v19372_v22 = vadd.f32 %v2842_v57, %v2331_v6  ;;  %16437 = vmatpush3.msk.msra.mxu0 %vm686_vm2, %v22924_v47  ;;  %v22928_v6 = vld [vmem:[#allocation52_spill] sm:$0xff]  ;;  %v22929_v47 = vld [vmem:[#allocation53_spill] sm:$0xff] }
 0x210   :  { %16245 = vmatprep.mubr.msk.f32.mxu0 %vm298_vm3, %v4498_v61  ;;  %v2142_v33 = vpop.f32.mrf.mxu0  ;;  %16343 = vmatprep.mubr.msk.f32.mxu1 %vm298_vm3, %v22925_v10  ;;  %v4501_v61 = vld [vmem:[#allocation2 + $0x70] sm:$0xff] }
 0x211   :  { %v2852_v27 = vpop.f32.mrf.mxu1  ;;  %v2333_v37 = vadd.f32 %v2142_v33, %v22926_v29  ;;  %v19380_v40 = vadd.f32 %v15998_v31, %v2334_v0  ;;  %v4502_v0 = vld [vmem:[#allocation2 + $0x80] sm:$0xff] }
 0x212   :  { %v15903_v23 = vpop.f32.mrf.mxu0  ;;  %16246 = vmatmul.mubr.msk.f32.gmra.mxu0 %vm298_vm3, %v4499_v15 }
 0x213   :  { %v16001_v21 = vpop.f32.mrf.mxu1  ;;  %16344 = vmatmul.mubr.msk.f32.gmra.mxu1 %vm298_vm3, %v18964_v17  ;;  %v2336_v18 = vadd.f32 %v15903_v23, %v22927_v52  ;;  %v19386_v57 = vadd.f32 %v2852_v27, %v2333_v37  ;;  %16248 = vmatprep.mubr.msk.f32.mxu0 %vm298_vm3, %v4500_v53  ;;  %v22930_v27 = vld [vmem:[#allocation54_spill] sm:$0xff] }
 0x214   :  { %16346 = vmatprep.mubr.msk.f32.mxu1 %vm298_vm3, %v22928_v6  ;;  %v2152_v24 = vpop.f32.mrf.mxu0  ;;  %v4503_v37 = vld [vmem:[#allocation2 + $0x90] sm:$0xff]  ;;  %v22931_v6 = vld [vmem:[#allocation55_spill] sm:$0xff] }
 0x215   :  { %v2862_v31 = vpop.f32.mrf.mxu1  ;;  %v2335_v33 = vadd.f32 %v2152_v24, %v22929_v47  ;;  %v19392_v15 = vadd.f32 %v16001_v21, %v2336_v18  ;;  %v5213_v23 = vld [vmem:[#allocation2 + $0x91] sm:$0xff]  ;;  %v4504_v18 = vld [vmem:[#allocation2 + $0xc0] sm:$0xff] }
 0x216   :  { %v15906_v10 = vpop.f32.mrf.mxu0  ;;  %16249 = vmatmul.mubr.msk.f32.gmra.mxu0 %vm298_vm3, %v4501_v61 }
 0x217   :  { %v16004_v17 = vpop.f32.mrf.mxu1  ;;  %16347 = vmatmul.mubr.msk.f32.gmra.mxu1 %vm298_vm3, %v18983_v59  ;;  %v2338_v53 = vadd.f32 %v15906_v10, %v22930_v27  ;;  %v19398_v29 = vadd.f32 %v2862_v31, %v2335_v33  ;;  %16251 = vmatprep.mubr.msk.f32.mxu0 %vm298_vm3, %v4502_v0  ;;  %v22932_v27 = vld [vmem:[#allocation56_spill] sm:$0xff] }
 0x218   :  { %16349 = vmatprep.mubr.msk.f32.mxu1 %vm298_vm3, %v18995_v28  ;;  %v2162_v21 = vpop.f32.mrf.mxu0  ;;  %v4505_v28 = vld [vmem:[#allocation2 + $0xd0] sm:$0xff] }
 0x219   :  { %v2872_v52 = vpop.f32.mrf.mxu1  ;;  %v2337_v61 = vadd.f32 %v2162_v21, %v22931_v6  ;;  %v19404_v24 = vadd.f32 %v16004_v17, %v2338_v53  ;;  %v4506_v17 = vld [vmem:[#allocation2 + $0xe0] sm:$0xff] }
 0x21a   :  { %v15909_v47 = vpop.f32.mrf.mxu0  ;;  %16252 = vmatmul.mubr.msk.f32.gmra.mxu0 %vm298_vm3, %v4503_v37 }
 0x21b   :  { %v16007_v59 = vpop.f32.mrf.mxu1  ;;  %16350 = vmatmul.mubr.msk.f32.gmra.mxu1 %vm298_vm3, %v5213_v23  ;;  %v2340_v31 = vadd.f32 %v15909_v47, %v19004_v30  ;;  %v19409_v0 = vadd.f32 %v2872_v52, %v2337_v61  ;;  %16254 = vmatprep.mubr.msk.f32.mxu0 %vm298_vm3, %v4504_v18  ;;  %v22933_v18 = vld [vmem:[#allocation57_spill] sm:$0xff]  ;;  %v4508_v47 = vld [vmem:[#allocation2 + $0x100] sm:$0xff] }
 0x21c   :  { %16352 = vmatprep.mubr.msk.f32.mxu1 %vm298_vm3, %v19007_v19  ;;  %v2172_v33 = vpop.f32.mrf.mxu0  ;;  %v4507_v19 = vld [vmem:[#allocation2 + $0xf0] sm:$0xff] }
 0x21d   :  { %v2882_v10 = vpop.f32.mrf.mxu1  ;;  %v2339_v53 = vadd.f32 %v2172_v33, %v22932_v27  ;;  %v19415_v21 = vadd.f32 %v16007_v59, %v2340_v31  ;;  %v22934_v59 = vld [vmem:[#allocation58_spill] sm:$0xff] }
 0x21e   :  { %v15912_v37 = vpop.f32.mrf.mxu0  ;;  %16255 = vmatmul.mubr.msk.f32.gmra.mxu0 %vm298_vm3, %v4505_v28  ;;  %v4509_v27 = vld [vmem:[#allocation2 + $0x110] sm:$0xff] }
 0x21f   :  { %v16010_v23 = vpop.f32.mrf.mxu1  ;;  %16353 = vmatmul.mubr.msk.f32.gmra.mxu1 %vm298_vm3, %v19011_v49  ;;  %v2342_v30 = vadd.f32 %v15912_v37, %v19019_v58  ;;  %v19421_v52 = vadd.f32 %v2882_v10, %v2339_v53  ;;  %16257 = vmatprep.mubr.msk.f32.mxu0 %vm298_vm3, %v4506_v17  ;;  %v22935_v58 = vld [vmem:[#allocation59_spill] sm:$0xff]  ;;  %v22936_v53 = vld [vmem:[#allocation60_spill] sm:$0xff] }
 0x220   :  { %16355 = vmatprep.mubr.msk.f32.mxu1 %vm298_vm3, %v22933_v18  ;;  %v2182_v6 = vpop.f32.mrf.mxu0  ;;  %v22937_v18 = vld [vmem:[#allocation61_spill] sm:$0xff] }
 0x221   :  { %v2892_v61 = vpop.f32.mrf.mxu1  ;;  %v2341_v31 = vadd.f32 %v2182_v6, %v22934_v59  ;;  %v19427_v28 = vadd.f32 %v16010_v23, %v2342_v30  ;;  %v4510_v30 = vld [vmem:[#allocation2 + $0x120] sm:$0xff] }
 0x222   :  { %v15915_v33 = vpop.f32.mrf.mxu0  ;;  %16258 = vmatmul.mubr.msk.f32.gmra.mxu0 %vm298_vm3, %v4507_v19 }
 0x223   :  { %v16013_v49 = vpop.f32.mrf.mxu1  ;;  %16356 = vmatmul.mubr.msk.f32.gmra.mxu1 %vm298_vm3, %v19027_v43  ;;  %v2344_v10 = vadd.f32 %v15915_v33, %v22935_v58  ;;  %v19433_v17 = vadd.f32 %v2892_v61, %v2341_v31  ;;  %16260 = vmatprep.mubr.msk.f32.mxu0 %vm298_vm3, %v4508_v47  ;;  %v22939_v61 = vld [vmem:[#allocation62_spill] sm:$0xff] }
 0x224   :  { %16358 = vmatprep.mubr.msk.f32.mxu1 %vm298_vm3, %v22936_v53  ;;  %v2192_v37 = vpop.f32.mrf.mxu0  ;;  %v4511_v33 = vld [vmem:[#allocation2 + $0x130] sm:$0xff]  ;;  %v4512_v53 = vld [vmem:[#allocation2 + $0x160] sm:$0xff] }
 0x225   :  { %v2902_v23 = vpop.f32.mrf.mxu1  ;;  %v2343_v6 = vadd.f32 %v2192_v37, %v22937_v18  ;;  %v19439_v19 = vadd.f32 %v16013_v49, %v2344_v10  ;;  %v5221_v58 = vld [vmem:[#allocation2 + $0x131] sm:$0xff] }
 0x226   :  { %v15918_v59 = vpop.f32.mrf.mxu0  ;;  %16261 = vmatmul.mubr.msk.f32.gmra.mxu0 %vm298_vm3, %v4509_v27  ;;  %v22940_v37 = vld [vmem:[#allocation63_spill] sm:$0xff] }
 0x227   :  { %22938 = vst [vmem:[#allocation22_spill] sm:$0xff] %v19439_v19  ;;  %v16016_v43 = vpop.f32.mrf.mxu1  ;;  %16359 = vmatmul.mubr.msk.f32.gmra.mxu1 %vm298_vm3, %v19043_v25  ;;  %v2346_v47 = vadd.f32 %v15918_v59, %v22939_v61  ;;  %v19445_v31 = vadd.f32 %v2902_v23, %v2343_v6  ;;  %16263 = vmatprep.mubr.msk.f32.mxu0 %vm298_vm3, %v4510_v30  ;;  %v22941_v61 = vld [vmem:[#allocation64_spill] sm:$0xff] }
 0x228   :  { %16361 = vmatprep.mubr.msk.f32.mxu1 %vm298_vm3, %v19055_v42  ;;  %v2202_v49 = vpop.f32.mrf.mxu0  ;;  %v4513_v42 = vld [vmem:[#allocation2 + $0x170] sm:$0xff] }
 0x229   :  { %v2912_v10 = vpop.f32.mrf.mxu1  ;;  %v2345_v27 = vadd.f32 %v2202_v49, %v22940_v37  ;;  %v19451_v18 = vadd.f32 %v16016_v43, %v2346_v47  ;;  %v4514_v43 = vld [vmem:[#allocation2 + $0x180] sm:$0xff] }
 0x22a   :  { %v15921_v19 = vpop.f32.mrf.mxu0  ;;  %16264 = vmatmul.mubr.msk.f32.gmra.mxu0 %vm298_vm3, %v4511_v33 }
 0x22b   :  { %v16019_v25 = vpop.f32.mrf.mxu1  ;;  %16362 = vmatmul.mubr.msk.f32.gmra.mxu1 %vm298_vm3, %v5221_v58  ;;  %v2348_v23 = vadd.f32 %v15921_v19, %v19064_v46  ;;  %v19456_v30 = vadd.f32 %v2912_v10, %v2345_v27  ;;  %16266 = vmatprep.mubr.msk.f32.mxu0 %vm298_vm3, %v4512_v53  ;;  %v22942_v10 = vld [vmem:[#allocation65_spill] sm:$0xff]  ;;  %v4516_v27 = vld [vmem:[#allocation2 + $0x1a0] sm:$0xff] }
 0x22c   :  { %16364 = vmatprep.mubr.msk.f32.mxu1 %vm298_vm3, %v19067_v34  ;;  %v2212_v6 = vpop.f32.mrf.mxu0  ;;  %v4515_v34 = vld [vmem:[#allocation2 + $0x190] sm:$0xff] }
 0x22d   :  { %v2922_v59 = vpop.f32.mrf.mxu1  ;;  %v2347_v47 = vadd.f32 %v2212_v6, %v22941_v61  ;;  %v19462_v49 = vadd.f32 %v16019_v25, %v2348_v23  ;;  %v22943_v25 = vld [vmem:[#allocation66_spill] sm:$0xff] }
 0x22e   :  { %v15924_v33 = vpop.f32.mrf.mxu0  ;;  %16267 = vmatmul.mubr.msk.f32.gmra.mxu0 %vm298_vm3, %v4513_v42  ;;  %v4517_v61 = vld [vmem:[#allocation2 + $0x1b0] sm:$0xff] }
 0x22f   :  { %v16022_v58 = vpop.f32.mrf.mxu1  ;;  %16365 = vmatmul.mubr.msk.f32.gmra.mxu1 %vm298_vm3, %v19071_v26  ;;  %v2350_v46 = vadd.f32 %v15924_v33, %v19079_v36  ;;  %v19468_v19 = vadd.f32 %v2922_v59, %v2347_v47  ;;  %16269 = vmatprep.mubr.msk.f32.mxu0 %vm298_vm3, %v4514_v43  ;;  %v22944_v36 = vld [vmem:[#allocation67_spill] sm:$0xff]  ;;  %v22945_v47 = vld [vmem:[#allocation68_spill] sm:$0xff] }
 0x230   :  { %16367 = vmatprep.mubr.msk.f32.mxu1 %vm298_vm3, %v22942_v10  ;;  %v2222_v53 = vpop.f32.mrf.mxu0  ;;  %v22946_v10 = vld [vmem:[#allocation69_spill] sm:$0xff] }
 0x231   :  { %v2932_v37 = vpop.f32.mrf.mxu1  ;;  %v2349_v23 = vadd.f32 %v2222_v53, %v22943_v25  ;;  %v19474_v42 = vadd.f32 %v16022_v58, %v2350_v46  ;;  %v4518_v46 = vld [vmem:[#allocation2 + $0x1c0] sm:$0xff] }
 0x232   :  { %v15927_v6 = vpop.f32.mrf.mxu0  ;;  %16270 = vmatmul.mubr.msk.f32.gmra.mxu0 %vm298_vm3, %v4515_v34 }
 0x233   :  { %v16025_v26 = vpop.f32.mrf.mxu1  ;;  %16368 = vmatmul.mubr.msk.f32.gmra.mxu1 %vm298_vm3, %v19087_v56  ;;  %v2352_v59 = vadd.f32 %v15927_v6, %v22944_v36  ;;  %v19480_v43 = vadd.f32 %v2932_v37, %v2349_v23  ;;  %16272 = vmatprep.mubr.msk.f32.mxu0 %vm298_vm3, %v4516_v27  ;;  %v22948_v37 = vld [vmem:[#allocation70_spill] sm:$0xff] }
 0x234   :  { %16370 = vmatprep.mubr.msk.f32.mxu1 %vm298_vm3, %v22945_v47  ;;  %v2232_v33 = vpop.f32.mrf.mxu0  ;;  %v4519_v6 = vld [vmem:[#allocation2 + $0x1d0] sm:$0xff]  ;;  %v4520_v47 = vld [vmem:[#allocation2 + $0x200] sm:$0xff] }
 0x235   :  { %v2942_v58 = vpop.f32.mrf.mxu1  ;;  %v2351_v53 = vadd.f32 %v2232_v33, %v22946_v10  ;;  %v19486_v34 = vadd.f32 %v16025_v26, %v2352_v59  ;;  %v5229_v36 = vld [vmem:[#allocation2 + $0x1d1] sm:$0xff] }
 0x236   :  { %v15930_v25 = vpop.f32.mrf.mxu0  ;;  %16273 = vmatmul.mubr.msk.f32.gmra.mxu0 %vm298_vm3, %v4517_v61  ;;  %v22950_v33 = vld [vmem:[#allocation71_spill] sm:$0xff] }
 0x237   :  { %22947 = vst [vmem:[#allocation23_spill] sm:$0xff] %v19486_v34  ;;  %v16028_v56 = vpop.f32.mrf.mxu1  ;;  %16371 = vmatmul.mubr.msk.f32.gmra.mxu1 %vm298_vm3, %v19103_v38  ;;  %v2354_v27 = vadd.f32 %v15930_v25, %v22948_v37  ;;  %v19492_v23 = vadd.f32 %v2942_v58, %v2351_v53  ;;  %16275 = vmatprep.mubr.msk.f32.mxu0 %vm298_vm3, %v4518_v46  ;;  %v22953_v53 = vld [vmem:[#allocation72_spill] sm:$0xff] }
 0x238   :  { %16373 = vmatprep.mubr.msk.f32.mxu1 %vm298_vm3, %v19115_v12  ;;  %v2242_v26 = vpop.f32.mrf.mxu0  ;;  %v4521_v12 = vld [vmem:[#allocation2 + $0x210] sm:$0xff] }
 0x239   :  { %22949 = vst [vmem:[#allocation24_spill] sm:$0xff] %v19492_v23  ;;  %v2952_v59 = vpop.f32.mrf.mxu1  ;;  %v2353_v61 = vadd.f32 %v2242_v26, %v22950_v33  ;;  %v19498_v10 = vadd.f32 %v16028_v56, %v2354_v27  ;;  %v4522_v56 = vld [vmem:[#allocation2 + $0x220] sm:$0xff]  ;;  %v22954_v26 = vld [vmem:[#allocation74_spill] sm:$0xff] }
 0x23a   :  { %v15933_v34 = vpop.f32.mrf.mxu0  ;;  %16276 = vmatmul.mubr.msk.f32.gmra.mxu0 %vm298_vm3, %v4519_v6  ;;  %v5232_v27 = vld [vmem:[#allocation2 + $0x221] sm:$0xff] }
 0x23b   :  { %22951 = vst [vmem:[#allocation25_spill] sm:$0xff] %v19498_v10  ;;  %v16031_v38 = vpop.f32.mrf.mxu1  ;;  %16374 = vmatmul.mubr.msk.f32.gmra.mxu1 %vm298_vm3, %v5229_v36  ;;  %v2356_v58 = vadd.f32 %v15933_v34, %v19124_v14  ;;  %v19503_v46 = vadd.f32 %v2952_v59, %v2353_v61  ;;  %16278 = vmatprep.mubr.msk.f32.mxu0 %vm298_vm3, %v4520_v47  ;;  %v22956_v34 = vld [vmem:[#allocation73_spill] sm:$0xff]  ;;  %v22957_v36 = vld [vmem:[#allocation75_spill] sm:$0xff]  ;;  %v4523_v61 = vld [vmem:[#allocation2 + $0x230] sm:$0xff] }
 0x23c   :  { %16376 = vmatprep.mubr.msk.f32.mxu1 %vm298_vm3, %v22953_v53  ;;  %v2252_v25 = vpop.f32.mrf.mxu0 }
 0x23d   :  { %22952 = vst [vmem:[#allocation26_spill] sm:$0xff] %v19503_v46  ;;  %v2962_v37 = vpop.f32.mrf.mxu1  ;;  %v2355_v33 = vadd.f32 %v2252_v25, %v22954_v26  ;;  %v19509_v6 = vadd.f32 %v16031_v38, %v2356_v58  ;;  %v4524_v38 = vld [vmem:[#allocation2 + $0x240] sm:$0xff]  ;;  %v22959_v26 = vld [vmem:[#allocation77_spill] sm:$0xff] }
 0x23e   :  { %v15936_v10 = vpop.f32.mrf.mxu0  ;;  %16279 = vmatmul.mubr.msk.f32.gmra.mxu0 %vm298_vm3, %v4521_v12  ;;  %v5234_v58 = vld [vmem:[#allocation2 + $0x241] sm:$0xff] }
 0x23f   :  { %22955 = vst [vmem:[#allocation27_spill] sm:$0xff] %v19509_v6  ;;  %v16034_v14 = vpop.f32.mrf.mxu1  ;;  %16377 = vmatmul.mubr.msk.f32.gmra.mxu1 %vm298_vm3, %v22956_v34  ;;  %v2358_v59 = vadd.f32 %v15936_v10, %v22957_v36  ;;  %v19515_v47 = vadd.f32 %v2962_v37, %v2355_v33  ;;  %16281 = vmatprep.mubr.msk.f32.mxu0 %vm298_vm3, %v4522_v56  ;;  %v22961_v10 = vld [vmem:[#allocation76_spill] sm:$0xff]  ;;  %v22962_v37 = vld [vmem:[#allocation78_spill] sm:$0xff] }
 0x240   :  { %16379 = vmatprep.mubr.msk.f32.mxu1 %vm298_vm3, %v5232_v27  ;;  %v2262_v53 = vpop.f32.mrf.mxu0  ;;  %v4525_v27 = vld [vmem:[#allocation2 + $0x250] sm:$0xff] }
 0x241   :  { %22958 = vst [vmem:[#allocation28_spill] sm:$0xff] %v19515_v47  ;;  %v2972_v25 = vpop.f32.mrf.mxu1  ;;  %v2357_v6 = vadd.f32 %v2262_v53, %v22959_v26  ;;  %v19520_v12 = vadd.f32 %v16034_v14, %v2358_v59  ;;  %v4526_v14 = vld [vmem:[#allocation2 + $0x260] sm:$0xff]  ;;  %v22964_v26 = vld [vmem:[#allocation79_spill] sm:$0xff] }
 0x242   :  { %v15939_v46 = vpop.f32.mrf.mxu0  ;;  %16282 = vmatmul.mubr.msk.f32.gmra.mxu0 %vm298_vm3, %v4523_v61  ;;  %v5236_v59 = vld [vmem:[#allocation2 + $0x261] sm:$0xff] }
 0x243   :  { %22960 = vst [vmem:[#allocation29_spill] sm:$0xff] %v19520_v12  ;;  %v16037_v34 = vpop.f32.mrf.mxu1  ;;  %16380 = vmatmul.mubr.msk.f32.gmra.mxu1 %vm298_vm3, %v22961_v10  ;;  %v2360_v56 = vadd.f32 %v15939_v46, %v22962_v37  ;;  %v19526_v33 = vadd.f32 %v2972_v25, %v2357_v6  ;;  %16284 = vmatprep.mubr.msk.f32.mxu0 %vm298_vm3, %v4524_v38  ;;  %v22966_v46 = vld [vmem:[#allocation13_spill] sm:$0xff]  ;;  %v22967_v6 = vld [vmem:[#allocation14_spill] sm:$0xff] }
 0x244   :  { %16382 = vmatprep.mubr.msk.f32.mxu1 %vm298_vm3, %v5234_v58  ;;  %v2272_v36 = vpop.f32.mrf.mxu0  ;;  %v4527_v58 = vld [vmem:[#allocation2 + $0x270] sm:$0xff] }
 0x245   :  { %22963 = vst [vmem:[#allocation30_spill] sm:$0xff] %v19526_v33  ;;  %v2982_v53 = vpop.f32.mrf.mxu1  ;;  %v2359_v12 = vadd.f32 %v2272_v36, %v22964_v26  ;;  %v19531_v61 = vadd.f32 %v16037_v34, %v2360_v56  ;;  %v5237_v37 = vld [vmem:[#allocation2 + $0x271] sm:$0xff]  ;;  %v4528_v56 = vld [vmem:[#allocation2 + $0x2a0] sm:$0xff] }
 0x246   :  { %v15942_v47 = vpop.f32.mrf.mxu0  ;;  %16285 = vmatmul.mubr.msk.f32.gmra.mxu0 %vm298_vm3, %v4525_v27  ;;  %v5238_v26 = vld [vmem:[#allocation2 + $0x2a1] sm:$0xff] }
 0x247   :  { %22965 = vst [vmem:[#allocation31_spill] sm:$0xff] %v19531_v61  ;;  %v16040_v10 = vpop.f32.mrf.mxu1  ;;  %16383 = vmatmul.mubr.msk.f32.gmra.mxu1 %vm298_vm3, %v22966_v46  ;;  %v2362_v25 = vadd.f32 %v15942_v47, %v22967_v6  ;;  %v19537_v38 = vadd.f32 %v2982_v53, %v2359_v12  ;;  %16287 = vmatprep.mubr.msk.f32.mxu0 %vm298_vm3, %v4526_v14  ;;  %v22969_v61 = vld [vmem:[#allocation15_spill] sm:$0xff]  ;;  %v22971_v12 = vld [vmem:[#allocation80_spill] sm:$0xff] }
 0x248   :  { %16385 = vmatprep.mubr.msk.f32.mxu1 %vm298_vm3, %v5236_v59  ;;  %v2282_v36 = vpop.f32.mrf.mxu0  ;;  %v4529_v59 = vld [vmem:[#allocation2 + $0x2b0] sm:$0xff] }
 0x249   :  { %22968 = vst [vmem:[#allocation32_spill] sm:$0xff] %v19537_v38  ;;  %v2992_v34 = vpop.f32.mrf.mxu1  ;;  %v2361_v27 = vadd.f32 %v2282_v36, %v22969_v61  ;;  %v19542_v33 = vadd.f32 %v16040_v10, %v2362_v25  ;;  %v5239_v46 = vld [vmem:[#allocation2 + $0x2b1] sm:$0xff]  ;;  %v4530_v10 = vld [vmem:[#allocation2 + $0x2c0] sm:$0xff] }
 0x24a   :  { %v15945_v23 = vpop.f32.mrf.mxu0  ;;  %16288 = vmatmul.mubr.msk.f32.gmra.mxu0 %vm298_vm3, %v4527_v58  ;;  %v5240_v25 = vld [vmem:[#allocation2 + $0x2c1] sm:$0xff] }
 0x24b   :  { %22970 = vst [vmem:[#allocation33_spill] sm:$0xff] %v19542_v33  ;;  %v16043_v47 = vpop.f32.mrf.mxu1  ;;  %16386 = vmatmul.mubr.msk.f32.gmra.mxu1 %vm298_vm3, %v5237_v37  ;;  %v2364_v53 = vadd.f32 %v15945_v23, %v22971_v12  ;;  %v19547_v14 = vadd.f32 %v2992_v34, %v2361_v27  ;;  %16290 = vmatprep.mubr.msk.f32.mxu0 %vm298_vm3, %v4528_v56  ;;  %v22972_v36 = vld [vmem:[#allocation16_spill] sm:$0xff]  ;;  %v22974_v34 = vld [vmem:[#allocation17_spill] sm:$0xff]  ;;  %v5241_v27 = vld [vmem:[#allocation2 + $0x2d1] sm:$0xff] }
 0x24c   :  { %16388 = vmatprep.mubr.msk.f32.mxu1 %vm298_vm3, %v5238_v26  ;;  %v2292_v6 = vpop.f32.mrf.mxu0  ;;  %v4531_v26 = vld [vmem:[#allocation2 + $0x2d0] sm:$0xff] }
 0x24d   :  { %v3002_v61 = vpop.f32.mrf.mxu1  ;;  %v2363_v33 = vadd.f32 %v2292_v6, %v22972_v36  ;;  %v19552_v58 = vadd.f32 %v16043_v47, %v2364_v53  ;;  %v4532_v47 = vld [vmem:[#allocation2 + $0x2e0] sm:$0xff] }
 0x24e   :  { %v16048_v38 = vpop.f32.mrf.mxu0  ;;  %16291 = vmatmul.mubr.msk.f32.gmra.mxu0 %vm298_vm3, %v4529_v59  ;;  %v5242_v53 = vld [vmem:[#allocation2 + $0x2e1] sm:$0xff] }
 0x24f   :  { %22973 = vst [vmem:[#allocation34_spill] sm:$0xff] %v19552_v58  ;;  %v16146_v23 = vpop.f32.mrf.mxu1  ;;  %16389 = vmatmul.mubr.msk.f32.gmra.mxu1 %vm298_vm3, %v5239_v46  ;;  %v19556_v37 = vadd.f32 %v3002_v61, %v2363_v33  ;;  %v3722_v56 = vadd.f32 %v16048_v38, %v22974_v34  ;;  %16293 = vmatprep.mubr.msk.f32.mxu0 %vm298_vm3, %v4530_v10  ;;  %v22976_v38 = vld [vmem:[#allocation18_spill] sm:$0xff] }
 0x250   :  { %16391 = vmatprep.mubr.msk.f32.mxu1 %vm298_vm3, %v5240_v25  ;;  %v3402_v12 = vpop.f32.mrf.mxu0  ;;  %v4533_v10 = vld [vmem:[#allocation2 + $0x2f0] sm:$0xff] }
 0x251   :  { %v4112_v6 = vpop.f32.mrf.mxu1  ;;  %v3721_v36 = vadd.f32 %v3402_v12, %v19196_v8  ;;  %v19562_v59 = vadd.f32 %v16146_v23, %v3722_v56  ;;  %v5243_v25 = vld [vmem:[#allocation2 + $0x2f1] sm:$0xff]  ;;  %v4534_v23 = vld [vmem:[#allocation2 + $0x300] sm:$0xff] }
 0x252   :  { %v16051_v58 = vpop.f32.mrf.mxu0  ;;  %16294 = vmatmul.mubr.msk.f32.gmra.mxu0 %vm298_vm3, %v4531_v26  ;;  %v5244_v56 = vld [vmem:[#allocation2 + $0x301] sm:$0xff] }
 0x253   :  { %22975 = vst [vmem:[#allocation35_spill] sm:$0xff] %v19562_v59  ;;  %v16149_v33 = vpop.f32.mrf.mxu1  ;;  %16392 = vmatmul.mubr.msk.f32.gmra.mxu1 %vm298_vm3, %v5241_v27  ;;  %v3724_v46 = vadd.f32 %v16051_v58, %v22976_v38  ;;  %v19567_v61 = vadd.f32 %v4112_v6, %v3721_v36  ;;  %16296 = vmatprep.mubr.msk.f32.mxu0 %vm298_vm3, %v4532_v47  ;;  %v4535_v47 = vld [vmem:[#allocation2 + $0x310] sm:$0xff]  ;;  %v5246_v38 = vld [vmem:[#allocation2 + $0x341] sm:$0xff] }
 0x254   :  { %16394 = vmatprep.mubr.msk.f32.mxu1 %vm298_vm3, %v5242_v53  ;;  %v3412_v34 = vpop.f32.mrf.mxu0  ;;  %v5245_v53 = vld [vmem:[#allocation2 + $0x311] sm:$0xff] }
 0x255   :  { %v4122_v8 = vpop.f32.mrf.mxu1  ;;  %v3723_v12 = vadd.f32 %v3412_v34, %v19208_v54  ;;  %v19572_v26 = vadd.f32 %v16149_v33, %v3724_v46  ;;  %v4536_v33 = vld [vmem:[#allocation2 + $0x340] sm:$0xff] }
 0x256   :  { %v16054_v59 = vpop.f32.mrf.mxu0  ;;  %16297 = vmatmul.mubr.msk.f32.gmra.mxu0 %vm298_vm3, %v4533_v10 }
 0x257   :  { %v16152_v58 = vpop.f32.mrf.mxu1  ;;  %16395 = vmatmul.mubr.msk.f32.gmra.mxu1 %vm298_vm3, %v5243_v25  ;;  %v3726_v27 = vadd.f32 %v16054_v59, %v19214_v50  ;;  %v19577_v6 = vadd.f32 %v4122_v8, %v3723_v12  ;;  %16299 = vmatprep.mubr.msk.f32.mxu0 %vm298_vm3, %v4534_v23  ;;  %v4537_v8 = vld [vmem:[#allocation2 + $0x350] sm:$0xff]  ;;  %v4538_v12 = vld [vmem:[#allocation2 + $0x360] sm:$0xff] }
 0x258   :  { %16397 = vmatprep.mubr.msk.f32.mxu1 %vm298_vm3, %v5244_v56  ;;  %v3422_v36 = vpop.f32.mrf.mxu0  ;;  %v5247_v23 = vld [vmem:[#allocation2 + $0x351] sm:$0xff] }
 0x259   :  { %v4132_v54 = vpop.f32.mrf.mxu1  ;;  %v3725_v46 = vadd.f32 %v3422_v36, %v19219_v45  ;;  %v19582_v10 = vadd.f32 %v16152_v58, %v3726_v27  ;;  %v5248_v58 = vld [vmem:[#allocation2 + $0x361] sm:$0xff] }
 0x25a   :  { %v16057_v34 = vpop.f32.mrf.mxu0  ;;  %16300 = vmatmul.mubr.msk.f32.gmra.mxu0 %vm298_vm3, %v4535_v47 }
 0x25b   :  { %v16155_v50 = vpop.f32.mrf.mxu1  ;;  %16398 = vmatmul.mubr.msk.f32.gmra.mxu1 %vm298_vm3, %v5245_v53  ;;  %v3728_v59 = vadd.f32 %v16057_v34, %v19225_v16  ;;  %v19587_v25 = vadd.f32 %v4132_v54, %v3725_v46  ;;  %16302 = vmatprep.mubr.msk.f32.mxu0 %vm298_vm3, %v4536_v33  ;;  %v4539_v33 = vld [vmem:[#allocation2 + $0x370] sm:$0xff]  ;;  %v6961_v46 = vld [vmem:[#allocation5 + $0x38] sm:$0xff] }
 0x25c   :  { %16400 = vmatprep.mubr.msk.f32.mxu1 %vm298_vm3, %v5246_v38  ;;  %v3432_v56 = vpop.f32.mrf.mxu0  ;;  %v5249_v38 = vld [vmem:[#allocation2 + $0x371] sm:$0xff]  ;;  %16534 = vmatprep.subr.mxu1 %v6961_v46 }
 0x25d   :  { %v4142_v45 = vpop.f32.mrf.mxu1  ;;  %v3727_v27 = vadd.f32 %v3432_v56, %v19231_v41  ;;  %v19592_v47 = vadd.f32 %v16155_v50, %v3728_v59  ;;  %v4540_v50 = vld [vmem:[#allocation2 + $0x380] sm:$0xff]  ;;  %16535 = vmatpush3.msra.mxu1 %v6961_v46 }
 0x25e   :  { %v16060_v36 = vpop.f32.mrf.mxu0  ;;  %16303 = vmatmul.mubr.msk.f32.gmra.mxu0 %vm298_vm3, %v4537_v8  ;;  %v5250_v59 = vld [vmem:[#allocation2 + $0x381] sm:$0xff] }
 0x25f   :  { %v16158_v16 = vpop.f32.mrf.mxu1  ;;  %16401 = vmatmul.mubr.msk.f32.gmra.mxu1 %vm298_vm3, %v5247_v23  ;;  %v3730_v53 = vadd.f32 %v16060_v36, %v19237_v39  ;;  %v19597_v54 = vadd.f32 %v4142_v45, %v3727_v27  ;;  %16305 = vmatprep.mubr.msk.f32.mxu0 %vm298_vm3, %v4538_v12  ;;  %v22978_v45 = vld [vmem:[#allocation19_spill] sm:$0xff]  ;;  %v4541_v27 = vld [vmem:[#allocation2 + $0x390] sm:$0xff]  ;;  %v5252_v46 = vld [vmem:[#allocation2 + $0x3a1] sm:$0xff] }
 0x260   :  { %16403 = vmatprep.mubr.msk.f32.mxu1 %vm298_vm3, %v5248_v58  ;;  %v3442_v41 = vpop.f32.mrf.mxu0  ;;  %v5251_v36 = vld [vmem:[#allocation2 + $0x391] sm:$0xff] }
 0x261   :  { %v4152_v34 = vpop.f32.mrf.mxu1  ;;  %v3729_v8 = vadd.f32 %v3442_v41, %v19243_v63  ;;  %v19602_v56 = vadd.f32 %v16158_v16, %v3730_v53  ;;  %v4542_v53 = vld [vmem:[#allocation2 + $0x3a0] sm:$0xff] }
 0x262   :  { %v16063_v39 = vpop.f32.mrf.mxu0  ;;  %16306 = vmatmul.mubr.msk.f32.gmra.mxu0 %vm298_vm3, %v4539_v33 }
 0x263   :  { %22977 = vst [vmem:[#allocation36_spill] sm:$0xff] %v19602_v56  ;;  %v16161_v23 = vpop.f32.mrf.mxu1  ;;  %16404 = vmatmul.mubr.msk.f32.gmra.mxu1 %vm298_vm3, %v5249_v38  ;;  %v3732_v12 = vadd.f32 %v16063_v39, %v22978_v45  ;;  %v19607_v58 = vadd.f32 %v4152_v34, %v3729_v8  ;;  %16308 = vmatprep.mubr.msk.f32.mxu0 %vm298_vm3, %v4540_v50  ;;  %v5253_v8 = vld [vmem:[#allocation2 + $0x3b1] sm:$0xff]  ;;  %v5254_v45 = vld [vmem:[#allocation2 + $0x3e1] sm:$0xff] }
 0x264   :  { %16406 = vmatprep.mubr.msk.f32.mxu1 %vm298_vm3, %v5250_v59  ;;  %v3452_v63 = vpop.f32.mrf.mxu0  ;;  %v4543_v59 = vld [vmem:[#allocation2 + $0x3b0] sm:$0xff] }
 0x265   :  { %v4162_v16 = vpop.f32.mrf.mxu1  ;;  %v3731_v41 = vadd.f32 %v3452_v63, %v19255_v4  ;;  %v19612_v33 = vadd.f32 %v16161_v23, %v3732_v12  ;;  %v4544_v23 = vld [vmem:[#allocation2 + $0x3e0] sm:$0xff] }
 0x266   :  { %v16066_v56 = vpop.f32.mrf.mxu0  ;;  %16309 = vmatmul.mubr.msk.f32.gmra.mxu0 %vm298_vm3, %v4541_v27 }
 0x267   :  { %v16164_v38 = vpop.f32.mrf.mxu1  ;;  %16407 = vmatmul.mubr.msk.f32.gmra.mxu1 %vm298_vm3, %v5251_v36  ;;  %v3734_v34 = vadd.f32 %v16066_v56, %v19261_v13  ;;  %v19617_v50 = vadd.f32 %v4162_v16, %v3731_v41  ;;  %16311 = vmatprep.mubr.msk.f32.mxu0 %vm298_vm3, %v4542_v53  ;;  %v4545_v16 = vld [vmem:[#allocation2 + $0x3f0] sm:$0xff]  ;;  %v4546_v41 = vld [vmem:[#allocation2 + $0x400] sm:$0xff] }
 0x268   :  { %16409 = vmatprep.mubr.msk.f32.mxu1 %vm298_vm3, %v5252_v46  ;;  %v3462_v39 = vpop.f32.mrf.mxu0  ;;  %v5255_v53 = vld [vmem:[#allocation2 + $0x3f1] sm:$0xff] }
 0x269   :  { %v4172_v4 = vpop.f32.mrf.mxu1  ;;  %v3733_v12 = vadd.f32 %v3462_v39, %v19266_v44  ;;  %v19622_v27 = vadd.f32 %v16164_v38, %v3734_v34  ;;  %v5256_v38 = vld [vmem:[#allocation2 + $0x401] sm:$0xff] }
 0x26a   :  { %v16069_v63 = vpop.f32.mrf.mxu0  ;;  %16312 = vmatmul.mubr.msk.f32.gmra.mxu0 %vm298_vm3, %v4543_v59 }
 0x26b   :  { %v16167_v13 = vpop.f32.mrf.mxu1  ;;  %16410 = vmatmul.mubr.msk.f32.gmra.mxu1 %vm298_vm3, %v5253_v8  ;;  %v3736_v56 = vadd.f32 %v16069_v63, %v19272_v3  ;;  %v19627_v36 = vadd.f32 %v4172_v4, %v3733_v12  ;;  %16314 = vmatprep.mubr.msk.f32.mxu0 %vm298_vm3, %v4544_v23  ;;  %v4547_v23 = vld [vmem:[#allocation2 + $0x410] sm:$0xff]  ;;  %v4548_v63 = vld [vmem:[#allocation2 + $0x420] sm:$0xff] }
 0x26c   :  { %16412 = vmatprep.mubr.msk.f32.mxu1 %vm298_vm3, %v5254_v45  ;;  %v3472_v46 = vpop.f32.mrf.mxu0  ;;  %v5257_v45 = vld [vmem:[#allocation2 + $0x411] sm:$0xff] }
 0x26d   :  { %v4182_v44 = vpop.f32.mrf.mxu1  ;;  %v3735_v34 = vadd.f32 %v3472_v46, %v19278_v60  ;;  %v19632_v59 = vadd.f32 %v16167_v13, %v3736_v56  ;;  %v5258_v13 = vld [vmem:[#allocation2 + $0x421] sm:$0xff] }
 0x26e   :  { %v16072_v39 = vpop.f32.mrf.mxu0  ;;  %16315 = vmatmul.mubr.msk.f32.gmra.mxu0 %vm298_vm3, %v4545_v16  ;;  %v22979_v46 = vld [vmem:[#allocation20_spill] sm:$0xff] }
 0x26f   :  { %v16170_v3 = vpop.f32.mrf.mxu1  ;;  %16413 = vmatmul.mubr.msk.f32.gmra.mxu1 %vm298_vm3, %v5255_v53  ;;  %v3738_v8 = vadd.f32 %v16072_v39, %v19284_v2  ;;  %v19637_v4 = vadd.f32 %v4182_v44, %v3735_v34  ;;  %16317 = vmatprep.mubr.msk.f32.mxu0 %vm298_vm3, %v4546_v41  ;;  %v4549_v41 = vld [vmem:[#allocation2 + $0x430] sm:$0xff] }
 0x270   :  { %16415 = vmatprep.mubr.msk.f32.mxu1 %vm298_vm3, %v5256_v38  ;;  %v3482_v12 = vpop.f32.mrf.mxu0  ;;  %v5259_v38 = vld [vmem:[#allocation2 + $0x431] sm:$0xff] }
 0x271   :  { %v19641_v60 = vpop.f32.mrf.mxu1  ;;  %v19644_v56 = vadd.f32 %v3482_v12, %v19290_v7  ;;  %v19646_v16 = vadd.f32 %v16170_v3, %v3738_v8  ;;  %v4550_v7 = vld [vmem:[#allocation2 + $0x440] sm:$0xff] }
 0x272   :  { %v16075_v53 = vpop.f32.mrf.mxu0  ;;  %16318 = vmatmul.mubr.msk.f32.gmra.mxu0 %vm298_vm3, %v4547_v23  ;;  %v5260_v3 = vld [vmem:[#allocation2 + $0x441] sm:$0xff] }
 0x273   :  { %v16173_v2 = vpop.f32.mrf.mxu1  ;;  %16416 = vmatmul.mubr.msk.f32.gmra.mxu1 %vm298_vm3, %v5257_v45  ;;  %v3740_v44 = vadd.f32 %v16075_v53, %v22979_v46  ;;  %16320 = vmatprep.mubr.msk.f32.mxu0 %vm298_vm3, %v4548_v63  ;;  %v5261_v53 = vld [vmem:[#allocation2 + $0x451] sm:$0xff] }
 0x274   :  { %16418 = vmatprep.mubr.msk.f32.mxu1 %vm298_vm3, %v5258_v13  ;;  %v3492_v34 = vpop.f32.mrf.mxu0  ;;  %v4551_v13 = vld [vmem:[#allocation2 + $0x450] sm:$0xff] }
 0x275   :  { %v19653_v39 = vpop.f32.mrf.mxu1  ;;  %v19656_v8 = vadd.f32 %v3492_v34, %v19302_v9  ;;  %v19658_v23 = vadd.f32 %v16173_v2, %v3740_v44  ;;  %v4552_v9 = vld [vmem:[#allocation2 + $0x480] sm:$0xff] }
 0x276   :  { %22980 = vst [vmem:[#allocation37_spill] sm:$0xff] %v19653_v39  ;;  %v16078_v12 = vpop.f32.mrf.mxu0  ;;  %16321 = vmatmul.mubr.msk.f32.gmra.mxu0 %vm298_vm3, %v4549_v41  ;;  %v5262_v2 = vld [vmem:[#allocation2 + $0x481] sm:$0xff] }
 0x277   :  { %22981 = vst [vmem:[#allocation38_spill] sm:$0xff] %v19656_v8  ;;  %v16176_v45 = vpop.f32.mrf.mxu1  ;;  %16419 = vmatmul.mubr.msk.f32.gmra.mxu1 %vm298_vm3, %v5259_v38  ;;  %v3742_v63 = vadd.f32 %v16078_v12, %v19308_v32  ;;  %16323 = vmatprep.mubr.msk.f32.mxu0 %vm298_vm3, %v4550_v7  ;;  %v4553_v7 = vld [vmem:[#allocation2 + $0x490] sm:$0xff] }
 0x278   :  { %16421 = vmatprep.mubr.msk.f32.mxu1 %vm298_vm3, %v5260_v3  ;;  %v3502_v46 = vpop.f32.mrf.mxu0  ;;  %v5263_v3 = vld [vmem:[#allocation2 + $0x491] sm:$0xff] }
 0x279   :  { %v19665_v39 = vpop.f32.mrf.mxu1  ;;  %v19668_v44 = vadd.f32 %v3502_v46, %v19313_v11  ;;  %v19670_v41 = vadd.f32 %v16176_v45, %v3742_v63  ;;  %v4554_v11 = vld [vmem:[#allocation2 + $0x4a0] sm:$0xff] }
 0x27a   :  { %22982 = vst [vmem:[#allocation39_spill] sm:$0xff] %v19665_v39  ;;  %v16081_v34 = vpop.f32.mrf.mxu0  ;;  %16324 = vmatmul.mubr.msk.f32.gmra.mxu0 %vm298_vm3, %v4551_v13  ;;  %v5264_v45 = vld [vmem:[#allocation2 + $0x4a1] sm:$0xff] }
 0x27b   :  { %22983 = vst [vmem:[#allocation40_spill] sm:$0xff] %v19668_v44  ;;  %v16179_v32 = vpop.f32.mrf.mxu1  ;;  %16422 = vmatmul.mubr.msk.f32.gmra.mxu1 %vm298_vm3, %v5261_v53  ;;  %v3744_v38 = vadd.f32 %v16081_v34, %v19319_v1  ;;  %16326 = vmatprep.mubr.msk.f32.mxu0 %vm298_vm3, %v4552_v9  ;;  %v4555_v9 = vld [vmem:[#allocation2 + $0x4b0] sm:$0xff] }
 0x27c   :  { %16424 = vmatprep.mubr.msk.f32.mxu1 %vm298_vm3, %v5262_v2  ;;  %v3512_v12 = vpop.f32.mrf.mxu0  ;;  %v5265_v2 = vld [vmem:[#allocation2 + $0x4b1] sm:$0xff] }
 0x27d   :  { %v19677_v39 = vpop.f32.mrf.mxu1  ;;  %v19680_v63 = vadd.f32 %v3512_v12, %v19325_v51  ;;  %v19682_v13 = vadd.f32 %v16179_v32, %v3744_v38  ;;  %v6960_v34 = vld [vmem:[#allocation5 + $0x30] sm:$0xff]  ;;  %v4556_v32 = vld [vmem:[#allocation2 + $0x4c0] sm:$0xff] }
 0x27e   :  { %22984 = vst [vmem:[#allocation41_spill] sm:$0xff] %v19677_v39  ;;  %v16084_v46 = vpop.f32.mrf.mxu0  ;;  %16327 = vmatmul.mubr.msk.f32.gmra.mxu0 %vm298_vm3, %v4553_v7  ;;  %v5266_v38 = vld [vmem:[#allocation2 + $0x4c1] sm:$0xff]  ;;  %16536 = vmatprep.subr.mxu1 %v6960_v34 }
 0x27f   :  { %22985 = vst [vmem:[#allocation42_spill] sm:$0xff] %v19680_v63  ;;  %v16182_v1 = vpop.f32.mrf.mxu1  ;;  %16425 = vmatmul.mubr.msk.f32.gmra.mxu1 %vm298_vm3, %v5263_v3  ;;  %v3746_v53 = vadd.f32 %v16084_v46, %v19331_v48  ;;  %16329 = vmatprep.mubr.msk.f32.mxu0 %vm298_vm3, %v4554_v11  ;;  %v22988_v11 = vld [vmem:[#allocation21_spill] sm:$0xff]  ;;  %v4557_v46 = vld [vmem:[#allocation2 + $0x4d0] sm:$0xff] }
 0x280   :  { %16427 = vmatprep.mubr.msk.f32.mxu1 %vm298_vm3, %v5264_v45  ;;  %v3522_v39 = vpop.f32.mrf.mxu0  ;;  %16537 = vmatpush3.msra.mxu1 %v6960_v34 }
 0x281   :  { %v19689_v51 = vpop.f32.mrf.mxu1  ;;  %v19692_v7 = vadd.f32 %v3522_v39, %v19337_v35  ;;  %v19694_v12 = vadd.f32 %v16182_v1, %v3746_v53  ;;  %v4558_v39 = vld [vmem:[#allocation2 + $0x4e0] sm:$0xff] }
 0x282   :  { %22986 = vst [vmem:[#allocation43_spill] sm:$0xff] %v19689_v51  ;;  %v16087_v48 = vpop.f32.mrf.mxu0  ;;  %16330 = vmatmul.mubr.msk.f32.gmra.mxu0 %vm298_vm3, %v4555_v9  ;;  %v5267_v51 = vld [vmem:[#allocation2 + $0x4d1] sm:$0xff]  ;;  %v5268_v1 = vld [vmem:[#allocation2 + $0x4e1] sm:$0xff] }
 0x283   :  { %22987 = vst [vmem:[#allocation44_spill] sm:$0xff] %v19692_v7  ;;  %v16185_v3 = vpop.f32.mrf.mxu1  ;;  %16428 = vmatmul.mubr.msk.f32.gmra.mxu1 %vm298_vm3, %v5265_v2  ;;  %v3748_v45 = vadd.f32 %v16087_v48, %v22988_v11  ;;  %16332 = vmatprep.mubr.msk.f32.mxu0 %vm298_vm3, %v4556_v32  ;;  %v5269_v48 = vld [vmem:[#allocation2 + $0x4f1] sm:$0xff] }
 0x284   :  { %16430 = vmatprep.mubr.msk.f32.mxu1 %vm298_vm3, %v5266_v38  ;;  %v3532_v63 = vpop.f32.mrf.mxu0  ;;  %v4559_v38 = vld [vmem:[#allocation2 + $0x4f0] sm:$0xff] }
 0x285   :  { %v19701_v35 = vpop.f32.mrf.mxu1  ;;  %v19704_v53 = vadd.f32 %v3532_v63, %v19349_v5  ;;  %v19706_v9 = vadd.f32 %v16185_v3, %v3748_v45  ;;  %v5916_v5 = vld [vmem:[#allocation2 + $0x22] sm:$0xff] }
 0x286   :  { %22989 = vst [vmem:[#allocation45_spill] sm:$0xff] %v19701_v35  ;;  %v16090_v34 = vpop.f32.mrf.mxu0  ;;  %16333 = vmatmul.mubr.msk.f32.gmra.mxu0 %vm298_vm3, %v4557_v46  ;;  %v5917_v46 = vld [vmem:[#allocation2 + $0x32] sm:$0xff] }
 0x287   :  { %22990 = vst [vmem:[#allocation46_spill] sm:$0xff] %v19704_v53  ;;  %v16188_v2 = vpop.f32.mrf.mxu1  ;;  %16431 = vmatmul.mubr.msk.f32.gmra.mxu1 %vm298_vm3, %v5267_v51  ;;  %v3750_v32 = vadd.f32 %v16090_v34, %v19355_v20  ;;  %16335 = vmatprep.mubr.msk.f32.mxu0 %vm298_vm3, %v4558_v39  ;;  %v5918_v34 = vld [vmem:[#allocation2 + $0x42] sm:$0xff] }
 0x288   :  { %16433 = vmatprep.mubr.msk.f32.mxu1 %vm298_vm3, %v5268_v1  ;;  %v3542_v11 = vpop.f32.mrf.mxu0  ;;  %v5966_v53 = vld [vmem:[#allocation2 + $0x402] sm:$0xff] }
 0x289   :  { %v19713_v35 = vpop.f32.mrf.mxu1  ;;  %v19716_v63 = vadd.f32 %v3542_v11, %v19360_v55  ;;  %v19718_v3 = vadd.f32 %v16188_v2, %v3750_v32 }
 0x28a   :  { %22991 = vst [vmem:[#allocation47_spill] sm:$0xff] %v19713_v35  ;;  %v16093_v45 = vpop.f32.mrf.mxu0  ;;  %16336 = vmatmul.mubr.msk.f32.gmra.mxu0 %vm298_vm3, %v4559_v38 }
 0x28b   :  { %22992 = vst [vmem:[#allocation48_spill] sm:$0xff] %v19716_v63  ;;  %v16191_v51 = vpop.f32.mrf.mxu1  ;;  %16434 = vmatmul.mubr.msk.f32.gmra.mxu1 %vm298_vm3, %v5269_v48  ;;  %v3752_v20 = vadd.f32 %v16093_v45, %v19366_v62  ;;  %16438 = vmatprep.mubr.msk.f32.mxu0 %vm298_vm3, %v5916_v5  ;;  %v5919_v62 = vld [vmem:[#allocation2 + $0x52] sm:$0xff]  ;;  %v5920_v45 = vld [vmem:[#allocation2 + $0x62] sm:$0xff] }
 0x28c   :  { %v3552_v39 = vpop.f32.mrf.mxu0  ;;  %v5960_v63 = vld [vmem:[#allocation2 + $0x382] sm:$0xff] }
 0x28d   :  { %v19724_v1 = vpop.f32.mrf.mxu1  ;;  %v19727_v55 = vadd.f32 %v3552_v39, %v19372_v22  ;;  %v19729_v2 = vadd.f32 %v16191_v51, %v3752_v20 }
 0x28e   :  { %22993 = vst [vmem:[#allocation49_spill] sm:$0xff] %v19724_v1  ;;  %v16096_v32 = vpop.f32.mrf.mxu0  ;;  %16439 = vmatmul.mubr.msk.f32.vlgmr.msra.gmra.mxu0 %vm298_vm3, %v5917_v46 }
 0x28f   :  { %22994 = vst [vmem:[#allocation50_spill] sm:$0xff] %v19727_v55  ;;  %v16194_v38 = vpop.f32.mrf.mxu1  ;;  %v3754_v48 = vadd.f32 %v16096_v32, %v19380_v40  ;;  %16441 = vmatprep.mubr.msk.f32.mxu0 %vm298_vm3, %v5918_v34  ;;  %v5921_v40 = vld [vmem:[#allocation2 + $0x72] sm:$0xff]  ;;  %v5922_v32 = vld [vmem:[#allocation2 + $0x82] sm:$0xff] }
 0x290   :  { %v3562_v11 = vpop.f32.mrf.mxu0  ;;  %v6889_v55 = vld [vmem:[#allocation5] sm:$0xff] }
 0x291   :  { %v19734_v5 = vpop.f32.mrf.mxu1  ;;  %v19737_v1 = vadd.f32 %v3562_v11, %v19386_v57  ;;  %v19739_v22 = vadd.f32 %v16194_v38, %v3754_v48 }
 0x292   :  { %22995 = vst [vmem:[#allocation51_spill] sm:$0xff] %v19734_v5  ;;  %v16099_v51 = vpop.f32.mrf.mxu0  ;;  %16442 = vmatmul.mubr.msk.f32.gmra.mxu0 %vm298_vm3, %v5919_v62 }
 0x293   :  { %22996 = vst [vmem:[#allocation52_spill] sm:$0xff] %v19737_v1  ;;  %v16197_v20 = vpop.f32.mrf.mxu1  ;;  %v3756_v46 = vadd.f32 %v16099_v51, %v19392_v15  ;;  %16444 = vmatprep.mubr.msk.f32.mxu0 %vm298_vm3, %v5920_v45  ;;  %v5923_v15 = vld [vmem:[#allocation2 + $0x92] sm:$0xff]  ;;  %v5924_v51 = vld [vmem:[#allocation2 + $0xc2] sm:$0xff] }
 0x294   :  { %v3572_v39 = vpop.f32.mrf.mxu0 }
 0x295   :  { %v19744_v34 = vpop.f32.mrf.mxu1  ;;  %v19747_v5 = vadd.f32 %v3572_v39, %v19398_v29  ;;  %v19749_v57 = vadd.f32 %v16197_v20, %v3756_v46 }
 0x296   :  { %22997 = vst [vmem:[#allocation53_spill] sm:$0xff] %v19744_v34  ;;  %v16102_v38 = vpop.f32.mrf.mxu0  ;;  %16445 = vmatmul.mubr.msk.f32.gmra.mxu0 %vm298_vm3, %v5921_v40 }
 0x297   :  { %22998 = vst [vmem:[#allocation54_spill] sm:$0xff] %v19747_v5  ;;  %v16200_v48 = vpop.f32.mrf.mxu1  ;;  %v3758_v62 = vadd.f32 %v16102_v38, %v19404_v24  ;;  %16447 = vmatprep.mubr.msk.f32.mxu0 %vm298_vm3, %v5922_v32  ;;  %v5925_v24 = vld [vmem:[#allocation2 + $0xd2] sm:$0xff]  ;;  %v5926_v38 = vld [vmem:[#allocation2 + $0xe2] sm:$0xff] }
 0x298   :  { %v3582_v11 = vpop.f32.mrf.mxu0  ;;  %v23032_v5 = vld [vmem:[#allocation32_spill] sm:$0xff] }
 0x299   :  { %v19754_v45 = vpop.f32.mrf.mxu1  ;;  %v19757_v34 = vadd.f32 %v3582_v11, %v19409_v0  ;;  %v19759_v29 = vadd.f32 %v16200_v48, %v3758_v62  ;;  %v6959_v11 = vld [vmem:[#allocation5 + $0x28] sm:$0xff] }
 0x29a   :  { %22999 = vst [vmem:[#allocation55_spill] sm:$0xff] %v19754_v45  ;;  %v16105_v20 = vpop.f32.mrf.mxu0  ;;  %16448 = vmatmul.mubr.msk.f32.gmra.mxu0 %vm298_vm3, %v5923_v15  ;;  %16538 = vmatprep.subr.mxu1 %v6959_v11 }
 0x29b   :  { %23000 = vst [vmem:[#allocation56_spill] sm:$0xff] %v19757_v34  ;;  %v16203_v46 = vpop.f32.mrf.mxu1  ;;  %v3760_v40 = vadd.f32 %v16105_v20, %v19415_v21  ;;  %16450 = vmatprep.mubr.msk.f32.mxu0 %vm298_vm3, %v5924_v51  ;;  %v5927_v21 = vld [vmem:[#allocation2 + $0xf2] sm:$0xff]  ;;  %16539 = vmatpush3.msra.mxu1 %v6959_v11 }
 0x29c   :  { %v3592_v39 = vpop.f32.mrf.mxu0  ;;  %v5931_v11 = vld [vmem:[#allocation2 + $0x132] sm:$0xff] }
 0x29d   :  { %v19764_v32 = vpop.f32.mrf.mxu1  ;;  %v19767_v45 = vadd.f32 %v3592_v39, %v19421_v52  ;;  %v19769_v0 = vadd.f32 %v16203_v46, %v3760_v40 }
 0x29e   :  { %23001 = vst [vmem:[#allocation57_spill] sm:$0xff] %v19764_v32  ;;  %v16108_v48 = vpop.f32.mrf.mxu0  ;;  %16451 = vmatmul.mubr.msk.f32.gmra.mxu0 %vm298_vm3, %v5925_v24  ;;  %v5928_v32 = vld [vmem:[#allocation2 + $0x102] sm:$0xff] }
 0x29f   :  { %23002 = vst [vmem:[#allocation58_spill] sm:$0xff] %v19767_v45  ;;  %v16206_v62 = vpop.f32.mrf.mxu1  ;;  %v3762_v15 = vadd.f32 %v16108_v48, %v19427_v28  ;;  %16453 = vmatprep.mubr.msk.f32.mxu0 %vm298_vm3, %v5926_v38  ;;  %v23005_v28 = vld [vmem:[#allocation22_spill] sm:$0xff] }
 0x2a0   :  { %v3602_v51 = vpop.f32.mrf.mxu0  ;;  %v5929_v38 = vld [vmem:[#allocation2 + $0x112] sm:$0xff] }
 0x2a1   :  { %v19774_v20 = vpop.f32.mrf.mxu1  ;;  %v19777_v52 = vadd.f32 %v3602_v51, %v19433_v17  ;;  %v19779_v46 = vadd.f32 %v16206_v62, %v3762_v15 }
 0x2a2   :  { %23003 = vst [vmem:[#allocation59_spill] sm:$0xff] %v19774_v20  ;;  %v16111_v40 = vpop.f32.mrf.mxu0  ;;  %16454 = vmatmul.mubr.msk.f32.gmra.mxu0 %vm298_vm3, %v5927_v21  ;;  %v5930_v20 = vld [vmem:[#allocation2 + $0x122] sm:$0xff] }
 0x2a3   :  { %23004 = vst [vmem:[#allocation60_spill] sm:$0xff] %v19777_v52  ;;  %v16209_v24 = vpop.f32.mrf.mxu1  ;;  %v3764_v39 = vadd.f32 %v16111_v40, %v23005_v28  ;;  %16456 = vmatprep.mubr.msk.f32.mxu0 %vm298_vm3, %v5928_v32  ;;  %v5932_v40 = vld [vmem:[#allocation2 + $0x162] sm:$0xff]  ;;  %v23028_v52 = vld [vmem:[#allocation30_spill] sm:$0xff] }
 0x2a4   :  { %v3612_v48 = vpop.f32.mrf.mxu0 }
 0x2a5   :  { %v19784_v45 = vpop.f32.mrf.mxu1  ;;  %v19787_v34 = vadd.f32 %v3612_v48, %v19445_v31  ;;  %v19789_v17 = vadd.f32 %v16209_v24, %v3764_v39 }
 0x2a6   :  { %23006 = vst [vmem:[#allocation61_spill] sm:$0xff] %v19784_v45  ;;  %v16114_v62 = vpop.f32.mrf.mxu0  ;;  %16457 = vmatmul.mubr.msk.f32.gmra.mxu0 %vm298_vm3, %v5929_v38 }
 0x2a7   :  { %23007 = vst [vmem:[#allocation62_spill] sm:$0xff] %v19787_v34  ;;  %v16212_v15 = vpop.f32.mrf.mxu1  ;;  %v3766_v21 = vadd.f32 %v16114_v62, %v19451_v18  ;;  %16459 = vmatprep.mubr.msk.f32.mxu0 %vm298_vm3, %v5930_v20  ;;  %v5933_v18 = vld [vmem:[#allocation2 + $0x172] sm:$0xff]  ;;  %v5934_v62 = vld [vmem:[#allocation2 + $0x182] sm:$0xff] }
 0x2a8   :  { %v3622_v32 = vpop.f32.mrf.mxu0 }
 0x2a9   :  { %v19794_v51 = vpop.f32.mrf.mxu1  ;;  %v19797_v28 = vadd.f32 %v3622_v32, %v19456_v30  ;;  %v19799_v31 = vadd.f32 %v16212_v15, %v3766_v21 }
 0x2aa   :  { %23008 = vst [vmem:[#allocation63_spill] sm:$0xff] %v19794_v51  ;;  %v16117_v24 = vpop.f32.mrf.mxu0  ;;  %16460 = vmatmul.mubr.msk.f32.gmra.mxu0 %vm298_vm3, %v5931_v11 }
 0x2ab   :  { %23009 = vst [vmem:[#allocation64_spill] sm:$0xff] %v19797_v28  ;;  %v16215_v39 = vpop.f32.mrf.mxu1  ;;  %v3768_v38 = vadd.f32 %v16117_v24, %v19462_v49  ;;  %16462 = vmatprep.mubr.msk.f32.mxu0 %vm298_vm3, %v5932_v40  ;;  %v5935_v49 = vld [vmem:[#allocation2 + $0x192] sm:$0xff]  ;;  %v5936_v24 = vld [vmem:[#allocation2 + $0x1a2] sm:$0xff] }
 0x2ac   :  { %v3632_v20 = vpop.f32.mrf.mxu0 }
 0x2ad   :  { %v19804_v48 = vpop.f32.mrf.mxu1  ;;  %v19807_v51 = vadd.f32 %v3632_v20, %v19468_v19  ;;  %v19809_v30 = vadd.f32 %v16215_v39, %v3768_v38 }
 0x2ae   :  { %23010 = vst [vmem:[#allocation65_spill] sm:$0xff] %v19804_v48  ;;  %v16120_v15 = vpop.f32.mrf.mxu0  ;;  %16463 = vmatmul.mubr.msk.f32.gmra.mxu0 %vm298_vm3, %v5933_v18  ;;  %v23014_v18 = vld [vmem:[#allocation23_spill] sm:$0xff] }
 0x2af   :  { %23011 = vst [vmem:[#allocation66_spill] sm:$0xff] %v19807_v51  ;;  %v16218_v21 = vpop.f32.mrf.mxu1  ;;  %v3770_v11 = vadd.f32 %v16120_v15, %v19474_v42  ;;  %16465 = vmatprep.mubr.msk.f32.mxu0 %vm298_vm3, %v5934_v62  ;;  %v5937_v42 = vld [vmem:[#allocation2 + $0x1b2] sm:$0xff]  ;;  %v5938_v51 = vld [vmem:[#allocation2 + $0x1c2] sm:$0xff] }
 0x2b0   :  { %v3642_v32 = vpop.f32.mrf.mxu0 }
 0x2b1   :  { %v19814_v40 = vpop.f32.mrf.mxu1  ;;  %v19817_v48 = vadd.f32 %v3642_v32, %v19480_v43  ;;  %v19819_v19 = vadd.f32 %v16218_v21, %v3770_v11 }
 0x2b2   :  { %23012 = vst [vmem:[#allocation67_spill] sm:$0xff] %v19814_v40  ;;  %v16123_v39 = vpop.f32.mrf.mxu0  ;;  %16466 = vmatmul.mubr.msk.f32.gmra.mxu0 %vm298_vm3, %v5935_v49  ;;  %v23016_v40 = vld [vmem:[#allocation24_spill] sm:$0xff]  ;;  %v23018_v49 = vld [vmem:[#allocation25_spill] sm:$0xff] }
 0x2b3   :  { %23013 = vst [vmem:[#allocation68_spill] sm:$0xff] %v19817_v48  ;;  %v16221_v38 = vpop.f32.mrf.mxu1  ;;  %v3772_v20 = vadd.f32 %v16123_v39, %v23014_v18  ;;  %16468 = vmatprep.mubr.msk.f32.mxu0 %vm298_vm3, %v5936_v24  ;;  %v5939_v39 = vld [vmem:[#allocation2 + $0x1d2] sm:$0xff]  ;;  %v5940_v48 = vld [vmem:[#allocation2 + $0x202] sm:$0xff] }
 0x2b4   :  { %v3652_v62 = vpop.f32.mrf.mxu0 }
 0x2b5   :  { %v19824_v15 = vpop.f32.mrf.mxu1  ;;  %v19827_v28 = vadd.f32 %v3652_v62, %v23016_v40  ;;  %v19829_v43 = vadd.f32 %v16221_v38, %v3772_v20 }
 0x2b6   :  { %23015 = vst [vmem:[#allocation69_spill] sm:$0xff] %v19824_v15  ;;  %v16126_v21 = vpop.f32.mrf.mxu0  ;;  %16469 = vmatmul.mubr.msk.f32.gmra.mxu0 %vm298_vm3, %v5937_v42  ;;  %v23020_v15 = vld [vmem:[#allocation26_spill] sm:$0xff]  ;;  %v23022_v42 = vld [vmem:[#allocation27_spill] sm:$0xff] }
 0x2b7   :  { %23017 = vst [vmem:[#allocation70_spill] sm:$0xff] %v19827_v28  ;;  %v16224_v11 = vpop.f32.mrf.mxu1  ;;  %v3774_v32 = vadd.f32 %v16126_v21, %v23018_v49  ;;  %16471 = vmatprep.mubr.msk.f32.mxu0 %vm298_vm3, %v5938_v51  ;;  %v5941_v21 = vld [vmem:[#allocation2 + $0x212] sm:$0xff]  ;;  %v5942_v28 = vld [vmem:[#allocation2 + $0x222] sm:$0xff] }
 0x2b8   :  { %v3662_v24 = vpop.f32.mrf.mxu0 }
 0x2b9   :  { %v19834_v18 = vpop.f32.mrf.mxu1  ;;  %v19837_v45 = vadd.f32 %v3662_v24, %v23020_v15  ;;  %v19839_v40 = vadd.f32 %v16224_v11, %v3774_v32 }
 0x2ba   :  { %23019 = vst [vmem:[#allocation71_spill] sm:$0xff] %v19834_v18  ;;  %v16129_v38 = vpop.f32.mrf.mxu0  ;;  %16472 = vmatmul.mubr.msk.f32.gmra.mxu0 %vm298_vm3, %v5939_v39  ;;  %v23024_v18 = vld [vmem:[#allocation28_spill] sm:$0xff]  ;;  %v23026_v39 = vld [vmem:[#allocation29_spill] sm:$0xff] }
 0x2bb   :  { %23021 = vst [vmem:[#allocation72_spill] sm:$0xff] %v19837_v45  ;;  %v16227_v20 = vpop.f32.mrf.mxu1  ;;  %v3776_v62 = vadd.f32 %v16129_v38, %v23022_v42  ;;  %16474 = vmatprep.mubr.msk.f32.mxu0 %vm298_vm3, %v5940_v48  ;;  %v5943_v38 = vld [vmem:[#allocation2 + $0x232] sm:$0xff]  ;;  %v6958_v48 = vld [vmem:[#allocation5 + $0x20] sm:$0xff] }
 0x2bc   :  { %v3672_v51 = vpop.f32.mrf.mxu0  ;;  %16540 = vmatprep.subr.mxu1 %v6958_v48 }
 0x2bd   :  { %v19844_v49 = vpop.f32.mrf.mxu1  ;;  %v19847_v34 = vadd.f32 %v3672_v51, %v23024_v18  ;;  %v19849_v15 = vadd.f32 %v16227_v20, %v3776_v62  ;;  %16541 = vmatpush3.msra.mxu1 %v6958_v48  ;;  %v23030_v51 = vld [vmem:[#allocation31_spill] sm:$0xff] }
 0x2be   :  { %23023 = vst [vmem:[#allocation74_spill] sm:$0xff] %v19844_v49  ;;  %v16132_v11 = vpop.f32.mrf.mxu0  ;;  %16475 = vmatmul.mubr.msk.f32.gmra.mxu0 %vm298_vm3, %v5941_v21  ;;  %v5944_v49 = vld [vmem:[#allocation2 + $0x242] sm:$0xff] }
 0x2bf   :  { %23025 = vst [vmem:[#allocation73_spill] sm:$0xff] %v19847_v34  ;;  %v16230_v32 = vpop.f32.mrf.mxu1  ;;  %v3778_v24 = vadd.f32 %v16132_v11, %v23026_v39  ;;  %16477 = vmatprep.mubr.msk.f32.mxu0 %vm298_vm3, %v5942_v28  ;;  %v5945_v28 = vld [vmem:[#allocation2 + $0x252] sm:$0xff] }
 0x2c0   :  { %v3682_v42 = vpop.f32.mrf.mxu0 }
 0x2c1   :  { %v19854_v45 = vpop.f32.mrf.mxu1  ;;  %v19857_v18 = vadd.f32 %v3682_v42, %v23028_v52  ;;  %v19859_v20 = vadd.f32 %v16230_v32, %v3778_v24  ;;  %v5947_v42 = vld [vmem:[#allocation2 + $0x272] sm:$0xff] }
 0x2c2   :  { %23027 = vst [vmem:[#allocation75_spill] sm:$0xff] %v19854_v45  ;;  %v16135_v62 = vpop.f32.mrf.mxu0  ;;  %16478 = vmatmul.mubr.msk.f32.gmra.mxu0 %vm298_vm3, %v5943_v38  ;;  %v5946_v45 = vld [vmem:[#allocation2 + $0x262] sm:$0xff] }
 0x2c3   :  { %23029 = vst [vmem:[#allocation77_spill] sm:$0xff] %v19857_v18  ;;  %v16233_v21 = vpop.f32.mrf.mxu1  ;;  %v3780_v11 = vadd.f32 %v16135_v62, %v23030_v51  ;;  %16480 = vmatprep.mubr.msk.f32.mxu0 %vm298_vm3, %v5944_v49  ;;  %v23034_v38 = vld [vmem:[#allocation33_spill] sm:$0xff] }
 0x2c4   :  { %v3692_v39 = vpop.f32.mrf.mxu0  ;;  %v5948_v51 = vld [vmem:[#allocation2 + $0x2a2] sm:$0xff] }
 0x2c5   :  { %v19864_v34 = vpop.f32.mrf.mxu1  ;;  %v19867_v1 = vadd.f32 %v3692_v39, %v23032_v5  ;;  %v19869_v52 = vadd.f32 %v16233_v21, %v3780_v11 }
 0x2c6   :  { %23031 = vst [vmem:[#allocation76_spill] sm:$0xff] %v19864_v34  ;;  %v16138_v32 = vpop.f32.mrf.mxu0  ;;  %16481 = vmatmul.mubr.msk.f32.gmra.mxu0 %vm298_vm3, %v5945_v28  ;;  %v23037_v28 = vld [vmem:[#allocation34_spill] sm:$0xff] }
 0x2c7   :  { %23033 = vst [vmem:[#allocation78_spill] sm:$0xff] %v19867_v1  ;;  %v16236_v24 = vpop.f32.mrf.mxu1  ;;  %v3782_v48 = vadd.f32 %v16138_v32, %v23034_v38  ;;  %16483 = vmatprep.mubr.msk.f32.mxu0 %vm298_vm3, %v5946_v45  ;;  %v5949_v32 = vld [vmem:[#allocation2 + $0x2b2] sm:$0xff]  ;;  %v5950_v1 = vld [vmem:[#allocation2 + $0x2c2] sm:$0xff] }
 0x2c8   :  { %v3702_v49 = vpop.f32.mrf.mxu0 }
 0x2c9   :  { %v19874_v62 = vpop.f32.mrf.mxu1  ;;  %v19877_v34 = vadd.f32 %v3702_v49, %v19547_v14  ;;  %v19879_v5 = vadd.f32 %v16236_v24, %v3782_v48 }
 0x2ca   :  { %23035 = vst [vmem:[#allocation79_spill] sm:$0xff] %v19874_v62  ;;  %v16141_v21 = vpop.f32.mrf.mxu0  ;;  %16484 = vmatmul.mubr.msk.f32.gmra.mxu0 %vm298_vm3, %v5947_v42  ;;  %v23040_v42 = vld [vmem:[#allocation35_spill] sm:$0xff] }
 0x2cb   :  { %23036 = vst [vmem:[#allocation13_spill] sm:$0xff] %v19877_v34  ;;  %v16239_v11 = vpop.f32.mrf.mxu1  ;;  %v3784_v39 = vadd.f32 %v16141_v21, %v23037_v28  ;;  %16486 = vmatprep.mubr.msk.f32.mxu0 %vm298_vm3, %v5948_v51  ;;  %v5951_v51 = vld [vmem:[#allocation2 + $0x2d2] sm:$0xff] }
 0x2cc   :  { %v3712_v45 = vpop.f32.mrf.mxu0  ;;  %v6891_v34 = vld [vmem:[#allocation5 + $0x10] sm:$0xff] }
 0x2cd   :  { %v19884_v38 = vpop.f32.mrf.mxu1  ;;  %v19887_v62 = vadd.f32 %v3712_v45, %v19556_v37  ;;  %v19889_v14 = vadd.f32 %v16239_v11, %v3784_v39 }
 0x2ce   :  { %23038 = vst [vmem:[#allocation14_spill] sm:$0xff] %v19884_v38  ;;  %v16244_v24 = vpop.f32.mrf.mxu0  ;;  %16487 = vmatmul.mubr.msk.f32.gmra.mxu0 %vm298_vm3, %v5949_v32  ;;  %v5952_v38 = vld [vmem:[#allocation2 + $0x2e2] sm:$0xff]  ;;  %v5953_v32 = vld [vmem:[#allocation2 + $0x2f2] sm:$0xff] }
 0x2cf   :  { %23039 = vst [vmem:[#allocation15_spill] sm:$0xff] %v19887_v62  ;;  %v19892_v48 = vpop.f32.mrf.mxu1  ;;  %v19895_v49 = vadd.f32 %v16244_v24, %v23040_v42  ;;  %16489 = vmatprep.mubr.msk.f32.mxu0 %vm298_vm3, %v5950_v1  ;;  %v5954_v1 = vld [vmem:[#allocation2 + $0x302] sm:$0xff] }
 0x2d0   :  { %v4823_v21 = vpop.f32.mrf.mxu0 }
 0x2d1   :  { %v19898_v28 = vpop.f32.mrf.mxu1  ;;  %v19901_v37 = vadd.f32 %v4823_v21, %v19567_v61  ;;  %v6892_v61 = vld [vmem:[#allocation5 + $0x18] sm:$0xff] }
 0x2d2   :  { %v16247_v11 = vpop.f32.mrf.mxu0  ;;  %16490 = vmatmul.mubr.msk.f32.gmra.mxu0 %vm298_vm3, %v5951_v51  ;;  %16638 = vmatprep.subr.mxu0 %v6892_v61 }
 0x2d3   :  { %v19905_v39 = vadd.f32 %v16247_v11, %v19572_v26  ;;  %16492 = vmatprep.mubr.msk.f32.mxu0 %vm298_vm3, %v5952_v38  ;;  %v19908_v24 = vpop.f32.mrf.mxu1  ;;  %v5955_v26 = vld [vmem:[#allocation2 + $0x312] sm:$0xff]  ;;  %v5956_v11 = vld [vmem:[#allocation2 + $0x342] sm:$0xff]  ;;  %16639 = vmatpush3.msra.mxu0 %v6892_v61 }
 0x2d4   :  { %v4833_v45 = vpop.f32.mrf.mxu0  ;;  %16640 = vmatprep.subr.mxu0 %v6891_v34  ;;  %v5958_v61 = vld [vmem:[#allocation2 + $0x362] sm:$0xff] }
 0x2d5   :  { %v19911_v42 = vadd.f32 %v4833_v45, %v19577_v6  ;;  %v19918_v38 = vpop.f32.mrf.mxu1  ;;  %16641 = vmatpush3.msra.mxu0 %v6891_v34  ;;  %v5959_v34 = vld [vmem:[#allocation2 + $0x372] sm:$0xff] }
 0x2d6   :  { %v16250_v62 = vpop.f32.mrf.mxu0  ;;  %16493 = vmatmul.mubr.msk.f32.gmra.mxu0 %vm298_vm3, %v5953_v32  ;;  %v6890_v32 = vld [vmem:[#allocation5 + $0x8] sm:$0xff] }
 0x2d7   :  { %v19915_v21 = vadd.f32 %v16250_v62, %v19582_v10  ;;  %16495 = vmatprep.mubr.msk.f32.mxu0 %vm298_vm3, %v5954_v1  ;;  %v5957_v62 = vld [vmem:[#allocation2 + $0x352] sm:$0xff]  ;;  %v19928_v1 = vpop.f32.mrf.mxu1  ;;  %16642 = vmatprep.subr.mxu0 %v6890_v32 }
 0x2d8   :  { %v4843_v51 = vpop.f32.mrf.mxu0  ;;  %16643 = vmatpush3.msra.mxu0 %v6890_v32 }
 0x2d9   :  { %v19921_v6 = vadd.f32 %v4843_v51, %v19587_v25  ;;  %v6893_v51 = vld [vmem:[#allocation2 + $0x1] sm:$0xff]  ;;  %16644 = vmatprep.subr.mxu0 %v6889_v55 }
 0x2da   :  { %v16253_v45 = vpop.f32.mrf.mxu0  ;;  %16496 = vmatmul.mubr.msk.f32.gmra.mxu0 %vm298_vm3, %v5955_v26  ;;  %16542 = vmatprep.mubr.msk.f32.mxu1 %vm71_vm0, %v6893_v51 }
 0x2db   :  { %v19925_v10 = vadd.f32 %v16253_v45, %v19592_v47  ;;  %16498 = vmatprep.mubr.msk.f32.mxu0 %vm298_vm3, %v5956_v11  ;;  %v23041_v47 = vld [vmem:[#allocation36_spill] sm:$0xff]  ;;  %v19939_v11 = vpop.f32.mrf.mxu1  ;;  %16645 = vmatpush3.msra.mxu0 %v6889_v55 }
 0x2dc   :  { %v4853_v18 = vpop.f32.mrf.mxu0  ;;  %v19954_v55 = vld [vmem:[#allocation5 + $0x58] sm:$0xff] }
 0x2dd   :  { %v19931_v25 = vadd.f32 %v4853_v18, %v19597_v54  ;;  %16742 = vmatprep.subr.mxu1 %v19954_v55 }
 0x2de   :  { %v16256_v26 = vpop.f32.mrf.mxu0  ;;  %16499 = vmatmul.mubr.msk.f32.gmra.mxu0 %vm298_vm3, %v5957_v62  ;;  %v5961_v62 = vld [vmem:[#allocation2 + $0x392] sm:$0xff] }
 0x2df   :  { %v19935_v45 = vadd.f32 %v16256_v26, %v23041_v47  ;;  %16501 = vmatprep.mubr.msk.f32.mxu0 %vm298_vm3, %v5958_v61  ;;  %v19949_v61 = vpop.f32.mrf.mxu1  ;;  %v5962_v26 = vld [vmem:[#allocation2 + $0x3a2] sm:$0xff] }
 0x2e0   :  { %v4863_v35 = vpop.f32.mrf.mxu0 }
 0x2e1   :  { %v19942_v54 = vadd.f32 %v4863_v35, %v19607_v58  ;;  %v5963_v35 = vld [vmem:[#allocation2 + $0x3b2] sm:$0xff] }
 0x2e2   :  { %v16259_v18 = vpop.f32.mrf.mxu0  ;;  %16502 = vmatmul.mubr.msk.f32.gmra.mxu0 %vm298_vm3, %v5959_v34 }
 0x2e3   :  { %v19946_v32 = vadd.f32 %v16259_v18, %v19612_v33  ;;  %16504 = vmatprep.mubr.msk.f32.mxu0 %vm298_vm3, %v5960_v63  ;;  %v19962_v63 = vpop.f32.mrf.mxu1  ;;  %v5964_v18 = vld [vmem:[#allocation2 + $0x3e2] sm:$0xff] }
 0x2e4   :  { %v4873_v51 = vpop.f32.mrf.mxu0 }
 0x2e5   :  { %v19952_v47 = vadd.f32 %v4873_v51, %v19617_v50 }
 0x2e6   :  { %v16262_v58 = vpop.f32.mrf.mxu0  ;;  %16505 = vmatmul.mubr.msk.f32.gmra.mxu0 %vm298_vm3, %v5961_v62 }
 0x2e7   :  { %v19959_v33 = vadd.f32 %v16262_v58, %v19622_v27  ;;  %16507 = vmatprep.mubr.msk.f32.mxu0 %vm298_vm3, %v5962_v26  ;;  %v5965_v27 = vld [vmem:[#allocation2 + $0x3f2] sm:$0xff]  ;;  %v19972_v58 = vpop.f32.mrf.mxu1 }
 0x2e8   :  { %v4883_v34 = vpop.f32.mrf.mxu0 }
 0x2e9   :  { %v19965_v50 = vadd.f32 %v4883_v34, %v19627_v36 }
 0x2ea   :  { %v16265_v51 = vpop.f32.mrf.mxu0  ;;  %16508 = vmatmul.mubr.msk.f32.gmra.mxu0 %vm298_vm3, %v5963_v35  ;;  %v19982_v35 = vpop.f32.mrf.mxu1 }
 0x2eb   :  { %v19969_v62 = vadd.f32 %v16265_v51, %v19632_v59  ;;  %16510 = vmatprep.mubr.msk.f32.mxu0 %vm298_vm3, %v5964_v18  ;;  %v5967_v59 = vld [vmem:[#allocation2 + $0x412] sm:$0xff]  ;;  %v5968_v18 = vld [vmem:[#allocation2 + $0x422] sm:$0xff] }
 0x2ec   :  { %v4893_v26 = vpop.f32.mrf.mxu0 }
 0x2ed   :  { %v19975_v7 = vadd.f32 %v4893_v26, %v19637_v4  ;;  %v19991_v26 = vpop.f32.mrf.mxu1 }
 0x2ee   :  { %v16268_v44 = vpop.f32.mrf.mxu0  ;;  %16511 = vmatmul.mubr.msk.f32.gmra.mxu0 %vm298_vm3, %v5965_v27  ;;  %v5969_v27 = vld [vmem:[#allocation2 + $0x432] sm:$0xff] }
 0x2ef   :  { %v19979_v36 = vadd.f32 %v16268_v44, %v19646_v16  ;;  %16513 = vmatprep.mubr.msk.f32.mxu0 %vm298_vm3, %v5966_v53  ;;  %v5970_v44 = vld [vmem:[#allocation2 + $0x442] sm:$0xff]  ;;  %v20000_v8 = vpop.f32.mrf.mxu1 }
 0x2f0   :  { %v19984_v34 = vpop.f32.mrf.mxu0 }
 0x2f1   :  { %23042 = vst [vmem:[#allocation80_spill] sm:$0xff] %v19979_v36 }
 0x2f2   :  { %v16271_v51 = vpop.f32.mrf.mxu0  ;;  %16514 = vmatmul.mubr.msk.f32.gmra.mxu0 %vm298_vm3, %v5967_v59  ;;  %v5971_v59 = vld [vmem:[#allocation2 + $0x452] sm:$0xff] }
 0x2f3   :  { %v19988_v4 = vadd.f32 %v16271_v51, %v19658_v23  ;;  %16516 = vmatprep.mubr.msk.f32.mxu0 %vm298_vm3, %v5968_v18  ;;  %v5972_v18 = vld [vmem:[#allocation2 + $0x482] sm:$0xff] }
 0x2f4   :  { %v19993_v16 = vpop.f32.mrf.mxu0 }
 0x2f5   :  { %23043 = vst [vmem:[#allocation16_spill] sm:$0xff] %v19988_v4  ;;  %23044 = vst [vmem:[#allocation17_spill] sm:$0xff] %v19993_v16  ;;  %v20009_v16 = vpop.f32.mrf.mxu1 }
 0x2f6   :  { %v16274_v53 = vpop.f32.mrf.mxu0  ;;  %16517 = vmatmul.mubr.msk.f32.gmra.mxu0 %vm298_vm3, %v5969_v27  ;;  %v5973_v27 = vld [vmem:[#allocation2 + $0x492] sm:$0xff] }
 0x2f7   :  { %v19997_v36 = vadd.f32 %v16274_v53, %v19670_v41  ;;  %16519 = vmatprep.mubr.msk.f32.mxu0 %vm298_vm3, %v5970_v44  ;;  %v5974_v44 = vld [vmem:[#allocation2 + $0x4a2] sm:$0xff] }
 0x2f8   :  { %v20002_v23 = vpop.f32.mrf.mxu0 }
 0x2f9   :  { %23045 = vst [vmem:[#allocation18_spill] sm:$0xff] %v19997_v36  ;;  %23046 = vst [vmem:[#allocation19_spill] sm:$0xff] %v20002_v23  ;;  %v20018_v23 = vpop.f32.mrf.mxu1 }
 0x2fa   :  { %v16277_v51 = vpop.f32.mrf.mxu0  ;;  %16520 = vmatmul.mubr.msk.f32.gmra.mxu0 %vm298_vm3, %v5971_v59  ;;  %v5975_v59 = vld [vmem:[#allocation2 + $0x4b2] sm:$0xff] }
 0x2fb   :  { %v20006_v4 = vadd.f32 %v16277_v51, %v19682_v13  ;;  %16522 = vmatprep.mubr.msk.f32.mxu0 %vm298_vm3, %v5972_v18  ;;  %v5976_v18 = vld [vmem:[#allocation2 + $0x4c2] sm:$0xff] }
 0x2fc   :  { %v20011_v41 = vpop.f32.mrf.mxu0 }
 0x2fd   :  { %23047 = vst [vmem:[#allocation20_spill] sm:$0xff] %v20006_v4  ;;  %23048 = vst [vmem:[#allocation21_spill] sm:$0xff] %v20011_v41  ;;  %v20027_v41 = vpop.f32.mrf.mxu1 }
 0x2fe   :  { %v16280_v53 = vpop.f32.mrf.mxu0  ;;  %16523 = vmatmul.mubr.msk.f32.gmra.mxu0 %vm298_vm3, %v5973_v27  ;;  %v5977_v27 = vld [vmem:[#allocation2 + $0x4d2] sm:$0xff] }
 0x2ff   :  { %v20015_v36 = vadd.f32 %v16280_v53, %v19694_v12  ;;  %16525 = vmatprep.mubr.msk.f32.mxu0 %vm298_vm3, %v5974_v44  ;;  %v5978_v44 = vld [vmem:[#allocation2 + $0x4e2] sm:$0xff] }
 0x300   :  { %v20020_v13 = vpop.f32.mrf.mxu0 }
 0x301   :  { %23049 = vst [vmem:[#allocation22_spill] sm:$0xff] %v20015_v36  ;;  %23050 = vst [vmem:[#allocation23_spill] sm:$0xff] %v20020_v13  ;;  %v20036_v13 = vpop.f32.mrf.mxu1 }
 0x302   :  { %v16283_v51 = vpop.f32.mrf.mxu0  ;;  %16526 = vmatmul.mubr.msk.f32.gmra.mxu0 %vm298_vm3, %v5975_v59  ;;  %v5979_v59 = vld [vmem:[#allocation2 + $0x4f2] sm:$0xff] }
 0x303   :  { %v20024_v4 = vadd.f32 %v16283_v51, %v19706_v9  ;;  %16528 = vmatprep.mubr.msk.f32.mxu0 %vm298_vm3, %v5976_v18  ;;  %v6825_v18 = vld [vmem:[#allocation2] sm:$0xff] }
 0x304   :  { %v20029_v12 = vpop.f32.mrf.mxu0 }
 0x305   :  { %23051 = vst [vmem:[#allocation24_spill] sm:$0xff] %v20024_v4  ;;  %23052 = vst [vmem:[#allocation25_spill] sm:$0xff] %v20029_v12 }
 0x306   :  { %v16286_v53 = vpop.f32.mrf.mxu0  ;;  %16529 = vmatmul.mubr.msk.f32.gmra.mxu0 %vm298_vm3, %v5977_v27  ;;  %v20045_v27 = vpop.f32.mrf.mxu1 }
 0x307   :  { %v20033_v36 = vadd.f32 %v16286_v53, %v19718_v3  ;;  %16531 = vmatprep.mubr.msk.f32.mxu0 %vm298_vm3, %v5978_v44 }
 0x308   :  { %v20038_v9 = vpop.f32.mrf.mxu0 }
 0x309   :  { %23053 = vst [vmem:[#allocation26_spill] sm:$0xff] %v20033_v36  ;;  %23054 = vst [vmem:[#allocation27_spill] sm:$0xff] %v20038_v9  ;;  %v20052_v36 = vpop.f32.mrf.mxu1 }
 0x30a   :  { %v16289_v51 = vpop.f32.mrf.mxu0  ;;  %16532 = vmatmul.mubr.msk.f32.gmra.mxu0 %vm298_vm3, %v5979_v59 }
 0x30b   :  { %v20042_v4 = vadd.f32 %v16289_v51, %v19729_v2  ;;  %16646 = vmatprep.mubr.msk.f32.mxu0 %vm71_vm0, %v6825_v18  ;;  %v20059_v2 = vpop.f32.mrf.mxu1 }
 0x30c   :  { %v20047_v3 = vpop.f32.mrf.mxu0 }
 0x30d   :  { %23055 = vst [vmem:[#allocation28_spill] sm:$0xff] %v20042_v4  ;;  %23056 = vst [vmem:[#allocation29_spill] sm:$0xff] %v20047_v3  ;;  %v20066_v3 = vpop.f32.mrf.mxu1 }
 0x30e   :  { %v16292_v53 = vpop.f32.mrf.mxu0 }
 0x30f   :  { %v20050_v44 = vadd.f32 %v16292_v53, %v19739_v22 }
 0x310   :  { %v20054_v9 = vpop.f32.mrf.mxu0 }
 0x311   :  { %23057 = vst [vmem:[#allocation30_spill] sm:$0xff] %v20050_v44  ;;  %23058 = vst [vmem:[#allocation31_spill] sm:$0xff] %v20054_v9  ;;  %v20073_v9 = vpop.f32.mrf.mxu1 }
 0x312   :  { %v16295_v12 = vpop.f32.mrf.mxu0 }
 0x313   :  { %v20057_v59 = vadd.f32 %v16295_v12, %v19749_v57 }
 0x314   :  { %v20061_v51 = vpop.f32.mrf.mxu0 }
 0x315   :  { %23059 = vst [vmem:[#allocation32_spill] sm:$0xff] %v20057_v59  ;;  %23060 = vst [vmem:[#allocation33_spill] sm:$0xff] %v20061_v51  ;;  %v20080_v51 = vpop.f32.mrf.mxu1 }
 0x316   :  { %v16298_v18 = vpop.f32.mrf.mxu0 }
 0x317   :  { %v20064_v4 = vadd.f32 %v16298_v18, %v19759_v29 }
 0x318   :  { %v20068_v22 = vpop.f32.mrf.mxu0 }
 0x319   :  { %23061 = vst [vmem:[#allocation34_spill] sm:$0xff] %v20064_v4  ;;  %23062 = vst [vmem:[#allocation35_spill] sm:$0xff] %v20068_v22  ;;  %v20087_v22 = vpop.f32.mrf.mxu1 }
 0x31a   :  { %v16301_v53 = vpop.f32.mrf.mxu0 }
 0x31b   :  { %v20071_v44 = vadd.f32 %v16301_v53, %v19769_v0 }
 0x31c   :  { %v20075_v57 = vpop.f32.mrf.mxu0 }
 0x31d   :  { %23063 = vst [vmem:[#allocation36_spill] sm:$0xff] %v20071_v44  ;;  %23064 = vst [vmem:[#allocation81_spill] sm:$0xff] %v20075_v57  ;;  %v20094_v57 = vpop.f32.mrf.mxu1 }
 0x31e   :  { %v16304_v12 = vpop.f32.mrf.mxu0 }
 0x31f   :  { %v20078_v59 = vadd.f32 %v16304_v12, %v19779_v46 }
 0x320   :  { %v20082_v29 = vpop.f32.mrf.mxu0 }
 0x321   :  { %23065 = vst [vmem:[#allocation82_spill] sm:$0xff] %v20078_v59  ;;  %23066 = vst [vmem:[#allocation83_spill] sm:$0xff] %v20082_v29  ;;  %v20101_v29 = vpop.f32.mrf.mxu1 }
 0x322   :  { %v16307_v18 = vpop.f32.mrf.mxu0 }
 0x323   :  { %v20085_v4 = vadd.f32 %v16307_v18, %v19789_v17 }
 0x324   :  { %v20089_v0 = vpop.f32.mrf.mxu0 }
 0x325   :  { %23067 = vst [vmem:[#allocation84_spill] sm:$0xff] %v20085_v4  ;;  %23068 = vst [vmem:[#allocation85_spill] sm:$0xff] %v20089_v0  ;;  %v20108_v0 = vpop.f32.mrf.mxu1 }
 0x326   :  { %v16310_v53 = vpop.f32.mrf.mxu0 }
 0x327   :  { %v20092_v44 = vadd.f32 %v16310_v53, %v19799_v31 }
 0x328   :  { %v20096_v46 = vpop.f32.mrf.mxu0 }
 0x329   :  { %23069 = vst [vmem:[#allocation86_spill] sm:$0xff] %v20092_v44  ;;  %23070 = vst [vmem:[#allocation87_spill] sm:$0xff] %v20096_v46  ;;  %v20115_v46 = vpop.f32.mrf.mxu1 }
 0x32a   :  { %v16313_v12 = vpop.f32.mrf.mxu0 }
 0x32b   :  { %v20099_v59 = vadd.f32 %v16313_v12, %v19809_v30 }
 0x32c   :  { %v20103_v17 = vpop.f32.mrf.mxu0 }
 0x32d   :  { %23071 = vst [vmem:[#allocation88_spill] sm:$0xff] %v20099_v59  ;;  %23072 = vst [vmem:[#allocation89_spill] sm:$0xff] %v20103_v17  ;;  %v20122_v17 = vpop.f32.mrf.mxu1 }
 0x32e   :  { %v16316_v18 = vpop.f32.mrf.mxu0 }
 0x32f   :  { %v20106_v4 = vadd.f32 %v16316_v18, %v19819_v19 }
 0x330   :  { %v20110_v31 = vpop.f32.mrf.mxu0 }
 0x331   :  { %23073 = vst [vmem:[#allocation90_spill] sm:$0xff] %v20106_v4  ;;  %23074 = vst [vmem:[#allocation91_spill] sm:$0xff] %v20110_v31  ;;  %v20129_v31 = vpop.f32.mrf.mxu1 }
 0x332   :  { %v16319_v53 = vpop.f32.mrf.mxu0 }
 0x333   :  { %v20113_v44 = vadd.f32 %v16319_v53, %v19829_v43 }
 0x334   :  { %v20117_v30 = vpop.f32.mrf.mxu0 }
 0x335   :  { %23075 = vst [vmem:[#allocation92_spill] sm:$0xff] %v20113_v44  ;;  %23076 = vst [vmem:[#allocation93_spill] sm:$0xff] %v20117_v30  ;;  %v20136_v30 = vpop.f32.mrf.mxu1 }
 0x336   :  { %v16322_v12 = vpop.f32.mrf.mxu0 }
 0x337   :  { %v20120_v59 = vadd.f32 %v16322_v12, %v19839_v40 }
 0x338   :  { %v20124_v19 = vpop.f32.mrf.mxu0 }
 0x339   :  { %23077 = vst [vmem:[#allocation94_spill] sm:$0xff] %v20120_v59  ;;  %23078 = vst [vmem:[#allocation95_spill] sm:$0xff] %v20124_v19  ;;  %v20143_v19 = vpop.f32.mrf.mxu1 }
 0x33a   :  { %v16325_v18 = vpop.f32.mrf.mxu0  ;;  %23084 = vst [vmem:[#allocation101_spill] sm:$0xff] %v20143_v19 }
 0x33b   :  { %v20127_v4 = vadd.f32 %v16325_v18, %v19849_v15 }
 0x33c   :  { %v20131_v43 = vpop.f32.mrf.mxu0 }
 0x33d   :  { %23079 = vst [vmem:[#allocation96_spill] sm:$0xff] %v20127_v4  ;;  %23080 = vst [vmem:[#allocation97_spill] sm:$0xff] %v20131_v43  ;;  %v20150_v43 = vpop.f32.mrf.mxu1 }
 0x33e   :  { %v16328_v53 = vpop.f32.mrf.mxu0  ;;  %23087 = vst [vmem:[#allocation104_spill] sm:$0xff] %v20150_v43 }
 0x33f   :  { %v20134_v44 = vadd.f32 %v16328_v53, %v19859_v20 }
 0x340   :  { %v20138_v40 = vpop.f32.mrf.mxu0 }
 0x341   :  { %23081 = vst [vmem:[#allocation98_spill] sm:$0xff] %v20134_v44  ;;  %23082 = vst [vmem:[#allocation99_spill] sm:$0xff] %v20138_v40  ;;  %v20157_v40 = vpop.f32.mrf.mxu1 }
 0x342   :  { %v16331_v12 = vpop.f32.mrf.mxu0  ;;  %23090 = vst [vmem:[#allocation107_spill] sm:$0xff] %v20157_v40 }
 0x343   :  { %v20141_v59 = vadd.f32 %v16331_v12, %v19869_v52  ;;  %v5853_v12 = vadd.f32 %v19892_v48, %v19895_v49  ;;  %v5854_v48 = vadd.f32 %v19918_v38, %v19911_v42  ;;  %v5856_v42 = vadd.f32 %v19939_v11, %v19921_v6 }
 0x344   :  { %v20145_v15 = vpop.f32.mrf.mxu0 }
 0x345   :  { %23083 = vst [vmem:[#allocation100_spill] sm:$0xff] %v20141_v59  ;;  %23085 = vst [vmem:[#allocation102_spill] sm:$0xff] %v20145_v15  ;;  %v20163_v15 = vld [vmem:[#allocation7] ss:$0 sm:$0xff] }
 0x346   :  { %v16334_v18 = vpop.f32.mrf.mxu0 }
 0x347   :  { %v20148_v4 = vadd.f32 %v16334_v18, %v19879_v5  ;;  %v5852_v5 = vadd.f32 %v19898_v28, %v19901_v37  ;;  %v5857_v37 = vadd.f32 %v19928_v1, %v19915_v21  ;;  %v5859_v1 = vadd.f32 %v19949_v61, %v19925_v10 }
 0x348   :  { %v20152_v20 = vpop.f32.mrf.mxu0  ;;  %v5861_v10 = vadd.f32 %v19972_v58, %v19935_v45 }
 0x349   :  { %23086 = vst [vmem:[#allocation103_spill] sm:$0xff] %v20148_v4  ;;  %23088 = vst [vmem:[#allocation105_spill] sm:$0xff] %v20152_v20  ;;  %v20167_v4 = vpop.f32.mrf.mxu1 }
 0x34a   :  { %v16337_v53 = vpop.f32.mrf.mxu0 }
 0x34b   :  { %v20155_v44 = vadd.f32 %v16337_v53, %v19889_v14  ;;  %v5855_v14 = vadd.f32 %v19908_v24, %v19905_v39  ;;  %v20175_v19 = vpop.f32.mrf.mxu1 }
 0x34c   :  { %v20159_v52 = vpop.f32.mrf.mxu0 }
 0x34d   :  { %23089 = vst [vmem:[#allocation106_spill] sm:$0xff] %v20155_v44  ;;  %23091 = vst [vmem:[#allocation108_spill] sm:$0xff] %v20159_v52 }
 0x34e   :  { %v16440_v59 = vpop.f32.mrf.mxu0 }
 0x34f   :  { %v6563_v18 = vadd.f32 %v16440_v59, %v5853_v12  ;;  %v8894_v12 = vld [vmem:[#allocation5 + $0x78] sm:$0xff] }
 0x350   :  { %v6243_v20 = vpop.f32.mrf.mxu0  ;;  %16846 = vmatprep.subr.mxu0 %v8894_v12 }
 0x351   :  { %v6634_v53 = vadd.f32 %v20163_v15, %v6563_v18  ;;  %v6562_v44 = vadd.f32 %v6243_v20, %v5852_v5  ;;  %v20185_v5 = vpop.f32.mrf.mxu1  ;;  %v5858_v18 = vadd.f32 %v19962_v63, %v19931_v25 }
 0x352   :  { %v16443_v52 = vpop.f32.mrf.mxu0 }
 0x353   :  { %v6698_v49 = vmax.f32 %v6634_v53, 0.0  ;;  %v6633_v40 = vadd.f32 %v20163_v15, %v6562_v44  ;;  %v6565_v43 = vadd.f32 %v16443_v52, %v5855_v14 }
 0x354   :  { %v6253_v28 = vpop.f32.mrf.mxu0 }
 0x355   :  { %6762 = vst.msk [vmem:[#allocation2 + $0x21] sm:$0xff] %vm71_vm0, %v6698_v49  ;;  %v6697_v39 = vmax.f32 %v6633_v40, 0.0  ;;  %v6636_v24 = vadd.f32 %v20163_v15, %v6565_v43  ;;  %v6564_v59 = vadd.f32 %v6253_v28, %v5854_v48  ;;  %v20195_v49 = vpop.f32.mrf.mxu1 }
 0x356   :  { %v16446_v20 = vpop.f32.mrf.mxu0 }
 0x357   :  { %6761 = vst.msk [vmem:[#allocation2 + $0x11] sm:$0xff] %vm71_vm0, %v6697_v39  ;;  %v6700_v38 = vmax.f32 %v6636_v24, 0.0  ;;  %v6635_v44 = vadd.f32 %v20163_v15, %v6564_v59  ;;  %v6567_v52 = vadd.f32 %v16446_v20, %v5857_v37  ;;  %v8183_v59 = vld [vmem:[#allocation5 + $0x50] sm:$0xff]  ;;  %v5860_v20 = vadd.f32 %v19982_v35, %v19942_v54  ;;  %v20207_v58 = vpop.f32.mrf.mxu1 }
 0x358   :  { %v6263_v21 = vpop.f32.mrf.mxu0  ;;  %v5863_v54 = vadd.f32 %v19991_v26, %v19946_v32 }
 0x359   :  { %6764 = vst.msk [vmem:[#allocation2 + $0x41] sm:$0xff] %vm71_vm0, %v6700_v38  ;;  %v6699_v43 = vmax.f32 %v6635_v44, 0.0  ;;  %v6638_v40 = vadd.f32 %v20163_v15, %v6567_v52  ;;  %v6566_v6 = vadd.f32 %v6263_v21, %v5856_v42 }
 0x35a   :  { %v16449_v11 = vpop.f32.mrf.mxu0 }
 0x35b   :  { %6763 = vst.msk [vmem:[#allocation2 + $0x31] sm:$0xff] %vm71_vm0, %v6699_v43  ;;  %v6702_v14 = vmax.f32 %v6638_v40, 0.0  ;;  %v6637_v53 = vadd.f32 %v20163_v15, %v6566_v6  ;;  %v6569_v48 = vadd.f32 %v16449_v11, %v5859_v1  ;;  %v8182_v40 = vld [vmem:[#allocation5 + $0x48] sm:$0xff] }
 0x35c   :  { %v6273_v28 = vpop.f32.mrf.mxu0  ;;  %v6895_v45 = vld [vmem:[#allocation2 + $0x21] sm:$0xff] }
 0x35d   :  { %6766 = vst.msk [vmem:[#allocation2 + $0x61] sm:$0xff] %vm71_vm0, %v6702_v14  ;;  %v6701_v61 = vmax.f32 %v6637_v53, 0.0  ;;  %v6640_v37 = vadd.f32 %v20163_v15, %v6569_v48  ;;  %v6568_v39 = vadd.f32 %v6273_v28, %v5858_v18  ;;  %v6827_v21 = vld [vmem:[#allocation2 + $0x20] sm:$0xff]  ;;  %v8893_v18 = vld [vmem:[#allocation5 + $0x70] sm:$0xff]  ;;  %v5862_v14 = vadd.f32 %v20000_v8, %v19952_v47 }
 0x35e   :  { %v16452_v24 = vpop.f32.mrf.mxu0  ;;  %v6894_v25 = vld [vmem:[#allocation2 + $0x11] sm:$0xff]  ;;  %v5865_v8 = vadd.f32 %v20009_v16, %v19959_v33 }
 0x35f   :  { %v6826_v63 = vld [vmem:[#allocation2 + $0x10] sm:$0xff]  ;;  %6765 = vst.msk [vmem:[#allocation2 + $0x51] sm:$0xff] %vm71_vm0, %v6701_v61  ;;  %v6704_v42 = vmax.f32 %v6640_v37, 0.0  ;;  %v6639_v38 = vadd.f32 %v20163_v15, %v6568_v39  ;;  %v6571_v44 = vadd.f32 %v16452_v24, %v5861_v10  ;;  %16543 = vmatmul.mubr.msk.f32.vlgmr.msra.gmra.mxu1 %vm71_vm0, %v6894_v25  ;;  %v20222_v10 = vpop.f32.mrf.mxu1  ;;  %v8181_v39 = vld [vmem:[#allocation5 + $0x40] sm:$0xff] }
 0x360   :  { %16647 = vmatmul.mubr.msk.f32.vlgmr.msra.gmra.mxu0 %vm71_vm0, %v6826_v63  ;;  %16743 = vmatpush3.msra.mxu1 %v19954_v55  ;;  %v6283_v52 = vpop.f32.mrf.mxu0  ;;  %v6897_v48 = vld [vmem:[#allocation2 + $0x41] sm:$0xff] }
 0x361   :  { %16545 = vmatprep.mubr.msk.f32.mxu1 %vm71_vm0, %v6895_v45  ;;  %6768 = vst.msk [vmem:[#allocation2 + $0x81] sm:$0xff] %vm71_vm0, %v6704_v42  ;;  %v6703_v35 = vmax.f32 %v6639_v38, 0.0  ;;  %v6642_v1 = vadd.f32 %v20163_v15, %v6571_v44  ;;  %v6570_v43 = vadd.f32 %v6283_v52, %v5860_v20  ;;  %16649 = vmatprep.mubr.msk.f32.mxu0 %vm71_vm0, %v6827_v21  ;;  %v6829_v28 = vld [vmem:[#allocation2 + $0x40] sm:$0xff]  ;;  %v20238_v52 = vpop.f32.mrf.mxu1 }
 0x362   :  { %16744 = vmatprep.subr.mxu1 %v8183_v59  ;;  %v16455_v6 = vpop.f32.mrf.mxu0  ;;  %v6896_v11 = vld [vmem:[#allocation2 + $0x31] sm:$0xff]  ;;  %16847 = vmatpush3.msra.mxu0 %v8894_v12  ;;  %v5864_v20 = vadd.f32 %v20018_v23, %v19965_v50  ;;  %v4447_v45 = vadd.f32 %v19641_v60, %v19644_v56  ;;  %v5867_v50 = vadd.f32 %v20027_v41, %v19969_v62  ;;  %v8891_v60 = vld [vmem:[#allocation5 + $0x60] sm:$0xff] }
 0x363   :  { %v6828_v55 = vld [vmem:[#allocation2 + $0x30] sm:$0xff]  ;;  %16745 = vmatpush3.msra.mxu1 %v8183_v59  ;;  %6767 = vst.msk [vmem:[#allocation2 + $0x71] sm:$0xff] %vm71_vm0, %v6703_v35  ;;  %v6706_v32 = vmax.f32 %v6642_v1, 0.0  ;;  %v6641_v26 = vadd.f32 %v20163_v15, %v6570_v43  ;;  %v6573_v53 = vadd.f32 %v16455_v6, %v5863_v54  ;;  %16848 = vmatprep.subr.mxu0 %v8893_v18  ;;  %v6901_v1 = vld [vmem:[#allocation2 + $0xa1] sm:$0xff] }
 0x364   :  { %16546 = vmatmul.mubr.msk.f32.gmra.mxu1 %vm71_vm0, %v6896_v11  ;;  %16650 = vmatmul.mubr.msk.f32.gmra.mxu0 %vm71_vm0, %v6828_v55  ;;  %v6293_v61 = vpop.f32.mrf.mxu0  ;;  %v8892_v59 = vld [vmem:[#allocation5 + $0x68] sm:$0xff]  ;;  %v6899_v38 = vld [vmem:[#allocation2 + $0x61] sm:$0xff]  ;;  %v5158_v56 = vadd.f32 %v19984_v34, %v4447_v45  ;;  %v5866_v62 = vadd.f32 %v20036_v13, %v19975_v7 }
 0x365   :  { %16548 = vmatprep.mubr.msk.f32.mxu1 %vm71_vm0, %v6897_v48  ;;  %16652 = vmatprep.mubr.msk.f32.mxu0 %vm71_vm0, %v6829_v28  ;;  %6770 = vst.msk [vmem:[#allocation2 + $0xc1] sm:$0xff] %vm71_vm0, %v6706_v32  ;;  %v6705_v47 = vmax.f32 %v6641_v26, 0.0  ;;  %v6644_v12 = vadd.f32 %v20163_v15, %v6573_v53  ;;  %v6572_v37 = vadd.f32 %v6293_v61, %v5862_v14  ;;  %v6831_v44 = vld [vmem:[#allocation2 + $0x60] sm:$0xff]  ;;  %v23092_v34 = vld [vmem:[#allocation38_spill] sm:$0xff]  ;;  %v23093_v32 = vld [vmem:[#allocation37_spill] sm:$0xff]  ;;  %v20255_v53 = vpop.f32.mrf.mxu1 }
 0x366   :  { %16746 = vmatprep.subr.mxu1 %v8182_v40  ;;  %v16458_v24 = vpop.f32.mrf.mxu0  ;;  %v6898_v25 = vld [vmem:[#allocation2 + $0x51] sm:$0xff]  ;;  %16849 = vmatpush3.msra.mxu0 %v8893_v18  ;;  %v6833_v43 = vld [vmem:[#allocation2 + $0xa0] sm:$0xff]  ;;  %v4449_v26 = vadd.f32 %v23093_v32, %v23092_v34 }
 0x367   :  { %v6830_v63 = vld [vmem:[#allocation2 + $0x50] sm:$0xff]  ;;  %16747 = vmatpush3.msra.mxu1 %v8182_v40  ;;  %6769 = vst.msk [vmem:[#allocation2 + $0xb1] sm:$0xff] %vm71_vm0, %v6705_v47  ;;  %v6708_v33 = vmax.f32 %v6644_v12, 0.0  ;;  %v6643_v16 = vadd.f32 %v20163_v15, %v6572_v37  ;;  %v6575_v42 = vadd.f32 %v16458_v24, %v5865_v8  ;;  %16850 = vmatprep.subr.mxu0 %v8892_v59  ;;  %v9604_v55 = vld [vmem:[#allocation5 + $0x98] sm:$0xff]  ;;  %v23095_v24 = vld [vmem:[#allocation17_spill] sm:$0xff] }
 0x368   :  { %16549 = vmatmul.mubr.msk.f32.gmra.mxu1 %vm71_vm0, %v6898_v25  ;;  %16653 = vmatmul.mubr.msk.f32.gmra.mxu0 %vm71_vm0, %v6830_v63  ;;  %v6303_v21 = vpop.f32.mrf.mxu0  ;;  %v23094_v7 = vld [vmem:[#allocation80_spill] sm:$0xff]  ;;  %v5868_v47 = vadd.f32 %v20052_v36, %v5158_v56  ;;  %v5160_v25 = vadd.f32 %v23095_v24, %v4449_v26  ;;  %v23097_v36 = vld [vmem:[#allocation39_spill] sm:$0xff] }
 0x369   :  { %16551 = vmatprep.mubr.msk.f32.mxu1 %vm71_vm0, %v6899_v38  ;;  %16655 = vmatprep.mubr.msk.f32.mxu0 %vm71_vm0, %v6831_v44  ;;  %6772 = vst.msk [vmem:[#allocation2 + $0xe1] sm:$0xff] %vm71_vm0, %v6708_v33  ;;  %v6707_v23 = vmax.f32 %v6643_v16, 0.0  ;;  %v6646_v54 = vadd.f32 %v20163_v15, %v6575_v42  ;;  %v6574_v35 = vadd.f32 %v6303_v21, %v5864_v20  ;;  %v23096_v16 = vld [vmem:[#allocation40_spill] sm:$0xff]  ;;  %v20271_v38 = vpop.f32.mrf.mxu1 }
 0x36a   :  { %16748 = vmatprep.subr.mxu1 %v8181_v39  ;;  %v16461_v40 = vpop.f32.mrf.mxu0  ;;  %v6900_v6 = vld [vmem:[#allocation2 + $0x71] sm:$0xff]  ;;  %16851 = vmatpush3.msra.mxu0 %v8892_v59  ;;  %v5869_v13 = vadd.f32 %v20045_v27, %v23094_v7  ;;  %v4451_v42 = vadd.f32 %v23097_v36, %v23096_v16  ;;  %v23098_v45 = vld [vmem:[#allocation16_spill] sm:$0xff] }
 0x36b   :  { %v6832_v11 = vld [vmem:[#allocation2 + $0x70] sm:$0xff]  ;;  %16749 = vmatpush3.msra.mxu1 %v8181_v39  ;;  %6771 = vst.msk [vmem:[#allocation2 + $0xd1] sm:$0xff] %vm71_vm0, %v6707_v23  ;;  %v6710_v41 = vmax.f32 %v6646_v54, 0.0  ;;  %v6645_v18 = vadd.f32 %v20163_v15, %v6574_v35  ;;  %v6577_v14 = vadd.f32 %v16461_v40, %v5867_v50  ;;  %16852 = vmatprep.subr.mxu0 %v8891_v60  ;;  %v23099_v35 = vld [vmem:[#allocation19_spill] sm:$0xff]  ;;  %v20287_v34 = vpop.f32.mrf.mxu1  ;;  %v23106_v16 = vld [vmem:[#allocation20_spill] sm:$0xff] }
 0x36c   :  { %16552 = vmatmul.mubr.msk.f32.gmra.mxu1 %vm71_vm0, %v6900_v6  ;;  %16656 = vmatmul.mubr.msk.f32.gmra.mxu0 %vm71_vm0, %v6832_v11  ;;  %v6313_v48 = vpop.f32.mrf.mxu0  ;;  %v6903_v20 = vld [vmem:[#allocation2 + $0xc1] sm:$0xff]  ;;  %v5871_v21 = vadd.f32 %v20059_v2, %v23098_v45  ;;  %v5870_v40 = vadd.f32 %v20066_v3, %v5160_v25  ;;  %v23102_v3 = vld [vmem:[#allocation18_spill] sm:$0xff]  ;;  %v5875_v36 = vadd.f32 %v20087_v22, %v23106_v16 }
 0x36d   :  { %16554 = vmatprep.mubr.msk.f32.mxu1 %vm71_vm0, %v6901_v1  ;;  %16658 = vmatprep.mubr.msk.f32.mxu0 %vm71_vm0, %v6833_v43  ;;  %6774 = vst.msk [vmem:[#allocation2 + $0x101] sm:$0xff] %vm71_vm0, %v6710_v41  ;;  %v6709_v28 = vmax.f32 %v6645_v18, 0.0  ;;  %v6648_v61 = vadd.f32 %v20163_v15, %v6577_v14  ;;  %v6576_v8 = vadd.f32 %v6313_v48, %v5866_v62  ;;  %v6835_v33 = vld [vmem:[#allocation2 + $0xc0] sm:$0xff]  ;;  %v23100_v41 = vld [vmem:[#allocation42_spill] sm:$0xff]  ;;  %v23101_v18 = vld [vmem:[#allocation41_spill] sm:$0xff] }
 0x36e   :  { %16950 = vmatprep.subr.mxu1 %v9604_v55  ;;  %v16464_v12 = vpop.f32.mrf.mxu0  ;;  %v6902_v37 = vld [vmem:[#allocation2 + $0xb1] sm:$0xff]  ;;  %16853 = vmatpush3.msra.mxu0 %v8891_v60  ;;  %v5162_v1 = vadd.f32 %v23099_v35, %v4451_v42  ;;  %v4453_v14 = vadd.f32 %v23101_v18, %v23100_v41  ;;  %v5873_v26 = vadd.f32 %v20073_v9, %v23102_v3 }
 0x36f   :  { %v6834_v39 = vld [vmem:[#allocation2 + $0xb0] sm:$0xff]  ;;  %6773 = vst.msk [vmem:[#allocation2 + $0xf1] sm:$0xff] %vm71_vm0, %v6709_v28  ;;  %v6712_v63 = vmax.f32 %v6648_v61, 0.0  ;;  %v6647_v27 = vadd.f32 %v20163_v15, %v6576_v8  ;;  %v6579_v59 = vadd.f32 %v16464_v12, %v5869_v13  ;;  %v23103_v12 = vld [vmem:[#allocation21_spill] sm:$0xff] }
 0x370   :  { %16555 = vmatmul.mubr.msk.f32.gmra.mxu1 %vm71_vm0, %v6902_v37  ;;  %16659 = vmatmul.mubr.msk.f32.gmra.mxu0 %vm71_vm0, %v6834_v39  ;;  %v6323_v44 = vpop.f32.mrf.mxu0  ;;  %v6905_v2 = vld [vmem:[#allocation2 + $0xe1] sm:$0xff]  ;;  %v5872_v28 = vadd.f32 %v20080_v51, %v5162_v1  ;;  %v5164_v37 = vadd.f32 %v23103_v12, %v4453_v14 }
 0x371   :  { %16557 = vmatprep.mubr.msk.f32.mxu1 %vm71_vm0, %v6903_v20  ;;  %16661 = vmatprep.mubr.msk.f32.mxu0 %vm71_vm0, %v6835_v33  ;;  %6776 = vst.msk [vmem:[#allocation2 + $0x121] sm:$0xff] %vm71_vm0, %v6712_v63  ;;  %v6711_v50 = vmax.f32 %v6647_v27, 0.0  ;;  %v6650_v23 = vadd.f32 %v20163_v15, %v6579_v59  ;;  %v6578_v54 = vadd.f32 %v6323_v44, %v5868_v47  ;;  %v6837_v62 = vld [vmem:[#allocation2 + $0xe0] sm:$0xff]  ;;  %v23105_v59 = vld [vmem:[#allocation43_spill] sm:$0xff]  ;;  %v20303_v20 = vpop.f32.mrf.mxu1 }
 0x372   :  { %v16467_v43 = vpop.f32.mrf.mxu0  ;;  %v6904_v60 = vld [vmem:[#allocation2 + $0xd1] sm:$0xff]  ;;  %v23104_v27 = vld [vmem:[#allocation44_spill] sm:$0xff] }
 0x373   :  { %v6836_v56 = vld [vmem:[#allocation2 + $0xd0] sm:$0xff]  ;;  %6775 = vst.msk [vmem:[#allocation2 + $0x111] sm:$0xff] %vm71_vm0, %v6711_v50  ;;  %v6714_v6 = vmax.f32 %v6650_v23, 0.0  ;;  %v6649_v11 = vadd.f32 %v20163_v15, %v6578_v54  ;;  %v6581_v55 = vadd.f32 %v16467_v43, %v5871_v21  ;;  %v4455_v51 = vadd.f32 %v23105_v59, %v23104_v27  ;;  %v6909_v21 = vld [vmem:[#allocation2 + $0x141] sm:$0xff]  ;;  %v23107_v23 = vld [vmem:[#allocation23_spill] sm:$0xff] }
 0x374   :  { %16558 = vmatmul.mubr.msk.f32.gmra.mxu1 %vm71_vm0, %v6904_v60  ;;  %16662 = vmatmul.mubr.msk.f32.gmra.mxu0 %vm71_vm0, %v6836_v56  ;;  %v6333_v32 = vpop.f32.mrf.mxu0  ;;  %v6907_v9 = vld [vmem:[#allocation2 + $0x101] sm:$0xff]  ;;  %v5874_v60 = vadd.f32 %v20094_v57, %v5164_v37  ;;  %v23110_v57 = vld [vmem:[#allocation22_spill] sm:$0xff] }
 0x375   :  { %16560 = vmatprep.mubr.msk.f32.mxu1 %vm71_vm0, %v6905_v2  ;;  %16664 = vmatprep.mubr.msk.f32.mxu0 %vm71_vm0, %v6837_v62  ;;  %6778 = vst.msk [vmem:[#allocation2 + $0x161] sm:$0xff] %vm71_vm0, %v6714_v6  ;;  %v6713_v48 = vmax.f32 %v6649_v11, 0.0  ;;  %v6652_v7 = vadd.f32 %v20163_v15, %v6581_v55  ;;  %v6580_v13 = vadd.f32 %v6333_v32, %v5870_v40  ;;  %v6839_v63 = vld [vmem:[#allocation2 + $0x100] sm:$0xff]  ;;  %v23108_v6 = vld [vmem:[#allocation46_spill] sm:$0xff]  ;;  %v23109_v11 = vld [vmem:[#allocation45_spill] sm:$0xff]  ;;  %v20319_v2 = vpop.f32.mrf.mxu1 }
 0x376   :  { %v16470_v61 = vpop.f32.mrf.mxu0  ;;  %v6906_v8 = vld [vmem:[#allocation2 + $0xf1] sm:$0xff]  ;;  %v6841_v50 = vld [vmem:[#allocation2 + $0x140] sm:$0xff]  ;;  %v5166_v54 = vadd.f32 %v23107_v23, %v4455_v51  ;;  %v4457_v55 = vadd.f32 %v23109_v11, %v23108_v6  ;;  %v5877_v41 = vadd.f32 %v20101_v29, %v23110_v57 }
 0x377   :  { %v6838_v47 = vld [vmem:[#allocation2 + $0xf0] sm:$0xff]  ;;  %6777 = vst.msk [vmem:[#allocation2 + $0x151] sm:$0xff] %vm71_vm0, %v6713_v48  ;;  %v6716_v39 = vmax.f32 %v6652_v7, 0.0  ;;  %v6651_v24 = vadd.f32 %v20163_v15, %v6580_v13  ;;  %v6583_v25 = vadd.f32 %v16470_v61, %v5873_v26  ;;  %v23111_v13 = vld [vmem:[#allocation25_spill] sm:$0xff]  ;;  %v23112_v37 = vld [vmem:[#allocation48_spill] sm:$0xff] }
 0x378   :  { %16561 = vmatmul.mubr.msk.f32.gmra.mxu1 %vm71_vm0, %v6906_v8  ;;  %16665 = vmatmul.mubr.msk.f32.gmra.mxu0 %vm71_vm0, %v6838_v47  ;;  %v6343_v33 = vpop.f32.mrf.mxu0  ;;  %v5876_v3 = vadd.f32 %v20108_v0, %v5166_v54 }
 0x379   :  { %16563 = vmatprep.mubr.msk.f32.mxu1 %vm71_vm0, %v6907_v9  ;;  %16667 = vmatprep.mubr.msk.f32.mxu0 %vm71_vm0, %v6839_v63  ;;  %6780 = vst.msk [vmem:[#allocation2 + $0x181] sm:$0xff] %vm71_vm0, %v6716_v39  ;;  %v6715_v42 = vmax.f32 %v6651_v24, 0.0  ;;  %v6654_v44 = vadd.f32 %v20163_v15, %v6583_v25  ;;  %v6582_v45 = vadd.f32 %v6343_v33, %v5872_v28  ;;  %v23113_v39 = vld [vmem:[#allocation47_spill] sm:$0xff]  ;;  %v20335_v24 = vpop.f32.mrf.mxu1  ;;  %v23114_v9 = vld [vmem:[#allocation24_spill] sm:$0xff] }
 0x37a   :  { %v16473_v35 = vpop.f32.mrf.mxu0  ;;  %v6908_v1 = vld [vmem:[#allocation2 + $0x111] sm:$0xff]  ;;  %v5168_v28 = vadd.f32 %v23111_v13, %v4457_v55  ;;  %v4459_v0 = vadd.f32 %v23113_v39, %v23112_v37  ;;  %v5879_v63 = vadd.f32 %v20115_v46, %v23114_v9 }
 0x37b   :  { %v6840_v43 = vld [vmem:[#allocation2 + $0x110] sm:$0xff]  ;;  %6779 = vst.msk [vmem:[#allocation2 + $0x171] sm:$0xff] %vm71_vm0, %v6715_v42  ;;  %v6718_v56 = vmax.f32 %v6654_v44, 0.0  ;;  %v6653_v22 = vadd.f32 %v20163_v15, %v6582_v45  ;;  %v6585_v40 = vadd.f32 %v16473_v35, %v5875_v36  ;;  %v23115_v33 = vld [vmem:[#allocation27_spill] sm:$0xff] }
 0x37c   :  { %16564 = vmatmul.mubr.msk.f32.gmra.mxu1 %vm71_vm0, %v6908_v1  ;;  %16668 = vmatmul.mubr.msk.f32.gmra.mxu0 %vm71_vm0, %v6840_v43  ;;  %v6353_v62 = vpop.f32.mrf.mxu0  ;;  %v6911_v29 = vld [vmem:[#allocation2 + $0x161] sm:$0xff]  ;;  %v5170_v16 = vadd.f32 %v23115_v33, %v4459_v0  ;;  %v5878_v45 = vadd.f32 %v20122_v17, %v5168_v28  ;;  %v23116_v35 = vld [vmem:[#allocation50_spill] sm:$0xff]  ;;  %v23121_v13 = vld [vmem:[#allocation51_spill] sm:$0xff] }
 0x37d   :  { %16566 = vmatprep.mubr.msk.f32.mxu1 %vm71_vm0, %v6909_v21  ;;  %16670 = vmatprep.mubr.msk.f32.mxu0 %vm71_vm0, %v6841_v50  ;;  %6782 = vst.msk [vmem:[#allocation2 + $0x1a1] sm:$0xff] %vm71_vm0, %v6718_v56  ;;  %v6717_v18 = vmax.f32 %v6653_v22, 0.0  ;;  %v6656_v14 = vadd.f32 %v20163_v15, %v6585_v40  ;;  %v6584_v32 = vadd.f32 %v6353_v62, %v5874_v60  ;;  %v6843_v12 = vld [vmem:[#allocation2 + $0x160] sm:$0xff]  ;;  %v23117_v1 = vld [vmem:[#allocation49_spill] sm:$0xff]  ;;  %v20351_v60 = vpop.f32.mrf.mxu1  ;;  %v23118_v17 = vld [vmem:[#allocation26_spill] sm:$0xff] }
 0x37e   :  { %v16476_v26 = vpop.f32.mrf.mxu0  ;;  %v6910_v48 = vld [vmem:[#allocation2 + $0x151] sm:$0xff]  ;;  %v4461_v43 = vadd.f32 %v23117_v1, %v23116_v35  ;;  %v5881_v22 = vadd.f32 %v20129_v31, %v23118_v17  ;;  %v5880_v55 = vadd.f32 %v20136_v30, %v5170_v16  ;;  %v6917_v0 = vld [vmem:[#allocation2 + $0x1e1] sm:$0xff] }
 0x37f   :  { %v6842_v7 = vld [vmem:[#allocation2 + $0x150] sm:$0xff]  ;;  %6781 = vst.msk [vmem:[#allocation2 + $0x191] sm:$0xff] %vm71_vm0, %v6717_v18  ;;  %v6720_v61 = vmax.f32 %v6656_v14, 0.0  ;;  %v6655_v8 = vadd.f32 %v20163_v15, %v6584_v32  ;;  %v6587_v47 = vadd.f32 %v16476_v26, %v5877_v41  ;;  %v23119_v18 = vld [vmem:[#allocation29_spill] sm:$0xff]  ;;  %v20367_v28 = vpop.f32.mrf.mxu1  ;;  %v23124_v9 = vld [vmem:[#allocation31_spill] sm:$0xff] }
 0x380   :  { %16567 = vmatmul.mubr.msk.f32.gmra.mxu1 %vm71_vm0, %v6910_v48  ;;  %16671 = vmatmul.mubr.msk.f32.gmra.mxu0 %vm71_vm0, %v6842_v7  ;;  %v6363_v25 = vpop.f32.mrf.mxu0  ;;  %v6913_v46 = vld [vmem:[#allocation2 + $0x181] sm:$0xff]  ;;  %v5172_v14 = vadd.f32 %v23119_v18, %v4461_v43  ;;  %v23129_v35 = vld [vmem:[#allocation107_spill] sm:$0xff] }
 0x381   :  { %16569 = vmatprep.mubr.msk.f32.mxu1 %vm71_vm0, %v6911_v29  ;;  %16673 = vmatprep.mubr.msk.f32.mxu0 %vm71_vm0, %v6843_v12  ;;  %6784 = vst.msk [vmem:[#allocation2 + $0x1c1] sm:$0xff] %vm71_vm0, %v6720_v61  ;;  %v6719_v27 = vmax.f32 %v6655_v8, 0.0  ;;  %v6658_v59 = vadd.f32 %v20163_v15, %v6587_v47  ;;  %v6586_v51 = vadd.f32 %v6363_v25, %v5876_v3  ;;  %v6845_v54 = vld [vmem:[#allocation2 + $0x180] sm:$0xff]  ;;  %v23123_v47 = vld [vmem:[#allocation101_spill] sm:$0xff] }
 0x382   :  { %v16479_v36 = vpop.f32.mrf.mxu0  ;;  %v6912_v42 = vld [vmem:[#allocation2 + $0x171] sm:$0xff]  ;;  %v23120_v7 = vld [vmem:[#allocation52_spill] sm:$0xff] }
 0x383   :  { %v6844_v44 = vld [vmem:[#allocation2 + $0x170] sm:$0xff]  ;;  %6783 = vst.msk [vmem:[#allocation2 + $0x1b1] sm:$0xff] %vm71_vm0, %v6719_v27  ;;  %v6722_v21 = vmax.f32 %v6658_v59, 0.0  ;;  %v6657_v50 = vadd.f32 %v20163_v15, %v6586_v51  ;;  %v6589_v23 = vadd.f32 %v16479_v36, %v5879_v63  ;;  %v4463_v30 = vadd.f32 %v23121_v13, %v23120_v7  ;;  %v23122_v8 = vld [vmem:[#allocation28_spill] sm:$0xff] }
 0x384   :  { %16570 = vmatmul.mubr.msk.f32.gmra.mxu1 %vm71_vm0, %v6912_v42  ;;  %16674 = vmatmul.mubr.msk.f32.gmra.mxu0 %vm71_vm0, %v6844_v44  ;;  %v6373_v56 = vpop.f32.mrf.mxu0  ;;  %v6915_v31 = vld [vmem:[#allocation2 + $0x1a1] sm:$0xff]  ;;  %v5883_v29 = vadd.f32 %v23123_v47, %v23122_v8  ;;  %v23134_v47 = vld [vmem:[#allocation35_spill] sm:$0xff] }
 0x385   :  { %16572 = vmatprep.mubr.msk.f32.mxu1 %vm71_vm0, %v6913_v46  ;;  %16676 = vmatprep.mubr.msk.f32.mxu0 %vm71_vm0, %v6845_v54  ;;  %6786 = vst.msk [vmem:[#allocation2 + $0x201] sm:$0xff] %vm71_vm0, %v6722_v21  ;;  %v6721_v40 = vmax.f32 %v6657_v50, 0.0  ;;  %v6660_v6 = vadd.f32 %v20163_v15, %v6589_v23  ;;  %v6588_v11 = vadd.f32 %v6373_v56, %v5878_v45  ;;  %v6847_v48 = vld [vmem:[#allocation2 + $0x1a0] sm:$0xff]  ;;  %v23126_v45 = vld [vmem:[#allocation54_spill] sm:$0xff]  ;;  %v23127_v21 = vld [vmem:[#allocation53_spill] sm:$0xff]  ;;  %v20383_v23 = vpop.f32.mrf.mxu1 }
 0x386   :  { %v16482_v62 = vpop.f32.mrf.mxu0  ;;  %v6914_v57 = vld [vmem:[#allocation2 + $0x191] sm:$0xff]  ;;  %v6849_v25 = vld [vmem:[#allocation2 + $0x1e0] sm:$0xff]  ;;  %v5174_v63 = vadd.f32 %v23124_v9, %v4463_v30  ;;  %v4465_v50 = vadd.f32 %v23127_v21, %v23126_v45 }
 0x387   :  { %v6846_v41 = vld [vmem:[#allocation2 + $0x190] sm:$0xff]  ;;  %6785 = vst.msk [vmem:[#allocation2 + $0x1f1] sm:$0xff] %vm71_vm0, %v6721_v40  ;;  %v6724_v32 = vmax.f32 %v6660_v6, 0.0  ;;  %v6659_v3 = vadd.f32 %v20163_v15, %v6588_v11  ;;  %v6591_v26 = vadd.f32 %v16482_v62, %v5881_v22  ;;  %v23125_v33 = vld [vmem:[#allocation104_spill] sm:$0xff] }
 0x388   :  { %16573 = vmatmul.mubr.msk.f32.gmra.mxu1 %vm71_vm0, %v6914_v57  ;;  %16677 = vmatmul.mubr.msk.f32.gmra.mxu0 %vm71_vm0, %v6846_v41  ;;  %v6383_v61 = vpop.f32.mrf.mxu0  ;;  %v5882_v16 = vadd.f32 %v23125_v33, %v5172_v14  ;;  %v23128_v54 = vld [vmem:[#allocation30_spill] sm:$0xff]  ;;  %v5884_v22 = vadd.f32 %v20167_v4, %v5174_v63  ;;  %v23131_v4 = vld [vmem:[#allocation56_spill] sm:$0xff] }
 0x389   :  { %16575 = vmatprep.mubr.msk.f32.mxu1 %vm71_vm0, %v6915_v31  ;;  %16679 = vmatprep.mubr.msk.f32.mxu0 %vm71_vm0, %v6847_v48  ;;  %6788 = vst.msk [vmem:[#allocation2 + $0x221] sm:$0xff] %vm71_vm0, %v6724_v32  ;;  %v6723_v12 = vmax.f32 %v6659_v3, 0.0  ;;  %v6662_v37 = vadd.f32 %v20163_v15, %v6591_v26  ;;  %v6590_v39 = vadd.f32 %v6383_v61, %v5880_v55  ;;  %v23130_v55 = vld [vmem:[#allocation33_spill] sm:$0xff]  ;;  %v23132_v3 = vld [vmem:[#allocation55_spill] sm:$0xff]  ;;  %v20404_v31 = vpop.f32.mrf.mxu1  ;;  %v23133_v7 = vld [vmem:[#allocation32_spill] sm:$0xff] }
 0x38a   :  { %v16485_v27 = vpop.f32.mrf.mxu0  ;;  %v6916_v59 = vld [vmem:[#allocation2 + $0x1b1] sm:$0xff]  ;;  %v5885_v1 = vadd.f32 %v23129_v35, %v23128_v54  ;;  %v5176_v62 = vadd.f32 %v23130_v55, %v4465_v50  ;;  %v4467_v26 = vadd.f32 %v23132_v3, %v23131_v4  ;;  %v5887_v13 = vadd.f32 %v20175_v19, %v23133_v7 }
 0x38b   :  { %v6848_v51 = vld [vmem:[#allocation2 + $0x1b0] sm:$0xff]  ;;  %6787 = vst.msk [vmem:[#allocation2 + $0x211] sm:$0xff] %vm71_vm0, %v6723_v12  ;;  %v6726_v36 = vmax.f32 %v6662_v37, 0.0  ;;  %v6661_v42 = vadd.f32 %v20163_v15, %v6590_v39  ;;  %v6593_v44 = vadd.f32 %v16485_v27, %v5883_v29  ;;  %v23142_v7 = vld [vmem:[#allocation83_spill] sm:$0xff] }
 0x38c   :  { %16576 = vmatmul.mubr.msk.f32.gmra.mxu1 %vm71_vm0, %v6916_v59  ;;  %16680 = vmatmul.mubr.msk.f32.gmra.mxu0 %vm71_vm0, %v6848_v51  ;;  %v6393_v46 = vpop.f32.mrf.mxu0  ;;  %v6919_v14 = vld [vmem:[#allocation2 + $0x201] sm:$0xff]  ;;  %v5178_v29 = vadd.f32 %v23134_v47, %v4467_v26  ;;  %v23135_v59 = vld [vmem:[#allocation58_spill] sm:$0xff] }
 0x38d   :  { %16578 = vmatprep.mubr.msk.f32.mxu1 %vm71_vm0, %v6917_v0  ;;  %16682 = vmatprep.mubr.msk.f32.mxu0 %vm71_vm0, %v6849_v25  ;;  %6790 = vst.msk [vmem:[#allocation2 + $0x241] sm:$0xff] %vm71_vm0, %v6726_v36  ;;  %v6725_v43 = vmax.f32 %v6661_v42, 0.0  ;;  %v6664_v56 = vadd.f32 %v20163_v15, %v6593_v44  ;;  %v6592_v17 = vadd.f32 %v6393_v46, %v5882_v16  ;;  %v20400_v32 = vld [vmem:[#allocation2 + $0x200] sm:$0xff]  ;;  %v23136_v51 = vld [vmem:[#allocation57_spill] sm:$0xff]  ;;  %v20426_v16 = vpop.f32.mrf.mxu1  ;;  %v23137_v36 = vld [vmem:[#allocation34_spill] sm:$0xff] }
 0x38e   :  { %v16488_v40 = vpop.f32.mrf.mxu0  ;;  %v6918_v6 = vld [vmem:[#allocation2 + $0x1f1] sm:$0xff]  ;;  %v5886_v0 = vadd.f32 %v20185_v5, %v5176_v62  ;;  %v4469_v33 = vadd.f32 %v23136_v51, %v23135_v59  ;;  %v5889_v42 = vadd.f32 %v20195_v49, %v23137_v36  ;;  %v5888_v50 = vadd.f32 %v20207_v58, %v5178_v29  ;;  %v23139_v58 = vld [vmem:[#allocation60_spill] sm:$0xff] }
 0x38f   :  { %v20392_v11 = vld [vmem:[#allocation2 + $0x1f0] sm:$0xff]  ;;  %6789 = vst.msk [vmem:[#allocation2 + $0x231] sm:$0xff] %vm71_vm0, %v6725_v43  ;;  %v6728_v57 = vmax.f32 %v6664_v56, 0.0  ;;  %v6663_v41 = vadd.f32 %v20163_v15, %v6592_v17  ;;  %v6595_v18 = vadd.f32 %v16488_v40, %v5885_v1  ;;  %v23138_v1 = vld [vmem:[#allocation81_spill] sm:$0xff]  ;;  %v20448_v62 = vpop.f32.mrf.mxu1 }
 0x390   :  { %16579 = vmatmul.mubr.msk.f32.gmra.mxu1 %vm71_vm0, %v6918_v6  ;;  %16683 = vmatmul.mubr.msk.f32.gmra.mxu0 %vm71_vm0, %v20392_v11  ;;  %v6403_v48 = vpop.f32.mrf.mxu0  ;;  %v6921_v63 = vld [vmem:[#allocation2 + $0x221] sm:$0xff]  ;;  %v5180_v43 = vadd.f32 %v23138_v1, %v4469_v33  ;;  %v23140_v6 = vld [vmem:[#allocation59_spill] sm:$0xff] }
 0x391   :  { %16581 = vmatprep.mubr.msk.f32.mxu1 %vm71_vm0, %v6919_v14  ;;  %16685 = vmatprep.mubr.msk.f32.mxu0 %vm71_vm0, %v20400_v32  ;;  %6792 = vst.msk [vmem:[#allocation2 + $0x261] sm:$0xff] %vm71_vm0, %v6728_v57  ;;  %v6727_v30 = vmax.f32 %v6663_v41, 0.0  ;;  %v6666_v61 = vadd.f32 %v20163_v15, %v6595_v18  ;;  %v6594_v8 = vadd.f32 %v6403_v48, %v5884_v22  ;;  %v20422_v27 = vld [vmem:[#allocation2 + $0x220] sm:$0xff] }
 0x392   :  { %v16491_v12 = vpop.f32.mrf.mxu0  ;;  %v6920_v37 = vld [vmem:[#allocation2 + $0x211] sm:$0xff]  ;;  %v4471_v55 = vadd.f32 %v23140_v6, %v23139_v58  ;;  %v23141_v41 = vld [vmem:[#allocation36_spill] sm:$0xff]  ;;  %v5890_v47 = vadd.f32 %v20238_v52, %v5180_v43 }
 0x393   :  { %v20414_v39 = vld [vmem:[#allocation2 + $0x210] sm:$0xff]  ;;  %6791 = vst.msk [vmem:[#allocation2 + $0x251] sm:$0xff] %vm71_vm0, %v6727_v30  ;;  %v6730_v25 = vmax.f32 %v6666_v61, 0.0  ;;  %v6665_v9 = vadd.f32 %v20163_v15, %v6594_v8  ;;  %v6597_v19 = vadd.f32 %v16491_v12, %v5887_v13  ;;  %v5891_v18 = vadd.f32 %v20222_v10, %v23141_v41  ;;  %v6925_v26 = vld [vmem:[#allocation2 + $0x281] sm:$0xff]  ;;  %v23148_v43 = vld [vmem:[#allocation63_spill] sm:$0xff] }
 0x394   :  { %16582 = vmatmul.mubr.msk.f32.gmra.mxu1 %vm71_vm0, %v6920_v37  ;;  %16686 = vmatmul.mubr.msk.f32.gmra.mxu0 %vm71_vm0, %v20414_v39  ;;  %v6413_v5 = vpop.f32.mrf.mxu0  ;;  %v6923_v22 = vld [vmem:[#allocation2 + $0x241] sm:$0xff]  ;;  %v5182_v13 = vadd.f32 %v23142_v7, %v4471_v55  ;;  %v23143_v37 = vld [vmem:[#allocation62_spill] sm:$0xff]  ;;  %v23150_v41 = vld [vmem:[#allocation87_spill] sm:$0xff] }
 0x395   :  { %16584 = vmatprep.mubr.msk.f32.mxu1 %vm71_vm0, %v6921_v63  ;;  %16688 = vmatprep.mubr.msk.f32.mxu0 %vm71_vm0, %v20422_v27  ;;  %6794 = vst.msk [vmem:[#allocation2 + $0x2a1] sm:$0xff] %vm71_vm0, %v6730_v25  ;;  %v6729_v44 = vmax.f32 %v6665_v9, 0.0  ;;  %v6668_v45 = vadd.f32 %v20163_v15, %v6597_v19  ;;  %v6596_v21 = vadd.f32 %v6413_v5, %v5886_v0  ;;  %v20444_v40 = vld [vmem:[#allocation2 + $0x240] sm:$0xff]  ;;  %v23144_v0 = vld [vmem:[#allocation61_spill] sm:$0xff]  ;;  %v20468_v9 = vpop.f32.mrf.mxu1  ;;  %v23145_v52 = vld [vmem:[#allocation82_spill] sm:$0xff] }
 0x396   :  { %v16494_v46 = vpop.f32.mrf.mxu0  ;;  %v6922_v54 = vld [vmem:[#allocation2 + $0x231] sm:$0xff]  ;;  %v6857_v48 = vld [vmem:[#allocation2 + $0x280] sm:$0xff]  ;;  %v4473_v25 = vadd.f32 %v23144_v0, %v23143_v37  ;;  %v5893_v63 = vadd.f32 %v20255_v53, %v23145_v52  ;;  %v5892_v5 = vadd.f32 %v20271_v38, %v5182_v13 }
 0x397   :  { %v20436_v35 = vld [vmem:[#allocation2 + $0x230] sm:$0xff]  ;;  %6793 = vst.msk [vmem:[#allocation2 + $0x291] sm:$0xff] %vm71_vm0, %v6729_v44  ;;  %v6732_v56 = vmax.f32 %v6668_v45, 0.0  ;;  %v6667_v17 = vadd.f32 %v20163_v15, %v6596_v21  ;;  %v6599_v49 = vadd.f32 %v16494_v46, %v5889_v42  ;;  %v23146_v45 = vld [vmem:[#allocation85_spill] sm:$0xff]  ;;  %v23147_v38 = vld [vmem:[#allocation64_spill] sm:$0xff] }
 0x398   :  { %16585 = vmatmul.mubr.msk.f32.gmra.mxu1 %vm71_vm0, %v6922_v54  ;;  %16689 = vmatmul.mubr.msk.f32.gmra.mxu0 %vm71_vm0, %v20436_v35  ;;  %v6423_v57 = vpop.f32.mrf.mxu0  ;;  %v5184_v21 = vadd.f32 %v23146_v45, %v4473_v25 }
 0x399   :  { %16587 = vmatprep.mubr.msk.f32.mxu1 %vm71_vm0, %v6923_v22  ;;  %16691 = vmatprep.mubr.msk.f32.mxu0 %vm71_vm0, %v20444_v40  ;;  %6796 = vst.msk [vmem:[#allocation2 + $0x2c1] sm:$0xff] %vm71_vm0, %v6732_v56  ;;  %v6731_v14 = vmax.f32 %v6667_v17, 0.0  ;;  %v6670_v4 = vadd.f32 %v20163_v15, %v6599_v49  ;;  %v6598_v3 = vadd.f32 %v6423_v57, %v5888_v50  ;;  %v20489_v17 = vpop.f32.mrf.mxu1  ;;  %v23149_v22 = vld [vmem:[#allocation84_spill] sm:$0xff] }
 0x39a   :  { %v16497_v30 = vpop.f32.mrf.mxu0  ;;  %v6924_v61 = vld [vmem:[#allocation2 + $0x251] sm:$0xff]  ;;  %v4475_v56 = vadd.f32 %v23148_v43, %v23147_v38  ;;  %v5895_v58 = vadd.f32 %v20287_v34, %v23149_v22  ;;  %v23157_v38 = vld [vmem:[#allocation88_spill] sm:$0xff] }
 0x39b   :  { %v20458_v8 = vld [vmem:[#allocation2 + $0x250] sm:$0xff]  ;;  %6795 = vst.msk [vmem:[#allocation2 + $0x2b1] sm:$0xff] %vm71_vm0, %v6731_v14  ;;  %v6734_v29 = vmax.f32 %v6670_v4, 0.0  ;;  %v6669_v10 = vadd.f32 %v20163_v15, %v6598_v3  ;;  %v6601_v12 = vadd.f32 %v16497_v30, %v5891_v18  ;;  %v5899_v43 = vadd.f32 %v20351_v60, %v23157_v38 }
 0x39c   :  { %16588 = vmatmul.mubr.msk.f32.gmra.mxu1 %vm71_vm0, %v6924_v61  ;;  %16692 = vmatmul.mubr.msk.f32.gmra.mxu0 %vm71_vm0, %v20458_v8  ;;  %v6433_v19 = vpop.f32.mrf.mxu0  ;;  %v6927_v54 = vld [vmem:[#allocation2 + $0x2a1] sm:$0xff]  ;;  %v5186_v18 = vadd.f32 %v23150_v41, %v4475_v56  ;;  %v23151_v61 = vld [vmem:[#allocation66_spill] sm:$0xff] }
 0x39d   :  { %16590 = vmatprep.mubr.msk.f32.mxu1 %vm71_vm0, %v6925_v26  ;;  %16694 = vmatprep.mubr.msk.f32.mxu0 %vm71_vm0, %v6857_v48  ;;  %6798 = vst.msk [vmem:[#allocation2 + $0x2e1] sm:$0xff] %vm71_vm0, %v6734_v29  ;;  %v6733_v59 = vmax.f32 %v6669_v10, 0.0  ;;  %v6672_v51 = vadd.f32 %v20163_v15, %v6601_v12  ;;  %v6600_v33 = vadd.f32 %v6433_v19, %v5890_v47  ;;  %v20485_v1 = vld [vmem:[#allocation2 + $0x2a0] sm:$0xff]  ;;  %v23152_v47 = vld [vmem:[#allocation65_spill] sm:$0xff]  ;;  %v20511_v10 = vpop.f32.mrf.mxu1  ;;  %v23153_v12 = vld [vmem:[#allocation86_spill] sm:$0xff] }
 0x39e   :  { %v16500_v36 = vpop.f32.mrf.mxu0  ;;  %v6926_v42 = vld [vmem:[#allocation2 + $0x291] sm:$0xff]  ;;  %v5894_v26 = vadd.f32 %v20303_v20, %v5184_v21  ;;  %v4477_v29 = vadd.f32 %v23152_v47, %v23151_v61  ;;  %v5897_v37 = vadd.f32 %v20319_v2, %v23153_v12  ;;  %v5896_v52 = vadd.f32 %v20335_v24, %v5186_v18  ;;  %v23155_v24 = vld [vmem:[#allocation68_spill] sm:$0xff] }
 0x39f   :  { %v20477_v44 = vld [vmem:[#allocation2 + $0x290] sm:$0xff]  ;;  %6797 = vst.msk [vmem:[#allocation2 + $0x2d1] sm:$0xff] %vm71_vm0, %v6733_v59  ;;  %v6736_v50 = vmax.f32 %v6672_v51, 0.0  ;;  %v6671_v46 = vadd.f32 %v20163_v15, %v6600_v33  ;;  %v6603_v53 = vadd.f32 %v16500_v36, %v5893_v63  ;;  %v23154_v33 = vld [vmem:[#allocation89_spill] sm:$0xff] }
 0x3a0   :  { %16591 = vmatmul.mubr.msk.f32.gmra.mxu1 %vm71_vm0, %v6926_v42  ;;  %16695 = vmatmul.mubr.msk.f32.gmra.mxu0 %vm71_vm0, %v20477_v44  ;;  %v6443_v49 = vpop.f32.mrf.mxu0  ;;  %v6929_v13 = vld [vmem:[#allocation2 + $0x2c1] sm:$0xff] }
 0x3a1   :  { %16593 = vmatprep.mubr.msk.f32.mxu1 %vm71_vm0, %v6927_v54  ;;  %16697 = vmatprep.mubr.msk.f32.mxu0 %vm71_vm0, %v20485_v1  ;;  %6800 = vst.msk [vmem:[#allocation2 + $0x301] sm:$0xff] %vm71_vm0, %v6736_v50  ;;  %v6735_v6 = vmax.f32 %v6671_v46, 0.0  ;;  %v6674_v55 = vadd.f32 %v20163_v15, %v6603_v53  ;;  %v6602_v57 = vadd.f32 %v6443_v49, %v5892_v5  ;;  %v20507_v30 = vld [vmem:[#allocation2 + $0x2c0] sm:$0xff]  ;;  %v23156_v50 = vld [vmem:[#allocation67_spill] sm:$0xff]  ;;  %v20533_v53 = vpop.f32.mrf.mxu1 }
 0x3a2   :  { %v16503_v14 = vpop.f32.mrf.mxu0  ;;  %v6928_v4 = vld [vmem:[#allocation2 + $0x2b1] sm:$0xff]  ;;  %v5188_v5 = vadd.f32 %v23154_v33, %v4477_v29  ;;  %v4479_v46 = vadd.f32 %v23156_v50, %v23155_v24 }
 0x3a3   :  { %v20499_v3 = vld [vmem:[#allocation2 + $0x2b0] sm:$0xff]  ;;  %6799 = vst.msk [vmem:[#allocation2 + $0x2f1] sm:$0xff] %vm71_vm0, %v6735_v6  ;;  %v6738_v48 = vmax.f32 %v6674_v55, 0.0  ;;  %v6673_v7 = vadd.f32 %v20163_v15, %v6602_v57  ;;  %v6605_v34 = vadd.f32 %v16503_v14, %v5895_v58  ;;  %v6933_v58 = vld [vmem:[#allocation2 + $0x321] sm:$0xff]  ;;  %v23158_v55 = vld [vmem:[#allocation91_spill] sm:$0xff]  ;;  %v20553_v61 = vpop.f32.mrf.mxu1 }
 0x3a4   :  { %16594 = vmatmul.mubr.msk.f32.gmra.mxu1 %vm71_vm0, %v6928_v4  ;;  %16698 = vmatmul.mubr.msk.f32.gmra.mxu0 %vm71_vm0, %v20499_v3  ;;  %v6453_v20 = vpop.f32.mrf.mxu0  ;;  %v6931_v45 = vld [vmem:[#allocation2 + $0x2e1] sm:$0xff]  ;;  %v5190_v57 = vadd.f32 %v23158_v55, %v4479_v46  ;;  %v5898_v4 = vadd.f32 %v20367_v28, %v5188_v5  ;;  %v23161_v28 = vld [vmem:[#allocation90_spill] sm:$0xff] }
 0x3a5   :  { %16596 = vmatprep.mubr.msk.f32.mxu1 %vm71_vm0, %v6929_v13  ;;  %16700 = vmatprep.mubr.msk.f32.mxu0 %vm71_vm0, %v20507_v30  ;;  %6802 = vst.msk [vmem:[#allocation2 + $0x341] sm:$0xff] %vm71_vm0, %v6738_v48  ;;  %v6737_v0 = vmax.f32 %v6673_v7, 0.0  ;;  %v6676_v25 = vadd.f32 %v20163_v15, %v6605_v34  ;;  %v6604_v19 = vadd.f32 %v6453_v20, %v5894_v26  ;;  %v20529_v21 = vld [vmem:[#allocation2 + $0x2e0] sm:$0xff]  ;;  %v23159_v7 = vld [vmem:[#allocation70_spill] sm:$0xff]  ;;  %v23160_v34 = vld [vmem:[#allocation69_spill] sm:$0xff]  ;;  %v20576_v24 = vpop.f32.mrf.mxu1 }
 0x3a6   :  { %v16506_v63 = vpop.f32.mrf.mxu0  ;;  %v6930_v59 = vld [vmem:[#allocation2 + $0x2d1] sm:$0xff]  ;;  %v6865_v6 = vld [vmem:[#allocation2 + $0x320] sm:$0xff]  ;;  %v4481_v13 = vadd.f32 %v23160_v34, %v23159_v7  ;;  %v5901_v29 = vadd.f32 %v20383_v23, %v23161_v28 }
 0x3a7   :  { %v20521_v51 = vld [vmem:[#allocation2 + $0x2d0] sm:$0xff]  ;;  %6801 = vst.msk [vmem:[#allocation2 + $0x331] sm:$0xff] %vm71_vm0, %v6737_v0  ;;  %v6740_v36 = vmax.f32 %v6676_v25, 0.0  ;;  %v6675_v42 = vadd.f32 %v20163_v15, %v6604_v19  ;;  %v6607_v2 = vadd.f32 %v16506_v63, %v5897_v37  ;;  %v20560_v20 = vld [vmem:[#allocation7] ss:$0 sm:$0xff]  ;;  %v5900_v0 = vadd.f32 %v20404_v31, %v5190_v57  ;;  %v23162_v63 = vld [vmem:[#allocation93_spill] sm:$0xff]  ;;  %v20598_v34 = vpop.f32.mrf.mxu1 }
 0x3a8   :  { %16597 = vmatmul.mubr.msk.f32.gmra.mxu1 %vm71_vm0, %v6930_v59  ;;  %16701 = vmatmul.mubr.msk.f32.gmra.mxu0 %vm71_vm0, %v20521_v51  ;;  %v6463_v54 = vpop.f32.mrf.mxu0  ;;  %v5192_v59 = vadd.f32 %v23162_v63, %v4481_v13  ;;  %v23163_v31 = vld [vmem:[#allocation72_spill] sm:$0xff]  ;;  %v23169_v13 = vld [vmem:[#allocation94_spill] sm:$0xff] }
 0x3a9   :  { %16599 = vmatprep.mubr.msk.f32.mxu1 %vm71_vm0, %v6931_v45  ;;  %16703 = vmatprep.mubr.msk.f32.mxu0 %vm71_vm0, %v20529_v21  ;;  %6804 = vst.msk [vmem:[#allocation2 + $0x361] sm:$0xff] %vm71_vm0, %v6740_v36  ;;  %v6739_v56 = vmax.f32 %v6675_v42, 0.0  ;;  %v6678_v49 = vadd.f32 %v20163_v15, %v6607_v2  ;;  %v6606_v22 = vadd.f32 %v6463_v54, %v5896_v52  ;;  %v23164_v2 = vld [vmem:[#allocation71_spill] sm:$0xff]  ;;  %v23165_v46 = vld [vmem:[#allocation92_spill] sm:$0xff] }
 0x3aa   :  { %v16509_v41 = vpop.f32.mrf.mxu0  ;;  %v6932_v18 = vld [vmem:[#allocation2 + $0x2f1] sm:$0xff]  ;;  %v4483_v45 = vadd.f32 %v23164_v2, %v23163_v31  ;;  %v5903_v54 = vadd.f32 %v20426_v16, %v23165_v46  ;;  %v5902_v57 = vadd.f32 %v20448_v62, %v5192_v59  ;;  %v5823_v2 = vpop.f32.mrf.mxu1 }
 0x3ab   :  { %v20543_v14 = vld [vmem:[#allocation2 + $0x2f0] sm:$0xff]  ;;  %6803 = vst.msk [vmem:[#allocation2 + $0x351] sm:$0xff] %vm71_vm0, %v6739_v56  ;;  %v6742_v26 = vmax.f32 %v6678_v49, 0.0  ;;  %v6677_v60 = vadd.f32 %v20163_v15, %v6606_v22  ;;  %v6609_v48 = vadd.f32 %v16509_v41, %v5899_v43  ;;  %v23166_v49 = vld [vmem:[#allocation95_spill] sm:$0xff] }
 0x3ac   :  { %16600 = vmatmul.mubr.msk.f32.gmra.mxu1 %vm71_vm0, %v6932_v18  ;;  %16704 = vmatmul.mubr.msk.f32.gmra.mxu0 %vm71_vm0, %v20543_v14  ;;  %v6473_v47 = vpop.f32.mrf.mxu0  ;;  %v6935_v36 = vld [vmem:[#allocation2 + $0x341] sm:$0xff]  ;;  %v5194_v22 = vadd.f32 %v23166_v49, %v4483_v45 }
 0x3ad   :  { %16602 = vmatprep.mubr.msk.f32.mxu1 %vm71_vm0, %v6933_v58  ;;  %16706 = vmatprep.mubr.msk.f32.mxu0 %vm71_vm0, %v6865_v6  ;;  %6806 = vst.msk [vmem:[#allocation2 + $0x381] sm:$0xff] %vm71_vm0, %v6742_v26  ;;  %v6741_v15 = vmax.f32 %v6677_v60, 0.0  ;;  %v6680_v12 = vadd.f32 %v20560_v20, %v6609_v48  ;;  %v6608_v37 = vadd.f32 %v6473_v47, %v5898_v4  ;;  %v20572_v42 = vld [vmem:[#allocation2 + $0x340] sm:$0xff]  ;;  %v23167_v60 = vld [vmem:[#allocation73_spill] sm:$0xff]  ;;  %v23168_v48 = vld [vmem:[#allocation74_spill] sm:$0xff] }
 0x3ae   :  { %v16512_v25 = vpop.f32.mrf.mxu0  ;;  %v6934_v19 = vld [vmem:[#allocation2 + $0x331] sm:$0xff]  ;;  %v4485_v7 = vadd.f32 %v23168_v48, %v23167_v60  ;;  %v5905_v47 = vadd.f32 %v20468_v9, %v23169_v13  ;;  %v6873_v49 = vld [vmem:[#allocation2 + $0x3c0] sm:$0xff] }
 0x3af   :  { %v20564_v52 = vld [vmem:[#allocation2 + $0x330] sm:$0xff]  ;;  %6805 = vst.msk [vmem:[#allocation2 + $0x371] sm:$0xff] %vm71_vm0, %v6741_v15  ;;  %v6744_v33 = vmax.f32 %v6680_v12, 0.0  ;;  %v6679_v23 = vadd.f32 %v20560_v20, %v6608_v37  ;;  %v6611_v5 = vadd.f32 %v16512_v25, %v5901_v29  ;;  %v5904_v12 = vadd.f32 %v20489_v17, %v5194_v22  ;;  %v23171_v17 = vld [vmem:[#allocation77_spill] sm:$0xff]  ;;  %v23174_v22 = vld [vmem:[#allocation99_spill] sm:$0xff] }
 0x3b0   :  { %16603 = vmatmul.mubr.msk.f32.gmra.mxu1 %vm71_vm0, %v6934_v19  ;;  %16707 = vmatmul.mubr.msk.f32.gmra.mxu0 %vm71_vm0, %v20564_v52  ;;  %v6483_v50 = vpop.f32.mrf.mxu0  ;;  %v6937_v4 = vld [vmem:[#allocation2 + $0x361] sm:$0xff]  ;;  %v23175_v60 = vld [vmem:[#allocation78_spill] sm:$0xff] }
 0x3b1   :  { %16605 = vmatprep.mubr.msk.f32.mxu1 %vm71_vm0, %v6935_v36  ;;  %16709 = vmatprep.mubr.msk.f32.mxu0 %vm71_vm0, %v20572_v42  ;;  %6808 = vst.msk [vmem:[#allocation2 + $0x3a1] sm:$0xff] %vm71_vm0, %v6744_v33  ;;  %v6743_v38 = vmax.f32 %v6679_v23, 0.0  ;;  %v6682_v43 = vadd.f32 %v20560_v20, %v6611_v5  ;;  %v6610_v56 = vadd.f32 %v6483_v50, %v5900_v0  ;;  %v20594_v26 = vld [vmem:[#allocation2 + $0x360] sm:$0xff]  ;;  %v23170_v19 = vld [vmem:[#allocation97_spill] sm:$0xff]  ;;  %v23172_v36 = vld [vmem:[#allocation75_spill] sm:$0xff] }
 0x3b2   :  { %v16515_v58 = vpop.f32.mrf.mxu0  ;;  %v6936_v6 = vld [vmem:[#allocation2 + $0x351] sm:$0xff]  ;;  %v5196_v63 = vadd.f32 %v23170_v19, %v4485_v7  ;;  %v4487_v31 = vadd.f32 %v23172_v36, %v23171_v17  ;;  %v23173_v50 = vld [vmem:[#allocation96_spill] sm:$0xff] }
 0x3b3   :  { %v20586_v55 = vld [vmem:[#allocation2 + $0x350] sm:$0xff]  ;;  %6807 = vst.msk [vmem:[#allocation2 + $0x391] sm:$0xff] %vm71_vm0, %v6743_v38  ;;  %v6746_v41 = vmax.f32 %v6682_v43, 0.0  ;;  %v6681_v18 = vadd.f32 %v20560_v20, %v6610_v56  ;;  %v6613_v16 = vadd.f32 %v16515_v58, %v5903_v54  ;;  %v5907_v46 = vadd.f32 %v20511_v10, %v23173_v50  ;;  %v6941_v56 = vld [vmem:[#allocation2 + $0x3c1] sm:$0xff]  ;;  %v23180_v36 = vld [vmem:[#allocation79_spill] sm:$0xff] }
 0x3b4   :  { %16606 = vmatmul.mubr.msk.f32.gmra.mxu1 %vm71_vm0, %v6936_v6  ;;  %16710 = vmatmul.mubr.msk.f32.gmra.mxu0 %vm71_vm0, %v20586_v55  ;;  %v6493_v62 = vpop.f32.mrf.mxu0  ;;  %v6939_v23 = vld [vmem:[#allocation2 + $0x381] sm:$0xff]  ;;  %v5198_v58 = vadd.f32 %v23174_v22, %v4487_v31 }
 0x3b5   :  { %16608 = vmatprep.mubr.msk.f32.mxu1 %vm71_vm0, %v6937_v4  ;;  %16712 = vmatprep.mubr.msk.f32.mxu0 %vm71_vm0, %v20594_v26  ;;  %6810 = vst.msk [vmem:[#allocation2 + $0x3e1] sm:$0xff] %vm71_vm0, %v6746_v41  ;;  %v6745_v28 = vmax.f32 %v6681_v18, 0.0  ;;  %v6684_v29 = vadd.f32 %v20560_v20, %v6613_v16  ;;  %v6612_v15 = vadd.f32 %v6493_v62, %v5902_v57  ;;  %v20616_v5 = vld [vmem:[#allocation2 + $0x380] sm:$0xff]  ;;  %v16432_v62 = vpop.f32.mrf.mxu1 }
 0x3b6   :  { %v16518_v37 = vpop.f32.mrf.mxu0  ;;  %v6938_v0 = vld [vmem:[#allocation2 + $0x371] sm:$0xff]  ;;  %v5906_v18 = vadd.f32 %v20533_v53, %v5196_v63  ;;  %v23176_v48 = vld [vmem:[#allocation76_spill] sm:$0xff] }
 0x3b7   :  { %v20608_v25 = vld [vmem:[#allocation2 + $0x370] sm:$0xff]  ;;  %6809 = vst.msk [vmem:[#allocation2 + $0x3d1] sm:$0xff] %vm71_vm0, %v6745_v28  ;;  %v6748_v59 = vmax.f32 %v6684_v29, 0.0  ;;  %v6683_v33 = vadd.f32 %v20560_v20, %v6612_v15  ;;  %v6615_v9 = vadd.f32 %v16518_v37, %v5905_v47  ;;  %v4489_v7 = vadd.f32 %v23176_v48, %v23175_v60  ;;  %v23183_v48 = vld [vmem:[#allocation15_spill] sm:$0xff] }
 0x3b8   :  { %16609 = vmatmul.mubr.msk.f32.gmra.mxu1 %vm71_vm0, %v6938_v0  ;;  %16713 = vmatmul.mubr.msk.f32.gmra.mxu0 %vm71_vm0, %v20608_v25  ;;  %v6503_v45 = vpop.f32.mrf.mxu0  ;;  %v23177_v53 = vld [vmem:[#allocation98_spill] sm:$0xff] }
 0x3b9   :  { %16611 = vmatprep.mubr.msk.f32.mxu1 %vm71_vm0, %v6939_v23  ;;  %16715 = vmatprep.mubr.msk.f32.mxu0 %vm71_vm0, %v20616_v5  ;;  %6812 = vst.msk [vmem:[#allocation2 + $0x401] sm:$0xff] %vm71_vm0, %v6748_v59  ;;  %v6747_v54 = vmax.f32 %v6683_v33, 0.0  ;;  %v6686_v38 = vadd.f32 %v20560_v20, %v6615_v9  ;;  %v6614_v43 = vadd.f32 %v6503_v45, %v5904_v12  ;;  %v23178_v63 = vld [vmem:[#allocation102_spill] sm:$0xff]  ;;  %v5833_v45 = vpop.f32.mrf.mxu1 }
 0x3ba   :  { %v16521_v6 = vpop.f32.mrf.mxu0  ;;  %v6940_v57 = vld [vmem:[#allocation2 + $0x391] sm:$0xff]  ;;  %v5909_v47 = vadd.f32 %v20553_v61, %v23177_v53  ;;  %v5908_v12 = vadd.f32 %v20576_v24, %v5198_v58  ;;  %v5200_v59 = vadd.f32 %v23178_v63, %v4489_v7  ;;  %v23179_v24 = vld [vmem:[#allocation13_spill] sm:$0xff] }
 0x3bb   :  { %v20628_v41 = vld [vmem:[#allocation2 + $0x390] sm:$0xff]  ;;  %6811 = vst.msk [vmem:[#allocation2 + $0x3f1] sm:$0xff] %vm71_vm0, %v6747_v54  ;;  %v6750_v16 = vmax.f32 %v6686_v38, 0.0  ;;  %v6685_v10 = vadd.f32 %v20560_v20, %v6614_v43  ;;  %v6617_v4 = vadd.f32 %v16521_v6, %v5907_v46  ;;  %v4491_v31 = vadd.f32 %v23180_v36, %v23179_v24  ;;  %v23181_v46 = vld [vmem:[#allocation100_spill] sm:$0xff]  ;;  %v16435_v53 = vpop.f32.mrf.mxu1 }
 0x3bc   :  { %16612 = vmatmul.mubr.msk.f32.gmra.mxu1 %vm71_vm0, %v6940_v57  ;;  %16716 = vmatmul.mubr.msk.f32.gmra.mxu0 %vm71_vm0, %v20628_v41  ;;  %v6513_v13 = vpop.f32.mrf.mxu0  ;;  %v6943_v23 = vld [vmem:[#allocation2 + $0x3e1] sm:$0xff]  ;;  %v5911_v54 = vadd.f32 %v20598_v34, %v23181_v46  ;;  %v23184_v7 = vld [vmem:[#allocation14_spill] sm:$0xff] }
 0x3bd   :  { %16614 = vmatprep.mubr.msk.f32.mxu1 %vm71_vm0, %v6941_v56  ;;  %16718 = vmatprep.mubr.msk.f32.mxu0 %vm71_vm0, %v6873_v49  ;;  %6814 = vst.msk [vmem:[#allocation2 + $0x421] sm:$0xff] %vm71_vm0, %v6750_v16  ;;  %v6749_v28 = vmax.f32 %v6685_v10, 0.0  ;;  %v6688_v29 = vadd.f32 %v20560_v20, %v6617_v4  ;;  %v6616_v15 = vadd.f32 %v6513_v13, %v5906_v18  ;;  %v20653_v17 = vld [vmem:[#allocation2 + $0x3e0] sm:$0xff]  ;;  %v23182_v49 = vld [vmem:[#allocation105_spill] sm:$0xff] }
 0x3be   :  { %v16524_v37 = vpop.f32.mrf.mxu0  ;;  %v6942_v0 = vld [vmem:[#allocation2 + $0x3d1] sm:$0xff]  ;;  %v5202_v22 = vadd.f32 %v23182_v49, %v4491_v31  ;;  %v5910_v18 = vadd.f32 %v5823_v2, %v5200_v59  ;;  %v4493_v13 = vadd.f32 %v23184_v7, %v23183_v48  ;;  %v5843_v31 = vpop.f32.mrf.mxu1  ;;  %v6881_v49 = vld [vmem:[#allocation2 + $0x460] sm:$0xff] }
 0x3bf   :  { %v20645_v19 = vld [vmem:[#allocation2 + $0x3d0] sm:$0xff]  ;;  %6813 = vst.msk [vmem:[#allocation2 + $0x411] sm:$0xff] %vm71_vm0, %v6749_v28  ;;  %v6752_v33 = vmax.f32 %v6688_v29, 0.0  ;;  %v6687_v9 = vadd.f32 %v20560_v20, %v6616_v15  ;;  %v6619_v61 = vadd.f32 %v16524_v37, %v5909_v47  ;;  %v23185_v2 = vld [vmem:[#allocation103_spill] sm:$0xff] }
 0x3c0   :  { %16615 = vmatmul.mubr.msk.f32.gmra.mxu1 %vm71_vm0, %v6942_v0  ;;  %16719 = vmatmul.mubr.msk.f32.gmra.mxu0 %vm71_vm0, %v20645_v19  ;;  %v6523_v50 = vpop.f32.mrf.mxu0  ;;  %v6945_v34 = vld [vmem:[#allocation2 + $0x401] sm:$0xff]  ;;  %v5913_v28 = vadd.f32 %v16432_v62, %v23185_v2  ;;  %v5912_v37 = vadd.f32 %v5833_v45, %v5202_v22 }
 0x3c1   :  { %16617 = vmatprep.mubr.msk.f32.mxu1 %vm71_vm0, %v6943_v23  ;;  %16721 = vmatprep.mubr.msk.f32.mxu0 %vm71_vm0, %v20653_v17  ;;  %6816 = vst.msk [vmem:[#allocation2 + $0x441] sm:$0xff] %vm71_vm0, %v6752_v33  ;;  %v6751_v38 = vmax.f32 %v6687_v9, 0.0  ;;  %v6690_v43 = vadd.f32 %v20560_v20, %v6619_v61  ;;  %v6618_v56 = vadd.f32 %v6523_v50, %v5908_v12  ;;  %v20672_v60 = vld [vmem:[#allocation2 + $0x400] sm:$0xff]  ;;  %v23187_v50 = vld [vmem:[#allocation106_spill] sm:$0xff] }
 0x3c2   :  { %v16527_v58 = vpop.f32.mrf.mxu0  ;;  %v6944_v6 = vld [vmem:[#allocation2 + $0x3f1] sm:$0xff]  ;;  %v23186_v33 = vld [vmem:[#allocation108_spill] sm:$0xff]  ;;  %v5915_v46 = vadd.f32 %v16435_v53, %v23187_v50 }
 0x3c3   :  { %v20665_v57 = vld [vmem:[#allocation2 + $0x3f0] sm:$0xff]  ;;  %6815 = vst.msk [vmem:[#allocation2 + $0x431] sm:$0xff] %vm71_vm0, %v6751_v38  ;;  %v6754_v16 = vmax.f32 %v6690_v43, 0.0  ;;  %v6689_v10 = vadd.f32 %v20560_v20, %v6618_v56  ;;  %v6621_v4 = vadd.f32 %v16527_v58, %v5911_v54  ;;  %v5204_v9 = vadd.f32 %v23186_v33, %v4493_v13  ;;  %v6949_v56 = vld [vmem:[#allocation2 + $0x461] sm:$0xff] }
 0x3c4   :  { %16618 = vmatmul.mubr.msk.f32.gmra.mxu1 %vm71_vm0, %v6944_v6  ;;  %16722 = vmatmul.mubr.msk.f32.gmra.mxu0 %vm71_vm0, %v20665_v57  ;;  %v6533_v47 = vpop.f32.mrf.mxu0  ;;  %v6947_v62 = vld [vmem:[#allocation2 + $0x421] sm:$0xff]  ;;  %v8826_v50 = vld [vmem:[#allocation2 + $0x10] sm:$0xff] }
 0x3c5   :  { %16620 = vmatprep.mubr.msk.f32.mxu1 %vm71_vm0, %v6945_v34  ;;  %16724 = vmatprep.mubr.msk.f32.mxu0 %vm71_vm0, %v20672_v60  ;;  %6818 = vst.msk [vmem:[#allocation2 + $0x481] sm:$0xff] %vm71_vm0, %v6754_v16  ;;  %v6753_v29 = vmax.f32 %v6689_v10, 0.0  ;;  %v6692_v15 = vadd.f32 %v20560_v20, %v6621_v4  ;;  %v6620_v12 = vadd.f32 %v6533_v47, %v5910_v18  ;;  %v20690_v36 = vld [vmem:[#allocation2 + $0x420] sm:$0xff] }
 0x3c6   :  { %v16530_v0 = vpop.f32.mrf.mxu0  ;;  %v6946_v63 = vld [vmem:[#allocation2 + $0x411] sm:$0xff]  ;;  %v5914_v18 = vadd.f32 %v5843_v31, %v5204_v9 }
 0x3c7   :  { %v20682_v59 = vld [vmem:[#allocation2 + $0x410] sm:$0xff]  ;;  %6817 = vst.msk [vmem:[#allocation2 + $0x471] sm:$0xff] %vm71_vm0, %v6753_v29  ;;  %v6756_v61 = vmax.f32 %v6692_v15, 0.0  ;;  %v6691_v23 = vadd.f32 %v20560_v20, %v6620_v12  ;;  %v6623_v24 = vadd.f32 %v16530_v0, %v5913_v28 }
 0x3c8   :  { %16621 = vmatmul.mubr.msk.f32.gmra.mxu1 %vm71_vm0, %v6946_v63  ;;  %16725 = vmatmul.mubr.msk.f32.gmra.mxu0 %vm71_vm0, %v20682_v59  ;;  %v6543_v45 = vpop.f32.mrf.mxu0 }
 0x3c9   :  { %16623 = vmatprep.mubr.msk.f32.mxu1 %vm71_vm0, %v6947_v62  ;;  %16727 = vmatprep.mubr.msk.f32.mxu0 %vm71_vm0, %v20690_v36  ;;  %6820 = vst.msk [vmem:[#allocation2 + $0x4a1] sm:$0xff] %vm71_vm0, %v6756_v61  ;;  %v6755_v54 = vmax.f32 %v6691_v23, 0.0  ;;  %v6694_v38 = vadd.f32 %v20560_v20, %v6623_v24  ;;  %v6622_v43 = vadd.f32 %v6543_v45, %v5912_v37  ;;  %v10314_v24 = vld [vmem:[#allocation5 + $0xb8] sm:$0xff] }
 0x3ca   :  { %v16533_v22 = vpop.f32.mrf.mxu0  ;;  %v6948_v58 = vld [vmem:[#allocation2 + $0x431] sm:$0xff]  ;;  %v8116_v62 = vld [vmem:[#allocation2 + $0x2] sm:$0xff]  ;;  %17054 = vmatprep.subr.mxu0 %v10314_v24 }
 0x3cb   :  { %v20698_v6 = vld [vmem:[#allocation2 + $0x430] sm:$0xff]  ;;  %6819 = vst.msk [vmem:[#allocation2 + $0x491] sm:$0xff] %vm71_vm0, %v6755_v54  ;;  %v6758_v16 = vmax.f32 %v6694_v38, 0.0  ;;  %v6693_v10 = vadd.f32 %v20560_v20, %v6622_v43  ;;  %v6625_v4 = vadd.f32 %v16533_v22, %v5915_v46  ;;  %v8827_v54 = vld [vmem:[#allocation2 + $0x20] sm:$0xff] }
 0x3cc   :  { %16624 = vmatmul.mubr.msk.f32.gmra.mxu1 %vm71_vm0, %v6948_v58  ;;  %16728 = vmatmul.mubr.msk.f32.gmra.mxu0 %vm71_vm0, %v20698_v6  ;;  %v6553_v34 = vpop.f32.mrf.mxu0  ;;  %v6951_v29 = vld [vmem:[#allocation2 + $0x481] sm:$0xff]  ;;  %v20750_v46 = vld [vmem:[#allocation2 + $0x12] sm:$0xff] }
 0x3cd   :  { %16626 = vmatprep.mubr.msk.f32.mxu1 %vm71_vm0, %v6949_v56  ;;  %16730 = vmatprep.mubr.msk.f32.mxu0 %vm71_vm0, %v6881_v49  ;;  %6822 = vst.msk [vmem:[#allocation2 + $0x4c1] sm:$0xff] %vm71_vm0, %v6758_v16  ;;  %v6757_v48 = vmax.f32 %v6693_v10, 0.0  ;;  %v6696_v7 = vadd.f32 %v20560_v20, %v6625_v4  ;;  %v6624_v13 = vadd.f32 %v6553_v34, %v5914_v18  ;;  %v20716_v15 = vld [vmem:[#allocation2 + $0x480] sm:$0xff]  ;;  %v9603_v38 = vld [vmem:[#allocation5 + $0x90] sm:$0xff]  ;;  %v9602_v18 = vld [vmem:[#allocation5 + $0x88] sm:$0xff] }
 0x3ce   :  { %v6950_v53 = vld [vmem:[#allocation2 + $0x471] sm:$0xff]  ;;  %v20755_v43 = vld [vmem:[#allocation2 + $0x22] sm:$0xff] }
 0x3cf   :  { %v20709_v47 = vld [vmem:[#allocation2 + $0x470] sm:$0xff]  ;;  %6821 = vst.msk [vmem:[#allocation2 + $0x4b1] sm:$0xff] %vm71_vm0, %v6757_v48  ;;  %v6760_v2 = vmax.f32 %v6696_v7, 0.0  ;;  %v6695_v28 = vadd.f32 %v20560_v20, %v6624_v13  ;;  %v17480_v56 = vld [vmem:[#allocation5 + $0x98] sm:$0xff]  ;;  %v9601_v7 = vld [vmem:[#allocation5 + $0x80] sm:$0xff] }
 0x3d0   :  { %16627 = vmatmul.mubr.msk.f32.gmra.mxu1 %vm71_vm0, %v6950_v53  ;;  %16731 = vmatmul.mubr.msk.f32.gmra.mxu0 %vm71_vm0, %v20709_v47  ;;  %v6953_v20 = vld [vmem:[#allocation2 + $0x4a1] sm:$0xff]  ;;  %v8828_v49 = vld [vmem:[#allocation2 + $0x30] sm:$0xff] }
 0x3d1   :  { %16629 = vmatprep.mubr.msk.f32.mxu1 %vm71_vm0, %v6951_v29  ;;  %16733 = vmatprep.mubr.msk.f32.mxu0 %vm71_vm0, %v20716_v15  ;;  %6824 = vst.msk [vmem:[#allocation2 + $0x4e1] sm:$0xff] %vm71_vm0, %v6760_v2  ;;  %v6759_v12 = vmax.f32 %v6695_v28, 0.0  ;;  %v20728_v63 = vld [vmem:[#allocation2 + $0x4a0] sm:$0xff]  ;;  %v20760_v58 = vld [vmem:[#allocation2 + $0x32] sm:$0xff] }
 0x3d2   :  { %v6952_v37 = vld [vmem:[#allocation2 + $0x491] sm:$0xff]  ;;  %v8829_v22 = vld [vmem:[#allocation2 + $0x40] sm:$0xff] }
 0x3d3   :  { %v20722_v0 = vld [vmem:[#allocation2 + $0x490] sm:$0xff]  ;;  %6823 = vst.msk [vmem:[#allocation2 + $0x4d1] sm:$0xff] %vm71_vm0, %v6759_v12  ;;  %v20765_v10 = vld [vmem:[#allocation2 + $0x42] sm:$0xff] }
 0x3d4   :  { %16630 = vmatmul.mubr.msk.f32.gmra.mxu1 %vm71_vm0, %v6952_v37  ;;  %16734 = vmatmul.mubr.msk.f32.gmra.mxu0 %vm71_vm0, %v20722_v0  ;;  %v6955_v61 = vld [vmem:[#allocation2 + $0x4c1] sm:$0xff]  ;;  %v10313_v16 = vld [vmem:[#allocation5 + $0xb0] sm:$0xff]  ;;  %v10312_v13 = vld [vmem:[#allocation5 + $0xa8] sm:$0xff] }
 0x3d5   :  { %16632 = vmatprep.mubr.msk.f32.mxu1 %vm71_vm0, %v6953_v20  ;;  %16736 = vmatprep.mubr.msk.f32.mxu0 %vm71_vm0, %v20728_v63  ;;  %v20738_v23 = vld [vmem:[#allocation2 + $0x4c0] sm:$0xff]  ;;  %v8830_v4 = vld [vmem:[#allocation2 + $0x50] sm:$0xff] }
 0x3d6   :  { %v6954_v33 = vld [vmem:[#allocation2 + $0x4b1] sm:$0xff]  ;;  %v8831_v34 = vld [vmem:[#allocation2 + $0x60] sm:$0xff] }
 0x3d7   :  { %v20733_v9 = vld [vmem:[#allocation2 + $0x4b0] sm:$0xff]  ;;  %v20775_v53 = vld [vmem:[#allocation2 + $0x62] sm:$0xff] }
 0x3d8   :  { %16633 = vmatmul.mubr.msk.f32.gmra.mxu1 %vm71_vm0, %v6954_v33  ;;  %16737 = vmatmul.mubr.msk.f32.gmra.mxu0 %vm71_vm0, %v20733_v9  ;;  %v20770_v48 = vld [vmem:[#allocation2 + $0x52] sm:$0xff]  ;;  %v8833_v28 = vld [vmem:[#allocation2 + $0x80] sm:$0xff] }
 0x3d9   :  { %16635 = vmatprep.mubr.msk.f32.mxu1 %vm71_vm0, %v6955_v61  ;;  %16739 = vmatprep.mubr.msk.f32.mxu0 %vm71_vm0, %v20738_v23  ;;  %v8832_v2 = vld [vmem:[#allocation2 + $0x70] sm:$0xff]  ;;  %v8124_v29 = vld [vmem:[#allocation2 + $0xa2] sm:$0xff] }
 0x3da   :  { %v6956_v31 = vld [vmem:[#allocation2 + $0x4d1] sm:$0xff]  ;;  %v10311_v37 = vld [vmem:[#allocation5 + $0xa0] sm:$0xff]  ;;  %v20782_v20 = vld [vmem:[#allocation5 + $0xd8] sm:$0xff] }
 0x3db   :  { %v20743_v45 = vld [vmem:[#allocation2 + $0x4d0] sm:$0xff] }
 0x3dc   :  { %16636 = vmatmul.mubr.msk.f32.gmra.mxu1 %vm71_vm0, %v6956_v31  ;;  %16740 = vmatmul.mubr.msk.f32.gmra.mxu0 %vm71_vm0, %v20743_v45  ;;  %v20780_v12 = vld [vmem:[#allocation2 + $0x72] sm:$0xff] }
 0x3dd   :  { %16854 = vmatprep.mubr.msk.f32.mxu0 %vm71_vm0, %v8826_v50  ;;  %16750 = vmatprep.mubr.msk.f32.mxu1 %vm71_vm0, %v8116_v62  ;;  %v17481_v33 = vld [vmem:[#allocation2 + $0xb0] sm:$0xff]  ;;  %v20795_v62 = vld [vmem:[#allocation2 + $0xc2] sm:$0xff] }
 0x3de   :  { %v20790_v61 = vld [vmem:[#allocation2 + $0xb2] sm:$0xff] }
 0x3df   :  { %v17483_v31 = vld [vmem:[#allocation2 + $0xd0] sm:$0xff] }
 0x3e0   :  { %16751 = vmatmul.mubr.msk.f32.vlgmr.msra.gmra.mxu1 %vm71_vm0, %v20750_v46  ;;  %16855 = vmatmul.mubr.msk.f32.vlgmr.msra.gmra.mxu0 %vm71_vm0, %v8827_v54  ;;  %v20800_v50 = vld [vmem:[#allocation2 + $0xd2] sm:$0xff]  ;;  %v17484_v54 = vld [vmem:[#allocation2 + $0xe0] sm:$0xff] }
 0x3e1   :  { %16951 = vmatpush3.msra.mxu1 %v17480_v56  ;;  %16753 = vmatprep.mubr.msk.f32.mxu1 %vm71_vm0, %v20755_v43  ;;  %v17485_v56 = vld [vmem:[#allocation2 + $0xf0] sm:$0xff] }
 0x3e2   :  { %16857 = vmatprep.mubr.msk.f32.mxu0 %vm71_vm0, %v8828_v49  ;;  %16952 = vmatprep.subr.mxu1 %v9603_v38  ;;  %v20810_v49 = vld [vmem:[#allocation2 + $0xf2] sm:$0xff] }
 0x3e3   :  { %16953 = vmatpush3.msra.mxu1 %v9603_v38  ;;  %17055 = vmatpush3.msra.mxu0 %v10314_v24  ;;  %v17482_v24 = vld [vmem:[#allocation2 + $0xc0] sm:$0xff] }
 0x3e4   :  { %16754 = vmatmul.mubr.msk.f32.gmra.mxu1 %vm71_vm0, %v20760_v58  ;;  %16858 = vmatmul.mubr.msk.f32.gmra.mxu0 %vm71_vm0, %v8829_v22  ;;  %v20805_v38 = vld [vmem:[#allocation2 + $0xe2] sm:$0xff] }
 0x3e5   :  { %16756 = vmatprep.mubr.msk.f32.mxu1 %vm71_vm0, %v20765_v10  ;;  %16860 = vmatprep.mubr.msk.f32.mxu0 %vm71_vm0, %v8830_v4  ;;  %v17486_v22 = vld [vmem:[#allocation2 + $0x100] sm:$0xff] }
 0x3e6   :  { %16954 = vmatprep.subr.mxu1 %v9602_v18  ;;  %17056 = vmatprep.subr.mxu0 %v10313_v16  ;;  %v8132_v4 = vld [vmem:[#allocation2 + $0x142] sm:$0xff] }
 0x3e7   :  { %16955 = vmatpush3.msra.mxu1 %v9602_v18  ;;  %17057 = vmatpush3.msra.mxu0 %v10313_v16  ;;  %v20815_v18 = vld [vmem:[#allocation2 + $0x102] sm:$0xff]  ;;  %v17487_v16 = vld [vmem:[#allocation2 + $0x110] sm:$0xff] }
 0x3e8   :  { %16757 = vmatmul.mubr.msk.f32.gmra.mxu1 %vm71_vm0, %v20770_v48  ;;  %16861 = vmatmul.mubr.msk.f32.gmra.mxu0 %vm71_vm0, %v8831_v34  ;;  %v20820_v34 = vld [vmem:[#allocation2 + $0x112] sm:$0xff] }
 0x3e9   :  { %16759 = vmatprep.mubr.msk.f32.mxu1 %vm71_vm0, %v20775_v53  ;;  %16863 = vmatprep.mubr.msk.f32.mxu0 %vm71_vm0, %v8832_v2  ;;  %v20827_v2 = vld [vmem:[#allocation2 + $0x152] sm:$0xff] }
 0x3ea   :  { %16956 = vmatprep.subr.mxu1 %v9601_v7  ;;  %17058 = vmatprep.subr.mxu0 %v10312_v13 }
 0x3eb   :  { %16957 = vmatpush3.msra.mxu1 %v9601_v7  ;;  %17059 = vmatpush3.msra.mxu0 %v10312_v13  ;;  %v8841_v7 = vld [vmem:[#allocation2 + $0x120] sm:$0xff]  ;;  %v17488_v13 = vld [vmem:[#allocation2 + $0x150] sm:$0xff] }
 0x3ec   :  { %16760 = vmatmul.mubr.msk.f32.gmra.mxu1 %vm71_vm0, %v20780_v12  ;;  %16864 = vmatmul.mubr.msk.f32.gmra.mxu0 %vm71_vm0, %v8833_v28  ;;  %v17489_v28 = vld [vmem:[#allocation2 + $0x160] sm:$0xff] }
 0x3ed   :  { %16866 = vmatprep.mubr.msk.f32.mxu0 %vm71_vm0, %v17481_v33  ;;  %16762 = vmatprep.mubr.msk.f32.mxu1 %vm71_vm0, %v8124_v29  ;;  %v20832_v29 = vld [vmem:[#allocation2 + $0x162] sm:$0xff]  ;;  %v20837_v33 = vld [vmem:[#allocation2 + $0x172] sm:$0xff] }
 0x3ee   :  { %17060 = vmatprep.subr.mxu0 %v10311_v37  ;;  %17158 = vmatprep.subr.mxu1 %v20782_v20 }
 0x3ef   :  { %17061 = vmatpush3.msra.mxu0 %v10311_v37  ;;  %v17490_v37 = vld [vmem:[#allocation2 + $0x170] sm:$0xff] }
 0x3f0   :  { %16763 = vmatmul.mubr.msk.f32.gmra.mxu1 %vm71_vm0, %v20790_v61  ;;  %16867 = vmatmul.mubr.msk.f32.gmra.mxu0 %vm71_vm0, %v17482_v24  ;;  %v17491_v24 = vld [vmem:[#allocation2 + $0x180] sm:$0xff] }
 0x3f1   :  { %16765 = vmatprep.mubr.msk.f32.mxu1 %vm71_vm0, %v20795_v62  ;;  %16869 = vmatprep.mubr.msk.f32.mxu0 %vm71_vm0, %v17483_v31  ;;  %v20842_v31 = vld [vmem:[#allocation2 + $0x182] sm:$0xff] }
 0x3f4   :  { %16766 = vmatmul.mubr.msk.f32.gmra.mxu1 %vm71_vm0, %v20800_v50  ;;  %16870 = vmatmul.mubr.msk.f32.gmra.mxu0 %vm71_vm0, %v17484_v54  ;;  %v17492_v54 = vld [vmem:[#allocation2 + $0x190] sm:$0xff] }
 0x3f5   :  { %16768 = vmatprep.mubr.msk.f32.mxu1 %vm71_vm0, %v20805_v38  ;;  %16872 = vmatprep.mubr.msk.f32.mxu0 %vm71_vm0, %v17485_v56  ;;  %v20847_v56 = vld [vmem:[#allocation2 + $0x192] sm:$0xff] }
 0x3f8   :  { %16769 = vmatmul.mubr.msk.f32.gmra.mxu1 %vm71_vm0, %v20810_v49  ;;  %16873 = vmatmul.mubr.msk.f32.gmra.mxu0 %vm71_vm0, %v17486_v22  ;;  %v17493_v22 = vld [vmem:[#allocation2 + $0x1a0] sm:$0xff] }
 0x3f9   :  { %16771 = vmatprep.mubr.msk.f32.mxu1 %vm71_vm0, %v20815_v18  ;;  %16875 = vmatprep.mubr.msk.f32.mxu0 %vm71_vm0, %v17487_v16  ;;  %v20852_v16 = vld [vmem:[#allocation2 + $0x1a2] sm:$0xff] }
 0x3fc   :  { %16772 = vmatmul.mubr.msk.f32.gmra.mxu1 %vm71_vm0, %v20820_v34  ;;  %16876 = vmatmul.mubr.msk.f32.gmra.mxu0 %vm71_vm0, %v8841_v7  ;;  %v8140_v7 = vld [vmem:[#allocation2 + $0x1e2] sm:$0xff] }
 0x3fd   :  { %16878 = vmatprep.mubr.msk.f32.mxu0 %vm71_vm0, %v17488_v13  ;;  %16774 = vmatprep.mubr.msk.f32.mxu1 %vm71_vm0, %v8132_v4  ;;  %v17494_v4 = vld [vmem:[#allocation2 + $0x1b0] sm:$0xff] }
 0x3fe   :  { %v20857_v13 = vld [vmem:[#allocation2 + $0x1b2] sm:$0xff] }
 0x400   :  { %16775 = vmatmul.mubr.msk.f32.gmra.mxu1 %vm71_vm0, %v20827_v2  ;;  %16879 = vmatmul.mubr.msk.f32.gmra.mxu0 %vm71_vm0, %v17489_v28  ;;  %v8849_v28 = vld [vmem:[#allocation2 + $0x1c0] sm:$0xff] }
 0x401   :  { %16777 = vmatprep.mubr.msk.f32.mxu1 %vm71_vm0, %v20832_v29  ;;  %16881 = vmatprep.mubr.msk.f32.mxu0 %vm71_vm0, %v17490_v37  ;;  %v20865_v37 = vld [vmem:[#allocation2 + $0x1f2] sm:$0xff] }
 0x404   :  { %16778 = vmatmul.mubr.msk.f32.gmra.mxu1 %vm71_vm0, %v20837_v33  ;;  %16882 = vmatmul.mubr.msk.f32.gmra.mxu0 %vm71_vm0, %v17491_v24  ;;  %v20871_v24 = vld [vmem:[#allocation2 + $0x202] sm:$0xff] }
 0x405   :  { %16780 = vmatprep.mubr.msk.f32.mxu1 %vm71_vm0, %v20842_v31  ;;  %16884 = vmatprep.mubr.msk.f32.mxu0 %vm71_vm0, %v17492_v54  ;;  %v20877_v54 = vld [vmem:[#allocation2 + $0x212] sm:$0xff] }
 0x408   :  { %16781 = vmatmul.mubr.msk.f32.gmra.mxu1 %vm71_vm0, %v20847_v56  ;;  %16885 = vmatmul.mubr.msk.f32.gmra.mxu0 %vm71_vm0, %v17493_v22  ;;  %v20901_v22 = vld [vmem:[#allocation2 + $0x252] sm:$0xff] }
 0x409   :  { %16783 = vmatprep.mubr.msk.f32.mxu1 %vm71_vm0, %v20852_v16  ;;  %16887 = vmatprep.mubr.msk.f32.mxu0 %vm71_vm0, %v17494_v4  ;;  %23189 = vst [vmem:[#allocation37_spill] sm:$0xff] %v20901_v22 }
 0x40c   :  { %16784 = vmatmul.mubr.msk.f32.gmra.mxu1 %vm71_vm0, %v20857_v13  ;;  %16888 = vmatmul.mubr.msk.f32.gmra.mxu0 %vm71_vm0, %v8849_v28 }
 0x40d   :  { %16890 = vmatprep.mubr.msk.f32.mxu0 %vm71_vm0, %v20392_v11  ;;  %16786 = vmatprep.mubr.msk.f32.mxu1 %vm71_vm0, %v8140_v7  ;;  %v20883_v11 = vld [vmem:[#allocation2 + $0x222] sm:$0xff] }
 0x410   :  { %16787 = vmatmul.mubr.msk.f32.gmra.mxu1 %vm71_vm0, %v20865_v37  ;;  %16891 = vmatmul.mubr.msk.f32.gmra.mxu0 %vm71_vm0, %v20400_v32  ;;  %v20889_v32 = vld [vmem:[#allocation2 + $0x232] sm:$0xff] }
 0x411   :  { %16789 = vmatprep.mubr.msk.f32.mxu1 %vm71_vm0, %v20871_v24  ;;  %16893 = vmatprep.mubr.msk.f32.mxu0 %vm71_vm0, %v20414_v39  ;;  %v20895_v39 = vld [vmem:[#allocation2 + $0x242] sm:$0xff] }
 0x412   :  { %23188 = vst [vmem:[#allocation38_spill] sm:$0xff] %v20895_v39 }
 0x414   :  { %16790 = vmatmul.mubr.msk.f32.gmra.mxu1 %vm71_vm0, %v20877_v54  ;;  %16894 = vmatmul.mubr.msk.f32.gmra.mxu0 %vm71_vm0, %v20422_v27  ;;  %v8148_v27 = vld [vmem:[#allocation2 + $0x282] sm:$0xff] }
 0x415   :  { %16792 = vmatprep.mubr.msk.f32.mxu1 %vm71_vm0, %v20883_v11  ;;  %16896 = vmatprep.mubr.msk.f32.mxu0 %vm71_vm0, %v20436_v35  ;;  %v8857_v35 = vld [vmem:[#allocation2 + $0x260] sm:$0xff] }
 0x418   :  { %16793 = vmatmul.mubr.msk.f32.gmra.mxu1 %vm71_vm0, %v20889_v32  ;;  %16897 = vmatmul.mubr.msk.f32.gmra.mxu0 %vm71_vm0, %v20444_v40  ;;  %v20909_v40 = vld [vmem:[#allocation2 + $0x292] sm:$0xff] }
 0x419   :  { %16795 = vmatprep.mubr.msk.f32.mxu1 %vm71_vm0, %v20895_v39  ;;  %16899 = vmatprep.mubr.msk.f32.mxu0 %vm71_vm0, %v20458_v8  ;;  %23190 = vst [vmem:[#allocation80_spill] sm:$0xff] %v20909_v40  ;;  %v20915_v8 = vld [vmem:[#allocation2 + $0x2a2] sm:$0xff] }
 0x41c   :  { %16796 = vmatmul.mubr.msk.f32.gmra.mxu1 %vm71_vm0, %v20901_v22  ;;  %16900 = vmatmul.mubr.msk.f32.gmra.mxu0 %vm71_vm0, %v8857_v35  ;;  %v20925_v22 = vld [vmem:[#allocation2 + $0x2b2] sm:$0xff] }
 0x41d   :  { %16902 = vmatprep.mubr.msk.f32.mxu0 %vm71_vm0, %v20477_v44  ;;  %16798 = vmatprep.mubr.msk.f32.mxu1 %vm71_vm0, %v8148_v27  ;;  %23192 = vst [vmem:[#allocation40_spill] sm:$0xff] %v20925_v22 }
 0x41f   :  { %v16544_v4 = vpop.f32.mrf.mxu1 }
 0x420   :  { %v16648_v7 = vpop.f32.mrf.mxu0  ;;  %16799 = vmatmul.mubr.msk.f32.gmra.mxu1 %vm71_vm0, %v20909_v40  ;;  %16903 = vmatmul.mubr.msk.f32.gmra.mxu0 %vm71_vm0, %v20485_v1  ;;  %v20931_v1 = vld [vmem:[#allocation2 + $0x2c2] sm:$0xff] }
 0x421   :  { %v20917_v28 = vadd.f32 %v16648_v7, %v16544_v4  ;;  %16801 = vmatprep.mubr.msk.f32.mxu1 %vm71_vm0, %v20915_v8  ;;  %16905 = vmatprep.mubr.msk.f32.mxu0 %vm71_vm0, %v20499_v3  ;;  %v7220_v44 = vpop.f32.mrf.mxu1 }
 0x422   :  { %v7797_v27 = vpop.f32.mrf.mxu0 }
 0x423   :  { %v20923_v35 = vadd.f32 %v7797_v27, %v7220_v44  ;;  %v20941_v27 = vld [vmem:[#allocation2 + $0x2d2] sm:$0xff] }
 0x424   :  { %v16547_v40 = vpop.f32.mrf.mxu1  ;;  %v16651_v39 = vpop.f32.mrf.mxu0  ;;  %16802 = vmatmul.mubr.msk.f32.gmra.mxu1 %vm71_vm0, %v20925_v22  ;;  %16906 = vmatmul.mubr.msk.f32.gmra.mxu0 %vm71_vm0, %v20507_v30  ;;  %23195 = vst [vmem:[#allocation19_spill] sm:$0xff] %v20941_v27  ;;  %v20947_v30 = vld [vmem:[#allocation2 + $0x2e2] sm:$0xff] }
 0x425   :  { %23191 = vst [vmem:[#allocation17_spill] sm:$0xff] %v20923_v35  ;;  %v20933_v4 = vadd.f32 %v16651_v39, %v16547_v40  ;;  %16804 = vmatprep.mubr.msk.f32.mxu1 %vm71_vm0, %v20931_v1  ;;  %16908 = vmatprep.mubr.msk.f32.mxu0 %vm71_vm0, %v20521_v51 }
 0x426   :  { %v7230_v3 = vpop.f32.mrf.mxu1  ;;  %v7807_v7 = vpop.f32.mrf.mxu0 }
 0x427   :  { %23193 = vst [vmem:[#allocation39_spill] sm:$0xff] %v20933_v4  ;;  %v20939_v44 = vadd.f32 %v7807_v7, %v7230_v3  ;;  %v8156_v3 = vld [vmem:[#allocation2 + $0x322] sm:$0xff] }
 0x428   :  { %v16550_v35 = vpop.f32.mrf.mxu1  ;;  %v16654_v22 = vpop.f32.mrf.mxu0  ;;  %16805 = vmatmul.mubr.msk.f32.gmra.mxu1 %vm71_vm0, %v20941_v27  ;;  %16909 = vmatmul.mubr.msk.f32.gmra.mxu0 %vm71_vm0, %v20529_v21  ;;  %v8865_v27 = vld [vmem:[#allocation2 + $0x300] sm:$0xff] }
 0x429   :  { %23194 = vst [vmem:[#allocation16_spill] sm:$0xff] %v20939_v44  ;;  %v20949_v39 = vadd.f32 %v16654_v22, %v16550_v35  ;;  %16807 = vmatprep.mubr.msk.f32.mxu1 %vm71_vm0, %v20947_v30  ;;  %16911 = vmatprep.mubr.msk.f32.mxu0 %vm71_vm0, %v20543_v14  ;;  %v20957_v44 = vld [vmem:[#allocation2 + $0x2f2] sm:$0xff] }
 0x42a   :  { %v7240_v51 = vpop.f32.mrf.mxu1  ;;  %v7817_v40 = vpop.f32.mrf.mxu0 }
 0x42b   :  { %23196 = vst [vmem:[#allocation42_spill] sm:$0xff] %v20949_v39  ;;  %v20955_v7 = vadd.f32 %v7817_v40, %v7240_v51  ;;  %v20969_v40 = vld [vmem:[#allocation2 + $0x332] sm:$0xff] }
 0x42c   :  { %v16553_v4 = vpop.f32.mrf.mxu1  ;;  %v16657_v21 = vpop.f32.mrf.mxu0  ;;  %16808 = vmatmul.mubr.msk.f32.gmra.mxu1 %vm71_vm0, %v20957_v44  ;;  %16912 = vmatmul.mubr.msk.f32.gmra.mxu0 %vm71_vm0, %v8865_v27 }
 0x42d   :  { %23197 = vst [vmem:[#allocation41_spill] sm:$0xff] %v20955_v7  ;;  %v20962_v22 = vadd.f32 %v16657_v21, %v16553_v4  ;;  %16914 = vmatprep.mubr.msk.f32.mxu0 %vm71_vm0, %v20564_v52  ;;  %16810 = vmatprep.mubr.msk.f32.mxu1 %vm71_vm0, %v8156_v3  ;;  %v20975_v4 = vld [vmem:[#allocation2 + $0x342] sm:$0xff] }
 0x42e   :  { %v7250_v14 = vpop.f32.mrf.mxu1  ;;  %v7827_v35 = vpop.f32.mrf.mxu0 }
 0x42f   :  { %v20967_v51 = vadd.f32 %v7827_v35, %v7250_v14  ;;  %v20985_v14 = vld [vmem:[#allocation2 + $0x352] sm:$0xff] }
 0x430   :  { %v16556_v7 = vpop.f32.mrf.mxu1  ;;  %v16660_v39 = vpop.f32.mrf.mxu0  ;;  %16811 = vmatmul.mubr.msk.f32.gmra.mxu1 %vm71_vm0, %v20969_v40  ;;  %16915 = vmatmul.mubr.msk.f32.gmra.mxu0 %vm71_vm0, %v20572_v42  ;;  %23200 = vst [vmem:[#allocation44_spill] sm:$0xff] %v20985_v14  ;;  %v20991_v42 = vld [vmem:[#allocation2 + $0x362] sm:$0xff] }
 0x431   :  { %23198 = vst [vmem:[#allocation18_spill] sm:$0xff] %v20967_v51  ;;  %v20977_v27 = vadd.f32 %v16660_v39, %v16556_v7  ;;  %16813 = vmatprep.mubr.msk.f32.mxu1 %vm71_vm0, %v20975_v4  ;;  %16917 = vmatprep.mubr.msk.f32.mxu0 %vm71_vm0, %v20586_v55 }
 0x432   :  { %v7260_v52 = vpop.f32.mrf.mxu1  ;;  %v7837_v3 = vpop.f32.mrf.mxu0 }
 0x433   :  { %v20983_v21 = vadd.f32 %v7837_v3, %v7260_v52  ;;  %v21001_v3 = vld [vmem:[#allocation2 + $0x372] sm:$0xff] }
 0x434   :  { %v16559_v35 = vpop.f32.mrf.mxu1  ;;  %v16663_v51 = vpop.f32.mrf.mxu0  ;;  %16814 = vmatmul.mubr.msk.f32.gmra.mxu1 %vm71_vm0, %v20985_v14  ;;  %16918 = vmatmul.mubr.msk.f32.gmra.mxu0 %vm71_vm0, %v20594_v26  ;;  %23203 = vst [vmem:[#allocation23_spill] sm:$0xff] %v21001_v3  ;;  %v21007_v26 = vld [vmem:[#allocation2 + $0x382] sm:$0xff] }
 0x435   :  { %23199 = vst [vmem:[#allocation21_spill] sm:$0xff] %v20983_v21  ;;  %v20993_v39 = vadd.f32 %v16663_v51, %v16559_v35  ;;  %16816 = vmatprep.mubr.msk.f32.mxu1 %vm71_vm0, %v20991_v42  ;;  %16920 = vmatprep.mubr.msk.f32.mxu0 %vm71_vm0, %v20608_v25 }
 0x436   :  { %v7270_v55 = vpop.f32.mrf.mxu1  ;;  %v7847_v7 = vpop.f32.mrf.mxu0 }
 0x437   :  { %23201 = vst [vmem:[#allocation43_spill] sm:$0xff] %v20993_v39  ;;  %v20999_v52 = vadd.f32 %v7847_v7, %v7270_v55  ;;  %v8164_v55 = vld [vmem:[#allocation2 + $0x3c2] sm:$0xff] }
 0x438   :  { %v16562_v21 = vpop.f32.mrf.mxu1  ;;  %v16666_v14 = vpop.f32.mrf.mxu0  ;;  %16817 = vmatmul.mubr.msk.f32.gmra.mxu1 %vm71_vm0, %v21001_v3  ;;  %16921 = vmatmul.mubr.msk.f32.gmra.mxu0 %vm71_vm0, %v20616_v5  ;;  %v8873_v3 = vld [vmem:[#allocation2 + $0x3a0] sm:$0xff] }
 0x439   :  { %23202 = vst [vmem:[#allocation20_spill] sm:$0xff] %v20999_v52  ;;  %v21009_v51 = vadd.f32 %v16666_v14, %v16562_v21  ;;  %16819 = vmatprep.mubr.msk.f32.mxu1 %vm71_vm0, %v21007_v26  ;;  %16923 = vmatprep.mubr.msk.f32.mxu0 %vm71_vm0, %v20628_v41  ;;  %v21017_v52 = vld [vmem:[#allocation2 + $0x392] sm:$0xff] }
 0x43a   :  { %v7280_v25 = vpop.f32.mrf.mxu1  ;;  %v7857_v35 = vpop.f32.mrf.mxu0 }
 0x43b   :  { %23204 = vst [vmem:[#allocation46_spill] sm:$0xff] %v21009_v51  ;;  %v21015_v7 = vadd.f32 %v7857_v35, %v7280_v25  ;;  %v21029_v35 = vld [vmem:[#allocation2 + $0x3d2] sm:$0xff] }
 0x43c   :  { %v16565_v39 = vpop.f32.mrf.mxu1  ;;  %v16669_v5 = vpop.f32.mrf.mxu0  ;;  %16820 = vmatmul.mubr.msk.f32.gmra.mxu1 %vm71_vm0, %v21017_v52  ;;  %16924 = vmatmul.mubr.msk.f32.gmra.mxu0 %vm71_vm0, %v8873_v3 }
 0x43d   :  { %23205 = vst [vmem:[#allocation45_spill] sm:$0xff] %v21015_v7  ;;  %v21022_v21 = vadd.f32 %v16669_v5, %v16565_v39  ;;  %16926 = vmatprep.mubr.msk.f32.mxu0 %vm71_vm0, %v20645_v19  ;;  %16822 = vmatprep.mubr.msk.f32.mxu1 %vm71_vm0, %v8164_v55  ;;  %v21035_v39 = vld [vmem:[#allocation2 + $0x3e2] sm:$0xff] }
 0x43e   :  { %v7290_v41 = vpop.f32.mrf.mxu1  ;;  %v7867_v14 = vpop.f32.mrf.mxu0 }
 0x43f   :  { %v21027_v25 = vadd.f32 %v7867_v14, %v7290_v41  ;;  %v21045_v41 = vld [vmem:[#allocation2 + $0x3f2] sm:$0xff] }
 0x440   :  { %v16568_v7 = vpop.f32.mrf.mxu1  ;;  %v16672_v51 = vpop.f32.mrf.mxu0  ;;  %16823 = vmatmul.mubr.msk.f32.gmra.mxu1 %vm71_vm0, %v21029_v35  ;;  %16927 = vmatmul.mubr.msk.f32.gmra.mxu0 %vm71_vm0, %v20653_v17  ;;  %23208 = vst [vmem:[#allocation48_spill] sm:$0xff] %v21045_v41  ;;  %v21051_v17 = vld [vmem:[#allocation2 + $0x402] sm:$0xff] }
 0x441   :  { %23206 = vst [vmem:[#allocation22_spill] sm:$0xff] %v21027_v25  ;;  %v21037_v3 = vadd.f32 %v16672_v51, %v16568_v7  ;;  %16825 = vmatprep.mubr.msk.f32.mxu1 %vm71_vm0, %v21035_v39  ;;  %16929 = vmatprep.mubr.msk.f32.mxu0 %vm71_vm0, %v20665_v57 }
 0x442   :  { %v7300_v19 = vpop.f32.mrf.mxu1  ;;  %v7877_v55 = vpop.f32.mrf.mxu0 }
 0x443   :  { %v21043_v5 = vadd.f32 %v7877_v55, %v7300_v19  ;;  %v21061_v55 = vld [vmem:[#allocation2 + $0x412] sm:$0xff] }
 0x444   :  { %v16571_v14 = vpop.f32.mrf.mxu1  ;;  %v16675_v25 = vpop.f32.mrf.mxu0  ;;  %16826 = vmatmul.mubr.msk.f32.gmra.mxu1 %vm71_vm0, %v21045_v41  ;;  %16930 = vmatmul.mubr.msk.f32.gmra.mxu0 %vm71_vm0, %v20672_v60  ;;  %23211 = vst [vmem:[#allocation27_spill] sm:$0xff] %v21061_v55  ;;  %v21067_v60 = vld [vmem:[#allocation2 + $0x422] sm:$0xff] }
 0x445   :  { %23207 = vst [vmem:[#allocation25_spill] sm:$0xff] %v21043_v5  ;;  %v21053_v51 = vadd.f32 %v16675_v25, %v16571_v14  ;;  %16828 = vmatprep.mubr.msk.f32.mxu1 %vm71_vm0, %v21051_v17  ;;  %16932 = vmatprep.mubr.msk.f32.mxu0 %vm71_vm0, %v20682_v59 }
 0x446   :  { %v7310_v57 = vpop.f32.mrf.mxu1  ;;  %v7887_v7 = vpop.f32.mrf.mxu0 }
 0x447   :  { %23209 = vst [vmem:[#allocation47_spill] sm:$0xff] %v21053_v51  ;;  %v21059_v19 = vadd.f32 %v7887_v7, %v7310_v57  ;;  %v8172_v57 = vld [vmem:[#allocation2 + $0x462] sm:$0xff] }
 0x448   :  { %v16574_v5 = vpop.f32.mrf.mxu1  ;;  %v16678_v41 = vpop.f32.mrf.mxu0  ;;  %16829 = vmatmul.mubr.msk.f32.gmra.mxu1 %vm71_vm0, %v21061_v55  ;;  %16933 = vmatmul.mubr.msk.f32.gmra.mxu0 %vm71_vm0, %v20690_v36  ;;  %v8881_v55 = vld [vmem:[#allocation2 + $0x440] sm:$0xff] }
 0x449   :  { %23210 = vst [vmem:[#allocation24_spill] sm:$0xff] %v21059_v19  ;;  %v21069_v25 = vadd.f32 %v16678_v41, %v16574_v5  ;;  %16831 = vmatprep.mubr.msk.f32.mxu1 %vm71_vm0, %v21067_v60  ;;  %16935 = vmatprep.mubr.msk.f32.mxu0 %vm71_vm0, %v20698_v6  ;;  %v21077_v19 = vld [vmem:[#allocation2 + $0x432] sm:$0xff] }
 0x44a   :  { %v7320_v59 = vpop.f32.mrf.mxu1  ;;  %v7897_v14 = vpop.f32.mrf.mxu0 }
 0x44b   :  { %23212 = vst [vmem:[#allocation50_spill] sm:$0xff] %v21069_v25  ;;  %v21075_v7 = vadd.f32 %v7897_v14, %v7320_v59  ;;  %v21089_v14 = vld [vmem:[#allocation2 + $0x472] sm:$0xff] }
 0x44c   :  { %v16577_v51 = vpop.f32.mrf.mxu1  ;;  %v16681_v36 = vpop.f32.mrf.mxu0  ;;  %16832 = vmatmul.mubr.msk.f32.gmra.mxu1 %vm71_vm0, %v21077_v19  ;;  %16936 = vmatmul.mubr.msk.f32.gmra.mxu0 %vm71_vm0, %v8881_v55 }
 0x44d   :  { %23213 = vst [vmem:[#allocation49_spill] sm:$0xff] %v21075_v7  ;;  %v21082_v5 = vadd.f32 %v16681_v36, %v16577_v51  ;;  %16938 = vmatprep.mubr.msk.f32.mxu0 %vm71_vm0, %v20709_v47  ;;  %16834 = vmatprep.mubr.msk.f32.mxu1 %vm71_vm0, %v8172_v57  ;;  %v21095_v51 = vld [vmem:[#allocation2 + $0x482] sm:$0xff] }
 0x44e   :  { %v7330_v6 = vpop.f32.mrf.mxu1  ;;  %v7907_v41 = vpop.f32.mrf.mxu0 }
 0x44f   :  { %v21087_v59 = vadd.f32 %v7907_v41, %v7330_v6  ;;  %v21105_v6 = vld [vmem:[#allocation2 + $0x492] sm:$0xff] }
 0x450   :  { %v16580_v7 = vpop.f32.mrf.mxu1  ;;  %v16684_v25 = vpop.f32.mrf.mxu0  ;;  %16835 = vmatmul.mubr.msk.f32.gmra.mxu1 %vm71_vm0, %v21089_v14  ;;  %16939 = vmatmul.mubr.msk.f32.gmra.mxu0 %vm71_vm0, %v20716_v15  ;;  %23216 = vst [vmem:[#allocation52_spill] sm:$0xff] %v21105_v6  ;;  %v21111_v15 = vld [vmem:[#allocation2 + $0x4a2] sm:$0xff] }
 0x451   :  { %23214 = vst [vmem:[#allocation26_spill] sm:$0xff] %v21087_v59  ;;  %v21097_v55 = vadd.f32 %v16684_v25, %v16580_v7  ;;  %16837 = vmatprep.mubr.msk.f32.mxu1 %vm71_vm0, %v21095_v51  ;;  %16941 = vmatprep.mubr.msk.f32.mxu0 %vm71_vm0, %v20722_v0 }
 0x452   :  { %v7340_v47 = vpop.f32.mrf.mxu1  ;;  %v7917_v57 = vpop.f32.mrf.mxu0 }
 0x453   :  { %v21103_v36 = vadd.f32 %v7917_v57, %v7340_v47  ;;  %v21121_v57 = vld [vmem:[#allocation2 + $0x4b2] sm:$0xff] }
 0x454   :  { %v16583_v41 = vpop.f32.mrf.mxu1  ;;  %v16687_v59 = vpop.f32.mrf.mxu0  ;;  %16838 = vmatmul.mubr.msk.f32.gmra.mxu1 %vm71_vm0, %v21105_v6  ;;  %16942 = vmatmul.mubr.msk.f32.gmra.mxu0 %vm71_vm0, %v20728_v63  ;;  %23219 = vst [vmem:[#allocation101_spill] sm:$0xff] %v21121_v57  ;;  %v21127_v63 = vld [vmem:[#allocation2 + $0x4c2] sm:$0xff] }
 0x455   :  { %23215 = vst [vmem:[#allocation29_spill] sm:$0xff] %v21103_v36  ;;  %v21113_v25 = vadd.f32 %v16687_v59, %v16583_v41  ;;  %16840 = vmatprep.mubr.msk.f32.mxu1 %vm71_vm0, %v21111_v15  ;;  %16944 = vmatprep.mubr.msk.f32.mxu0 %vm71_vm0, %v20733_v9  ;;  %23220 = vst [vmem:[#allocation31_spill] sm:$0xff] %v21127_v63 }
 0x456   :  { %v7350_v0 = vpop.f32.mrf.mxu1  ;;  %v7927_v7 = vpop.f32.mrf.mxu0 }
 0x457   :  { %23217 = vst [vmem:[#allocation51_spill] sm:$0xff] %v21113_v25  ;;  %v21119_v47 = vadd.f32 %v7927_v7, %v7350_v0  ;;  %v21137_v7 = vld [vmem:[#allocation2 + $0x4d2] sm:$0xff] }
 0x458   :  { %v16586_v36 = vpop.f32.mrf.mxu1  ;;  %v16690_v6 = vpop.f32.mrf.mxu0  ;;  %16841 = vmatmul.mubr.msk.f32.gmra.mxu1 %vm71_vm0, %v21121_v57  ;;  %16945 = vmatmul.mubr.msk.f32.gmra.mxu0 %vm71_vm0, %v20738_v23  ;;  %23223 = vst [vmem:[#allocation53_spill] sm:$0xff] %v21137_v7  ;;  %v11734_v57 = vld [vmem:[#allocation5 + $0xf8] sm:$0xff] }
 0x459   :  { %23218 = vst [vmem:[#allocation28_spill] sm:$0xff] %v21119_v47  ;;  %v21129_v59 = vadd.f32 %v16690_v6, %v16586_v36  ;;  %16843 = vmatprep.mubr.msk.f32.mxu1 %vm71_vm0, %v21127_v63  ;;  %16947 = vmatprep.mubr.msk.f32.mxu0 %vm71_vm0, %v20743_v45  ;;  %v8889_v47 = vld [vmem:[#allocation2 + $0x4e0] sm:$0xff]  ;;  %v9536_v36 = vld [vmem:[#allocation2 + $0x11] sm:$0xff] }
 0x45a   :  { %v7360_v9 = vpop.f32.mrf.mxu1  ;;  %v7937_v41 = vpop.f32.mrf.mxu0  ;;  %17262 = vmatprep.subr.mxu0 %v11734_v57 }
 0x45b   :  { %23221 = vst [vmem:[#allocation104_spill] sm:$0xff] %v21129_v59  ;;  %v21135_v0 = vadd.f32 %v7937_v41, %v7360_v9  ;;  %v11023_v59 = vld [vmem:[#allocation5 + $0xd0] sm:$0xff] }
 0x45c   :  { %v16589_v25 = vpop.f32.mrf.mxu1  ;;  %v16693_v23 = vpop.f32.mrf.mxu0  ;;  %16844 = vmatmul.mubr.msk.f32.gmra.mxu1 %vm71_vm0, %v21137_v7  ;;  %16948 = vmatmul.mubr.msk.f32.gmra.mxu0 %vm71_vm0, %v8889_v47 }
 0x45d   :  { %23222 = vst [vmem:[#allocation54_spill] sm:$0xff] %v21135_v0  ;;  %v21142_v6 = vadd.f32 %v16693_v23, %v16589_v25  ;;  %16958 = vmatprep.mubr.msk.f32.mxu1 %vm71_vm0, %v9536_v36  ;;  %17062 = vmatprep.mubr.msk.f32.mxu0 %vm71_vm0, %v20750_v46  ;;  %v21149_v0 = vld [vmem:[#allocation2 + $0x21] sm:$0xff]  ;;  %v21155_v25 = vld [vmem:[#allocation2 + $0x31] sm:$0xff] }
 0x45e   :  { %v7370_v45 = vpop.f32.mrf.mxu1  ;;  %v7947_v9 = vpop.f32.mrf.mxu0 }
 0x45f   :  { %v21147_v41 = vadd.f32 %v7947_v9, %v7370_v45  ;;  %v21166_v45 = vld [vmem:[#allocation2 + $0x41] sm:$0xff] }
 0x460   :  { %v16592_v63 = vpop.f32.mrf.mxu1  ;;  %v16696_v7 = vpop.f32.mrf.mxu0  ;;  %16959 = vmatmul.mubr.msk.f32.vlgmr.msra.gmra.mxu1 %vm71_vm0, %v21149_v0  ;;  %17063 = vmatmul.mubr.msk.f32.vlgmr.msra.gmra.mxu0 %vm71_vm0, %v20755_v43  ;;  %v11022_v43 = vld [vmem:[#allocation5 + $0xc8] sm:$0xff] }
 0x461   :  { %v21157_v47 = vadd.f32 %v16696_v7, %v16592_v63  ;;  %17159 = vmatpush3.msra.mxu1 %v20782_v20  ;;  %16961 = vmatprep.mubr.msk.f32.mxu1 %vm71_vm0, %v21155_v25  ;;  %v11733_v63 = vld [vmem:[#allocation5 + $0xf0] sm:$0xff] }
 0x462   :  { %17065 = vmatprep.mubr.msk.f32.mxu0 %vm71_vm0, %v20760_v58  ;;  %v7380_v46 = vpop.f32.mrf.mxu1  ;;  %v7957_v23 = vpop.f32.mrf.mxu0  ;;  %17160 = vmatprep.subr.mxu1 %v11023_v59  ;;  %v21172_v58 = vld [vmem:[#allocation2 + $0x51] sm:$0xff] }
 0x463   :  { %v21164_v36 = vadd.f32 %v7957_v23, %v7380_v46  ;;  %17161 = vmatpush3.msra.mxu1 %v11023_v59  ;;  %17263 = vmatpush3.msra.mxu0 %v11734_v57  ;;  %v21182_v23 = vld [vmem:[#allocation2 + $0x61] sm:$0xff] }
 0x464   :  { %v16595_v7 = vpop.f32.mrf.mxu1  ;;  %v16699_v9 = vpop.f32.mrf.mxu0  ;;  %16962 = vmatmul.mubr.msk.f32.gmra.mxu1 %vm71_vm0, %v21166_v45  ;;  %17066 = vmatmul.mubr.msk.f32.gmra.mxu0 %vm71_vm0, %v20765_v10  ;;  %v11021_v10 = vld [vmem:[#allocation5 + $0xc0] sm:$0xff] }
 0x465   :  { %23224 = vst [vmem:[#allocation30_spill] sm:$0xff] %v21164_v36  ;;  %v21174_v20 = vadd.f32 %v16699_v9, %v16595_v7  ;;  %16964 = vmatprep.mubr.msk.f32.mxu1 %vm71_vm0, %v21172_v58  ;;  %17068 = vmatprep.mubr.msk.f32.mxu0 %vm71_vm0, %v20770_v48  ;;  %v11732_v36 = vld [vmem:[#allocation5 + $0xe8] sm:$0xff] }
 0x466   :  { %v7390_v57 = vpop.f32.mrf.mxu1  ;;  %v7967_v59 = vpop.f32.mrf.mxu0  ;;  %17162 = vmatprep.subr.mxu1 %v11022_v43  ;;  %17264 = vmatprep.subr.mxu0 %v11733_v63  ;;  %v21188_v48 = vld [vmem:[#allocation2 + $0x71] sm:$0xff] }
 0x467   :  { %23225 = vst [vmem:[#allocation107_spill] sm:$0xff] %v21174_v20  ;;  %v21180_v46 = vadd.f32 %v7967_v59, %v7390_v57  ;;  %17163 = vmatpush3.msra.mxu1 %v11022_v43  ;;  %17265 = vmatpush3.msra.mxu0 %v11733_v63  ;;  %23227 = vst [vmem:[#allocation56_spill] sm:$0xff] %v21188_v48  ;;  %v21196_v57 = vld [vmem:[#allocation2 + $0x81] sm:$0xff] }
 0x468   :  { %v16598_v7 = vpop.f32.mrf.mxu1  ;;  %v16702_v9 = vpop.f32.mrf.mxu0  ;;  %16965 = vmatmul.mubr.msk.f32.gmra.mxu1 %vm71_vm0, %v21182_v23  ;;  %17069 = vmatmul.mubr.msk.f32.gmra.mxu0 %vm71_vm0, %v20775_v53  ;;  %v11731_v53 = vld [vmem:[#allocation5 + $0xe0] sm:$0xff] }
 0x469   :  { %23226 = vst [vmem:[#allocation33_spill] sm:$0xff] %v21180_v46  ;;  %v21190_v20 = vadd.f32 %v16702_v9, %v16598_v7  ;;  %16967 = vmatprep.mubr.msk.f32.mxu1 %vm71_vm0, %v21188_v48  ;;  %17071 = vmatprep.mubr.msk.f32.mxu0 %vm71_vm0, %v20780_v12  ;;  %v10253_v46 = vld [vmem:[#allocation2 + $0x82] sm:$0xff]  ;;  %v9544_v12 = vld [vmem:[#allocation2 + $0xb1] sm:$0xff] }
 0x46a   :  { %v7400_v43 = vpop.f32.mrf.mxu1  ;;  %v7977_v63 = vpop.f32.mrf.mxu0  ;;  %17164 = vmatprep.subr.mxu1 %v11021_v10  ;;  %17266 = vmatprep.subr.mxu0 %v11732_v36  ;;  %v21200_v7 = vld [vmem:[#allocation5 + $0x118] sm:$0xff] }
 0x46b   :  { %23228 = vst [vmem:[#allocation55_spill] sm:$0xff] %v21190_v20  ;;  %v21198_v59 = vadd.f32 %v7977_v63, %v7400_v43  ;;  %17165 = vmatpush3.msra.mxu1 %v11021_v10  ;;  %17267 = vmatpush3.msra.mxu0 %v11732_v36  ;;  %v21213_v63 = vld [vmem:[#allocation2 + $0xc1] sm:$0xff] }
 0x46c   :  { %v16601_v9 = vpop.f32.mrf.mxu1  ;;  %v16705_v20 = vpop.f32.mrf.mxu0  ;;  %16968 = vmatmul.mubr.msk.f32.gmra.mxu1 %vm71_vm0, %v21196_v57  ;;  %17072 = vmatmul.mubr.msk.f32.gmra.mxu0 %vm71_vm0, %v10253_v46 }
 0x46d   :  { %23229 = vst [vmem:[#allocation32_spill] sm:$0xff] %v21198_v59  ;;  %v21205_v48 = vadd.f32 %v16705_v20, %v16601_v9  ;;  %16970 = vmatprep.mubr.msk.f32.mxu1 %vm71_vm0, %v9544_v12  ;;  %17074 = vmatprep.mubr.msk.f32.mxu0 %vm71_vm0, %v20790_v61  ;;  %v21219_v20 = vld [vmem:[#allocation2 + $0xd1] sm:$0xff] }
 0x46e   :  { %v7410_v10 = vpop.f32.mrf.mxu1  ;;  %v7987_v36 = vpop.f32.mrf.mxu0  ;;  %17268 = vmatprep.subr.mxu0 %v11731_v53  ;;  %17366 = vmatprep.subr.mxu1 %v21200_v7 }
 0x46f   :  { %v21211_v43 = vadd.f32 %v7987_v36, %v7410_v10  ;;  %17269 = vmatpush3.msra.mxu0 %v11731_v53  ;;  %v21229_v10 = vld [vmem:[#allocation2 + $0xe1] sm:$0xff] }
 0x470   :  { %v16604_v59 = vpop.f32.mrf.mxu1  ;;  %v16708_v46 = vpop.f32.mrf.mxu0  ;;  %16971 = vmatmul.mubr.msk.f32.gmra.mxu1 %vm71_vm0, %v21213_v63  ;;  %17075 = vmatmul.mubr.msk.f32.gmra.mxu0 %vm71_vm0, %v20795_v62  ;;  %v9548_v62 = vld [vmem:[#allocation2 + $0xf1] sm:$0xff] }
 0x471   :  { %23230 = vst [vmem:[#allocation35_spill] sm:$0xff] %v21211_v43  ;;  %v21221_v61 = vadd.f32 %v16708_v46, %v16604_v59  ;;  %16973 = vmatprep.mubr.msk.f32.mxu1 %vm71_vm0, %v21219_v20  ;;  %17077 = vmatprep.mubr.msk.f32.mxu0 %vm71_vm0, %v20800_v50 }
 0x472   :  { %v7420_v9 = vpop.f32.mrf.mxu1  ;;  %v7997_v53 = vpop.f32.mrf.mxu0 }
 0x473   :  { %23231 = vst [vmem:[#allocation58_spill] sm:$0xff] %v21221_v61  ;;  %v21227_v12 = vadd.f32 %v7997_v53, %v7420_v9  ;;  %v21242_v53 = vld [vmem:[#allocation2 + $0x101] sm:$0xff] }
 0x474   :  { %v16607_v36 = vpop.f32.mrf.mxu1  ;;  %v16711_v43 = vpop.f32.mrf.mxu0  ;;  %16974 = vmatmul.mubr.msk.f32.gmra.mxu1 %vm71_vm0, %v21229_v10  ;;  %17078 = vmatmul.mubr.msk.f32.gmra.mxu0 %vm71_vm0, %v20805_v38  ;;  %23234 = vst [vmem:[#allocation81_spill] sm:$0xff] %v21242_v53  ;;  %v9550_v38 = vld [vmem:[#allocation2 + $0x111] sm:$0xff] }
 0x475   :  { %23232 = vst [vmem:[#allocation57_spill] sm:$0xff] %v21227_v12  ;;  %v21235_v59 = vadd.f32 %v16711_v43, %v16607_v36  ;;  %16976 = vmatprep.mubr.msk.f32.mxu1 %vm71_vm0, %v9548_v62  ;;  %17080 = vmatprep.mubr.msk.f32.mxu0 %vm71_vm0, %v20810_v49 }
 0x476   :  { %v7430_v50 = vpop.f32.mrf.mxu1  ;;  %v8007_v46 = vpop.f32.mrf.mxu0 }
 0x477   :  { %v21240_v9 = vadd.f32 %v8007_v46, %v7430_v50  ;;  %v21255_v50 = vld [vmem:[#allocation2 + $0x121] sm:$0xff] }
 0x478   :  { %v16610_v12 = vpop.f32.mrf.mxu1  ;;  %v16714_v61 = vpop.f32.mrf.mxu0  ;;  %16977 = vmatmul.mubr.msk.f32.gmra.mxu1 %vm71_vm0, %v21242_v53  ;;  %17081 = vmatmul.mubr.msk.f32.gmra.mxu0 %vm71_vm0, %v20815_v18  ;;  %v10261_v46 = vld [vmem:[#allocation2 + $0x122] sm:$0xff]  ;;  %v9552_v18 = vld [vmem:[#allocation2 + $0x151] sm:$0xff] }
 0x479   :  { %23233 = vst [vmem:[#allocation34_spill] sm:$0xff] %v21240_v9  ;;  %v21248_v43 = vadd.f32 %v16714_v61, %v16610_v12  ;;  %16979 = vmatprep.mubr.msk.f32.mxu1 %vm71_vm0, %v9550_v38  ;;  %17083 = vmatprep.mubr.msk.f32.mxu0 %vm71_vm0, %v20820_v34 }
 0x47a   :  { %v7440_v49 = vpop.f32.mrf.mxu1  ;;  %v8017_v36 = vpop.f32.mrf.mxu0 }
 0x47b   :  { %v21253_v62 = vadd.f32 %v8017_v36, %v7440_v49  ;;  %v21267_v49 = vld [vmem:[#allocation2 + $0x161] sm:$0xff] }
 0x47c   :  { %v16613_v9 = vpop.f32.mrf.mxu1  ;;  %v16717_v53 = vpop.f32.mrf.mxu0  ;;  %16980 = vmatmul.mubr.msk.f32.gmra.mxu1 %vm71_vm0, %v21255_v50  ;;  %17084 = vmatmul.mubr.msk.f32.gmra.mxu0 %vm71_vm0, %v10261_v46 }
 0x47d   :  { %23235 = vst [vmem:[#allocation60_spill] sm:$0xff] %v21253_v62  ;;  %v21260_v61 = vadd.f32 %v16717_v53, %v16613_v9  ;;  %16982 = vmatprep.mubr.msk.f32.mxu1 %vm71_vm0, %v9552_v18  ;;  %17086 = vmatprep.mubr.msk.f32.mxu0 %vm71_vm0, %v20827_v2  ;;  %v9554_v9 = vld [vmem:[#allocation2 + $0x171] sm:$0xff] }
 0x47e   :  { %v7450_v34 = vpop.f32.mrf.mxu1  ;;  %v8027_v12 = vpop.f32.mrf.mxu0 }
 0x47f   :  { %v21265_v38 = vadd.f32 %v8027_v12, %v7450_v34  ;;  %v9555_v34 = vld [vmem:[#allocation2 + $0x181] sm:$0xff] }
 0x480   :  { %v16616_v36 = vpop.f32.mrf.mxu1  ;;  %v16720_v62 = vpop.f32.mrf.mxu0  ;;  %16983 = vmatmul.mubr.msk.f32.gmra.mxu1 %vm71_vm0, %v21267_v49  ;;  %17087 = vmatmul.mubr.msk.f32.gmra.mxu0 %vm71_vm0, %v20832_v29  ;;  %v9556_v29 = vld [vmem:[#allocation2 + $0x191] sm:$0xff] }
 0x481   :  { %23236 = vst [vmem:[#allocation59_spill] sm:$0xff] %v21265_v38  ;;  %v21273_v53 = vadd.f32 %v16720_v62, %v16616_v36  ;;  %16985 = vmatprep.mubr.msk.f32.mxu1 %vm71_vm0, %v9554_v9  ;;  %17089 = vmatprep.mubr.msk.f32.mxu0 %vm71_vm0, %v20837_v33 }
 0x482   :  { %v7460_v2 = vpop.f32.mrf.mxu1  ;;  %v8037_v46 = vpop.f32.mrf.mxu0 }
 0x483   :  { %v21278_v18 = vadd.f32 %v8037_v46, %v7460_v2  ;;  %v9557_v2 = vld [vmem:[#allocation2 + $0x1a1] sm:$0xff] }
 0x484   :  { %v16619_v12 = vpop.f32.mrf.mxu1  ;;  %v16723_v38 = vpop.f32.mrf.mxu0  ;;  %16986 = vmatmul.mubr.msk.f32.gmra.mxu1 %vm71_vm0, %v9555_v34  ;;  %17090 = vmatmul.mubr.msk.f32.gmra.mxu0 %vm71_vm0, %v20842_v31  ;;  %v9558_v31 = vld [vmem:[#allocation2 + $0x1b1] sm:$0xff] }
 0x485   :  { %23237 = vst [vmem:[#allocation36_spill] sm:$0xff] %v21278_v18  ;;  %v21283_v62 = vadd.f32 %v16723_v38, %v16619_v12  ;;  %16988 = vmatprep.mubr.msk.f32.mxu1 %vm71_vm0, %v9556_v29  ;;  %17092 = vmatprep.mubr.msk.f32.mxu0 %vm71_vm0, %v20847_v56  ;;  %v9559_v29 = vld [vmem:[#allocation2 + $0x1c1] sm:$0xff] }
 0x486   :  { %v7470_v33 = vpop.f32.mrf.mxu1  ;;  %v8047_v36 = vpop.f32.mrf.mxu0 }
 0x487   :  { %v21288_v9 = vadd.f32 %v8047_v36, %v7470_v33  ;;  %v10269_v33 = vld [vmem:[#allocation2 + $0x1c2] sm:$0xff] }
 0x488   :  { %v16622_v46 = vpop.f32.mrf.mxu1  ;;  %v16726_v18 = vpop.f32.mrf.mxu0  ;;  %16989 = vmatmul.mubr.msk.f32.gmra.mxu1 %vm71_vm0, %v9557_v2  ;;  %17093 = vmatmul.mubr.msk.f32.gmra.mxu0 %vm71_vm0, %v20852_v16  ;;  %v9560_v16 = vld [vmem:[#allocation2 + $0x1f1] sm:$0xff] }
 0x489   :  { %23238 = vst [vmem:[#allocation83_spill] sm:$0xff] %v21288_v9  ;;  %v21293_v38 = vadd.f32 %v16726_v18, %v16622_v46  ;;  %16991 = vmatprep.mubr.msk.f32.mxu1 %vm71_vm0, %v9558_v31  ;;  %17095 = vmatprep.mubr.msk.f32.mxu0 %vm71_vm0, %v20857_v13  ;;  %v9561_v31 = vld [vmem:[#allocation2 + $0x201] sm:$0xff] }
 0x48a   :  { %v7480_v56 = vpop.f32.mrf.mxu1  ;;  %v8057_v34 = vpop.f32.mrf.mxu0 }
 0x48b   :  { %v21298_v12 = vadd.f32 %v8057_v34, %v7480_v56 }
 0x48c   :  { %v16625_v36 = vpop.f32.mrf.mxu1  ;;  %v16729_v9 = vpop.f32.mrf.mxu0  ;;  %16992 = vmatmul.mubr.msk.f32.gmra.mxu1 %vm71_vm0, %v9559_v29  ;;  %17096 = vmatmul.mubr.msk.f32.gmra.mxu0 %vm71_vm0, %v10269_v33  ;;  %v9562_v29 = vld [vmem:[#allocation2 + $0x211] sm:$0xff] }
 0x48d   :  { %v21302_v18 = vadd.f32 %v16729_v9, %v16625_v36  ;;  %16994 = vmatprep.mubr.msk.f32.mxu1 %vm71_vm0, %v9560_v16  ;;  %17098 = vmatprep.mubr.msk.f32.mxu0 %vm71_vm0, %v20865_v37  ;;  %v9563_v16 = vld [vmem:[#allocation2 + $0x221] sm:$0xff] }
 0x48e   :  { %v7490_v13 = vpop.f32.mrf.mxu1  ;;  %v8067_v2 = vpop.f32.mrf.mxu0 }
 0x48f   :  { %v21307_v46 = vadd.f32 %v8067_v2, %v7490_v13 }
 0x490   :  { %v16628_v56 = vpop.f32.mrf.mxu1  ;;  %v16732_v34 = vpop.f32.mrf.mxu0  ;;  %16995 = vmatmul.mubr.msk.f32.gmra.mxu1 %vm71_vm0, %v9561_v31  ;;  %17099 = vmatmul.mubr.msk.f32.gmra.mxu0 %vm71_vm0, %v20871_v24  ;;  %v9564_v24 = vld [vmem:[#allocation2 + $0x231] sm:$0xff] }
 0x491   :  { %v21312_v9 = vadd.f32 %v16732_v34, %v16628_v56  ;;  %16997 = vmatprep.mubr.msk.f32.mxu1 %vm71_vm0, %v9562_v29  ;;  %17101 = vmatprep.mubr.msk.f32.mxu0 %vm71_vm0, %v20877_v54  ;;  %v9565_v29 = vld [vmem:[#allocation2 + $0x241] sm:$0xff] }
 0x492   :  { %v7500_v37 = vpop.f32.mrf.mxu1  ;;  %v8077_v33 = vpop.f32.mrf.mxu0 }
 0x493   :  { %23239 = vst [vmem:[#allocation62_spill] sm:$0xff] %v21312_v9  ;;  %v21317_v36 = vadd.f32 %v8077_v33, %v7500_v37 }
 0x494   :  { %v16631_v13 = vpop.f32.mrf.mxu1  ;;  %v16735_v2 = vpop.f32.mrf.mxu0  ;;  %16998 = vmatmul.mubr.msk.f32.gmra.mxu1 %vm71_vm0, %v9563_v16  ;;  %17102 = vmatmul.mubr.msk.f32.gmra.mxu0 %vm71_vm0, %v20883_v11  ;;  %v23243_v16 = vld [vmem:[#allocation38_spill] sm:$0xff] }
 0x495   :  { %23240 = vst [vmem:[#allocation61_spill] sm:$0xff] %v21317_v36  ;;  %v21322_v31 = vadd.f32 %v16735_v2, %v16631_v13  ;;  %17000 = vmatprep.mubr.msk.f32.mxu1 %vm71_vm0, %v9564_v24  ;;  %17104 = vmatprep.mubr.msk.f32.mxu0 %vm71_vm0, %v20889_v32  ;;  %v9566_v11 = vld [vmem:[#allocation2 + $0x251] sm:$0xff]  ;;  %v23245_v2 = vld [vmem:[#allocation37_spill] sm:$0xff] }
 0x496   :  { %v7510_v54 = vpop.f32.mrf.mxu1  ;;  %v8087_v56 = vpop.f32.mrf.mxu0 }
 0x497   :  { %23241 = vst [vmem:[#allocation82_spill] sm:$0xff] %v21322_v31  ;;  %v21327_v34 = vadd.f32 %v8087_v56, %v7510_v54  ;;  %v9567_v56 = vld [vmem:[#allocation2 + $0x261] sm:$0xff] }
 0x498   :  { %v16634_v37 = vpop.f32.mrf.mxu1  ;;  %v16738_v33 = vpop.f32.mrf.mxu0  ;;  %17001 = vmatmul.mubr.msk.f32.gmra.mxu1 %vm71_vm0, %v9565_v29  ;;  %17105 = vmatmul.mubr.msk.f32.gmra.mxu0 %vm71_vm0, %v23243_v16  ;;  %v9568_v29 = vld [vmem:[#allocation2 + $0x291] sm:$0xff] }
 0x499   :  { %23242 = vst [vmem:[#allocation85_spill] sm:$0xff] %v21327_v34  ;;  %v21332_v13 = vadd.f32 %v16738_v33, %v16634_v37  ;;  %17003 = vmatprep.mubr.msk.f32.mxu1 %vm71_vm0, %v9566_v11  ;;  %17107 = vmatprep.mubr.msk.f32.mxu0 %vm71_vm0, %v23245_v2  ;;  %v10277_v34 = vld [vmem:[#allocation2 + $0x262] sm:$0xff] }
 0x49a   :  { %v7520_v32 = vpop.f32.mrf.mxu1  ;;  %v8097_v24 = vpop.f32.mrf.mxu0  ;;  %v23248_v33 = vld [vmem:[#allocation80_spill] sm:$0xff] }
 0x49b   :  { %23244 = vst [vmem:[#allocation64_spill] sm:$0xff] %v21332_v13  ;;  %v21337_v54 = vadd.f32 %v8097_v24, %v7520_v32  ;;  %v9569_v32 = vld [vmem:[#allocation2 + $0x2a1] sm:$0xff] }
 0x49c   :  { %v16637_v31 = vpop.f32.mrf.mxu1  ;;  %v16741_v36 = vpop.f32.mrf.mxu0  ;;  %17004 = vmatmul.mubr.msk.f32.gmra.mxu1 %vm71_vm0, %v9567_v56  ;;  %17108 = vmatmul.mubr.msk.f32.gmra.mxu0 %vm71_vm0, %v10277_v34  ;;  %v9570_v34 = vld [vmem:[#allocation2 + $0x2b1] sm:$0xff] }
 0x49d   :  { %23246 = vst [vmem:[#allocation63_spill] sm:$0xff] %v21337_v54  ;;  %v21341_v37 = vadd.f32 %v16741_v36, %v16637_v31  ;;  %17006 = vmatprep.mubr.msk.f32.mxu1 %vm71_vm0, %v9568_v29  ;;  %17110 = vmatprep.mubr.msk.f32.mxu0 %vm71_vm0, %v23248_v33  ;;  %v23250_v31 = vld [vmem:[#allocation40_spill] sm:$0xff] }
 0x49e   :  { %v7530_v16 = vpop.f32.mrf.mxu1  ;;  %v8107_v11 = vpop.f32.mrf.mxu0 }
 0x49f   :  { %23247 = vst [vmem:[#allocation84_spill] sm:$0xff] %v21341_v37  ;;  %v21346_v2 = vadd.f32 %v8107_v11, %v7530_v16  ;;  %v23252_v16 = vld [vmem:[#allocation17_spill] sm:$0xff] }
 0x4a0   :  { %v16752_v24 = vpop.f32.mrf.mxu1  ;;  %v16856_v54 = vpop.f32.mrf.mxu0  ;;  %17007 = vmatmul.mubr.msk.f32.gmra.mxu1 %vm71_vm0, %v9569_v32  ;;  %17111 = vmatmul.mubr.msk.f32.gmra.mxu0 %vm71_vm0, %v20915_v8  ;;  %v9572_v8 = vld [vmem:[#allocation2 + $0x2d1] sm:$0xff] }
 0x4a1   :  { %23249 = vst [vmem:[#allocation87_spill] sm:$0xff] %v21346_v2  ;;  %v8763_v36 = vadd.f32 %v16752_v24, %v20917_v28  ;;  %17009 = vmatprep.mubr.msk.f32.mxu1 %vm71_vm0, %v9570_v34  ;;  %17113 = vmatprep.mubr.msk.f32.mxu0 %vm71_vm0, %v23250_v31  ;;  %v9571_v2 = vld [vmem:[#allocation2 + $0x2c1] sm:$0xff]  ;;  %v23253_v24 = vld [vmem:[#allocation39_spill] sm:$0xff] }
 0x4a2   :  { %v8443_v56 = vpop.f32.mrf.mxu1  ;;  %v9153_v29 = vpop.f32.mrf.mxu0  ;;  %v23254_v31 = vld [vmem:[#allocation19_spill] sm:$0xff] }
 0x4a3   :  { %v21355_v33 = vadd.f32 %v16856_v54, %v8763_v36  ;;  %v8762_v11 = vadd.f32 %v8443_v56, %v23252_v16  ;;  %v23255_v16 = vld [vmem:[#allocation16_spill] sm:$0xff] }
 0x4a4   :  { %v16755_v37 = vpop.f32.mrf.mxu1  ;;  %v16859_v32 = vpop.f32.mrf.mxu0  ;;  %17010 = vmatmul.mubr.msk.f32.gmra.mxu1 %vm71_vm0, %v9571_v2  ;;  %17114 = vmatmul.mubr.msk.f32.gmra.mxu0 %vm71_vm0, %v20931_v1  ;;  %v9573_v2 = vld [vmem:[#allocation2 + $0x2e1] sm:$0xff]  ;;  %v9574_v1 = vld [vmem:[#allocation2 + $0x2f1] sm:$0xff] }
 0x4a5   :  { %23251 = vst [vmem:[#allocation66_spill] sm:$0xff] %v21355_v33  ;;  %v21361_v28 = vadd.f32 %v9153_v29, %v8762_v11  ;;  %v8765_v34 = vadd.f32 %v16755_v37, %v23253_v24  ;;  %17012 = vmatprep.mubr.msk.f32.mxu1 %vm71_vm0, %v9572_v8  ;;  %17116 = vmatprep.mubr.msk.f32.mxu0 %vm71_vm0, %v23254_v31  ;;  %v23256_v29 = vld [vmem:[#allocation42_spill] sm:$0xff] }
 0x4a6   :  { %v8453_v54 = vpop.f32.mrf.mxu1  ;;  %v9163_v36 = vpop.f32.mrf.mxu0 }
 0x4a7   :  { %v21367_v56 = vadd.f32 %v16859_v32, %v8765_v34  ;;  %v8764_v33 = vadd.f32 %v8453_v54, %v23255_v16  ;;  %v23257_v34 = vld [vmem:[#allocation41_spill] sm:$0xff] }
 0x4a8   :  { %v16758_v13 = vpop.f32.mrf.mxu1  ;;  %v16862_v9 = vpop.f32.mrf.mxu0  ;;  %17013 = vmatmul.mubr.msk.f32.gmra.mxu1 %vm71_vm0, %v9573_v2  ;;  %17117 = vmatmul.mubr.msk.f32.gmra.mxu0 %vm71_vm0, %v20947_v30  ;;  %v9575_v54 = vld [vmem:[#allocation2 + $0x301] sm:$0xff] }
 0x4a9   :  { %v21373_v37 = vadd.f32 %v9163_v36, %v8764_v33  ;;  %v8767_v11 = vadd.f32 %v16758_v13, %v23256_v29  ;;  %17015 = vmatprep.mubr.msk.f32.mxu1 %vm71_vm0, %v9574_v1  ;;  %17119 = vmatprep.mubr.msk.f32.mxu0 %vm71_vm0, %v20957_v44  ;;  %v10285_v16 = vld [vmem:[#allocation2 + $0x302] sm:$0xff]  ;;  %v9576_v13 = vld [vmem:[#allocation2 + $0x331] sm:$0xff] }
 0x4aa   :  { %v8463_v32 = vpop.f32.mrf.mxu1  ;;  %v9173_v8 = vpop.f32.mrf.mxu0  ;;  %v23258_v29 = vld [vmem:[#allocation18_spill] sm:$0xff] }
 0x4ab   :  { %v21379_v24 = vadd.f32 %v16862_v9, %v8767_v11  ;;  %v8766_v31 = vadd.f32 %v8463_v32, %v23257_v34  ;;  %v9577_v32 = vld [vmem:[#allocation2 + $0x341] sm:$0xff] }
 0x4ac   :  { %v16761_v2 = vpop.f32.mrf.mxu1  ;;  %v16865_v30 = vpop.f32.mrf.mxu0  ;;  %17016 = vmatmul.mubr.msk.f32.gmra.mxu1 %vm71_vm0, %v9575_v54  ;;  %17120 = vmatmul.mubr.msk.f32.gmra.mxu0 %vm71_vm0, %v10285_v16 }
 0x4ad   :  { %v21384_v33 = vadd.f32 %v9173_v8, %v8766_v31  ;;  %v8769_v36 = vadd.f32 %v16761_v2, %v20962_v22  ;;  %17018 = vmatprep.mubr.msk.f32.mxu1 %vm71_vm0, %v9576_v13  ;;  %17122 = vmatprep.mubr.msk.f32.mxu0 %vm71_vm0, %v20969_v40  ;;  %v9578_v22 = vld [vmem:[#allocation2 + $0x351] sm:$0xff]  ;;  %v23259_v40 = vld [vmem:[#allocation44_spill] sm:$0xff]  ;;  %v23261_v13 = vld [vmem:[#allocation21_spill] sm:$0xff] }
 0x4ae   :  { %v8473_v44 = vpop.f32.mrf.mxu1  ;;  %v9183_v9 = vpop.f32.mrf.mxu0 }
 0x4af   :  { %v21390_v1 = vadd.f32 %v16865_v30, %v8769_v36  ;;  %v8768_v11 = vadd.f32 %v8473_v44, %v23258_v29  ;;  %v9579_v44 = vld [vmem:[#allocation2 + $0x361] sm:$0xff] }
 0x4b0   :  { %v16764_v34 = vpop.f32.mrf.mxu1  ;;  %v16868_v54 = vpop.f32.mrf.mxu0  ;;  %17019 = vmatmul.mubr.msk.f32.gmra.mxu1 %vm71_vm0, %v9577_v32  ;;  %17123 = vmatmul.mubr.msk.f32.gmra.mxu0 %vm71_vm0, %v20975_v4  ;;  %v9580_v4 = vld [vmem:[#allocation2 + $0x371] sm:$0xff] }
 0x4b1   :  { %v21396_v8 = vadd.f32 %v9183_v9, %v8768_v11  ;;  %v8771_v31 = vadd.f32 %v16764_v34, %v20977_v27  ;;  %17021 = vmatprep.mubr.msk.f32.mxu1 %vm71_vm0, %v9578_v22  ;;  %17125 = vmatprep.mubr.msk.f32.mxu0 %vm71_vm0, %v23259_v40  ;;  %v23262_v9 = vld [vmem:[#allocation43_spill] sm:$0xff]  ;;  %v23264_v40 = vld [vmem:[#allocation20_spill] sm:$0xff] }
 0x4b2   :  { %v8483_v16 = vpop.f32.mrf.mxu1  ;;  %v9193_v2 = vpop.f32.mrf.mxu0  ;;  %v23263_v34 = vld [vmem:[#allocation23_spill] sm:$0xff] }
 0x4b3   :  { %v21402_v30 = vadd.f32 %v16868_v54, %v8771_v31  ;;  %v8770_v36 = vadd.f32 %v8483_v16, %v23261_v13  ;;  %v9581_v13 = vld [vmem:[#allocation2 + $0x381] sm:$0xff] }
 0x4b4   :  { %v16767_v29 = vpop.f32.mrf.mxu1  ;;  %v16871_v32 = vpop.f32.mrf.mxu0  ;;  %17022 = vmatmul.mubr.msk.f32.gmra.mxu1 %vm71_vm0, %v9579_v44  ;;  %17126 = vmatmul.mubr.msk.f32.gmra.mxu0 %vm71_vm0, %v20991_v42  ;;  %v9582_v42 = vld [vmem:[#allocation2 + $0x391] sm:$0xff] }
 0x4b5   :  { %23260 = vst [vmem:[#allocation65_spill] sm:$0xff] %v21402_v30  ;;  %v21408_v27 = vadd.f32 %v9193_v2, %v8770_v36  ;;  %v8773_v11 = vadd.f32 %v16767_v29, %v23262_v9  ;;  %17024 = vmatprep.mubr.msk.f32.mxu1 %vm71_vm0, %v9580_v4  ;;  %17128 = vmatprep.mubr.msk.f32.mxu0 %vm71_vm0, %v23263_v34  ;;  %v23265_v36 = vld [vmem:[#allocation46_spill] sm:$0xff] }
 0x4b6   :  { %v8493_v54 = vpop.f32.mrf.mxu1  ;;  %v9203_v22 = vpop.f32.mrf.mxu0 }
 0x4b7   :  { %v21414_v31 = vadd.f32 %v16871_v32, %v8773_v11  ;;  %v8772_v16 = vadd.f32 %v8493_v54, %v23264_v40  ;;  %v23266_v11 = vld [vmem:[#allocation45_spill] sm:$0xff] }
 0x4b8   :  { %v16770_v44 = vpop.f32.mrf.mxu1  ;;  %v16874_v30 = vpop.f32.mrf.mxu0  ;;  %17025 = vmatmul.mubr.msk.f32.gmra.mxu1 %vm71_vm0, %v9581_v13  ;;  %17129 = vmatmul.mubr.msk.f32.gmra.mxu0 %vm71_vm0, %v21007_v26  ;;  %v9583_v54 = vld [vmem:[#allocation2 + $0x3a1] sm:$0xff] }
 0x4b9   :  { %v21420_v2 = vadd.f32 %v9203_v22, %v8772_v16  ;;  %v8775_v29 = vadd.f32 %v16770_v44, %v23265_v36  ;;  %17027 = vmatprep.mubr.msk.f32.mxu1 %vm71_vm0, %v9582_v42  ;;  %17131 = vmatprep.mubr.msk.f32.mxu0 %vm71_vm0, %v21017_v52  ;;  %v10293_v40 = vld [vmem:[#allocation2 + $0x3a2] sm:$0xff]  ;;  %v9584_v22 = vld [vmem:[#allocation2 + $0x3d1] sm:$0xff] }
 0x4ba   :  { %v8503_v32 = vpop.f32.mrf.mxu1  ;;  %v9213_v4 = vpop.f32.mrf.mxu0  ;;  %v23267_v36 = vld [vmem:[#allocation22_spill] sm:$0xff] }
 0x4bb   :  { %v21426_v9 = vadd.f32 %v16874_v30, %v8775_v29  ;;  %v8774_v34 = vadd.f32 %v8503_v32, %v23266_v11  ;;  %v9585_v32 = vld [vmem:[#allocation2 + $0x3e1] sm:$0xff] }
 0x4bc   :  { %v16773_v13 = vpop.f32.mrf.mxu1  ;;  %v16877_v26 = vpop.f32.mrf.mxu0  ;;  %17028 = vmatmul.mubr.msk.f32.gmra.mxu1 %vm71_vm0, %v9583_v54  ;;  %17132 = vmatmul.mubr.msk.f32.gmra.mxu0 %vm71_vm0, %v10293_v40 }
 0x4bd   :  { %v21431_v16 = vadd.f32 %v9213_v4, %v8774_v34  ;;  %v8777_v44 = vadd.f32 %v16773_v13, %v21022_v21  ;;  %17030 = vmatprep.mubr.msk.f32.mxu1 %vm71_vm0, %v9584_v22  ;;  %17134 = vmatprep.mubr.msk.f32.mxu0 %vm71_vm0, %v21029_v35  ;;  %v9586_v21 = vld [vmem:[#allocation2 + $0x3f1] sm:$0xff]  ;;  %v23268_v35 = vld [vmem:[#allocation48_spill] sm:$0xff]  ;;  %v23270_v22 = vld [vmem:[#allocation25_spill] sm:$0xff] }
 0x4be   :  { %v8513_v52 = vpop.f32.mrf.mxu1  ;;  %v9223_v30 = vpop.f32.mrf.mxu0 }
 0x4bf   :  { %v21437_v42 = vadd.f32 %v16877_v26, %v8777_v44  ;;  %v8776_v29 = vadd.f32 %v8513_v52, %v23267_v36  ;;  %v9587_v52 = vld [vmem:[#allocation2 + $0x401] sm:$0xff] }
 0x4c0   :  { %v16776_v11 = vpop.f32.mrf.mxu1  ;;  %v16880_v54 = vpop.f32.mrf.mxu0  ;;  %17031 = vmatmul.mubr.msk.f32.gmra.mxu1 %vm71_vm0, %v9585_v32  ;;  %17135 = vmatmul.mubr.msk.f32.gmra.mxu0 %vm71_vm0, %v21035_v39  ;;  %v9588_v39 = vld [vmem:[#allocation2 + $0x411] sm:$0xff] }
 0x4c1   :  { %v21443_v4 = vadd.f32 %v9223_v30, %v8776_v29  ;;  %v8779_v34 = vadd.f32 %v16776_v11, %v21037_v3  ;;  %17033 = vmatprep.mubr.msk.f32.mxu1 %vm71_vm0, %v9586_v21  ;;  %17137 = vmatprep.mubr.msk.f32.mxu0 %vm71_vm0, %v23268_v35  ;;  %v23271_v30 = vld [vmem:[#allocation47_spill] sm:$0xff]  ;;  %v23273_v35 = vld [vmem:[#allocation24_spill] sm:$0xff] }
 0x4c2   :  { %v8523_v40 = vpop.f32.mrf.mxu1  ;;  %v9233_v13 = vpop.f32.mrf.mxu0  ;;  %v23272_v11 = vld [vmem:[#allocation27_spill] sm:$0xff] }
 0x4c3   :  { %v21449_v26 = vadd.f32 %v16880_v54, %v8779_v34  ;;  %v8778_v44 = vadd.f32 %v8523_v40, %v23270_v22  ;;  %v9589_v22 = vld [vmem:[#allocation2 + $0x421] sm:$0xff] }
 0x4c4   :  { %v16779_v36 = vpop.f32.mrf.mxu1  ;;  %v16883_v32 = vpop.f32.mrf.mxu0  ;;  %17034 = vmatmul.mubr.msk.f32.gmra.mxu1 %vm71_vm0, %v9587_v52  ;;  %17138 = vmatmul.mubr.msk.f32.gmra.mxu0 %vm71_vm0, %v21051_v17  ;;  %v9590_v17 = vld [vmem:[#allocation2 + $0x431] sm:$0xff] }
 0x4c5   :  { %23269 = vst [vmem:[#allocation86_spill] sm:$0xff] %v21449_v26  ;;  %v21455_v3 = vadd.f32 %v9233_v13, %v8778_v44  ;;  %v8781_v29 = vadd.f32 %v16779_v36, %v23271_v30  ;;  %17036 = vmatprep.mubr.msk.f32.mxu1 %vm71_vm0, %v9588_v39  ;;  %17140 = vmatprep.mubr.msk.f32.mxu0 %vm71_vm0, %v23272_v11  ;;  %v23274_v44 = vld [vmem:[#allocation50_spill] sm:$0xff] }
 0x4c6   :  { %v8533_v54 = vpop.f32.mrf.mxu1  ;;  %v9243_v21 = vpop.f32.mrf.mxu0 }
 0x4c7   :  { %v21461_v34 = vadd.f32 %v16883_v32, %v8781_v29  ;;  %v8780_v40 = vadd.f32 %v8533_v54, %v23273_v35  ;;  %v23275_v29 = vld [vmem:[#allocation49_spill] sm:$0xff] }
 0x4c8   :  { %v16782_v52 = vpop.f32.mrf.mxu1  ;;  %v16886_v26 = vpop.f32.mrf.mxu0  ;;  %17037 = vmatmul.mubr.msk.f32.gmra.mxu1 %vm71_vm0, %v9589_v22  ;;  %17141 = vmatmul.mubr.msk.f32.gmra.mxu0 %vm71_vm0, %v21067_v60  ;;  %v9591_v54 = vld [vmem:[#allocation2 + $0x441] sm:$0xff] }
 0x4c9   :  { %v21467_v13 = vadd.f32 %v9243_v21, %v8780_v40  ;;  %v8783_v36 = vadd.f32 %v16782_v52, %v23274_v44  ;;  %17039 = vmatprep.mubr.msk.f32.mxu1 %vm71_vm0, %v9590_v17  ;;  %17143 = vmatprep.mubr.msk.f32.mxu0 %vm71_vm0, %v21077_v19  ;;  %v10301_v35 = vld [vmem:[#allocation2 + $0x442] sm:$0xff]  ;;  %v9592_v21 = vld [vmem:[#allocation2 + $0x471] sm:$0xff] }
 0x4ca   :  { %v8543_v32 = vpop.f32.mrf.mxu1  ;;  %v9253_v39 = vpop.f32.mrf.mxu0  ;;  %v23276_v44 = vld [vmem:[#allocation26_spill] sm:$0xff] }
 0x4cb   :  { %v21473_v30 = vadd.f32 %v16886_v26, %v8783_v36  ;;  %v8782_v11 = vadd.f32 %v8543_v32, %v23275_v29  ;;  %v9593_v32 = vld [vmem:[#allocation2 + $0x481] sm:$0xff] }
 0x4cc   :  { %v16785_v22 = vpop.f32.mrf.mxu1  ;;  %v16889_v60 = vpop.f32.mrf.mxu0  ;;  %17040 = vmatmul.mubr.msk.f32.gmra.mxu1 %vm71_vm0, %v9591_v54  ;;  %17144 = vmatmul.mubr.msk.f32.gmra.mxu0 %vm71_vm0, %v10301_v35 }
 0x4cd   :  { %v21478_v40 = vadd.f32 %v9253_v39, %v8782_v11  ;;  %v8785_v52 = vadd.f32 %v16785_v22, %v21082_v5  ;;  %17042 = vmatprep.mubr.msk.f32.mxu1 %vm71_vm0, %v9592_v21  ;;  %17146 = vmatprep.mubr.msk.f32.mxu0 %vm71_vm0, %v21089_v14  ;;  %v9594_v5 = vld [vmem:[#allocation2 + $0x491] sm:$0xff]  ;;  %v23277_v14 = vld [vmem:[#allocation52_spill] sm:$0xff]  ;;  %v23279_v21 = vld [vmem:[#allocation29_spill] sm:$0xff] }
 0x4ce   :  { %v8553_v19 = vpop.f32.mrf.mxu1  ;;  %v9263_v26 = vpop.f32.mrf.mxu0 }
 0x4cf   :  { %v21484_v17 = vadd.f32 %v16889_v60, %v8785_v52  ;;  %v8784_v36 = vadd.f32 %v8553_v19, %v23276_v44  ;;  %v9595_v19 = vld [vmem:[#allocation2 + $0x4a1] sm:$0xff] }
 0x4d0   :  { %v16788_v29 = vpop.f32.mrf.mxu1  ;;  %v16892_v54 = vpop.f32.mrf.mxu0  ;;  %17043 = vmatmul.mubr.msk.f32.gmra.mxu1 %vm71_vm0, %v9593_v32  ;;  %17147 = vmatmul.mubr.msk.f32.gmra.mxu0 %vm71_vm0, %v21095_v51  ;;  %v9596_v51 = vld [vmem:[#allocation2 + $0x4b1] sm:$0xff] }
 0x4d1   :  { %v21490_v39 = vadd.f32 %v9263_v26, %v8784_v36  ;;  %v8787_v11 = vadd.f32 %v16788_v29, %v21097_v55  ;;  %17045 = vmatprep.mubr.msk.f32.mxu1 %vm71_vm0, %v9594_v5  ;;  %17149 = vmatprep.mubr.msk.f32.mxu0 %vm71_vm0, %v23277_v14  ;;  %v23281_v26 = vld [vmem:[#allocation51_spill] sm:$0xff]  ;;  %v23282_v29 = vld [vmem:[#allocation101_spill] sm:$0xff]  ;;  %v23284_v14 = vld [vmem:[#allocation28_spill] sm:$0xff] }
 0x4d2   :  { %v8563_v35 = vpop.f32.mrf.mxu1  ;;  %v9273_v22 = vpop.f32.mrf.mxu0 }
 0x4d3   :  { %v21496_v60 = vadd.f32 %v16892_v54, %v8787_v11  ;;  %v8786_v52 = vadd.f32 %v8563_v35, %v23279_v21  ;;  %v9597_v21 = vld [vmem:[#allocation2 + $0x4c1] sm:$0xff] }
 0x4d4   :  { %v16791_v44 = vpop.f32.mrf.mxu1  ;;  %v16895_v32 = vpop.f32.mrf.mxu0  ;;  %17046 = vmatmul.mubr.msk.f32.gmra.mxu1 %vm71_vm0, %v9595_v19  ;;  %17150 = vmatmul.mubr.msk.f32.gmra.mxu0 %vm71_vm0, %v21111_v15  ;;  %v23285_v15 = vld [vmem:[#allocation31_spill] sm:$0xff] }
 0x4d5   :  { %23278 = vst [vmem:[#allocation89_spill] sm:$0xff] %v21496_v60  ;;  %v21502_v55 = vadd.f32 %v9273_v22, %v8786_v52  ;;  %v8789_v36 = vadd.f32 %v16791_v44, %v23281_v26  ;;  %17048 = vmatprep.mubr.msk.f32.mxu1 %vm71_vm0, %v9596_v51  ;;  %17152 = vmatprep.mubr.msk.f32.mxu0 %vm71_vm0, %v23282_v29  ;;  %v9598_v22 = vld [vmem:[#allocation2 + $0x4d1] sm:$0xff]  ;;  %v23286_v44 = vld [vmem:[#allocation104_spill] sm:$0xff]  ;;  %v23287_v26 = vld [vmem:[#allocation53_spill] sm:$0xff] }
 0x4d6   :  { %v8573_v54 = vpop.f32.mrf.mxu1  ;;  %v9283_v5 = vpop.f32.mrf.mxu0 }
 0x4d7   :  { %23280 = vst [vmem:[#allocation68_spill] sm:$0xff] %v21502_v55  ;;  %v21508_v11 = vadd.f32 %v16895_v32, %v8789_v36  ;;  %v8788_v35 = vadd.f32 %v8573_v54, %v23284_v14  ;;  %v23288_v54 = vld [vmem:[#allocation54_spill] sm:$0xff] }
 0x4d8   :  { %v16794_v19 = vpop.f32.mrf.mxu1  ;;  %v16898_v60 = vpop.f32.mrf.mxu0  ;;  %17049 = vmatmul.mubr.msk.f32.gmra.mxu1 %vm71_vm0, %v9597_v21  ;;  %17153 = vmatmul.mubr.msk.f32.gmra.mxu0 %vm71_vm0, %v23285_v15  ;;  %v9599_v21 = vld [vmem:[#allocation2 + $0x4e1] sm:$0xff] }
 0x4d9   :  { %23283 = vst [vmem:[#allocation67_spill] sm:$0xff] %v21508_v11  ;;  %v21514_v52 = vadd.f32 %v9283_v5, %v8788_v35  ;;  %v8791_v51 = vadd.f32 %v16794_v19, %v23286_v44  ;;  %17051 = vmatprep.mubr.msk.f32.mxu1 %vm71_vm0, %v9598_v22  ;;  %17155 = vmatprep.mubr.msk.f32.mxu0 %vm71_vm0, %v23287_v26  ;;  %v10309_v11 = vld [vmem:[#allocation2 + $0x4e2] sm:$0xff]  ;;  %v10957_v26 = vld [vmem:[#allocation2 + $0x30] sm:$0xff] }
 0x4da   :  { %v8583_v32 = vpop.f32.mrf.mxu1  ;;  %v9293_v36 = vpop.f32.mrf.mxu0  ;;  %v10956_v5 = vld [vmem:[#allocation2 + $0x20] sm:$0xff] }
 0x4db   :  { %v21520_v29 = vadd.f32 %v16898_v60, %v8791_v51  ;;  %v8790_v14 = vadd.f32 %v8583_v32, %v23288_v54  ;;  %v12443_v32 = vld [vmem:[#allocation5 + $0x110] sm:$0xff] }
 0x4dc   :  { %v16797_v55 = vpop.f32.mrf.mxu1  ;;  %v16901_v15 = vpop.f32.mrf.mxu0  ;;  %17052 = vmatmul.mubr.msk.f32.gmra.mxu1 %vm71_vm0, %v9599_v21  ;;  %17156 = vmatmul.mubr.msk.f32.gmra.mxu0 %vm71_vm0, %v10309_v11  ;;  %v23289_v21 = vld [vmem:[#allocation30_spill] sm:$0xff] }
 0x4dd   :  { %v21525_v35 = vadd.f32 %v9293_v36, %v8790_v14  ;;  %v8793_v19 = vadd.f32 %v16797_v55, %v21142_v6  ;;  %17166 = vmatprep.mubr.msk.f32.mxu1 %vm71_vm0, %v10956_v5  ;;  %17270 = vmatprep.mubr.msk.f32.mxu0 %vm71_vm0, %v21149_v0  ;;  %v10958_v6 = vld [vmem:[#allocation2 + $0x40] sm:$0xff]  ;;  %v12442_v5 = vld [vmem:[#allocation5 + $0x108] sm:$0xff] }
 0x4de   :  { %v8593_v60 = vpop.f32.mrf.mxu1  ;;  %v9303_v22 = vpop.f32.mrf.mxu0 }
 0x4df   :  { %v21531_v44 = vadd.f32 %v16901_v15, %v8793_v19  ;;  %v8792_v51 = vadd.f32 %v8593_v60, %v21147_v41 }
 0x4e0   :  { %v16800_v54 = vpop.f32.mrf.mxu1  ;;  %v16904_v11 = vpop.f32.mrf.mxu0  ;;  %17167 = vmatmul.mubr.msk.f32.vlgmr.msra.gmra.mxu1 %vm71_vm0, %v10957_v26  ;;  %17271 = vmatmul.mubr.msk.f32.vlgmr.msra.gmra.mxu0 %vm71_vm0, %v21155_v25  ;;  %v10959_v25 = vld [vmem:[#allocation2 + $0x50] sm:$0xff] }
 0x4e1   :  { %v21537_v55 = vadd.f32 %v9303_v22, %v8792_v51  ;;  %v8795_v0 = vadd.f32 %v16800_v54, %v21157_v47  ;;  %17367 = vmatpush3.msra.mxu1 %v21200_v7  ;;  %17169 = vmatprep.mubr.msk.f32.mxu1 %vm71_vm0, %v10958_v6  ;;  %v10960_v47 = vld [vmem:[#allocation2 + $0x60] sm:$0xff]  ;;  %v23291_v54 = vld [vmem:[#allocation33_spill] sm:$0xff]  ;;  %v10961_v6 = vld [vmem:[#allocation2 + $0x70] sm:$0xff] }
 0x4e2   :  { %17273 = vmatprep.mubr.msk.f32.mxu0 %vm71_vm0, %v21166_v45  ;;  %v8603_v41 = vpop.f32.mrf.mxu1  ;;  %v9313_v36 = vpop.f32.mrf.mxu0  ;;  %17368 = vmatprep.subr.mxu1 %v12443_v32  ;;  %v23290_v45 = vld [vmem:[#allocation107_spill] sm:$0xff] }
 0x4e3   :  { %v21544_v14 = vadd.f32 %v16904_v11, %v8795_v0  ;;  %v8794_v15 = vadd.f32 %v8603_v41, %v23289_v21  ;;  %17369 = vmatpush3.msra.mxu1 %v12443_v32  ;;  %v10962_v21 = vld [vmem:[#allocation2 + $0x80] sm:$0xff] }
 0x4e4   :  { %v16803_v19 = vpop.f32.mrf.mxu1  ;;  %v16907_v60 = vpop.f32.mrf.mxu0  ;;  %17170 = vmatmul.mubr.msk.f32.gmra.mxu1 %vm71_vm0, %v10959_v25  ;;  %17274 = vmatmul.mubr.msk.f32.gmra.mxu0 %vm71_vm0, %v21172_v58  ;;  %v12441_v58 = vld [vmem:[#allocation5 + $0x100] sm:$0xff] }
 0x4e5   :  { %v21550_v7 = vadd.f32 %v9313_v36, %v8794_v15  ;;  %v8797_v22 = vadd.f32 %v16803_v19, %v23290_v45  ;;  %17172 = vmatprep.mubr.msk.f32.mxu1 %vm71_vm0, %v10960_v47  ;;  %17276 = vmatprep.mubr.msk.f32.mxu0 %vm71_vm0, %v21182_v23  ;;  %v23292_v36 = vld [vmem:[#allocation56_spill] sm:$0xff]  ;;  %v23293_v23 = vld [vmem:[#allocation55_spill] sm:$0xff]  ;;  %v10963_v19 = vld [vmem:[#allocation2 + $0x90] sm:$0xff] }
 0x4e6   :  { %v8613_v51 = vpop.f32.mrf.mxu1  ;;  %v9323_v26 = vpop.f32.mrf.mxu0  ;;  %17370 = vmatprep.subr.mxu1 %v12442_v5 }
 0x4e7   :  { %v21556_v32 = vadd.f32 %v16907_v60, %v8797_v22  ;;  %v8796_v11 = vadd.f32 %v8613_v51, %v23291_v54  ;;  %17371 = vmatpush3.msra.mxu1 %v12442_v5  ;;  %v11673_v5 = vld [vmem:[#allocation2 + $0x91] sm:$0xff]  ;;  %v23294_v22 = vld [vmem:[#allocation32_spill] sm:$0xff] }
 0x4e8   :  { %v16806_v0 = vpop.f32.mrf.mxu1  ;;  %v16910_v41 = vpop.f32.mrf.mxu0  ;;  %17173 = vmatmul.mubr.msk.f32.gmra.mxu1 %vm71_vm0, %v10961_v6  ;;  %17277 = vmatmul.mubr.msk.f32.gmra.mxu0 %vm71_vm0, %v23292_v36 }
 0x4e9   :  { %v21562_v15 = vadd.f32 %v9323_v26, %v8796_v11  ;;  %v8799_v25 = vadd.f32 %v16806_v0, %v23293_v23  ;;  %17175 = vmatprep.mubr.msk.f32.mxu1 %vm71_vm0, %v10962_v21  ;;  %17279 = vmatprep.mubr.msk.f32.mxu0 %vm71_vm0, %v21196_v57  ;;  %v10964_v11 = vld [vmem:[#allocation2 + $0xc0] sm:$0xff]  ;;  %v10965_v23 = vld [vmem:[#allocation2 + $0xd0] sm:$0xff] }
 0x4ea   :  { %v8623_v60 = vpop.f32.mrf.mxu1  ;;  %v9333_v47 = vpop.f32.mrf.mxu0  ;;  %17372 = vmatprep.subr.mxu1 %v12441_v58 }
 0x4eb   :  { %v21568_v45 = vadd.f32 %v16910_v41, %v8799_v25  ;;  %v8798_v51 = vadd.f32 %v8623_v60, %v23294_v22  ;;  %17373 = vmatpush3.msra.mxu1 %v12441_v58  ;;  %v23295_v58 = vld [vmem:[#allocation35_spill] sm:$0xff]  ;;  %v23296_v60 = vld [vmem:[#allocation58_spill] sm:$0xff] }
 0x4ec   :  { %v16809_v54 = vpop.f32.mrf.mxu1  ;;  %v16913_v26 = vpop.f32.mrf.mxu0  ;;  %17176 = vmatmul.mubr.msk.f32.gmra.mxu1 %vm71_vm0, %v10963_v19  ;;  %17280 = vmatmul.mubr.msk.f32.gmra.mxu0 %vm71_vm0, %v11673_v5 }
 0x4ed   :  { %v21573_v6 = vadd.f32 %v9333_v47, %v8798_v51  ;;  %v8801_v57 = vadd.f32 %v16809_v54, %v21205_v48  ;;  %17178 = vmatprep.mubr.msk.f32.mxu1 %vm71_vm0, %v10964_v11  ;;  %17282 = vmatprep.mubr.msk.f32.mxu0 %vm71_vm0, %v21213_v63  ;;  %v10966_v48 = vld [vmem:[#allocation2 + $0xe0] sm:$0xff]  ;;  %v23297_v54 = vld [vmem:[#allocation57_spill] sm:$0xff]  ;;  %v10967_v11 = vld [vmem:[#allocation2 + $0xf0] sm:$0xff] }
 0x4ee   :  { %v8633_v0 = vpop.f32.mrf.mxu1  ;;  %v9343_v41 = vpop.f32.mrf.mxu0 }
 0x4ef   :  { %v21579_v36 = vadd.f32 %v16913_v26, %v8801_v57  ;;  %v8800_v21 = vadd.f32 %v8633_v0, %v23295_v58  ;;  %v11677_v57 = vld [vmem:[#allocation2 + $0xf1] sm:$0xff] }
 0x4f0   :  { %v16812_v25 = vpop.f32.mrf.mxu1  ;;  %v16916_v19 = vpop.f32.mrf.mxu0  ;;  %17179 = vmatmul.mubr.msk.f32.gmra.mxu1 %vm71_vm0, %v10965_v23  ;;  %17283 = vmatmul.mubr.msk.f32.gmra.mxu0 %vm71_vm0, %v21219_v20 }
 0x4f1   :  { %v21585_v5 = vadd.f32 %v9343_v41, %v8800_v21  ;;  %v8803_v47 = vadd.f32 %v16812_v25, %v23296_v60  ;;  %17181 = vmatprep.mubr.msk.f32.mxu1 %vm71_vm0, %v10966_v48  ;;  %17285 = vmatprep.mubr.msk.f32.mxu0 %vm71_vm0, %v21229_v10  ;;  %v10968_v41 = vld [vmem:[#allocation2 + $0x100] sm:$0xff]  ;;  %v23298_v10 = vld [vmem:[#allocation81_spill] sm:$0xff]  ;;  %v23299_v48 = vld [vmem:[#allocation34_spill] sm:$0xff] }
 0x4f2   :  { %v8643_v63 = vpop.f32.mrf.mxu1  ;;  %v9353_v22 = vpop.f32.mrf.mxu0 }
 0x4f3   :  { %v21591_v51 = vadd.f32 %v16916_v19, %v8803_v47  ;;  %v8802_v26 = vadd.f32 %v8643_v63, %v23297_v54  ;;  %v10969_v47 = vld [vmem:[#allocation2 + $0x110] sm:$0xff] }
 0x4f4   :  { %v16815_v0 = vpop.f32.mrf.mxu1  ;;  %v16919_v20 = vpop.f32.mrf.mxu0  ;;  %17182 = vmatmul.mubr.msk.f32.gmra.mxu1 %vm71_vm0, %v10967_v11  ;;  %17286 = vmatmul.mubr.msk.f32.gmra.mxu0 %vm71_vm0, %v11677_v57  ;;  %v11679_v63 = vld [vmem:[#allocation2 + $0x111] sm:$0xff] }
 0x4f5   :  { %v21596_v58 = vadd.f32 %v9353_v22, %v8802_v26  ;;  %v8805_v21 = vadd.f32 %v16815_v0, %v21235_v59  ;;  %17184 = vmatprep.mubr.msk.f32.mxu1 %vm71_vm0, %v10968_v41  ;;  %17288 = vmatprep.mubr.msk.f32.mxu0 %vm71_vm0, %v23298_v10  ;;  %v10970_v59 = vld [vmem:[#allocation2 + $0x120] sm:$0xff]  ;;  %v10971_v57 = vld [vmem:[#allocation2 + $0x130] sm:$0xff] }
 0x4f6   :  { %v8653_v23 = vpop.f32.mrf.mxu1  ;;  %v9363_v25 = vpop.f32.mrf.mxu0  ;;  %v11681_v0 = vld [vmem:[#allocation2 + $0x131] sm:$0xff]  ;;  %v23300_v10 = vld [vmem:[#allocation60_spill] sm:$0xff] }
 0x4f7   :  { %v21602_v19 = vadd.f32 %v16919_v20, %v8805_v21  ;;  %v8804_v60 = vadd.f32 %v8653_v23, %v23299_v48 }
 0x4f8   :  { %v16818_v54 = vpop.f32.mrf.mxu1  ;;  %v16922_v11 = vpop.f32.mrf.mxu0  ;;  %17185 = vmatmul.mubr.msk.f32.gmra.mxu1 %vm71_vm0, %v10969_v47  ;;  %17289 = vmatmul.mubr.msk.f32.gmra.mxu0 %vm71_vm0, %v11679_v63 }
 0x4f9   :  { %v21607_v22 = vadd.f32 %v9363_v25, %v8804_v60  ;;  %v8807_v26 = vadd.f32 %v16818_v54, %v21248_v43  ;;  %17187 = vmatprep.mubr.msk.f32.mxu1 %vm71_vm0, %v10970_v59  ;;  %17291 = vmatprep.mubr.msk.f32.mxu0 %vm71_vm0, %v21255_v50  ;;  %v10972_v43 = vld [vmem:[#allocation2 + $0x160] sm:$0xff] }
 0x4fa   :  { %v8663_v20 = vpop.f32.mrf.mxu1  ;;  %v9373_v41 = vpop.f32.mrf.mxu0 }
 0x4fb   :  { %v21613_v21 = vadd.f32 %v16922_v11, %v8807_v26  ;;  %v8806_v23 = vadd.f32 %v8663_v20, %v23300_v10  ;;  %v23301_v11 = vld [vmem:[#allocation59_spill] sm:$0xff]  ;;  %v10973_v26 = vld [vmem:[#allocation2 + $0x170] sm:$0xff] }
 0x4fc   :  { %v16821_v48 = vpop.f32.mrf.mxu1  ;;  %v16925_v47 = vpop.f32.mrf.mxu0  ;;  %17188 = vmatmul.mubr.msk.f32.gmra.mxu1 %vm71_vm0, %v10971_v57  ;;  %17292 = vmatmul.mubr.msk.f32.gmra.mxu0 %vm71_vm0, %v11681_v0  ;;  %v11683_v57 = vld [vmem:[#allocation2 + $0x171] sm:$0xff] }
 0x4fd   :  { %v21618_v25 = vadd.f32 %v9373_v41, %v8806_v23  ;;  %v8809_v60 = vadd.f32 %v16821_v48, %v21260_v61  ;;  %17190 = vmatprep.mubr.msk.f32.mxu1 %vm71_vm0, %v10972_v43  ;;  %17294 = vmatprep.mubr.msk.f32.mxu0 %vm71_vm0, %v21267_v49  ;;  %v10974_v61 = vld [vmem:[#allocation2 + $0x180] sm:$0xff] }
 0x4fe   :  { %v8673_v50 = vpop.f32.mrf.mxu1  ;;  %v9383_v63 = vpop.f32.mrf.mxu0  ;;  %v11684_v41 = vld [vmem:[#allocation2 + $0x181] sm:$0xff] }
 0x4ff   :  { %v21624_v54 = vadd.f32 %v16925_v47, %v8809_v60  ;;  %v8808_v59 = vadd.f32 %v8673_v50, %v23301_v11  ;;  %v23303_v43 = vld [vmem:[#allocation36_spill] sm:$0xff]  ;;  %v10975_v50 = vld [vmem:[#allocation2 + $0x190] sm:$0xff] }
 0x500   :  { %v16824_v20 = vpop.f32.mrf.mxu1  ;;  %v16928_v0 = vpop.f32.mrf.mxu0  ;;  %17191 = vmatmul.mubr.msk.f32.gmra.mxu1 %vm71_vm0, %v10973_v26  ;;  %17295 = vmatmul.mubr.msk.f32.gmra.mxu0 %vm71_vm0, %v11683_v57  ;;  %v11685_v11 = vld [vmem:[#allocation2 + $0x191] sm:$0xff] }
 0x501   :  { %v21629_v10 = vadd.f32 %v9383_v63, %v8808_v59  ;;  %v8811_v49 = vadd.f32 %v16824_v20, %v21273_v53  ;;  %17193 = vmatprep.mubr.msk.f32.mxu1 %vm71_vm0, %v10974_v61  ;;  %17297 = vmatprep.mubr.msk.f32.mxu0 %vm71_vm0, %v11684_v41  ;;  %v10976_v63 = vld [vmem:[#allocation2 + $0x1a0] sm:$0xff] }
 0x502   :  { %v8683_v23 = vpop.f32.mrf.mxu1  ;;  %v9393_v48 = vpop.f32.mrf.mxu0  ;;  %v11686_v53 = vld [vmem:[#allocation2 + $0x1a1] sm:$0xff] }
 0x503   :  { %v21634_v47 = vadd.f32 %v16928_v0, %v8811_v49  ;;  %v8810_v60 = vadd.f32 %v8683_v23, %v23303_v43  ;;  %v23304_v49 = vld [vmem:[#allocation83_spill] sm:$0xff]  ;;  %v10977_v43 = vld [vmem:[#allocation2 + $0x1b0] sm:$0xff] }
 0x504   :  { %v16827_v26 = vpop.f32.mrf.mxu1  ;;  %v16931_v57 = vpop.f32.mrf.mxu0  ;;  %17194 = vmatmul.mubr.msk.f32.gmra.mxu1 %vm71_vm0, %v10975_v50  ;;  %17298 = vmatmul.mubr.msk.f32.gmra.mxu0 %vm71_vm0, %v11685_v11  ;;  %v11687_v50 = vld [vmem:[#allocation2 + $0x1b1] sm:$0xff] }
 0x505   :  { %23302 = vst [vmem:[#allocation88_spill] sm:$0xff] %v21634_v47  ;;  %v21639_v59 = vadd.f32 %v9393_v48, %v8810_v60  ;;  %v8813_v20 = vadd.f32 %v16827_v26, %v21283_v62  ;;  %17196 = vmatprep.mubr.msk.f32.mxu1 %vm71_vm0, %v10976_v63  ;;  %17300 = vmatprep.mubr.msk.f32.mxu0 %vm71_vm0, %v11686_v53  ;;  %v10978_v48 = vld [vmem:[#allocation2 + $0x1c0] sm:$0xff]  ;;  %v11689_v63 = vld [vmem:[#allocation2 + $0x1d1] sm:$0xff] }
 0x506   :  { %v8693_v0 = vpop.f32.mrf.mxu1  ;;  %v9403_v61 = vpop.f32.mrf.mxu0  ;;  %v11688_v62 = vld [vmem:[#allocation2 + $0x1c1] sm:$0xff] }
 0x507   :  { %v21644_v41 = vadd.f32 %v16931_v57, %v8813_v20  ;;  %v8812_v23 = vadd.f32 %v8693_v0, %v23304_v49  ;;  %v10979_v57 = vld [vmem:[#allocation2 + $0x1d0] sm:$0xff] }
 0x508   :  { %v16830_v47 = vpop.f32.mrf.mxu1  ;;  %v16934_v11 = vpop.f32.mrf.mxu0  ;;  %17197 = vmatmul.mubr.msk.f32.gmra.mxu1 %vm71_vm0, %v10977_v43  ;;  %17301 = vmatmul.mubr.msk.f32.gmra.mxu0 %vm71_vm0, %v11687_v50 }
 0x509   :  { %v21649_v60 = vadd.f32 %v9403_v61, %v8812_v23  ;;  %v8815_v26 = vadd.f32 %v16830_v47, %v21293_v38  ;;  %17199 = vmatprep.mubr.msk.f32.mxu1 %vm71_vm0, %v10978_v48  ;;  %17303 = vmatprep.mubr.msk.f32.mxu0 %vm71_vm0, %v11688_v62  ;;  %v10980_v61 = vld [vmem:[#allocation2 + $0x200] sm:$0xff] }
 0x50a   :  { %v8703_v53 = vpop.f32.mrf.mxu1  ;;  %v9413_v20 = vpop.f32.mrf.mxu0  ;;  %v11690_v38 = vld [vmem:[#allocation2 + $0x201] sm:$0xff] }
 0x50b   :  { %v21654_v0 = vadd.f32 %v16934_v11, %v8815_v26  ;;  %v8814_v49 = vadd.f32 %v8703_v53, %v21298_v12  ;;  %v10981_v26 = vld [vmem:[#allocation2 + $0x210] sm:$0xff] }
 0x50c   :  { %v16833_v43 = vpop.f32.mrf.mxu1  ;;  %v16937_v50 = vpop.f32.mrf.mxu0  ;;  %17200 = vmatmul.mubr.msk.f32.gmra.mxu1 %vm71_vm0, %v10979_v57  ;;  %17304 = vmatmul.mubr.msk.f32.gmra.mxu0 %vm71_vm0, %v11689_v63  ;;  %v11691_v57 = vld [vmem:[#allocation2 + $0x211] sm:$0xff] }
 0x50d   :  { %v21659_v47 = vadd.f32 %v9413_v20, %v8814_v49  ;;  %v8817_v23 = vadd.f32 %v16833_v43, %v21302_v18  ;;  %17202 = vmatprep.mubr.msk.f32.mxu1 %vm71_vm0, %v10980_v61  ;;  %17306 = vmatprep.mubr.msk.f32.mxu0 %vm71_vm0, %v11690_v38  ;;  %v10982_v20 = vld [vmem:[#allocation2 + $0x220] sm:$0xff]  ;;  %v23308_v43 = vld [vmem:[#allocation62_spill] sm:$0xff] }
 0x50e   :  { %v8713_v11 = vpop.f32.mrf.mxu1  ;;  %v9423_v48 = vpop.f32.mrf.mxu0  ;;  %v11692_v18 = vld [vmem:[#allocation2 + $0x221] sm:$0xff] }
 0x50f   :  { %23305 = vst [vmem:[#allocation91_spill] sm:$0xff] %v21659_v47  ;;  %v21664_v62 = vadd.f32 %v16937_v50, %v8817_v23  ;;  %v8816_v12 = vadd.f32 %v8713_v11, %v21307_v46  ;;  %v23310_v23 = vld [vmem:[#allocation61_spill] sm:$0xff] }
 0x510   :  { %v16836_v53 = vpop.f32.mrf.mxu1  ;;  %v16940_v63 = vpop.f32.mrf.mxu0  ;;  %17203 = vmatmul.mubr.msk.f32.gmra.mxu1 %vm71_vm0, %v10981_v26  ;;  %17307 = vmatmul.mubr.msk.f32.gmra.mxu0 %vm71_vm0, %v11691_v57  ;;  %v11693_v26 = vld [vmem:[#allocation2 + $0x231] sm:$0xff] }
 0x511   :  { %23306 = vst [vmem:[#allocation70_spill] sm:$0xff] %v21664_v62  ;;  %v21669_v49 = vadd.f32 %v9423_v48, %v8816_v12  ;;  %v8819_v61 = vadd.f32 %v16836_v53, %v23308_v43  ;;  %17205 = vmatprep.mubr.msk.f32.mxu1 %vm71_vm0, %v10982_v20  ;;  %17309 = vmatprep.mubr.msk.f32.mxu0 %vm71_vm0, %v11692_v18  ;;  %v10983_v62 = vld [vmem:[#allocation2 + $0x230] sm:$0xff]  ;;  %v10984_v48 = vld [vmem:[#allocation2 + $0x240] sm:$0xff] }
 0x512   :  { %v8723_v50 = vpop.f32.mrf.mxu1  ;;  %v9433_v46 = vpop.f32.mrf.mxu0  ;;  %v11694_v12 = vld [vmem:[#allocation2 + $0x241] sm:$0xff]  ;;  %v23312_v20 = vld [vmem:[#allocation82_spill] sm:$0xff] }
 0x513   :  { %23307 = vst [vmem:[#allocation69_spill] sm:$0xff] %v21669_v49  ;;  %v21674_v38 = vadd.f32 %v16940_v63, %v8819_v61  ;;  %v8818_v11 = vadd.f32 %v8723_v50, %v23310_v23  ;;  %v23314_v50 = vld [vmem:[#allocation85_spill] sm:$0xff] }
 0x514   :  { %v16839_v47 = vpop.f32.mrf.mxu1  ;;  %v16943_v57 = vpop.f32.mrf.mxu0  ;;  %17206 = vmatmul.mubr.msk.f32.gmra.mxu1 %vm71_vm0, %v10983_v62  ;;  %17310 = vmatmul.mubr.msk.f32.gmra.mxu0 %vm71_vm0, %v11693_v26  ;;  %v11695_v62 = vld [vmem:[#allocation2 + $0x251] sm:$0xff] }
 0x515   :  { %23309 = vst [vmem:[#allocation90_spill] sm:$0xff] %v21674_v38  ;;  %v21679_v53 = vadd.f32 %v9433_v46, %v8818_v11  ;;  %v8821_v18 = vadd.f32 %v16839_v47, %v23312_v20  ;;  %17208 = vmatprep.mubr.msk.f32.mxu1 %vm71_vm0, %v10984_v48  ;;  %17312 = vmatprep.mubr.msk.f32.mxu0 %vm71_vm0, %v11694_v12  ;;  %v10985_v38 = vld [vmem:[#allocation2 + $0x250] sm:$0xff]  ;;  %v10986_v46 = vld [vmem:[#allocation2 + $0x260] sm:$0xff] }
 0x516   :  { %v8733_v63 = vpop.f32.mrf.mxu1  ;;  %v9443_v43 = vpop.f32.mrf.mxu0  ;;  %v11696_v47 = vld [vmem:[#allocation2 + $0x261] sm:$0xff]  ;;  %v11697_v20 = vld [vmem:[#allocation2 + $0x271] sm:$0xff] }
 0x517   :  { %23311 = vst [vmem:[#allocation93_spill] sm:$0xff] %v21679_v53  ;;  %v21684_v61 = vadd.f32 %v16943_v57, %v8821_v18  ;;  %v8820_v23 = vadd.f32 %v8733_v63, %v23314_v50  ;;  %v23316_v48 = vld [vmem:[#allocation64_spill] sm:$0xff]  ;;  %v10987_v57 = vld [vmem:[#allocation2 + $0x270] sm:$0xff] }
 0x518   :  { %v16842_v49 = vpop.f32.mrf.mxu1  ;;  %v16946_v26 = vpop.f32.mrf.mxu0  ;;  %17209 = vmatmul.mubr.msk.f32.gmra.mxu1 %vm71_vm0, %v10985_v38  ;;  %17313 = vmatmul.mubr.msk.f32.gmra.mxu0 %vm71_vm0, %v11695_v62 }
 0x519   :  { %23313 = vst [vmem:[#allocation72_spill] sm:$0xff] %v21684_v61  ;;  %v21689_v11 = vadd.f32 %v9443_v43, %v8820_v23  ;;  %v8823_v12 = vadd.f32 %v16842_v49, %v23316_v48  ;;  %17211 = vmatprep.mubr.msk.f32.mxu1 %vm71_vm0, %v10986_v46  ;;  %17315 = vmatprep.mubr.msk.f32.mxu0 %vm71_vm0, %v11696_v47  ;;  %v23318_v61 = vld [vmem:[#allocation63_spill] sm:$0xff]  ;;  %v10988_v43 = vld [vmem:[#allocation2 + $0x2a0] sm:$0xff] }
 0x51a   :  { %v8743_v18 = vpop.f32.mrf.mxu1  ;;  %v9453_v63 = vpop.f32.mrf.mxu0  ;;  %v11698_v49 = vld [vmem:[#allocation2 + $0x2a1] sm:$0xff] }
 0x51b   :  { %23315 = vst [vmem:[#allocation71_spill] sm:$0xff] %v21689_v11  ;;  %v21694_v50 = vadd.f32 %v16946_v26, %v8823_v12  ;;  %v8822_v38 = vadd.f32 %v8743_v18, %v23318_v61  ;;  %v23319_v46 = vld [vmem:[#allocation84_spill] sm:$0xff]  ;;  %v23321_v61 = vld [vmem:[#allocation87_spill] sm:$0xff] }
 0x51c   :  { %v16845_v53 = vpop.f32.mrf.mxu1  ;;  %v16949_v62 = vpop.f32.mrf.mxu0  ;;  %17212 = vmatmul.mubr.msk.f32.gmra.mxu1 %vm71_vm0, %v10987_v57  ;;  %17316 = vmatmul.mubr.msk.f32.gmra.mxu0 %vm71_vm0, %v11697_v20  ;;  %v11699_v57 = vld [vmem:[#allocation2 + $0x2b1] sm:$0xff] }
 0x51d   :  { %23317 = vst [vmem:[#allocation92_spill] sm:$0xff] %v21694_v50  ;;  %v21699_v23 = vadd.f32 %v9453_v63, %v8822_v38  ;;  %v8825_v47 = vadd.f32 %v16845_v53, %v23319_v46  ;;  %17214 = vmatprep.mubr.msk.f32.mxu1 %vm71_vm0, %v10988_v43  ;;  %17318 = vmatprep.mubr.msk.f32.mxu0 %vm71_vm0, %v11698_v49  ;;  %v10989_v50 = vld [vmem:[#allocation2 + $0x2b0] sm:$0xff]  ;;  %v10990_v63 = vld [vmem:[#allocation2 + $0x2c0] sm:$0xff] }
 0x51e   :  { %v8753_v26 = vpop.f32.mrf.mxu1  ;;  %v9463_v48 = vpop.f32.mrf.mxu0  ;;  %v11700_v53 = vld [vmem:[#allocation2 + $0x2c1] sm:$0xff]  ;;  %v23322_v43 = vld [vmem:[#allocation66_spill] sm:$0xff] }
 0x51f   :  { %v21704_v12 = vadd.f32 %v16949_v62, %v8825_v47  ;;  %v8824_v18 = vadd.f32 %v8753_v26, %v23321_v61  ;;  %v10991_v61 = vld [vmem:[#allocation2 + $0x2d0] sm:$0xff] }
 0x520   :  { %v16960_v11 = vpop.f32.mrf.mxu1  ;;  %v17064_v20 = vpop.f32.mrf.mxu0  ;;  %17215 = vmatmul.mubr.msk.f32.gmra.mxu1 %vm71_vm0, %v10989_v50  ;;  %17319 = vmatmul.mubr.msk.f32.gmra.mxu0 %vm71_vm0, %v11699_v57  ;;  %v11701_v50 = vld [vmem:[#allocation2 + $0x2d1] sm:$0xff] }
 0x521   :  { %23320 = vst [vmem:[#allocation95_spill] sm:$0xff] %v21704_v12  ;;  %v21709_v38 = vadd.f32 %v9463_v48, %v8824_v18  ;;  %v10183_v49 = vadd.f32 %v16960_v11, %v23322_v43  ;;  %17217 = vmatprep.mubr.msk.f32.mxu1 %vm71_vm0, %v10990_v63  ;;  %17321 = vmatprep.mubr.msk.f32.mxu0 %vm71_vm0, %v11700_v53  ;;  %v10992_v48 = vld [vmem:[#allocation2 + $0x2e0] sm:$0xff] }
 0x522   :  { %v9863_v62 = vpop.f32.mrf.mxu1  ;;  %v10573_v46 = vpop.f32.mrf.mxu0  ;;  %v11702_v11 = vld [vmem:[#allocation2 + $0x2e1] sm:$0xff] }
 0x523   :  { %v21714_v47 = vadd.f32 %v17064_v20, %v10183_v49  ;;  %v10182_v26 = vadd.f32 %v9863_v62, %v21361_v28  ;;  %v10993_v49 = vld [vmem:[#allocation2 + $0x2f0] sm:$0xff] }
 0x524   :  { %v16963_v12 = vpop.f32.mrf.mxu1  ;;  %v17067_v57 = vpop.f32.mrf.mxu0  ;;  %17218 = vmatmul.mubr.msk.f32.gmra.mxu1 %vm71_vm0, %v10991_v61  ;;  %17322 = vmatmul.mubr.msk.f32.gmra.mxu0 %vm71_vm0, %v11701_v50  ;;  %v11703_v62 = vld [vmem:[#allocation2 + $0x2f1] sm:$0xff] }
 0x525   :  { %v21719_v18 = vadd.f32 %v10573_v46, %v10182_v26  ;;  %v10185_v63 = vadd.f32 %v16963_v12, %v21367_v56  ;;  %17220 = vmatprep.mubr.msk.f32.mxu1 %vm71_vm0, %v10992_v48  ;;  %17324 = vmatprep.mubr.msk.f32.mxu0 %vm71_vm0, %v11702_v11  ;;  %v10994_v46 = vld [vmem:[#allocation2 + $0x300] sm:$0xff] }
 0x526   :  { %v9873_v20 = vpop.f32.mrf.mxu1  ;;  %v10583_v28 = vpop.f32.mrf.mxu0  ;;  %v11704_v56 = vld [vmem:[#allocation2 + $0x301] sm:$0xff] }
 0x527   :  { %v21724_v53 = vadd.f32 %v17067_v57, %v10185_v63  ;;  %v10184_v43 = vadd.f32 %v9873_v20, %v21373_v37  ;;  %v10995_v57 = vld [vmem:[#allocation2 + $0x310] sm:$0xff] }
 0x528   :  { %v16966_v61 = vpop.f32.mrf.mxu1  ;;  %v17070_v50 = vpop.f32.mrf.mxu0  ;;  %17221 = vmatmul.mubr.msk.f32.gmra.mxu1 %vm71_vm0, %v10993_v49  ;;  %17325 = vmatmul.mubr.msk.f32.gmra.mxu0 %vm71_vm0, %v11703_v62  ;;  %v11705_v37 = vld [vmem:[#allocation2 + $0x311] sm:$0xff] }
 0x529   :  { %v21729_v12 = vadd.f32 %v10583_v28, %v10184_v43  ;;  %v10187_v26 = vadd.f32 %v16966_v61, %v21379_v24  ;;  %17223 = vmatprep.mubr.msk.f32.mxu1 %vm71_vm0, %v10994_v46  ;;  %17327 = vmatprep.mubr.msk.f32.mxu0 %vm71_vm0, %v11704_v56  ;;  %v10996_v28 = vld [vmem:[#allocation2 + $0x340] sm:$0xff] }
 0x52a   :  { %v9883_v48 = vpop.f32.mrf.mxu1  ;;  %v10593_v11 = vpop.f32.mrf.mxu0  ;;  %v11706_v24 = vld [vmem:[#allocation2 + $0x341] sm:$0xff] }
 0x52b   :  { %v21734_v63 = vadd.f32 %v17070_v50, %v10187_v26  ;;  %v10186_v20 = vadd.f32 %v9883_v48, %v21384_v33  ;;  %v10997_v26 = vld [vmem:[#allocation2 + $0x350] sm:$0xff] }
 0x52c   :  { %v16969_v49 = vpop.f32.mrf.mxu1  ;;  %v17073_v62 = vpop.f32.mrf.mxu0  ;;  %17224 = vmatmul.mubr.msk.f32.gmra.mxu1 %vm71_vm0, %v10995_v57  ;;  %17328 = vmatmul.mubr.msk.f32.gmra.mxu0 %vm71_vm0, %v11705_v37  ;;  %v11707_v57 = vld [vmem:[#allocation2 + $0x351] sm:$0xff] }
 0x52d   :  { %v21739_v43 = vadd.f32 %v10593_v11, %v10186_v20  ;;  %v10189_v61 = vadd.f32 %v16969_v49, %v21390_v1  ;;  %17226 = vmatprep.mubr.msk.f32.mxu1 %vm71_vm0, %v10996_v28  ;;  %17330 = vmatprep.mubr.msk.f32.mxu0 %vm71_vm0, %v11706_v24  ;;  %v10998_v11 = vld [vmem:[#allocation2 + $0x360] sm:$0xff]  ;;  %v23324_v49 = vld [vmem:[#allocation65_spill] sm:$0xff] }
 0x52e   :  { %v9893_v50 = vpop.f32.mrf.mxu1  ;;  %v10603_v46 = vpop.f32.mrf.mxu0  ;;  %v11708_v1 = vld [vmem:[#allocation2 + $0x361] sm:$0xff] }
 0x52f   :  { %v21744_v56 = vadd.f32 %v17073_v62, %v10189_v61  ;;  %v10188_v33 = vadd.f32 %v9893_v50, %v21396_v8  ;;  %v10999_v50 = vld [vmem:[#allocation2 + $0x370] sm:$0xff] }
 0x530   :  { %v16972_v48 = vpop.f32.mrf.mxu1  ;;  %v17076_v37 = vpop.f32.mrf.mxu0  ;;  %17227 = vmatmul.mubr.msk.f32.gmra.mxu1 %vm71_vm0, %v10997_v26  ;;  %17331 = vmatmul.mubr.msk.f32.gmra.mxu0 %vm71_vm0, %v11707_v57  ;;  %v11709_v26 = vld [vmem:[#allocation2 + $0x371] sm:$0xff] }
 0x531   :  { %23323 = vst [vmem:[#allocation73_spill] sm:$0xff] %v21744_v56  ;;  %v21749_v20 = vadd.f32 %v10603_v46, %v10188_v33  ;;  %v10191_v28 = vadd.f32 %v16972_v48, %v23324_v49  ;;  %17229 = vmatprep.mubr.msk.f32.mxu1 %vm71_vm0, %v10998_v11  ;;  %17333 = vmatprep.mubr.msk.f32.mxu0 %vm71_vm0, %v11708_v1  ;;  %v11000_v46 = vld [vmem:[#allocation2 + $0x380] sm:$0xff] }
 0x532   :  { %v9903_v62 = vpop.f32.mrf.mxu1  ;;  %v10613_v8 = vpop.f32.mrf.mxu0  ;;  %v11710_v33 = vld [vmem:[#allocation2 + $0x381] sm:$0xff] }
 0x533   :  { %v21754_v24 = vadd.f32 %v17076_v37, %v10191_v28  ;;  %v10190_v61 = vadd.f32 %v9903_v62, %v21408_v27  ;;  %v11001_v28 = vld [vmem:[#allocation2 + $0x390] sm:$0xff] }
 0x534   :  { %v16975_v56 = vpop.f32.mrf.mxu1  ;;  %v17079_v57 = vpop.f32.mrf.mxu0  ;;  %17230 = vmatmul.mubr.msk.f32.gmra.mxu1 %vm71_vm0, %v10999_v50  ;;  %17334 = vmatmul.mubr.msk.f32.gmra.mxu0 %vm71_vm0, %v11709_v26  ;;  %v11711_v62 = vld [vmem:[#allocation2 + $0x391] sm:$0xff] }
 0x535   :  { %v21759_v48 = vadd.f32 %v10613_v8, %v10190_v61  ;;  %v10193_v11 = vadd.f32 %v16975_v56, %v21414_v31  ;;  %17232 = vmatprep.mubr.msk.f32.mxu1 %vm71_vm0, %v11000_v46  ;;  %17336 = vmatprep.mubr.msk.f32.mxu0 %vm71_vm0, %v11710_v33  ;;  %v11002_v8 = vld [vmem:[#allocation2 + $0x3a0] sm:$0xff] }
 0x536   :  { %v9913_v37 = vpop.f32.mrf.mxu1  ;;  %v10623_v27 = vpop.f32.mrf.mxu0  ;;  %v11712_v31 = vld [vmem:[#allocation2 + $0x3a1] sm:$0xff] }
 0x537   :  { %v21764_v1 = vadd.f32 %v17079_v57, %v10193_v11  ;;  %v10192_v49 = vadd.f32 %v9913_v37, %v21420_v2  ;;  %v11003_v57 = vld [vmem:[#allocation2 + $0x3b0] sm:$0xff] }
 0x538   :  { %v16978_v50 = vpop.f32.mrf.mxu1  ;;  %v17082_v26 = vpop.f32.mrf.mxu0  ;;  %17233 = vmatmul.mubr.msk.f32.gmra.mxu1 %vm71_vm0, %v11001_v28  ;;  %17337 = vmatmul.mubr.msk.f32.gmra.mxu0 %vm71_vm0, %v11711_v62  ;;  %v11713_v2 = vld [vmem:[#allocation2 + $0x3b1] sm:$0xff] }
 0x539   :  { %v21769_v56 = vadd.f32 %v10623_v27, %v10192_v49  ;;  %v10195_v61 = vadd.f32 %v16978_v50, %v21426_v9  ;;  %17235 = vmatprep.mubr.msk.f32.mxu1 %vm71_vm0, %v11002_v8  ;;  %17339 = vmatprep.mubr.msk.f32.mxu0 %vm71_vm0, %v11712_v31  ;;  %v11004_v27 = vld [vmem:[#allocation2 + $0x3e0] sm:$0xff] }
 0x53a   :  { %v9923_v46 = vpop.f32.mrf.mxu1  ;;  %v10633_v33 = vpop.f32.mrf.mxu0  ;;  %v11714_v9 = vld [vmem:[#allocation2 + $0x3e1] sm:$0xff] }
 0x53b   :  { %v21774_v11 = vadd.f32 %v17082_v26, %v10195_v61  ;;  %v10194_v37 = vadd.f32 %v9923_v46, %v21431_v16  ;;  %v11005_v61 = vld [vmem:[#allocation2 + $0x3f0] sm:$0xff] }
 0x53c   :  { %v16981_v28 = vpop.f32.mrf.mxu1  ;;  %v17085_v62 = vpop.f32.mrf.mxu0  ;;  %17236 = vmatmul.mubr.msk.f32.gmra.mxu1 %vm71_vm0, %v11003_v57  ;;  %17340 = vmatmul.mubr.msk.f32.gmra.mxu0 %vm71_vm0, %v11713_v2  ;;  %v11715_v57 = vld [vmem:[#allocation2 + $0x3f1] sm:$0xff] }
 0x53d   :  { %v21779_v49 = vadd.f32 %v10633_v33, %v10194_v37  ;;  %v10197_v50 = vadd.f32 %v16981_v28, %v21437_v42  ;;  %17238 = vmatprep.mubr.msk.f32.mxu1 %vm71_vm0, %v11004_v27  ;;  %17342 = vmatprep.mubr.msk.f32.mxu0 %vm71_vm0, %v11714_v9  ;;  %v11006_v33 = vld [vmem:[#allocation2 + $0x400] sm:$0xff]  ;;  %v23326_v28 = vld [vmem:[#allocation86_spill] sm:$0xff] }
 0x53e   :  { %v9933_v26 = vpop.f32.mrf.mxu1  ;;  %v10643_v8 = vpop.f32.mrf.mxu0  ;;  %v11716_v42 = vld [vmem:[#allocation2 + $0x401] sm:$0xff] }
 0x53f   :  { %v21784_v31 = vadd.f32 %v17085_v62, %v10197_v50  ;;  %v10196_v16 = vadd.f32 %v9933_v26, %v21443_v4  ;;  %v11007_v26 = vld [vmem:[#allocation2 + $0x410] sm:$0xff] }
 0x540   :  { %v16984_v46 = vpop.f32.mrf.mxu1  ;;  %v17088_v2 = vpop.f32.mrf.mxu0  ;;  %17239 = vmatmul.mubr.msk.f32.gmra.mxu1 %vm71_vm0, %v11005_v61  ;;  %17343 = vmatmul.mubr.msk.f32.gmra.mxu0 %vm71_vm0, %v11715_v57  ;;  %v11717_v61 = vld [vmem:[#allocation2 + $0x411] sm:$0xff] }
 0x541   :  { %23325 = vst [vmem:[#allocation74_spill] sm:$0xff] %v21784_v31  ;;  %v21789_v37 = vadd.f32 %v10643_v8, %v10196_v16  ;;  %v10199_v27 = vadd.f32 %v16984_v46, %v23326_v28  ;;  %17241 = vmatprep.mubr.msk.f32.mxu1 %vm71_vm0, %v11006_v33  ;;  %17345 = vmatprep.mubr.msk.f32.mxu0 %vm71_vm0, %v11716_v42  ;;  %v11008_v8 = vld [vmem:[#allocation2 + $0x420] sm:$0xff] }
 0x542   :  { %v9943_v62 = vpop.f32.mrf.mxu1  ;;  %v10653_v4 = vpop.f32.mrf.mxu0  ;;  %v11718_v16 = vld [vmem:[#allocation2 + $0x421] sm:$0xff] }
 0x543   :  { %v21794_v9 = vadd.f32 %v17088_v2, %v10199_v27  ;;  %v10198_v50 = vadd.f32 %v9943_v62, %v21455_v3  ;;  %v11009_v27 = vld [vmem:[#allocation2 + $0x430] sm:$0xff] }
 0x544   :  { %v16987_v31 = vpop.f32.mrf.mxu1  ;;  %v17091_v57 = vpop.f32.mrf.mxu0  ;;  %17242 = vmatmul.mubr.msk.f32.gmra.mxu1 %vm71_vm0, %v11007_v26  ;;  %17346 = vmatmul.mubr.msk.f32.gmra.mxu0 %vm71_vm0, %v11717_v61  ;;  %v11719_v62 = vld [vmem:[#allocation2 + $0x431] sm:$0xff] }
 0x545   :  { %v21799_v46 = vadd.f32 %v10653_v4, %v10198_v50  ;;  %v10201_v33 = vadd.f32 %v16987_v31, %v21461_v34  ;;  %17244 = vmatprep.mubr.msk.f32.mxu1 %vm71_vm0, %v11008_v8  ;;  %17348 = vmatprep.mubr.msk.f32.mxu0 %vm71_vm0, %v11718_v16  ;;  %v11010_v4 = vld [vmem:[#allocation2 + $0x440] sm:$0xff] }
 0x546   :  { %v9953_v2 = vpop.f32.mrf.mxu1  ;;  %v10663_v3 = vpop.f32.mrf.mxu0  ;;  %v11720_v34 = vld [vmem:[#allocation2 + $0x441] sm:$0xff] }
 0x547   :  { %v21804_v42 = vadd.f32 %v17091_v57, %v10201_v33  ;;  %v10200_v28 = vadd.f32 %v9953_v2, %v21467_v13  ;;  %v11011_v57 = vld [vmem:[#allocation2 + $0x450] sm:$0xff] }
 0x548   :  { %v16990_v26 = vpop.f32.mrf.mxu1  ;;  %v17094_v61 = vpop.f32.mrf.mxu0  ;;  %17245 = vmatmul.mubr.msk.f32.gmra.mxu1 %vm71_vm0, %v11009_v27  ;;  %17349 = vmatmul.mubr.msk.f32.gmra.mxu0 %vm71_vm0, %v11719_v62  ;;  %v11721_v13 = vld [vmem:[#allocation2 + $0x451] sm:$0xff] }
 0x549   :  { %v21809_v31 = vadd.f32 %v10663_v3, %v10200_v28  ;;  %v10203_v50 = vadd.f32 %v16990_v26, %v21473_v30  ;;  %17247 = vmatprep.mubr.msk.f32.mxu1 %vm71_vm0, %v11010_v4  ;;  %17351 = vmatprep.mubr.msk.f32.mxu0 %vm71_vm0, %v11720_v34  ;;  %v11012_v3 = vld [vmem:[#allocation2 + $0x480] sm:$0xff] }
 0x54a   :  { %v9963_v8 = vpop.f32.mrf.mxu1  ;;  %v10673_v16 = vpop.f32.mrf.mxu0  ;;  %v11722_v30 = vld [vmem:[#allocation2 + $0x481] sm:$0xff] }
 0x54b   :  { %v21814_v33 = vadd.f32 %v17094_v61, %v10203_v50  ;;  %v10202_v2 = vadd.f32 %v9963_v8, %v21478_v40  ;;  %v11013_v50 = vld [vmem:[#allocation2 + $0x490] sm:$0xff] }
 0x54c   :  { %v16993_v27 = vpop.f32.mrf.mxu1  ;;  %v17097_v62 = vpop.f32.mrf.mxu0  ;;  %17248 = vmatmul.mubr.msk.f32.gmra.mxu1 %vm71_vm0, %v11011_v57  ;;  %17352 = vmatmul.mubr.msk.f32.gmra.mxu0 %vm71_vm0, %v11721_v13  ;;  %v11723_v57 = vld [vmem:[#allocation2 + $0x491] sm:$0xff] }
 0x54d   :  { %v21819_v28 = vadd.f32 %v10673_v16, %v10202_v2  ;;  %v10205_v26 = vadd.f32 %v16993_v27, %v21484_v17  ;;  %17250 = vmatprep.mubr.msk.f32.mxu1 %vm71_vm0, %v11012_v3  ;;  %17354 = vmatprep.mubr.msk.f32.mxu0 %vm71_vm0, %v11722_v30  ;;  %v11014_v16 = vld [vmem:[#allocation2 + $0x4a0] sm:$0xff]  ;;  %v23329_v27 = vld [vmem:[#allocation89_spill] sm:$0xff] }
 0x54e   :  { %v9973_v61 = vpop.f32.mrf.mxu1  ;;  %v10683_v4 = vpop.f32.mrf.mxu0  ;;  %v11724_v17 = vld [vmem:[#allocation2 + $0x4a1] sm:$0xff] }
 0x54f   :  { %23327 = vst [vmem:[#allocation94_spill] sm:$0xff] %v21819_v28  ;;  %v21824_v34 = vadd.f32 %v17097_v62, %v10205_v26  ;;  %v10204_v40 = vadd.f32 %v9973_v61, %v21490_v39  ;;  %v23331_v26 = vld [vmem:[#allocation68_spill] sm:$0xff] }
 0x550   :  { %v16996_v8 = vpop.f32.mrf.mxu1  ;;  %v17100_v13 = vpop.f32.mrf.mxu0  ;;  %17251 = vmatmul.mubr.msk.f32.gmra.mxu1 %vm71_vm0, %v11013_v50  ;;  %17355 = vmatmul.mubr.msk.f32.gmra.mxu0 %vm71_vm0, %v11723_v57  ;;  %v11725_v50 = vld [vmem:[#allocation2 + $0x4b1] sm:$0xff] }
 0x551   :  { %23328 = vst [vmem:[#allocation97_spill] sm:$0xff] %v21824_v34  ;;  %v21829_v2 = vadd.f32 %v10683_v4, %v10204_v40  ;;  %v10207_v3 = vadd.f32 %v16996_v8, %v23329_v27  ;;  %17253 = vmatprep.mubr.msk.f32.mxu1 %vm71_vm0, %v11014_v16  ;;  %17357 = vmatprep.mubr.msk.f32.mxu0 %vm71_vm0, %v11724_v17  ;;  %v11015_v34 = vld [vmem:[#allocation2 + $0x4b0] sm:$0xff]  ;;  %v11016_v4 = vld [vmem:[#allocation2 + $0x4c0] sm:$0xff]  ;;  %v23332_v16 = vld [vmem:[#allocation67_spill] sm:$0xff] }
 0x552   :  { %v9983_v62 = vpop.f32.mrf.mxu1  ;;  %v10693_v39 = vpop.f32.mrf.mxu0  ;;  %v11726_v40 = vld [vmem:[#allocation2 + $0x4c1] sm:$0xff] }
 0x553   :  { %v21834_v30 = vadd.f32 %v17100_v13, %v10207_v3  ;;  %v10206_v61 = vadd.f32 %v9983_v62, %v23331_v26  ;;  %v11017_v26 = vld [vmem:[#allocation2 + $0x4d0] sm:$0xff] }
 0x554   :  { %v16999_v28 = vpop.f32.mrf.mxu1  ;;  %v17103_v57 = vpop.f32.mrf.mxu0  ;;  %17254 = vmatmul.mubr.msk.f32.gmra.mxu1 %vm71_vm0, %v11015_v34  ;;  %17358 = vmatmul.mubr.msk.f32.gmra.mxu0 %vm71_vm0, %v11725_v50  ;;  %v11727_v34 = vld [vmem:[#allocation2 + $0x4d1] sm:$0xff] }
 0x555   :  { %23330 = vst [vmem:[#allocation77_spill] sm:$0xff] %v21834_v30  ;;  %v21839_v8 = vadd.f32 %v10693_v39, %v10206_v61  ;;  %v10209_v17 = vadd.f32 %v16999_v28, %v23332_v16  ;;  %17256 = vmatprep.mubr.msk.f32.mxu1 %vm71_vm0, %v11016_v4  ;;  %17360 = vmatprep.mubr.msk.f32.mxu0 %vm71_vm0, %v11726_v40  ;;  %v11018_v39 = vld [vmem:[#allocation2 + $0x4e0] sm:$0xff] }
 0x556   :  { %v9993_v13 = vpop.f32.mrf.mxu1  ;;  %v10703_v27 = vpop.f32.mrf.mxu0  ;;  %v11728_v28 = vld [vmem:[#allocation2 + $0x4e1] sm:$0xff] }
 0x557   :  { %v21844_v3 = vadd.f32 %v17103_v57, %v10209_v17  ;;  %v10208_v62 = vadd.f32 %v9993_v13, %v21514_v52  ;;  %v11019_v57 = vld [vmem:[#allocation2 + $0x4f0] sm:$0xff] }
 0x558   :  { %v17002_v30 = vpop.f32.mrf.mxu1  ;;  %v17106_v50 = vpop.f32.mrf.mxu0  ;;  %17257 = vmatmul.mubr.msk.f32.gmra.mxu1 %vm71_vm0, %v11017_v26  ;;  %17361 = vmatmul.mubr.msk.f32.gmra.mxu0 %vm71_vm0, %v11727_v34  ;;  %v11729_v52 = vld [vmem:[#allocation2 + $0x4f1] sm:$0xff] }
 0x559   :  { %v21849_v61 = vadd.f32 %v10703_v27, %v10208_v62  ;;  %v10211_v4 = vadd.f32 %v17002_v30, %v21520_v29  ;;  %17259 = vmatprep.mubr.msk.f32.mxu1 %vm71_vm0, %v11018_v39  ;;  %17363 = vmatprep.mubr.msk.f32.mxu0 %vm71_vm0, %v11728_v28  ;;  %v12376_v27 = vld [vmem:[#allocation2 + $0x22] sm:$0xff] }
 0x55a   :  { %v10003_v40 = vpop.f32.mrf.mxu1  ;;  %v10713_v16 = vpop.f32.mrf.mxu0 }
 0x55b   :  { %v21854_v17 = vadd.f32 %v17106_v50, %v10211_v4  ;;  %v10210_v13 = vadd.f32 %v10003_v40, %v21525_v35  ;;  %v12377_v35 = vld [vmem:[#allocation2 + $0x32] sm:$0xff] }
 0x55c   :  { %v17005_v26 = vpop.f32.mrf.mxu1  ;;  %v17109_v34 = vpop.f32.mrf.mxu0  ;;  %17260 = vmatmul.mubr.msk.f32.gmra.mxu1 %vm71_vm0, %v11019_v57  ;;  %17364 = vmatmul.mubr.msk.f32.gmra.mxu0 %vm71_vm0, %v11729_v52  ;;  %v12378_v57 = vld [vmem:[#allocation2 + $0x42] sm:$0xff] }
 0x55d   :  { %23333 = vst [vmem:[#allocation75_spill] sm:$0xff] %v21854_v17  ;;  %v21859_v29 = vadd.f32 %v10713_v16, %v10210_v13  ;;  %v10213_v30 = vadd.f32 %v17005_v26, %v21531_v44  ;;  %17374 = vmatprep.mubr.msk.f32.mxu1 %vm71_vm0, %v12376_v27 }
 0x55e   :  { %v10013_v62 = vpop.f32.mrf.mxu1  ;;  %v10723_v39 = vpop.f32.mrf.mxu0 }
 0x55f   :  { %v21863_v28 = vadd.f32 %v17109_v34, %v10213_v30  ;;  %v10212_v50 = vadd.f32 %v10013_v62, %v21537_v55  ;;  %v12379_v34 = vld [vmem:[#allocation2 + $0x52] sm:$0xff]  ;;  %v12380_v30 = vld [vmem:[#allocation2 + $0x62] sm:$0xff] }
 0x560   :  { %v17008_v4 = vpop.f32.mrf.mxu1  ;;  %v17112_v40 = vpop.f32.mrf.mxu0  ;;  %17375 = vmatmul.mubr.msk.f32.vlgmr.msra.gmra.mxu1 %vm71_vm0, %v12377_v35 }
 0x561   :  { %v21867_v17 = vadd.f32 %v10723_v39, %v10212_v50  ;;  %v10215_v52 = vadd.f32 %v17008_v4, %v21544_v14  ;;  %17377 = vmatprep.mubr.msk.f32.mxu1 %vm71_vm0, %v12378_v57 }
 0x562   :  { %v10023_v44 = vpop.f32.mrf.mxu1  ;;  %v10733_v16 = vpop.f32.mrf.mxu0 }
 0x563   :  { %v21871_v13 = vadd.f32 %v17112_v40, %v10215_v52  ;;  %v10214_v26 = vadd.f32 %v10023_v44, %v21550_v7  ;;  %v12381_v40 = vld [vmem:[#allocation2 + $0x72] sm:$0xff]  ;;  %v12382_v52 = vld [vmem:[#allocation2 + $0x82] sm:$0xff] }
 0x564   :  { %v17011_v55 = vpop.f32.mrf.mxu1  ;;  %v17115_v27 = vpop.f32.mrf.mxu0  ;;  %17378 = vmatmul.mubr.msk.f32.gmra.mxu1 %vm71_vm0, %v12379_v34 }
 0x565   :  { %v21875_v62 = vadd.f32 %v10733_v16, %v10214_v26  ;;  %v10217_v39 = vadd.f32 %v17011_v55, %v21556_v32  ;;  %17380 = vmatprep.mubr.msk.f32.mxu1 %vm71_vm0, %v12380_v30  ;;  %v12383_v32 = vld [vmem:[#allocation2 + $0x92] sm:$0xff] }
 0x566   :  { %v10033_v14 = vpop.f32.mrf.mxu1  ;;  %v10743_v50 = vpop.f32.mrf.mxu0 }
 0x567   :  { %v21879_v35 = vadd.f32 %v17115_v27, %v10217_v39  ;;  %v10216_v4 = vadd.f32 %v10033_v14, %v21562_v15  ;;  %v12384_v39 = vld [vmem:[#allocation2 + $0xc2] sm:$0xff] }
 0x568   :  { %v17014_v7 = vpop.f32.mrf.mxu1  ;;  %v17118_v57 = vpop.f32.mrf.mxu0  ;;  %17381 = vmatmul.mubr.msk.f32.gmra.mxu1 %vm71_vm0, %v12381_v40 }
 0x569   :  { %v21883_v44 = vadd.f32 %v10743_v50, %v10216_v4  ;;  %v10219_v16 = vadd.f32 %v17014_v7, %v21568_v45  ;;  %17383 = vmatprep.mubr.msk.f32.mxu1 %vm71_vm0, %v12382_v52 }
 0x56a   :  { %v10043_v26 = vpop.f32.mrf.mxu1  ;;  %v10753_v34 = vpop.f32.mrf.mxu0 }
 0x56b   :  { %v21887_v55 = vadd.f32 %v17118_v57, %v10219_v16  ;;  %v10218_v27 = vadd.f32 %v10043_v26, %v21573_v6  ;;  %v12385_v57 = vld [vmem:[#allocation2 + $0xd2] sm:$0xff]  ;;  %v12386_v16 = vld [vmem:[#allocation2 + $0xe2] sm:$0xff] }
 0x56c   :  { %v17017_v15 = vpop.f32.mrf.mxu1  ;;  %v17121_v30 = vpop.f32.mrf.mxu0  ;;  %17384 = vmatmul.mubr.msk.f32.gmra.mxu1 %vm71_vm0, %v12383_v32 }
 0x56d   :  { %v21891_v14 = vadd.f32 %v10753_v34, %v10218_v27  ;;  %v10221_v50 = vadd.f32 %v17017_v15, %v21579_v36  ;;  %17386 = vmatprep.mubr.msk.f32.mxu1 %vm71_vm0, %v12384_v39 }
 0x56e   :  { %v10053_v45 = vpop.f32.mrf.mxu1  ;;  %v10763_v4 = vpop.f32.mrf.mxu0 }
 0x56f   :  { %v21895_v40 = vadd.f32 %v17121_v30, %v10221_v50  ;;  %v10220_v7 = vadd.f32 %v10053_v45, %v21585_v5  ;;  %v12387_v30 = vld [vmem:[#allocation2 + $0xf2] sm:$0xff]  ;;  %v12388_v50 = vld [vmem:[#allocation2 + $0x102] sm:$0xff] }
 0x570   :  { %v17020_v52 = vpop.f32.mrf.mxu1  ;;  %v17124_v6 = vpop.f32.mrf.mxu0  ;;  %17387 = vmatmul.mubr.msk.f32.gmra.mxu1 %vm71_vm0, %v12385_v57 }
 0x571   :  { %v21899_v32 = vadd.f32 %v10763_v4, %v10220_v7  ;;  %v10223_v26 = vadd.f32 %v17020_v52, %v21591_v51  ;;  %17389 = vmatprep.mubr.msk.f32.mxu1 %vm71_vm0, %v12386_v16 }
 0x572   :  { %v10063_v36 = vpop.f32.mrf.mxu1  ;;  %v10773_v34 = vpop.f32.mrf.mxu0 }
 0x573   :  { %v21903_v27 = vadd.f32 %v17124_v6, %v10223_v26  ;;  %v10222_v15 = vadd.f32 %v10063_v36, %v21596_v58  ;;  %v12389_v6 = vld [vmem:[#allocation2 + $0x112] sm:$0xff]  ;;  %v12390_v26 = vld [vmem:[#allocation2 + $0x122] sm:$0xff] }
 0x574   :  { %v17023_v5 = vpop.f32.mrf.mxu1  ;;  %v17127_v39 = vpop.f32.mrf.mxu0  ;;  %17390 = vmatmul.mubr.msk.f32.gmra.mxu1 %vm71_vm0, %v12387_v30 }
 0x575   :  { %v21907_v45 = vadd.f32 %v10773_v34, %v10222_v15  ;;  %v10225_v4 = vadd.f32 %v17023_v5, %v21602_v19  ;;  %17392 = vmatprep.mubr.msk.f32.mxu1 %vm71_vm0, %v12388_v50  ;;  %v12391_v19 = vld [vmem:[#allocation2 + $0x132] sm:$0xff] }
 0x576   :  { %v10073_v51 = vpop.f32.mrf.mxu1  ;;  %v10783_v7 = vpop.f32.mrf.mxu0 }
 0x577   :  { %v21911_v57 = vadd.f32 %v17127_v39, %v10225_v4  ;;  %v10224_v52 = vadd.f32 %v10073_v51, %v21607_v22  ;;  %v12392_v4 = vld [vmem:[#allocation2 + $0x162] sm:$0xff] }
 0x578   :  { %v17026_v58 = vpop.f32.mrf.mxu1  ;;  %v17130_v16 = vpop.f32.mrf.mxu0  ;;  %17393 = vmatmul.mubr.msk.f32.gmra.mxu1 %vm71_vm0, %v12389_v6 }
 0x579   :  { %v21915_v36 = vadd.f32 %v10783_v7, %v10224_v52  ;;  %v10227_v34 = vadd.f32 %v17026_v58, %v21613_v21  ;;  %17395 = vmatprep.mubr.msk.f32.mxu1 %vm71_vm0, %v12390_v26 }
 0x57a   :  { %v10083_v15 = vpop.f32.mrf.mxu1  ;;  %v10793_v30 = vpop.f32.mrf.mxu0 }
 0x57b   :  { %v21919_v5 = vadd.f32 %v17130_v16, %v10227_v34  ;;  %v10226_v39 = vadd.f32 %v10083_v15, %v21618_v25  ;;  %v12393_v16 = vld [vmem:[#allocation2 + $0x172] sm:$0xff]  ;;  %v12394_v34 = vld [vmem:[#allocation2 + $0x182] sm:$0xff] }
 0x57c   :  { %v17029_v22 = vpop.f32.mrf.mxu1  ;;  %v17133_v50 = vpop.f32.mrf.mxu0  ;;  %17396 = vmatmul.mubr.msk.f32.gmra.mxu1 %vm71_vm0, %v12391_v19  ;;  %v23334_v15 = vld [vmem:[#allocation88_spill] sm:$0xff] }
 0x57d   :  { %v21923_v51 = vadd.f32 %v10793_v30, %v10226_v39  ;;  %v10229_v7 = vadd.f32 %v17029_v22, %v21624_v54  ;;  %17398 = vmatprep.mubr.msk.f32.mxu1 %vm71_vm0, %v12392_v4  ;;  %v12395_v4 = vld [vmem:[#allocation2 + $0x192] sm:$0xff] }
 0x57e   :  { %v10093_v21 = vpop.f32.mrf.mxu1  ;;  %v10803_v52 = vpop.f32.mrf.mxu0 }
 0x57f   :  { %v21927_v6 = vadd.f32 %v17133_v50, %v10229_v7  ;;  %v10228_v58 = vadd.f32 %v10093_v21, %v21629_v10  ;;  %v12396_v21 = vld [vmem:[#allocation2 + $0x1a2] sm:$0xff] }
 0x580   :  { %v17032_v26 = vpop.f32.mrf.mxu1  ;;  %v17136_v25 = vpop.f32.mrf.mxu0  ;;  %17399 = vmatmul.mubr.msk.f32.gmra.mxu1 %vm71_vm0, %v12393_v16 }
 0x581   :  { %v21931_v19 = vadd.f32 %v10803_v52, %v10228_v58  ;;  %v10231_v30 = vadd.f32 %v17032_v26, %v23334_v15  ;;  %17401 = vmatprep.mubr.msk.f32.mxu1 %vm71_vm0, %v12394_v34  ;;  %v12397_v15 = vld [vmem:[#allocation2 + $0x1b2] sm:$0xff] }
 0x582   :  { %v10103_v54 = vpop.f32.mrf.mxu1  ;;  %v10813_v39 = vpop.f32.mrf.mxu0 }
 0x583   :  { %v21935_v22 = vadd.f32 %v17136_v25, %v10231_v30  ;;  %v10230_v50 = vadd.f32 %v10103_v54, %v21639_v59  ;;  %v12398_v54 = vld [vmem:[#allocation2 + $0x1c2] sm:$0xff] }
 0x584   :  { %v17035_v10 = vpop.f32.mrf.mxu1  ;;  %v17139_v7 = vpop.f32.mrf.mxu0  ;;  %17402 = vmatmul.mubr.msk.f32.gmra.mxu1 %vm71_vm0, %v12395_v4 }
 0x585   :  { %v21939_v16 = vadd.f32 %v10813_v39, %v10230_v50  ;;  %v10233_v52 = vadd.f32 %v17035_v10, %v21644_v41  ;;  %17404 = vmatprep.mubr.msk.f32.mxu1 %vm71_vm0, %v12396_v21  ;;  %v12399_v41 = vld [vmem:[#allocation2 + $0x1d2] sm:$0xff] }
 0x586   :  { %v10113_v58 = vpop.f32.mrf.mxu1  ;;  %v10823_v26 = vpop.f32.mrf.mxu0 }
 0x587   :  { %v21943_v34 = vadd.f32 %v17139_v7, %v10233_v52  ;;  %v10232_v25 = vadd.f32 %v10113_v58, %v21649_v60  ;;  %v23338_v7 = vld [vmem:[#allocation91_spill] sm:$0xff] }
 0x588   :  { %v17038_v59 = vpop.f32.mrf.mxu1  ;;  %v17142_v30 = vpop.f32.mrf.mxu0  ;;  %17405 = vmatmul.mubr.msk.f32.gmra.mxu1 %vm71_vm0, %v12397_v15 }
 0x589   :  { %23335 = vst [vmem:[#allocation96_spill] sm:$0xff] %v21943_v34  ;;  %v21947_v4 = vadd.f32 %v10823_v26, %v10232_v25  ;;  %v10235_v39 = vadd.f32 %v17038_v59, %v21654_v0  ;;  %17407 = vmatprep.mubr.msk.f32.mxu1 %vm71_vm0, %v12398_v54  ;;  %v12400_v34 = vld [vmem:[#allocation2 + $0x202] sm:$0xff]  ;;  %v23340_v26 = vld [vmem:[#allocation70_spill] sm:$0xff] }
 0x58a   :  { %v10123_v50 = vpop.f32.mrf.mxu1  ;;  %v10833_v10 = vpop.f32.mrf.mxu0 }
 0x58b   :  { %23336 = vst [vmem:[#allocation99_spill] sm:$0xff] %v21947_v4  ;;  %v21951_v21 = vadd.f32 %v17142_v30, %v10235_v39  ;;  %v10234_v52 = vadd.f32 %v10123_v50, %v23338_v7  ;;  %v23342_v4 = vld [vmem:[#allocation69_spill] sm:$0xff]  ;;  %v12401_v39 = vld [vmem:[#allocation2 + $0x212] sm:$0xff] }
 0x58c   :  { %v17041_v60 = vpop.f32.mrf.mxu1  ;;  %v17145_v58 = vpop.f32.mrf.mxu0  ;;  %17408 = vmatmul.mubr.msk.f32.gmra.mxu1 %vm71_vm0, %v12399_v41  ;;  %v12402_v7 = vld [vmem:[#allocation2 + $0x222] sm:$0xff] }
 0x58d   :  { %23337 = vst [vmem:[#allocation78_spill] sm:$0xff] %v21951_v21  ;;  %v21955_v15 = vadd.f32 %v10833_v10, %v10234_v52  ;;  %v10237_v25 = vadd.f32 %v17041_v60, %v23340_v26  ;;  %17410 = vmatprep.mubr.msk.f32.mxu1 %vm71_vm0, %v12400_v34  ;;  %v23344_v10 = vld [vmem:[#allocation90_spill] sm:$0xff] }
 0x58e   :  { %v10133_v0 = vpop.f32.mrf.mxu1  ;;  %v10843_v59 = vpop.f32.mrf.mxu0 }
 0x58f   :  { %23339 = vst [vmem:[#allocation76_spill] sm:$0xff] %v21955_v15  ;;  %v21959_v54 = vadd.f32 %v17145_v58, %v10237_v25  ;;  %v10236_v30 = vadd.f32 %v10133_v0, %v23342_v4  ;;  %v23346_v58 = vld [vmem:[#allocation93_spill] sm:$0xff] }
 0x590   :  { %v17044_v21 = vpop.f32.mrf.mxu1  ;;  %v17148_v50 = vpop.f32.mrf.mxu0  ;;  %17411 = vmatmul.mubr.msk.f32.gmra.mxu1 %vm71_vm0, %v12401_v39  ;;  %v12404_v15 = vld [vmem:[#allocation2 + $0x242] sm:$0xff] }
 0x591   :  { %23341 = vst [vmem:[#allocation98_spill] sm:$0xff] %v21959_v54  ;;  %v21963_v41 = vadd.f32 %v10843_v59, %v10236_v30  ;;  %v10239_v52 = vadd.f32 %v17044_v21, %v23344_v10  ;;  %17413 = vmatprep.mubr.msk.f32.mxu1 %vm71_vm0, %v12402_v7  ;;  %v12403_v54 = vld [vmem:[#allocation2 + $0x232] sm:$0xff]  ;;  %v23348_v59 = vld [vmem:[#allocation72_spill] sm:$0xff] }
 0x592   :  { %v10143_v60 = vpop.f32.mrf.mxu1  ;;  %v10853_v34 = vpop.f32.mrf.mxu0 }
 0x593   :  { %23343 = vst [vmem:[#allocation102_spill] sm:$0xff] %v21963_v41  ;;  %v21967_v26 = vadd.f32 %v17148_v50, %v10239_v52  ;;  %v10238_v25 = vadd.f32 %v10143_v60, %v23346_v58  ;;  %v23349_v50 = vld [vmem:[#allocation71_spill] sm:$0xff]  ;;  %v12406_v41 = vld [vmem:[#allocation2 + $0x262] sm:$0xff] }
 0x594   :  { %v17047_v4 = vpop.f32.mrf.mxu1  ;;  %v17151_v0 = vpop.f32.mrf.mxu0  ;;  %17414 = vmatmul.mubr.msk.f32.gmra.mxu1 %vm71_vm0, %v12403_v54 }
 0x595   :  { %23345 = vst [vmem:[#allocation13_spill] sm:$0xff] %v21967_v26  ;;  %v21971_v39 = vadd.f32 %v10853_v34, %v10238_v25  ;;  %v10241_v30 = vadd.f32 %v17047_v4, %v23348_v59  ;;  %17416 = vmatprep.mubr.msk.f32.mxu1 %vm71_vm0, %v12404_v15  ;;  %v12405_v26 = vld [vmem:[#allocation2 + $0x252] sm:$0xff]  ;;  %v23350_v34 = vld [vmem:[#allocation92_spill] sm:$0xff] }
 0x596   :  { %v10153_v21 = vpop.f32.mrf.mxu1  ;;  %v10863_v7 = vpop.f32.mrf.mxu0  ;;  %v12407_v4 = vld [vmem:[#allocation2 + $0x272] sm:$0xff] }
 0x597   :  { %23347 = vst [vmem:[#allocation79_spill] sm:$0xff] %v21971_v39  ;;  %v21975_v10 = vadd.f32 %v17151_v0, %v10241_v30  ;;  %v10240_v52 = vadd.f32 %v10153_v21, %v23349_v50  ;;  %v12408_v50 = vld [vmem:[#allocation2 + $0x2a2] sm:$0xff] }
 0x598   :  { %v17050_v60 = vpop.f32.mrf.mxu1  ;;  %v17154_v58 = vpop.f32.mrf.mxu0  ;;  %17417 = vmatmul.mubr.msk.f32.gmra.mxu1 %vm71_vm0, %v12405_v26 }
 0x599   :  { %v21979_v54 = vadd.f32 %v10863_v7, %v10240_v52  ;;  %v10243_v25 = vadd.f32 %v17050_v60, %v23350_v34  ;;  %17419 = vmatprep.mubr.msk.f32.mxu1 %vm71_vm0, %v12406_v41  ;;  %v23352_v7 = vld [vmem:[#allocation95_spill] sm:$0xff] }
 0x59a   :  { %v10163_v15 = vpop.f32.mrf.mxu1  ;;  %v10873_v59 = vpop.f32.mrf.mxu0 }
 0x59b   :  { %v21983_v39 = vadd.f32 %v17154_v58, %v10243_v25  ;;  %v10242_v0 = vadd.f32 %v10163_v15, %v21699_v23  ;;  %v12409_v25 = vld [vmem:[#allocation2 + $0x2b2] sm:$0xff] }
 0x59c   :  { %v17053_v30 = vpop.f32.mrf.mxu1  ;;  %v17157_v21 = vpop.f32.mrf.mxu0  ;;  %17420 = vmatmul.mubr.msk.f32.gmra.mxu1 %vm71_vm0, %v12407_v4  ;;  %v12410_v4 = vld [vmem:[#allocation2 + $0x2c2] sm:$0xff] }
 0x59d   :  { %23351 = vst [vmem:[#allocation100_spill] sm:$0xff] %v21983_v39  ;;  %v21987_v26 = vadd.f32 %v10873_v59, %v10242_v0  ;;  %v10245_v52 = vadd.f32 %v17053_v30, %v23352_v7  ;;  %17422 = vmatprep.mubr.msk.f32.mxu1 %vm71_vm0, %v12408_v50  ;;  %v12412_v7 = vld [vmem:[#allocation2 + $0x2e2] sm:$0xff] }
 0x59e   :  { %v10173_v60 = vpop.f32.mrf.mxu1  ;;  %v10883_v41 = vpop.f32.mrf.mxu0 }
 0x59f   :  { %v21991_v34 = vadd.f32 %v17157_v21, %v10245_v52  ;;  %v10244_v58 = vadd.f32 %v10173_v60, %v21709_v38  ;;  %v12411_v21 = vld [vmem:[#allocation2 + $0x2d2] sm:$0xff] }
 0x5a0   :  { %v17168_v39 = vpop.f32.mrf.mxu1  ;;  %v21994_v23 = vpop.f32.mrf.mxu0  ;;  %17423 = vmatmul.mubr.msk.f32.gmra.mxu1 %vm71_vm0, %v12409_v25  ;;  %v12413_v60 = vld [vmem:[#allocation2 + $0x2f2] sm:$0xff] }
 0x5a1   :  { %v21997_v15 = vadd.f32 %v10883_v41, %v10244_v58  ;;  %v22000_v59 = vadd.f32 %v17168_v39, %v21714_v47  ;;  %17425 = vmatprep.mubr.msk.f32.mxu1 %vm71_vm0, %v12410_v4  ;;  %v12414_v58 = vld [vmem:[#allocation2 + $0x302] sm:$0xff] }
 0x5a2   :  { %v11283_v0 = vpop.f32.mrf.mxu1  ;;  %v22006_v38 = vpop.f32.mrf.mxu0 }
 0x5a3   :  { %v22004_v30 = vadd.f32 %v11283_v0, %v21719_v18 }
 0x5a4   :  { %v17171_v50 = vpop.f32.mrf.mxu1  ;;  %17426 = vmatmul.mubr.msk.f32.gmra.mxu1 %vm71_vm0, %v12411_v21  ;;  %v22016_v41 = vpop.f32.mrf.mxu0 }
 0x5a5   :  { %v22010_v52 = vadd.f32 %v17171_v50, %v21724_v53  ;;  %17428 = vmatprep.mubr.msk.f32.mxu1 %vm71_vm0, %v12412_v7  ;;  %v12415_v53 = vld [vmem:[#allocation2 + $0x312] sm:$0xff]  ;;  %v12416_v50 = vld [vmem:[#allocation2 + $0x342] sm:$0xff] }
 0x5a6   :  { %v11293_v47 = vpop.f32.mrf.mxu1  ;;  %v22026_v21 = vpop.f32.mrf.mxu0  ;;  %v23354_v7 = vld [vmem:[#allocation73_spill] sm:$0xff] }
 0x5a7   :  { %v22014_v39 = vadd.f32 %v11293_v47, %v21729_v12 }
 0x5a8   :  { %v17174_v18 = vpop.f32.mrf.mxu1  ;;  %17429 = vmatmul.mubr.msk.f32.gmra.mxu1 %vm71_vm0, %v12413_v60 }
 0x5a9   :  { %v22020_v25 = vadd.f32 %v17174_v18, %v21734_v63  ;;  %17431 = vmatprep.mubr.msk.f32.mxu1 %vm71_vm0, %v12414_v58  ;;  %v12417_v18 = vld [vmem:[#allocation2 + $0x352] sm:$0xff]  ;;  %v22036_v58 = vpop.f32.mrf.mxu0 }
 0x5aa   :  { %v11303_v4 = vpop.f32.mrf.mxu1 }
 0x5ab   :  { %v22024_v0 = vadd.f32 %v11303_v4, %v21739_v43  ;;  %v12418_v4 = vld [vmem:[#allocation2 + $0x362] sm:$0xff] }
 0x5ac   :  { %v17177_v12 = vpop.f32.mrf.mxu1  ;;  %17432 = vmatmul.mubr.msk.f32.gmra.mxu1 %vm71_vm0, %v12415_v53 }
 0x5ad   :  { %23353 = vst [vmem:[#allocation105_spill] sm:$0xff] %v22024_v0  ;;  %v22030_v47 = vadd.f32 %v17177_v12, %v23354_v7  ;;  %17434 = vmatprep.mubr.msk.f32.mxu1 %vm71_vm0, %v12416_v50  ;;  %v12419_v50 = vld [vmem:[#allocation2 + $0x372] sm:$0xff]  ;;  %v22046_v7 = vpop.f32.mrf.mxu0 }
 0x5ae   :  { %v11313_v63 = vpop.f32.mrf.mxu1 }
 0x5af   :  { %v22034_v60 = vadd.f32 %v11313_v63, %v21749_v20  ;;  %v12420_v63 = vld [vmem:[#allocation2 + $0x382] sm:$0xff] }
 0x5b0   :  { %v17180_v43 = vpop.f32.mrf.mxu1  ;;  %17435 = vmatmul.mubr.msk.f32.gmra.mxu1 %vm71_vm0, %v12417_v18 }
 0x5b1   :  { %23355 = vst [vmem:[#allocation15_spill] sm:$0xff] %v22034_v60  ;;  %v22040_v0 = vadd.f32 %v17180_v43, %v21754_v24  ;;  %17437 = vmatprep.mubr.msk.f32.mxu1 %vm71_vm0, %v12418_v4  ;;  %v12421_v43 = vld [vmem:[#allocation2 + $0x392] sm:$0xff]  ;;  %v22056_v4 = vpop.f32.mrf.mxu0 }
 0x5b2   :  { %v11323_v53 = vpop.f32.mrf.mxu1 }
 0x5b3   :  { %v22044_v12 = vadd.f32 %v11323_v53, %v21759_v48  ;;  %v12422_v53 = vld [vmem:[#allocation2 + $0x3a2] sm:$0xff] }
 0x5b4   :  { %v17183_v20 = vpop.f32.mrf.mxu1  ;;  %17438 = vmatmul.mubr.msk.f32.gmra.mxu1 %vm71_vm0, %v12419_v50 }
 0x5b5   :  { %23356 = vst [vmem:[#allocation14_spill] sm:$0xff] %v22044_v12  ;;  %v22050_v60 = vadd.f32 %v17183_v20, %v21764_v1  ;;  %17440 = vmatprep.mubr.msk.f32.mxu1 %vm71_vm0, %v12420_v63  ;;  %v12423_v1 = vld [vmem:[#allocation2 + $0x3b2] sm:$0xff]  ;;  %v22066_v63 = vpop.f32.mrf.mxu0 }
 0x5b6   :  { %v11333_v24 = vpop.f32.mrf.mxu1 }
 0x5b7   :  { %23357 = vst [vmem:[#allocation103_spill] sm:$0xff] %v22050_v60  ;;  %v22054_v18 = vadd.f32 %v11333_v24, %v21769_v56  ;;  %v12424_v24 = vld [vmem:[#allocation2 + $0x3e2] sm:$0xff] }
 0x5b8   :  { %v17186_v48 = vpop.f32.mrf.mxu1  ;;  %17441 = vmatmul.mubr.msk.f32.gmra.mxu1 %vm71_vm0, %v12421_v43 }
 0x5b9   :  { %23358 = vst [vmem:[#allocation108_spill] sm:$0xff] %v22054_v18  ;;  %v22060_v12 = vadd.f32 %v17186_v48, %v21774_v11  ;;  %17443 = vmatprep.mubr.msk.f32.mxu1 %vm71_vm0, %v12422_v53  ;;  %v23360_v18 = vld [vmem:[#allocation74_spill] sm:$0xff]  ;;  %v22076_v53 = vpop.f32.mrf.mxu0 }
 0x5ba   :  { %v11343_v50 = vpop.f32.mrf.mxu1  ;;  %v12425_v48 = vld [vmem:[#allocation2 + $0x3f2] sm:$0xff] }
 0x5bb   :  { %v22064_v20 = vadd.f32 %v11343_v50, %v21779_v49  ;;  %v12426_v50 = vld [vmem:[#allocation2 + $0x402] sm:$0xff] }
 0x5bc   :  { %v17189_v56 = vpop.f32.mrf.mxu1  ;;  %17444 = vmatmul.mubr.msk.f32.gmra.mxu1 %vm71_vm0, %v12423_v1 }
 0x5bd   :  { %23359 = vst [vmem:[#allocation106_spill] sm:$0xff] %v22064_v20  ;;  %v22070_v60 = vadd.f32 %v17189_v56, %v23360_v18  ;;  %17446 = vmatprep.mubr.msk.f32.mxu1 %vm71_vm0, %v12424_v24  ;;  %v12427_v56 = vld [vmem:[#allocation2 + $0x412] sm:$0xff]  ;;  %v22086_v24 = vpop.f32.mrf.mxu0 }
 0x5be   :  { %v11353_v11 = vpop.f32.mrf.mxu1 }
 0x5bf   :  { %v22074_v43 = vadd.f32 %v11353_v11, %v21789_v37  ;;  %v12428_v11 = vld [vmem:[#allocation2 + $0x422] sm:$0xff] }
 0x5c0   :  { %v17192_v49 = vpop.f32.mrf.mxu1  ;;  %17447 = vmatmul.mubr.msk.f32.gmra.mxu1 %vm71_vm0, %v12425_v48 }
 0x5c1   :  { %23361 = vst [vmem:[#allocation38_spill] sm:$0xff] %v22074_v43  ;;  %v22080_v20 = vadd.f32 %v17192_v49, %v21794_v9  ;;  %17449 = vmatprep.mubr.msk.f32.mxu1 %vm71_vm0, %v12426_v50  ;;  %v12429_v49 = vld [vmem:[#allocation2 + $0x432] sm:$0xff]  ;;  %v22096_v50 = vpop.f32.mrf.mxu0 }
 0x5c2   :  { %v11363_v18 = vpop.f32.mrf.mxu1 }
 0x5c3   :  { %23362 = vst [vmem:[#allocation37_spill] sm:$0xff] %v22080_v20  ;;  %v22084_v1 = vadd.f32 %v11363_v18, %v21799_v46  ;;  %v12430_v18 = vld [vmem:[#allocation2 + $0x442] sm:$0xff] }
 0x5c4   :  { %v17195_v37 = vpop.f32.mrf.mxu1  ;;  %17450 = vmatmul.mubr.msk.f32.gmra.mxu1 %vm71_vm0, %v12427_v56 }
 0x5c5   :  { %23363 = vst [vmem:[#allocation80_spill] sm:$0xff] %v22084_v1  ;;  %v22090_v43 = vadd.f32 %v17195_v37, %v21804_v42  ;;  %17452 = vmatprep.mubr.msk.f32.mxu1 %vm71_vm0, %v12428_v11  ;;  %v12431_v42 = vld [vmem:[#allocation2 + $0x452] sm:$0xff] }
 0x5c6   :  { %v11373_v9 = vpop.f32.mrf.mxu1  ;;  %v23367_v37 = vld [vmem:[#allocation94_spill] sm:$0xff] }
 0x5c7   :  { %23364 = vst [vmem:[#allocation40_spill] sm:$0xff] %v22090_v43  ;;  %v22094_v48 = vadd.f32 %v11373_v9, %v21809_v31  ;;  %v22106_v43 = vpop.f32.mrf.mxu0  ;;  %v12432_v9 = vld [vmem:[#allocation2 + $0x482] sm:$0xff] }
 0x5c8   :  { %v17198_v46 = vpop.f32.mrf.mxu1  ;;  %17453 = vmatmul.mubr.msk.f32.gmra.mxu1 %vm71_vm0, %v12429_v49 }
 0x5c9   :  { %23365 = vst [vmem:[#allocation17_spill] sm:$0xff] %v22094_v48  ;;  %v22100_v1 = vadd.f32 %v17198_v46, %v21814_v33  ;;  %17455 = vmatprep.mubr.msk.f32.mxu1 %vm71_vm0, %v12430_v18  ;;  %v23369_v48 = vld [vmem:[#allocation97_spill] sm:$0xff]  ;;  %v12433_v46 = vld [vmem:[#allocation2 + $0x492] sm:$0xff]  ;;  %v22116_v18 = vpop.f32.mrf.mxu0 }
 0x5ca   :  { %v11383_v56 = vpop.f32.mrf.mxu1 }
 0x5cb   :  { %23366 = vst [vmem:[#allocation39_spill] sm:$0xff] %v22100_v1  ;;  %v22104_v11 = vadd.f32 %v11383_v56, %v23367_v37  ;;  %v12434_v37 = vld [vmem:[#allocation2 + $0x4a2] sm:$0xff] }
 0x5cc   :  { %v17201_v31 = vpop.f32.mrf.mxu1  ;;  %17456 = vmatmul.mubr.msk.f32.gmra.mxu1 %vm71_vm0, %v12431_v42 }
 0x5cd   :  { %23368 = vst [vmem:[#allocation19_spill] sm:$0xff] %v22104_v11  ;;  %v22110_v20 = vadd.f32 %v17201_v31, %v23369_v48  ;;  %17458 = vmatprep.mubr.msk.f32.mxu1 %vm71_vm0, %v12432_v9  ;;  %v23371_v11 = vld [vmem:[#allocation77_spill] sm:$0xff]  ;;  %v12435_v31 = vld [vmem:[#allocation2 + $0x4b2] sm:$0xff]  ;;  %v22126_v9 = vpop.f32.mrf.mxu0 }
 0x5ce   :  { %v11393_v33 = vpop.f32.mrf.mxu1 }
 0x5cf   :  { %v22114_v49 = vadd.f32 %v11393_v33, %v21829_v2  ;;  %v12436_v33 = vld [vmem:[#allocation2 + $0x4c2] sm:$0xff] }
 0x5d0   :  { %v17204_v56 = vpop.f32.mrf.mxu1  ;;  %17459 = vmatmul.mubr.msk.f32.gmra.mxu1 %vm71_vm0, %v12433_v46 }
 0x5d1   :  { %23370 = vst [vmem:[#allocation16_spill] sm:$0xff] %v22114_v49  ;;  %v22120_v1 = vadd.f32 %v17204_v56, %v23371_v11  ;;  %17461 = vmatprep.mubr.msk.f32.mxu1 %vm71_vm0, %v12434_v37  ;;  %v12437_v56 = vld [vmem:[#allocation2 + $0x4d2] sm:$0xff]  ;;  %v22136_v37 = vpop.f32.mrf.mxu0 }
 0x5d2   :  { %v11403_v48 = vpop.f32.mrf.mxu1 }
 0x5d3   :  { %23372 = vst [vmem:[#allocation42_spill] sm:$0xff] %v22120_v1  ;;  %v22124_v42 = vadd.f32 %v11403_v48, %v21839_v8  ;;  %v12438_v48 = vld [vmem:[#allocation2 + $0x4e2] sm:$0xff] }
 0x5d4   :  { %v17207_v2 = vpop.f32.mrf.mxu1  ;;  %17462 = vmatmul.mubr.msk.f32.gmra.mxu1 %vm71_vm0, %v12435_v31 }
 0x5d5   :  { %23373 = vst [vmem:[#allocation41_spill] sm:$0xff] %v22124_v42  ;;  %v22130_v49 = vadd.f32 %v17207_v2, %v21844_v3  ;;  %17464 = vmatprep.mubr.msk.f32.mxu1 %vm71_vm0, %v12436_v33  ;;  %v23375_v42 = vld [vmem:[#allocation75_spill] sm:$0xff]  ;;  %v22146_v33 = vpop.f32.mrf.mxu0 }
 0x5d6   :  { %v11413_v11 = vpop.f32.mrf.mxu1  ;;  %v12439_v3 = vld [vmem:[#allocation2 + $0x4f2] sm:$0xff] }
 0x5d7   :  { %v22134_v46 = vadd.f32 %v11413_v11, %v21849_v61 }
 0x5d8   :  { %v17210_v8 = vpop.f32.mrf.mxu1  ;;  %17465 = vmatmul.mubr.msk.f32.gmra.mxu1 %vm71_vm0, %v12437_v56 }
 0x5d9   :  { %23374 = vst [vmem:[#allocation18_spill] sm:$0xff] %v22134_v46  ;;  %v22140_v1 = vadd.f32 %v17210_v8, %v23375_v42  ;;  %17467 = vmatprep.mubr.msk.f32.mxu1 %vm71_vm0, %v12438_v48  ;;  %v22155_v42 = vpop.f32.mrf.mxu0 }
 0x5da   :  { %v11423_v31 = vpop.f32.mrf.mxu1 }
 0x5db   :  { %v22144_v2 = vadd.f32 %v11423_v31, %v21859_v29 }
 0x5dc   :  { %v17213_v61 = vpop.f32.mrf.mxu1  ;;  %17468 = vmatmul.mubr.msk.f32.gmra.mxu1 %vm71_vm0, %v12439_v3 }
 0x5dd   :  { %23376 = vst [vmem:[#allocation44_spill] sm:$0xff] %v22144_v2  ;;  %v22150_v11 = vadd.f32 %v17213_v61, %v21863_v28  ;;  %v22163_v2 = vpop.f32.mrf.mxu0 }
 0x5de   :  { %v11433_v56 = vpop.f32.mrf.mxu1 }
 0x5df   :  { %v22153_v46 = vadd.f32 %v11433_v56, %v21867_v17  ;;  %v22171_v56 = vpop.f32.mrf.mxu0 }
 0x5e0   :  { %v17216_v8 = vpop.f32.mrf.mxu1 }
 0x5e1   :  { %23377 = vst [vmem:[#allocation21_spill] sm:$0xff] %v22153_v46  ;;  %v22158_v48 = vadd.f32 %v17216_v8, %v21871_v13 }
 0x5e2   :  { %v11443_v29 = vpop.f32.mrf.mxu1 }
 0x5e3   :  { %v22161_v31 = vadd.f32 %v11443_v29, %v21875_v62  ;;  %v22179_v29 = vpop.f32.mrf.mxu0 }
 0x5e4   :  { %v17219_v3 = vpop.f32.mrf.mxu1 }
 0x5e5   :  { %23378 = vst [vmem:[#allocation43_spill] sm:$0xff] %v22161_v31  ;;  %v22166_v28 = vadd.f32 %v17219_v3, %v21879_v35 }
 0x5e6   :  { %v11453_v61 = vpop.f32.mrf.mxu1 }
 0x5e7   :  { %v22169_v17 = vadd.f32 %v11453_v61, %v21883_v44  ;;  %v22187_v61 = vpop.f32.mrf.mxu0 }
 0x5e8   :  { %v17222_v46 = vpop.f32.mrf.mxu1 }
 0x5e9   :  { %23379 = vst [vmem:[#allocation23_spill] sm:$0xff] %v22169_v17  ;;  %v22174_v13 = vadd.f32 %v17222_v46, %v21887_v55 }
 0x5ea   :  { %v11463_v8 = vpop.f32.mrf.mxu1 }
 0x5eb   :  { %v22177_v62 = vadd.f32 %v11463_v8, %v21891_v14  ;;  %v22195_v8 = vpop.f32.mrf.mxu0 }
 0x5ec   :  { %v17225_v31 = vpop.f32.mrf.mxu1 }
 0x5ed   :  { %23380 = vst [vmem:[#allocation20_spill] sm:$0xff] %v22177_v62  ;;  %v22182_v35 = vadd.f32 %v17225_v31, %v21895_v40 }
 0x5ee   :  { %v11473_v3 = vpop.f32.mrf.mxu1 }
 0x5ef   :  { %23381 = vst [vmem:[#allocation46_spill] sm:$0xff] %v22182_v35  ;;  %v22185_v44 = vadd.f32 %v11473_v3, %v21899_v32  ;;  %v22203_v3 = vpop.f32.mrf.mxu0  ;;  %v23405_v35 = vld [vmem:[#allocation13_spill] sm:$0xff] }
 0x5f0   :  { %v17228_v17 = vpop.f32.mrf.mxu1 }
 0x5f1   :  { %23382 = vst [vmem:[#allocation45_spill] sm:$0xff] %v22185_v44  ;;  %v22190_v55 = vadd.f32 %v17228_v17, %v21903_v27 }
 0x5f2   :  { %v11483_v46 = vpop.f32.mrf.mxu1 }
 0x5f3   :  { %23383 = vst [vmem:[#allocation22_spill] sm:$0xff] %v22190_v55  ;;  %v22193_v14 = vadd.f32 %v11483_v46, %v21907_v45  ;;  %v22211_v46 = vpop.f32.mrf.mxu0  ;;  %v23401_v55 = vld [vmem:[#allocation98_spill] sm:$0xff] }
 0x5f4   :  { %v17231_v62 = vpop.f32.mrf.mxu1 }
 0x5f5   :  { %23384 = vst [vmem:[#allocation48_spill] sm:$0xff] %v22193_v14  ;;  %v22198_v40 = vadd.f32 %v17231_v62, %v21911_v57 }
 0x5f6   :  { %v11493_v31 = vpop.f32.mrf.mxu1 }
 0x5f7   :  { %23385 = vst [vmem:[#allocation25_spill] sm:$0xff] %v22198_v40  ;;  %v22201_v32 = vadd.f32 %v11493_v31, %v21915_v36  ;;  %v22219_v31 = vpop.f32.mrf.mxu0  ;;  %v23397_v40 = vld [vmem:[#allocation78_spill] sm:$0xff] }
 0x5f8   :  { %v17234_v44 = vpop.f32.mrf.mxu1 }
 0x5f9   :  { %23386 = vst [vmem:[#allocation47_spill] sm:$0xff] %v22201_v32  ;;  %v22206_v27 = vadd.f32 %v17234_v44, %v21919_v5 }
 0x5fa   :  { %v11503_v17 = vpop.f32.mrf.mxu1 }
 0x5fb   :  { %23387 = vst [vmem:[#allocation27_spill] sm:$0xff] %v22206_v27  ;;  %v22209_v45 = vadd.f32 %v11503_v17, %v21923_v51  ;;  %v22227_v17 = vpop.f32.mrf.mxu0  ;;  %v23393_v27 = vld [vmem:[#allocation96_spill] sm:$0xff] }
 0x5fc   :  { %v17237_v14 = vpop.f32.mrf.mxu1 }
 0x5fd   :  { %23388 = vst [vmem:[#allocation24_spill] sm:$0xff] %v22209_v45  ;;  %v22214_v57 = vadd.f32 %v17237_v14, %v21927_v6 }
 0x5fe   :  { %v11513_v62 = vpop.f32.mrf.mxu1 }
 0x5ff   :  { %23389 = vst [vmem:[#allocation50_spill] sm:$0xff] %v22214_v57  ;;  %v22217_v36 = vadd.f32 %v11513_v62, %v21931_v19  ;;  %v23395_v57 = vld [vmem:[#allocation99_spill] sm:$0xff]  ;;  %v22235_v62 = vpop.f32.mrf.mxu0 }
 0x600   :  { %v17240_v32 = vpop.f32.mrf.mxu1 }
 0x601   :  { %23390 = vst [vmem:[#allocation49_spill] sm:$0xff] %v22217_v36  ;;  %v22222_v5 = vadd.f32 %v17240_v32, %v21935_v22 }
 0x602   :  { %v11523_v44 = vpop.f32.mrf.mxu1 }
 0x603   :  { %23391 = vst [vmem:[#allocation26_spill] sm:$0xff] %v22222_v5  ;;  %v22225_v51 = vadd.f32 %v11523_v44, %v21939_v16  ;;  %v23399_v5 = vld [vmem:[#allocation76_spill] sm:$0xff]  ;;  %v22243_v44 = vpop.f32.mrf.mxu0 }
 0x604   :  { %v17243_v45 = vpop.f32.mrf.mxu1 }
 0x605   :  { %23392 = vst [vmem:[#allocation52_spill] sm:$0xff] %v22225_v51  ;;  %v22230_v6 = vadd.f32 %v17243_v45, %v23393_v27 }
 0x606   :  { %v11533_v14 = vpop.f32.mrf.mxu1 }
 0x607   :  { %23394 = vst [vmem:[#allocation29_spill] sm:$0xff] %v22230_v6  ;;  %v22233_v19 = vadd.f32 %v11533_v14, %v23395_v57  ;;  %v23403_v6 = vld [vmem:[#allocation102_spill] sm:$0xff]  ;;  %v22251_v14 = vpop.f32.mrf.mxu0 }
 0x608   :  { %v17246_v36 = vpop.f32.mrf.mxu1 }
 0x609   :  { %23396 = vst [vmem:[#allocation51_spill] sm:$0xff] %v22233_v19  ;;  %v22238_v22 = vadd.f32 %v17246_v36, %v23397_v40 }
 0x60a   :  { %v11543_v32 = vpop.f32.mrf.mxu1 }
 0x60b   :  { %23398 = vst [vmem:[#allocation101_spill] sm:$0xff] %v22238_v22  ;;  %v22241_v16 = vadd.f32 %v11543_v32, %v23399_v5  ;;  %v23406_v22 = vld [vmem:[#allocation79_spill] sm:$0xff]  ;;  %v22259_v32 = vpop.f32.mrf.mxu0 }
 0x60c   :  { %v17249_v51 = vpop.f32.mrf.mxu1 }
 0x60d   :  { %23400 = vst [vmem:[#allocation28_spill] sm:$0xff] %v22241_v16  ;;  %v22246_v27 = vadd.f32 %v17249_v51, %v23401_v55 }
 0x60e   :  { %v11553_v45 = vpop.f32.mrf.mxu1 }
 0x60f   :  { %23402 = vst [vmem:[#allocation31_spill] sm:$0xff] %v22246_v27  ;;  %v22249_v57 = vadd.f32 %v11553_v45, %v23403_v6  ;;  %v22267_v45 = vpop.f32.mrf.mxu0  ;;  %v23410_v27 = vld [vmem:[#allocation100_spill] sm:$0xff] }
 0x610   :  { %v17252_v19 = vpop.f32.mrf.mxu1 }
 0x611   :  { %23404 = vst [vmem:[#allocation104_spill] sm:$0xff] %v22249_v57  ;;  %v22254_v40 = vadd.f32 %v17252_v19, %v23405_v35 }
 0x612   :  { %v11563_v36 = vpop.f32.mrf.mxu1 }
 0x613   :  { %v22257_v5 = vadd.f32 %v11563_v36, %v23406_v22  ;;  %v22275_v36 = vpop.f32.mrf.mxu0 }
 0x614   :  { %v17255_v16 = vpop.f32.mrf.mxu1 }
 0x615   :  { %23407 = vst [vmem:[#allocation53_spill] sm:$0xff] %v22257_v5  ;;  %v22262_v55 = vadd.f32 %v17255_v16, %v21975_v10 }
 0x616   :  { %v11573_v51 = vpop.f32.mrf.mxu1 }
 0x617   :  { %23408 = vst [vmem:[#allocation54_spill] sm:$0xff] %v22262_v55  ;;  %v22265_v6 = vadd.f32 %v11573_v51, %v21979_v54  ;;  %v12313_v54 = vadd.f32 %v21994_v23, %v22000_v59  ;;  %v12314_v59 = vadd.f32 %v22026_v21, %v22014_v39  ;;  %v23415_v21 = vld [vmem:[#allocation105_spill] sm:$0xff] }
 0x618   :  { %v17258_v57 = vpop.f32.mrf.mxu1 }
 0x619   :  { %23409 = vst [vmem:[#allocation30_spill] sm:$0xff] %v22265_v6  ;;  %v22270_v35 = vadd.f32 %v17258_v57, %v23410_v27  ;;  %v22285_v6 = vpop.f32.mrf.mxu0  ;;  %v22287_v57 = vld [vmem:[#allocation8] ss:$0 sm:$0xff] }
 0x61a   :  { %v11583_v19 = vpop.f32.mrf.mxu1 }
 0x61b   :  { %23411 = vst [vmem:[#allocation107_spill] sm:$0xff] %v22270_v35  ;;  %v22273_v22 = vadd.f32 %v11583_v19, %v21987_v26  ;;  %v12312_v26 = vadd.f32 %v22006_v38, %v22004_v30  ;;  %v22294_v23 = vpop.f32.mrf.mxu0  ;;  %v12317_v30 = vadd.f32 %v22036_v58, %v22020_v25 }
 0x61c   :  { %v17261_v5 = vpop.f32.mrf.mxu1 }
 0x61d   :  { %23412 = vst [vmem:[#allocation33_spill] sm:$0xff] %v22273_v22  ;;  %v22278_v10 = vadd.f32 %v17261_v5, %v21991_v34  ;;  %v12315_v34 = vadd.f32 %v22016_v41, %v22010_v52 }
 0x61e   :  { %v11593_v16 = vpop.f32.mrf.mxu1 }
 0x61f   :  { %23413 = vst [vmem:[#allocation56_spill] sm:$0xff] %v22278_v10  ;;  %v22283_v51 = vadd.f32 %v11593_v16, %v21997_v15 }
 0x620   :  { %v17376_v27 = vpop.f32.mrf.mxu1 }
 0x621   :  { %23414 = vst [vmem:[#allocation55_spill] sm:$0xff] %v22283_v51  ;;  %v13023_v19 = vadd.f32 %v17376_v27, %v12313_v54 }
 0x622   :  { %v12703_v22 = vpop.f32.mrf.mxu1 }
 0x623   :  { %v13094_v5 = vadd.f32 %v22287_v57, %v13023_v19  ;;  %v13022_v10 = vadd.f32 %v12703_v22, %v12312_v26  ;;  %v22306_v22 = vpop.f32.mrf.mxu0 }
 0x624   :  { %v17379_v15 = vpop.f32.mrf.mxu1 }
 0x625   :  { %v13158_v16 = vmax.f32 %v13094_v5, 0.0  ;;  %v13093_v51 = vadd.f32 %v22287_v57, %v13022_v10  ;;  %v13025_v35 = vadd.f32 %v17379_v15, %v12315_v34  ;;  %v12316_v10 = vadd.f32 %v22046_v7, %v23415_v21  ;;  %v22322_v26 = vpop.f32.mrf.mxu0  ;;  %v23416_v34 = vld [vmem:[#allocation15_spill] sm:$0xff] }
 0x626   :  { %v12713_v55 = vpop.f32.mrf.mxu1  ;;  %v12318_v5 = vadd.f32 %v22066_v63, %v23416_v34 }
 0x627   :  { %13222 = vst.msk [vmem:[%s22772_s5 + $0x8] sm:$0xff] %vm71_vm0, %v13158_v16  ;;  %v13157_v38 = vmax.f32 %v13093_v51, 0.0  ;;  %v13096_v52 = vadd.f32 %v22287_v57, %v13025_v35  ;;  %v13024_v41 = vadd.f32 %v12713_v55, %v12314_v59  ;;  %v12319_v35 = vadd.f32 %v22056_v4, %v22030_v47 }
 0x628   :  { %v17382_v39 = vpop.f32.mrf.mxu1  ;;  %v12321_v16 = vadd.f32 %v22076_v53, %v22040_v0 }
 0x629   :  { %13221 = vst.msk [vmem:[%s22772_s5] sm:$0xff] %vm71_vm0, %v13157_v38  ;;  %v13160_v25 = vmax.f32 %v13096_v52, 0.0  ;;  %v13095_v58 = vadd.f32 %v22287_v57, %v13024_v41  ;;  %v13027_v54 = vadd.f32 %v17382_v39, %v12317_v30  ;;  %v22338_v52 = vpop.f32.mrf.mxu0  ;;  %v23417_v39 = vld [vmem:[#allocation14_spill] sm:$0xff] }
 0x62a   :  { %v12723_v27 = vpop.f32.mrf.mxu1  ;;  %v12320_v21 = vadd.f32 %v22086_v24, %v23417_v39 }
 0x62b   :  { %13224 = vst.msk [vmem:[%s22772_s5 + $0x18] sm:$0xff] %vm71_vm0, %v13160_v25  ;;  %v13159_v55 = vmax.f32 %v13095_v58, 0.0  ;;  %v13098_v7 = vadd.f32 %v22287_v57, %v13027_v54  ;;  %v13026_v51 = vadd.f32 %v12723_v27, %v12316_v10  ;;  %v23418_v58 = vld [vmem:[#allocation103_spill] sm:$0xff] }
 0x62c   :  { %v17385_v19 = vpop.f32.mrf.mxu1  ;;  %v12323_v54 = vadd.f32 %v22096_v50, %v23418_v58  ;;  %v23421_v58 = vld [vmem:[#allocation38_spill] sm:$0xff] }
 0x62d   :  { %13223 = vst.msk [vmem:[%s22772_s5 + $0x10] sm:$0xff] %vm71_vm0, %v13159_v55  ;;  %v13162_v47 = vmax.f32 %v13098_v7, 0.0  ;;  %v13097_v4 = vadd.f32 %v22287_v57, %v13026_v51  ;;  %v13029_v15 = vadd.f32 %v17385_v19, %v12319_v35  ;;  %v22354_v55 = vpop.f32.mrf.mxu0  ;;  %v23419_v51 = vld [vmem:[#allocation108_spill] sm:$0xff] }
 0x62e   :  { %v12733_v59 = vpop.f32.mrf.mxu1  ;;  %v12322_v19 = vadd.f32 %v22106_v43, %v23419_v51 }
 0x62f   :  { %13226 = vst.msk [vmem:[%s22772_s5 + $0x28] sm:$0xff] %vm71_vm0, %v13162_v47  ;;  %v13161_v30 = vmax.f32 %v13097_v4, 0.0  ;;  %v13100_v63 = vadd.f32 %v22287_v57, %v13029_v15  ;;  %v13028_v38 = vadd.f32 %v12733_v59, %v12318_v5  ;;  %v12325_v4 = vadd.f32 %v22116_v18, %v22060_v12 }
 0x630   :  { %v17388_v41 = vpop.f32.mrf.mxu1 }
 0x631   :  { %13225 = vst.msk [vmem:[%s22772_s5 + $0x20] sm:$0xff] %vm71_vm0, %v13161_v30  ;;  %v13164_v0 = vmax.f32 %v13100_v63, 0.0  ;;  %v13099_v53 = vadd.f32 %v22287_v57, %v13028_v38  ;;  %v13031_v10 = vadd.f32 %v17388_v41, %v12321_v16  ;;  %v22370_v16 = vpop.f32.mrf.mxu0  ;;  %v23420_v63 = vld [vmem:[#allocation106_spill] sm:$0xff] }
 0x632   :  { %v12743_v25 = vpop.f32.mrf.mxu1  ;;  %v12324_v38 = vadd.f32 %v22126_v9, %v23420_v63 }
 0x633   :  { %13228 = vst.msk [vmem:[%s22772_s5 + $0x38] sm:$0xff] %vm71_vm0, %v13164_v0  ;;  %v13163_v27 = vmax.f32 %v13099_v53, 0.0  ;;  %v13102_v24 = vadd.f32 %v22287_v57, %v13031_v10  ;;  %v13030_v35 = vadd.f32 %v12743_v25, %v12320_v21  ;;  %v12327_v21 = vadd.f32 %v22136_v37, %v22070_v60  ;;  %v22386_v10 = vpop.f32.mrf.mxu0 }
 0x634   :  { %v17391_v7 = vpop.f32.mrf.mxu1 }
 0x635   :  { %13227 = vst.msk [vmem:[%s22772_s5 + $0x30] sm:$0xff] %vm71_vm0, %v13163_v27  ;;  %v13166_v50 = vmax.f32 %v13102_v24, 0.0  ;;  %v13101_v34 = vadd.f32 %v22287_v57, %v13030_v35  ;;  %v13033_v5 = vadd.f32 %v17391_v7, %v12323_v54  ;;  %v12326_v54 = vadd.f32 %v22146_v33, %v23421_v58  ;;  %v23422_v35 = vld [vmem:[#allocation37_spill] sm:$0xff] }
 0x636   :  { %v12753_v47 = vpop.f32.mrf.mxu1  ;;  %v12329_v7 = vadd.f32 %v22155_v42, %v23422_v35 }
 0x637   :  { %13230 = vst.msk [vmem:[%s22772_s5 + $0x48] sm:$0xff] %vm71_vm0, %v13166_v50  ;;  %v13165_v15 = vmax.f32 %v13101_v34, 0.0  ;;  %v13104_v43 = vadd.f32 %v22287_v57, %v13033_v5  ;;  %v13032_v59 = vadd.f32 %v12753_v47, %v12322_v19  ;;  %v22402_v50 = vpop.f32.mrf.mxu0  ;;  %v23423_v5 = vld [vmem:[#allocation80_spill] sm:$0xff] }
 0x638   :  { %v17394_v30 = vpop.f32.mrf.mxu1  ;;  %v12328_v47 = vadd.f32 %v22163_v2, %v23423_v5 }
 0x639   :  { %13229 = vst.msk [vmem:[%s22772_s5 + $0x40] sm:$0xff] %vm71_vm0, %v13165_v15  ;;  %v13168_v12 = vmax.f32 %v13104_v43, 0.0  ;;  %v13103_v18 = vadd.f32 %v22287_v57, %v13032_v59  ;;  %v13035_v41 = vadd.f32 %v17394_v30, %v12325_v4  ;;  %v23424_v59 = vld [vmem:[#allocation40_spill] sm:$0xff] }
 0x63a   :  { %v12763_v39 = vpop.f32.mrf.mxu1  ;;  %v12331_v30 = vadd.f32 %v22171_v56, %v23424_v59  ;;  %v23429_v59 = vld [vmem:[#allocation42_spill] sm:$0xff] }
 0x63b   :  { %13232 = vst.msk [vmem:[%s22772_s5 + $0x58] sm:$0xff] %vm71_vm0, %v13168_v12  ;;  %v13167_v0 = vmax.f32 %v13103_v18, 0.0  ;;  %v13106_v9 = vadd.f32 %v22287_v57, %v13035_v41  ;;  %v13034_v53 = vadd.f32 %v12763_v39, %v12324_v38  ;;  %v22418_v12 = vpop.f32.mrf.mxu0  ;;  %v23425_v41 = vld [vmem:[#allocation17_spill] sm:$0xff] }
 0x63c   :  { %v17397_v25 = vpop.f32.mrf.mxu1  ;;  %v12330_v39 = vadd.f32 %v22179_v29, %v23425_v41  ;;  %v23430_v41 = vld [vmem:[#allocation41_spill] sm:$0xff] }
 0x63d   :  { %13231 = vst.msk [vmem:[%s22772_s5 + $0x50] sm:$0xff] %vm71_vm0, %v13167_v0  ;;  %v13170_v60 = vmax.f32 %v13106_v9, 0.0  ;;  %v13105_v37 = vadd.f32 %v22287_v57, %v13034_v53  ;;  %v13037_v27 = vadd.f32 %v17397_v25, %v12327_v21  ;;  %v23426_v53 = vld [vmem:[#allocation39_spill] sm:$0xff] }
 0x63e   :  { %v12773_v24 = vpop.f32.mrf.mxu1  ;;  %v12333_v25 = vadd.f32 %v22187_v61, %v23426_v53 }
 0x63f   :  { %13234 = vst.msk [vmem:[%s22772_s5 + $0x68] sm:$0xff] %vm71_vm0, %v13170_v60  ;;  %v13169_v51 = vmax.f32 %v13105_v37, 0.0  ;;  %v13108_v33 = vadd.f32 %v22287_v57, %v13037_v27  ;;  %v13036_v19 = vadd.f32 %v12773_v24, %v12326_v54  ;;  %v22434_v60 = vpop.f32.mrf.mxu0  ;;  %v23427_v27 = vld [vmem:[#allocation19_spill] sm:$0xff] }
 0x640   :  { %v17400_v34 = vpop.f32.mrf.mxu1  ;;  %v12332_v24 = vadd.f32 %v22195_v8, %v23427_v27 }
 0x641   :  { %13233 = vst.msk [vmem:[%s22772_s5 + $0x60] sm:$0xff] %vm71_vm0, %v13169_v51  ;;  %v13172_v42 = vmax.f32 %v13108_v33, 0.0  ;;  %v13107_v4 = vadd.f32 %v22287_v57, %v13036_v19  ;;  %v13039_v15 = vadd.f32 %v17400_v34, %v12329_v7  ;;  %v12335_v33 = vadd.f32 %v22203_v3, %v22110_v20  ;;  %v22450_v5 = vpop.f32.mrf.mxu0 }
 0x642   :  { %v12783_v43 = vpop.f32.mrf.mxu1 }
 0x643   :  { %13236 = vst.msk [vmem:[%s22772_s5 + $0x78] sm:$0xff] %vm71_vm0, %v13172_v42  ;;  %v13171_v63 = vmax.f32 %v13107_v4, 0.0  ;;  %v13110_v2 = vadd.f32 %v22287_v57, %v13039_v15  ;;  %v13038_v38 = vadd.f32 %v12783_v43, %v12328_v47  ;;  %v23428_v42 = vld [vmem:[#allocation16_spill] sm:$0xff] }
 0x644   :  { %v17403_v18 = vpop.f32.mrf.mxu1  ;;  %v12334_v4 = vadd.f32 %v22211_v46, %v23428_v42  ;;  %v12343_v42 = vadd.f32 %v22267_v45, %v22150_v11 }
 0x645   :  { %13235 = vst.msk [vmem:[%s22772_s5 + $0x70] sm:$0xff] %vm71_vm0, %v13171_v63  ;;  %v13174_v56 = vmax.f32 %v13110_v2, 0.0  ;;  %v13109_v21 = vadd.f32 %v22287_v57, %v13038_v38  ;;  %v13041_v0 = vadd.f32 %v17403_v18, %v12331_v30  ;;  %v12337_v30 = vadd.f32 %v22219_v31, %v23429_v59  ;;  %v22466_v38 = vpop.f32.mrf.mxu0 }
 0x646   :  { %v12793_v9 = vpop.f32.mrf.mxu1 }
 0x647   :  { %13238 = vst.msk [vmem:[%s22772_s5 + $0x88] sm:$0xff] %vm71_vm0, %v13174_v56  ;;  %v13173_v58 = vmax.f32 %v13109_v21, 0.0  ;;  %v13112_v29 = vadd.f32 %v22287_v57, %v13041_v0  ;;  %v13040_v54 = vadd.f32 %v12793_v9, %v12330_v39  ;;  %v12336_v39 = vadd.f32 %v22227_v17, %v23430_v41 }
 0x648   :  { %v17406_v37 = vpop.f32.mrf.mxu1  ;;  %v12339_v9 = vadd.f32 %v22235_v62, %v22130_v49 }
 0x649   :  { %13237 = vst.msk [vmem:[%s22772_s5 + $0x80] sm:$0xff] %vm71_vm0, %v13173_v58  ;;  %v13176_v61 = vmax.f32 %v13112_v29, 0.0  ;;  %v13111_v35 = vadd.f32 %v22287_v57, %v13040_v54  ;;  %v13043_v7 = vadd.f32 %v17406_v37, %v12333_v25  ;;  %v22482_v58 = vpop.f32.mrf.mxu0  ;;  %v23431_v54 = vld [vmem:[#allocation18_spill] sm:$0xff] }
 0x64a   :  { %v12803_v51 = vpop.f32.mrf.mxu1  ;;  %v12338_v37 = vadd.f32 %v22243_v44, %v23431_v54  ;;  %v23435_v54 = vld [vmem:[#allocation23_spill] sm:$0xff] }
 0x64b   :  { %13240 = vst.msk [vmem:[%s22772_s5 + $0x98] sm:$0xff] %vm71_vm0, %v13176_v61  ;;  %v13175_v19 = vmax.f32 %v13111_v35, 0.0  ;;  %v13114_v8 = vadd.f32 %v22287_v57, %v13043_v7  ;;  %v13042_v34 = vadd.f32 %v12803_v51, %v12332_v24  ;;  %v12341_v61 = vadd.f32 %v22251_v14, %v22140_v1  ;;  %v22498_v51 = vpop.f32.mrf.mxu0 }
 0x64c   :  { %v17409_v47 = vpop.f32.mrf.mxu1 }
 0x64d   :  { %13239 = vst.msk [vmem:[%s22772_s5 + $0x90] sm:$0xff] %vm71_vm0, %v13175_v19  ;;  %v13178_v20 = vmax.f32 %v13114_v8, 0.0  ;;  %v13113_v3 = vadd.f32 %v22287_v57, %v13042_v34  ;;  %v13045_v15 = vadd.f32 %v17409_v47, %v12335_v33  ;;  %v23432_v19 = vld [vmem:[#allocation44_spill] sm:$0xff] }
 0x64e   :  { %v12813_v43 = vpop.f32.mrf.mxu1  ;;  %v12340_v8 = vadd.f32 %v22259_v32, %v23432_v19 }
 0x64f   :  { %13242 = vst.msk [vmem:[%s22772_s5 + $0xa8] sm:$0xff] %vm71_vm0, %v13178_v20  ;;  %v13177_v63 = vmax.f32 %v13113_v3, 0.0  ;;  %v13116_v46 = vadd.f32 %v22287_v57, %v13045_v15  ;;  %v13044_v2 = vadd.f32 %v12813_v43, %v12334_v4  ;;  %v22514_v3 = vpop.f32.mrf.mxu0  ;;  %v23433_v43 = vld [vmem:[#allocation21_spill] sm:$0xff] }
 0x650   :  { %v17412_v18 = vpop.f32.mrf.mxu1  ;;  %v12342_v59 = vadd.f32 %v22275_v36, %v23433_v43 }
 0x651   :  { %13241 = vst.msk [vmem:[%s22772_s5 + $0xa0] sm:$0xff] %vm71_vm0, %v13177_v63  ;;  %v13180_v31 = vmax.f32 %v13116_v46, 0.0  ;;  %v13115_v56 = vadd.f32 %v22287_v57, %v13044_v2  ;;  %v13047_v21 = vadd.f32 %v17412_v18, %v12337_v30  ;;  %v12345_v46 = vadd.f32 %v22285_v6, %v22158_v48  ;;  %v22530_v41 = vpop.f32.mrf.mxu0 }
 0x652   :  { %v12823_v0 = vpop.f32.mrf.mxu1 }
 0x653   :  { %13244 = vst.msk [vmem:[%s22772_s5 + $0xb8] sm:$0xff] %vm71_vm0, %v13180_v31  ;;  %v13179_v53 = vmax.f32 %v13115_v56, 0.0  ;;  %v13118_v17 = vadd.f32 %v22287_v57, %v13047_v21  ;;  %v13046_v25 = vadd.f32 %v12823_v0, %v12336_v39  ;;  %v23434_v31 = vld [vmem:[#allocation43_spill] sm:$0xff] }
 0x654   :  { %v17415_v29 = vpop.f32.mrf.mxu1  ;;  %v12344_v56 = vadd.f32 %v22294_v23, %v23434_v31 }
 0x655   :  { %13243 = vst.msk [vmem:[%s22772_s5 + $0xb0] sm:$0xff] %vm71_vm0, %v13179_v53  ;;  %v13182_v49 = vmax.f32 %v13118_v17, 0.0  ;;  %v13117_v62 = vadd.f32 %v22287_v57, %v13046_v25  ;;  %v13049_v27 = vadd.f32 %v17415_v29, %v12339_v9  ;;  %v12347_v9 = vadd.f32 %v22306_v22, %v22166_v28  ;;  %v22546_v25 = vpop.f32.mrf.mxu0 }
 0x656   :  { %v12833_v24 = vpop.f32.mrf.mxu1 }
 0x657   :  { %13246 = vst.msk [vmem:[%s22772_s5 + $0xc8] sm:$0xff] %vm71_vm0, %v13182_v49  ;;  %v13181_v35 = vmax.f32 %v13117_v62, 0.0  ;;  %v13120_v44 = vadd.f32 %v22287_v57, %v13049_v27  ;;  %v13048_v7 = vadd.f32 %v12833_v24, %v12338_v37  ;;  %v12346_v37 = vadd.f32 %v22322_v26, %v23435_v54 }
 0x658   :  { %v17418_v33 = vpop.f32.mrf.mxu1  ;;  %v12349_v27 = vadd.f32 %v22338_v52, %v22174_v13 }
 0x659   :  { %13245 = vst.msk [vmem:[%s22772_s5 + $0xc0] sm:$0xff] %vm71_vm0, %v13181_v35  ;;  %v13184_v1 = vmax.f32 %v13120_v44, 0.0  ;;  %v13119_v14 = vadd.f32 %v22287_v57, %v13048_v7  ;;  %v13051_v34 = vadd.f32 %v17418_v33, %v12341_v61  ;;  %v22562_v35 = vpop.f32.mrf.mxu0  ;;  %v23436_v7 = vld [vmem:[#allocation20_spill] sm:$0xff] }
 0x65a   :  { %v12843_v47 = vpop.f32.mrf.mxu1  ;;  %v12348_v33 = vadd.f32 %v22354_v55, %v23436_v7 }
 0x65b   :  { %13248 = vst.msk [vmem:[%s22772_s5 + $0xd8] sm:$0xff] %vm71_vm0, %v13184_v1  ;;  %v13183_v4 = vmax.f32 %v13119_v14, 0.0  ;;  %v13122_v32 = vadd.f32 %v22287_v57, %v13051_v34  ;;  %v13050_v20 = vadd.f32 %v12843_v47, %v12340_v8  ;;  %v23437_v1 = vld [vmem:[#allocation46_spill] sm:$0xff] }
 0x65c   :  { %v17421_v15 = vpop.f32.mrf.mxu1  ;;  %v12351_v14 = vadd.f32 %v22370_v16, %v23437_v1 }
 0x65d   :  { %13247 = vst.msk [vmem:[%s22772_s5 + $0xd0] sm:$0xff] %vm71_vm0, %v13183_v4  ;;  %v13186_v11 = vmax.f32 %v13122_v32, 0.0  ;;  %v13121_v45 = vadd.f32 %v22287_v57, %v13050_v20  ;;  %v13053_v30 = vadd.f32 %v17421_v15, %v12343_v42  ;;  %v22578_v42 = vpop.f32.mrf.mxu0  ;;  %v23438_v32 = vld [vmem:[#allocation45_spill] sm:$0xff] }
 0x65e   :  { %v12853_v63 = vpop.f32.mrf.mxu1  ;;  %v12350_v20 = vadd.f32 %v22386_v10, %v23438_v32 }
 0x65f   :  { %13250 = vst.msk [vmem:[%s22772_s5 + $0xe8] sm:$0xff] %vm71_vm0, %v13186_v11  ;;  %v13185_v2 = vmax.f32 %v13121_v45, 0.0  ;;  %v13124_v36 = vadd.f32 %v22287_v57, %v13053_v30  ;;  %v13052_v18 = vadd.f32 %v12853_v63, %v12342_v59  ;;  %v23439_v11 = vld [vmem:[#allocation22_spill] sm:$0xff] }
 0x660   :  { %v17424_v39 = vpop.f32.mrf.mxu1  ;;  %v12353_v45 = vadd.f32 %v22402_v50, %v23439_v11 }
 0x661   :  { %13249 = vst.msk [vmem:[%s22772_s5 + $0xe0] sm:$0xff] %vm71_vm0, %v13185_v2  ;;  %v13188_v48 = vmax.f32 %v13124_v36, 0.0  ;;  %v13123_v6 = vadd.f32 %v22287_v57, %v13052_v18  ;;  %v13055_v21 = vadd.f32 %v17424_v39, %v12345_v46  ;;  %v22594_v46 = vpop.f32.mrf.mxu0  ;;  %v23440_v36 = vld [vmem:[#allocation48_spill] sm:$0xff] }
 0x662   :  { %v12863_v0 = vpop.f32.mrf.mxu1  ;;  %v12352_v18 = vadd.f32 %v22418_v12, %v23440_v36  ;;  %v23449_v36 = vld [vmem:[#allocation29_spill] sm:$0xff] }
 0x663   :  { %13252 = vst.msk [vmem:[%s22772_s5 + $0xf8] sm:$0xff] %vm71_vm0, %v13188_v48  ;;  %v13187_v53 = vmax.f32 %v13123_v6, 0.0  ;;  %v13126_v23 = vadd.f32 %v22287_v57, %v13055_v21  ;;  %v13054_v17 = vadd.f32 %v12863_v0, %v12344_v56  ;;  %v23441_v48 = vld [vmem:[#allocation25_spill] sm:$0xff] }
 0x664   :  { %v17427_v29 = vpop.f32.mrf.mxu1  ;;  %v12355_v6 = vadd.f32 %v22434_v60, %v23441_v48  ;;  %v23450_v48 = vld [vmem:[#allocation51_spill] sm:$0xff] }
 0x665   :  { %13251 = vst.msk [vmem:[%s22772_s5 + $0xf0] sm:$0xff] %vm71_vm0, %v13187_v53  ;;  %v13190_v28 = vmax.f32 %v13126_v23, 0.0  ;;  %v13125_v22 = vadd.f32 %v22287_v57, %v13054_v17  ;;  %v13057_v49 = vadd.f32 %v17427_v29, %v12347_v9  ;;  %v22610_v9 = vpop.f32.mrf.mxu0  ;;  %v23442_v23 = vld [vmem:[#allocation47_spill] sm:$0xff] }
 0x666   :  { %v12873_v62 = vpop.f32.mrf.mxu1  ;;  %v12354_v17 = vadd.f32 %v22450_v5, %v23442_v23 }
 0x667   :  { %13254 = vst.msk [vmem:[%s22772_s5 + $0x108] sm:$0xff] %vm71_vm0, %v13190_v28  ;;  %v13189_v24 = vmax.f32 %v13125_v22, 0.0  ;;  %v13128_v26 = vadd.f32 %v22287_v57, %v13057_v49  ;;  %v13056_v61 = vadd.f32 %v12873_v62, %v12346_v37  ;;  %v23443_v28 = vld [vmem:[#allocation27_spill] sm:$0xff] }
 0x668   :  { %v17430_v44 = vpop.f32.mrf.mxu1  ;;  %v12357_v22 = vadd.f32 %v22466_v38, %v23443_v28 }
 0x669   :  { %13253 = vst.msk [vmem:[%s22772_s5 + $0x100] sm:$0xff] %vm71_vm0, %v13189_v24  ;;  %v13192_v13 = vmax.f32 %v13128_v26, 0.0  ;;  %v13127_v52 = vadd.f32 %v22287_v57, %v13056_v61  ;;  %v13059_v19 = vadd.f32 %v17430_v44, %v12349_v27  ;;  %v17353_v27 = vpop.f32.mrf.mxu0  ;;  %v23444_v26 = vld [vmem:[#allocation24_spill] sm:$0xff] }
 0x66a   :  { %v12883_v8 = vpop.f32.mrf.mxu1  ;;  %v12356_v61 = vadd.f32 %v22482_v58, %v23444_v26 }
 0x66b   :  { %13256 = vst.msk [vmem:[%s22772_s5 + $0x118] sm:$0xff] %vm71_vm0, %v13192_v13  ;;  %v13191_v34 = vmax.f32 %v13127_v52, 0.0  ;;  %v13130_v55 = vadd.f32 %v22287_v57, %v13059_v19  ;;  %v13058_v47 = vadd.f32 %v12883_v8, %v12348_v33  ;;  %v23445_v13 = vld [vmem:[#allocation50_spill] sm:$0xff]  ;;  %v12263_v1 = vpop.f32.mrf.mxu0 }
 0x66c   :  { %v17433_v4 = vpop.f32.mrf.mxu1  ;;  %v12359_v52 = vadd.f32 %v22498_v51, %v23445_v13 }
 0x66d   :  { %13255 = vst.msk [vmem:[%s22772_s5 + $0x110] sm:$0xff] %vm71_vm0, %v13191_v34  ;;  %v13194_v16 = vmax.f32 %v13130_v55, 0.0  ;;  %v13129_v15 = vadd.f32 %v22287_v57, %v13058_v47  ;;  %v13061_v43 = vadd.f32 %v17433_v4, %v12351_v14  ;;  %v23446_v34 = vld [vmem:[#allocation49_spill] sm:$0xff] }
 0x66e   :  { %v12893_v59 = vpop.f32.mrf.mxu1  ;;  %v12358_v55 = vadd.f32 %v22514_v3, %v23446_v34 }
 0x66f   :  { %13258 = vst.msk [vmem:[%s22772_s5 + $0x128] sm:$0xff] %vm71_vm0, %v13194_v16  ;;  %v13193_v30 = vmax.f32 %v13129_v15, 0.0  ;;  %v13132_v10 = vadd.f32 %v22287_v57, %v13061_v43  ;;  %v13060_v63 = vadd.f32 %v12893_v59, %v12350_v20  ;;  %v23447_v20 = vld [vmem:[#allocation26_spill] sm:$0xff]  ;;  %v17356_v59 = vpop.f32.mrf.mxu0 }
 0x670   :  { %v17436_v2 = vpop.f32.mrf.mxu1  ;;  %v12361_v16 = vadd.f32 %v22530_v41, %v23447_v20 }
 0x671   :  { %13257 = vst.msk [vmem:[%s22772_s5 + $0x120] sm:$0xff] %vm71_vm0, %v13193_v30  ;;  %v13196_v50 = vmax.f32 %v13132_v10, 0.0  ;;  %v13131_v39 = vadd.f32 %v22287_v57, %v13060_v63  ;;  %v13063_v31 = vadd.f32 %v17436_v2, %v12353_v45  ;;  %v23448_v45 = vld [vmem:[#allocation52_spill] sm:$0xff] }
 0x672   :  { %v12903_v56 = vpop.f32.mrf.mxu1  ;;  %v12360_v30 = vadd.f32 %v22546_v25, %v23448_v45 }
 0x673   :  { %13260 = vst.msk [vmem:[%s22772_s5 + $0x138] sm:$0xff] %vm71_vm0, %v13196_v50  ;;  %v13195_v21 = vmax.f32 %v13131_v39, 0.0  ;;  %v13134_v12 = vadd.f32 %v22287_v57, %v13063_v31  ;;  %v13062_v0 = vadd.f32 %v12903_v56, %v12352_v18  ;;  %v12363_v18 = vadd.f32 %v22562_v35, %v23449_v36  ;;  %v12273_v31 = vpop.f32.mrf.mxu0 }
 0x674   :  { %v17439_v53 = vpop.f32.mrf.mxu1 }
 0x675   :  { %13259 = vst.msk [vmem:[%s22772_s5 + $0x130] sm:$0xff] %vm71_vm0, %v13195_v21  ;;  %v13198_v60 = vmax.f32 %v13134_v12, 0.0  ;;  %v13133_v29 = vadd.f32 %v22287_v57, %v13062_v0  ;;  %v13065_v54 = vadd.f32 %v17439_v53, %v12355_v6  ;;  %v12362_v6 = vadd.f32 %v22578_v42, %v23450_v48  ;;  %v23451_v53 = vld [vmem:[#allocation101_spill] sm:$0xff] }
 0x676   :  { %v12913_v37 = vpop.f32.mrf.mxu1  ;;  %v12365_v23 = vadd.f32 %v22594_v46, %v23451_v53 }
 0x677   :  { %13262 = vst.msk [vmem:[%s22772_s5 + $0x148] sm:$0xff] %vm71_vm0, %v13198_v60  ;;  %v13197_v49 = vmax.f32 %v13133_v29, 0.0  ;;  %v13136_v5 = vadd.f32 %v22287_v57, %v13065_v54  ;;  %v13064_v62 = vadd.f32 %v12913_v37, %v12354_v17  ;;  %v17359_v29 = vpop.f32.mrf.mxu0  ;;  %v23452_v37 = vld [vmem:[#allocation28_spill] sm:$0xff] }
 0x678   :  { %v17442_v24 = vpop.f32.mrf.mxu1  ;;  %v12364_v28 = vadd.f32 %v22610_v9, %v23452_v37 }
 0x679   :  { %13261 = vst.msk [vmem:[%s22772_s5 + $0x140] sm:$0xff] %vm71_vm0, %v13197_v49  ;;  %v13200_v38 = vmax.f32 %v13136_v5, 0.0  ;;  %v13135_v44 = vadd.f32 %v22287_v57, %v13064_v62  ;;  %v13067_v7 = vadd.f32 %v17442_v24, %v12357_v22  ;;  %v23453_v62 = vld [vmem:[#allocation31_spill] sm:$0xff] }
 0x67a   :  { %v12923_v33 = vpop.f32.mrf.mxu1  ;;  %v12367_v24 = vadd.f32 %v17353_v27, %v23453_v62 }
 0x67b   :  { %13264 = vst.msk [vmem:[%s22772_s5 + $0x158] sm:$0xff] %vm71_vm0, %v13200_v38  ;;  %v13199_v19 = vmax.f32 %v13135_v44, 0.0  ;;  %v13138_v58 = vadd.f32 %v22287_v57, %v13067_v7  ;;  %v13066_v8 = vadd.f32 %v12923_v33, %v12356_v61  ;;  %v12283_v38 = vpop.f32.mrf.mxu0  ;;  %v23454_v7 = vld [vmem:[#allocation104_spill] sm:$0xff] }
 0x67c   :  { %v17445_v14 = vpop.f32.mrf.mxu1  ;;  %v12366_v33 = vadd.f32 %v12263_v1, %v23454_v7 }
 0x67d   :  { %13263 = vst.msk [vmem:[%s22772_s5 + $0x150] sm:$0xff] %vm71_vm0, %v13199_v19  ;;  %v13202_v51 = vmax.f32 %v13138_v58, 0.0  ;;  %v13137_v47 = vadd.f32 %v22287_v57, %v13066_v8  ;;  %v13069_v4 = vadd.f32 %v17445_v14, %v12359_v52  ;;  %v12369_v58 = vadd.f32 %v17356_v59, %v22254_v40  ;;  %v17362_v34 = vpop.f32.mrf.mxu0 }
 0x67e   :  { %v12933_v32 = vpop.f32.mrf.mxu1 }
 0x67f   :  { %13266 = vst.msk [vmem:[%s22772_s5 + $0x168] sm:$0xff] %vm71_vm0, %v13202_v51  ;;  %v13201_v15 = vmax.f32 %v13137_v47, 0.0  ;;  %v13140_v3 = vadd.f32 %v22287_v57, %v13069_v4  ;;  %v13068_v43 = vadd.f32 %v12933_v32, %v12358_v55  ;;  %v23455_v51 = vld [vmem:[#allocation53_spill] sm:$0xff] }
 0x680   :  { %v17448_v11 = vpop.f32.mrf.mxu1  ;;  %v12368_v47 = vadd.f32 %v12273_v31, %v23455_v51 }
 0x681   :  { %13265 = vst.msk [vmem:[%s22772_s5 + $0x160] sm:$0xff] %vm71_vm0, %v13201_v15  ;;  %v13204_v41 = vmax.f32 %v13140_v3, 0.0  ;;  %v13139_v10 = vadd.f32 %v22287_v57, %v13068_v43  ;;  %v13071_v63 = vadd.f32 %v17448_v11, %v12361_v16  ;;  %v23456_v16 = vld [vmem:[#allocation54_spill] sm:$0xff]  ;;  %v12293_v11 = vpop.f32.mrf.mxu0 }
 0x682   :  { %v12943_v2 = vpop.f32.mrf.mxu1  ;;  %v12371_v15 = vadd.f32 %v17359_v29, %v23456_v16 }
 0x683   :  { %13268 = vst.msk [vmem:[%s22772_s5 + $0x178] sm:$0xff] %vm71_vm0, %v13204_v41  ;;  %v13203_v50 = vmax.f32 %v13139_v10, 0.0  ;;  %v13142_v25 = vadd.f32 %v22287_v57, %v13071_v63  ;;  %v13070_v39 = vadd.f32 %v12943_v2, %v12360_v30  ;;  %v23457_v30 = vld [vmem:[#allocation30_spill] sm:$0xff]  ;;  %v17365_v36 = vpop.f32.mrf.mxu0 }
 0x684   :  { %v17451_v56 = vpop.f32.mrf.mxu1  ;;  %v12370_v41 = vadd.f32 %v12283_v38, %v23457_v30 }
 0x685   :  { %13267 = vst.msk [vmem:[%s22772_s5 + $0x170] sm:$0xff] %vm71_vm0, %v13203_v50  ;;  %v13206_v35 = vmax.f32 %v13142_v25, 0.0  ;;  %v13141_v21 = vadd.f32 %v22287_v57, %v13070_v39  ;;  %v13073_v12 = vadd.f32 %v17451_v56, %v12363_v18  ;;  %v23458_v50 = vld [vmem:[#allocation107_spill] sm:$0xff]  ;;  %v12303_v53 = vpop.f32.mrf.mxu0 }
 0x686   :  { %v12953_v0 = vpop.f32.mrf.mxu1  ;;  %v12373_v25 = vadd.f32 %v17362_v34, %v23458_v50 }
 0x687   :  { %13270 = vst.msk [vmem:[%s22772_s5 + $0x188] sm:$0xff] %vm71_vm0, %v13206_v35  ;;  %v13205_v17 = vmax.f32 %v13141_v21, 0.0  ;;  %v13144_v42 = vadd.f32 %v22287_v57, %v13073_v12  ;;  %v13072_v60 = vadd.f32 %v12953_v0, %v12362_v6  ;;  %v23459_v6 = vld [vmem:[#allocation33_spill] sm:$0xff] }
 0x688   :  { %v17454_v54 = vpop.f32.mrf.mxu1  ;;  %v12372_v35 = vadd.f32 %v12293_v11, %v23459_v6 }
 0x689   :  { %13269 = vst.msk [vmem:[%s22772_s5 + $0x180] sm:$0xff] %vm71_vm0, %v13205_v17  ;;  %v13208_v46 = vmax.f32 %v13144_v42, 0.0  ;;  %v13143_v22 = vadd.f32 %v22287_v57, %v13072_v60  ;;  %v13075_v49 = vadd.f32 %v17454_v54, %v12365_v23  ;;  %v23460_v17 = vld [vmem:[#allocation56_spill] sm:$0xff] }
 0x68a   :  { %v12963_v5 = vpop.f32.mrf.mxu1  ;;  %v12375_v42 = vadd.f32 %v17365_v36, %v23460_v17 }
 0x68b   :  { %13272 = vst.msk [vmem:[%s22772_s5 + $0x198] sm:$0xff] %vm71_vm0, %v13208_v46  ;;  %v13207_v26 = vmax.f32 %v13143_v22, 0.0  ;;  %v13146_v9 = vadd.f32 %v22287_v57, %v13075_v49  ;;  %v13074_v61 = vadd.f32 %v12963_v5, %v12364_v28  ;;  %v23461_v28 = vld [vmem:[#allocation55_spill] sm:$0xff] }
 0x68c   :  { %v17457_v44 = vpop.f32.mrf.mxu1  ;;  %v12374_v46 = vadd.f32 %v12303_v53, %v23461_v28 }
 0x68d   :  { %13271 = vst.msk [vmem:[%s22772_s5 + $0x190] sm:$0xff] %vm71_vm0, %v13207_v26  ;;  %v13210_v13 = vmax.f32 %v13146_v9, 0.0  ;;  %v13145_v27 = vadd.f32 %v22287_v57, %v13074_v61  ;;  %v13077_v52 = vadd.f32 %v17457_v44, %v12367_v24 }
 0x68e   :  { %v12973_v19 = vpop.f32.mrf.mxu1 }
 0x68f   :  { %13274 = vst.msk [vmem:[%s22772_s5 + $0x1a8] sm:$0xff] %vm71_vm0, %v13210_v13  ;;  %v13209_v8 = vmax.f32 %v13145_v27, 0.0  ;;  %v13148_v1 = vadd.f32 %v22287_v57, %v13077_v52  ;;  %v13076_v14 = vadd.f32 %v12973_v19, %v12366_v33 }
 0x690   :  { %v17460_v55 = vpop.f32.mrf.mxu1 }
 0x691   :  { %13273 = vst.msk [vmem:[%s22772_s5 + $0x1a0] sm:$0xff] %vm71_vm0, %v13209_v8  ;;  %v13212_v4 = vmax.f32 %v13148_v1, 0.0  ;;  %v13147_v40 = vadd.f32 %v22287_v57, %v13076_v14  ;;  %v13079_v32 = vadd.f32 %v17460_v55, %v12369_v58 }
 0x692   :  { %v12983_v20 = vpop.f32.mrf.mxu1 }
 0x693   :  { %13276 = vst.msk [vmem:[%s22772_s5 + $0x1b8] sm:$0xff] %vm71_vm0, %v13212_v4  ;;  %v13211_v3 = vmax.f32 %v13147_v40, 0.0  ;;  %v13150_v43 = vadd.f32 %v22287_v57, %v13079_v32  ;;  %v13078_v59 = vadd.f32 %v12983_v20, %v12368_v47 }
 0x694   :  { %v17463_v45 = vpop.f32.mrf.mxu1 }
 0x695   :  { %13275 = vst.msk [vmem:[%s22772_s5 + $0x1b0] sm:$0xff] %vm71_vm0, %v13211_v3  ;;  %v13214_v10 = vmax.f32 %v13150_v43, 0.0  ;;  %v13149_v63 = vadd.f32 %v22287_v57, %v13078_v59  ;;  %v13081_v2 = vadd.f32 %v17463_v45, %v12371_v15 }
 0x696   :  { %v12993_v18 = vpop.f32.mrf.mxu1 }
 0x697   :  { %13278 = vst.msk [vmem:[%s22772_s5 + $0x1c8] sm:$0xff] %vm71_vm0, %v13214_v10  ;;  %v13213_v39 = vmax.f32 %v13149_v63, 0.0  ;;  %v13152_v31 = vadd.f32 %v22287_v57, %v13081_v2  ;;  %v13080_v56 = vadd.f32 %v12993_v18, %v12370_v41 }
 0x698   :  { %v17466_v48 = vpop.f32.mrf.mxu1 }
 0x699   :  { %13277 = vst.msk [vmem:[%s22772_s5 + $0x1c0] sm:$0xff] %vm71_vm0, %v13213_v39  ;;  %v13216_v21 = vmax.f32 %v13152_v31, 0.0  ;;  %v13151_v12 = vadd.f32 %v22287_v57, %v13080_v56  ;;  %v13083_v0 = vadd.f32 %v17466_v48, %v12373_v25 }
 0x69a   :  { %v13003_v23 = vpop.f32.mrf.mxu1 }
 0x69b   :  { %13280 = vst.msk [vmem:[%s22772_s5 + $0x1d8] sm:$0xff] %vm71_vm0, %v13216_v21  ;;  %v13215_v60 = vmax.f32 %v13151_v12, 0.0  ;;  %v13154_v29 = vadd.f32 %v22287_v57, %v13083_v0  ;;  %v13082_v54 = vadd.f32 %v13003_v23, %v12372_v35 }
 0x69c   :  { %v17469_v37 = vpop.f32.mrf.mxu1 }
 0x69d   :  { %13279 = vst.msk [vmem:[%s22772_s5 + $0x1d0] sm:$0xff] %vm71_vm0, %v13215_v60  ;;  %v13218_v22 = vmax.f32 %v13154_v29, 0.0  ;;  %v13153_v49 = vadd.f32 %v22287_v57, %v13082_v54  ;;  %v13085_v5 = vadd.f32 %v17469_v37, %v12375_v42 }
 0x69e   :  { %v13013_v62 = vpop.f32.mrf.mxu1 }
 0x69f   :  { %13282 = vst.msk [vmem:[%s22772_s5 + $0x1e8] sm:$0xff] %vm71_vm0, %v13218_v22  ;;  %v13217_v24 = vmax.f32 %v13153_v49, 0.0  ;;  %v13156_v26 = vadd.f32 %v22287_v57, %v13085_v5  ;;  %v13084_v9 = vadd.f32 %v13013_v62, %v12374_v46 }
 0x6a1   :  { %13281 = vst.msk [vmem:[%s22772_s5 + $0x1e0] sm:$0xff] %vm71_vm0, %v13217_v24  ;;  %v13220_v61 = vmax.f32 %v13156_v26, 0.0  ;;  %v13155_v38 = vadd.f32 %v22287_v57, %v13084_v9 }
 0x6a3   :  { %13284 = vst.msk [vmem:[%s22772_s5 + $0x1f8] sm:$0xff] %vm71_vm0, %v13220_v61  ;;  %v13219_v44 = vmax.f32 %v13155_v38, 0.0 }
 0x6a5   :  { %13283 = vst.msk [vmem:[%s22772_s5 + $0x1f0] sm:$0xff] %vm71_vm0, %v13219_v44 }
 0x6a6   :  { %13289 = vsyncpa [#allocation4], 1 }
 0x6a7   :  { %13290 = vsyncpa [#allocation6], 1 }
 0x6a8   :  { %13291 = vsyncpa [#allocation9], 1 }

</bundles_post_ra>
